<compile_context>
chip_gen: v5e
topology: v5e:2x2
jax: 0.10.0
libtpu: 0.0.40
codegen_flags: <defaults>
</compile_context>

<pallas_src>
import functools

import jax
import jax.numpy as jnp
from jax.experimental import pallas as pl
from jax.experimental.pallas import tpu as pltpu


# ---------------------------------------------------------------------------
# Helpers
# ---------------------------------------------------------------------------
def _round_up(x, m):
    return ((x + m - 1) // m) * m


_CONV_TM = 256          # M-tile for the conv matmul (fits v7x 64MiB VMEM easily)
_VMEM_LIMIT = 32 * 1024 * 1024


# ---------------------------------------------------------------------------
# Pallas kernels (hot paths)
# ---------------------------------------------------------------------------
def _conv_mm_kernel(x_ref, w_ref, b_ref, o_ref):
    """Fused im2col-matmul + folded-BN bias + ReLU.

    x: [TM, K] bf16, w: [K, Cpad] bf16, b: [1, Cpad] f32, o: [TM, Cpad] f32.
    """
    acc = jnp.dot(x_ref[...], w_ref[...], preferred_element_type=jnp.float32)
    o_ref[...] = jnp.maximum(acc + b_ref[...], 0.0)


def _maxpool3_kernel(x_ref, o_ref):
    """3x3 stride-1 max over shifted windows.  x:[1,H,W,C] -> o:[1,H-2,W-2,C]."""
    x = x_ref[0]                                   # (H, W, C)
    ho = o_ref.shape[1]
    wo = o_ref.shape[2]
    m = x[0:ho, 0:wo, :]
    for di in range(3):
        for dj in range(3):
            if di == 0 and dj == 0:
                continue
            m = jnp.maximum(m, x[di:di + ho, dj:dj + wo, :])
    o_ref[0] = m


def _avgpool3_kernel(x_ref, o_ref):
    """3x3 stride-1 pad-1 avg pool, count_include_pad=False.

    x: [1, H+2, W+2, C] (already zero-padded), o: [1, H, W, C].
    """
    xp = x_ref[0]                                  # (H+2, W+2, C)
    h = o_ref.shape[1]
    w = o_ref.shape[2]
    c = xp.shape[-1]
    s = jnp.zeros((h, w, c), jnp.float32)
    for di in range(3):
        for dj in range(3):
            s = s + xp[di:di + h, dj:dj + w, :]
    # valid-count per output position (depends only on h,w and padding=1)
    hi = jax.lax.broadcasted_iota(jnp.int32, (h, w), 0)
    wi = jax.lax.broadcasted_iota(jnp.int32, (h, w), 1)
    rcnt = jnp.minimum(hi + 1, h - 1) - jnp.maximum(hi - 1, 0) + 1
    ccnt = jnp.minimum(wi + 1, w - 1) - jnp.maximum(wi - 1, 0) + 1
    inv = 1.0 / (rcnt * ccnt).astype(jnp.float32)
    o_ref[0] = s * inv[:, :, None]


# ---------------------------------------------------------------------------
# Pallas wrappers
# ---------------------------------------------------------------------------
def _pallas_conv_mm(cols, w, b, cout):
    """cols: [M, K] bf16, w: [K, Cpad] bf16, b: [1, Cpad] f32 -> [M, cout] f32."""
    m, k = cols.shape
    cpad = w.shape[1]

    mpad = _round_up(m, 8)
    if mpad > _CONV_TM:
        tm = _CONV_TM
        mpad = _round_up(m, tm)
    else:
        tm = mpad
    if mpad != m:
        cols = jnp.pad(cols, ((0, mpad - m), (0, 0)))

    grid = (mpad // tm,)
    cost = pl.CostEstimate(
        flops=2 * mpad * k * cpad,
        transcendentals=0,
        bytes_accessed=mpad * k * 2 + k * cpad * 2 + cpad * 4 + mpad * cpad * 4,
    )
    out = pl.pallas_call(
        _conv_mm_kernel,
        out_shape=jax.ShapeDtypeStruct((mpad, cpad), jnp.float32),
        grid=grid,
        in_specs=[
            pl.BlockSpec((tm, k), lambda i: (i, 0)),
            pl.BlockSpec((k, cpad), lambda i: (0, 0)),
            pl.BlockSpec((1, cpad), lambda i: (0, 0)),
        ],
        out_specs=pl.BlockSpec((tm, cpad), lambda i: (i, 0)),
        compiler_params=pltpu.CompilerParams(
            dimension_semantics=("parallel",),
            vmem_limit_bytes=_VMEM_LIMIT,
        ),
        cost_estimate=cost,
    )(cols, w, b)
    return out[:m, :cout]


def max_pool_3x3_s2(x):
    """MaxPool2d(kernel=3, stride=2, padding=0) on NHWC input."""
    n, h, w, c = x.shape
    hf, wf = h - 2, w - 2
    y_full = pl.pallas_call(
        _maxpool3_kernel,
        out_shape=jax.ShapeDtypeStruct((n, hf, wf, c), jnp.float32),
        grid=(n,),
        in_specs=[pl.BlockSpec((1, h, w, c), lambda i: (i, 0, 0, 0))],
        out_specs=pl.BlockSpec((1, hf, wf, c), lambda i: (i, 0, 0, 0)),
        compiler_params=pltpu.CompilerParams(
            dimension_semantics=("parallel",),
            vmem_limit_bytes=_VMEM_LIMIT,
        ),
    )(x)
    # stride-2 subsample of the stride-1 pooled map (cheap XLA gather)
    return y_full[:, ::2, ::2, :]


def avg_pool_3x3_s1_p1(x):
    """AvgPool2d(kernel=3, stride=1, padding=1, count_include_pad=False), NHWC."""
    n, h, w, c = x.shape
    xp = jnp.pad(x, ((0, 0), (1, 1), (1, 1), (0, 0)))
    return pl.pallas_call(
        _avgpool3_kernel,
        out_shape=jax.ShapeDtypeStruct((n, h, w, c), jnp.float32),
        grid=(n,),
        in_specs=[pl.BlockSpec((1, h + 2, w + 2, c), lambda i: (i, 0, 0, 0))],
        out_specs=pl.BlockSpec((1, h, w, c), lambda i: (i, 0, 0, 0)),
        compiler_params=pltpu.CompilerParams(
            dimension_semantics=("parallel",),
            vmem_limit_bytes=_VMEM_LIMIT,
        ),
    )(xp)


# ---------------------------------------------------------------------------
# Glue: im2col (pure data movement in XLA, NHWC, K ordered as (kh, kw, cin))
# ---------------------------------------------------------------------------
# TODO(synk): patch extraction is still materialized by XLA rather than fused
# into the matmul kernel's input DMA (kh*kw shifted-window BlockSpecs).
def _im2col_nhwc(x, kh, kw, stride, pad):
    n, h, w, c = x.shape
    if pad:
        x = jnp.pad(x, ((0, 0), (pad, pad), (pad, pad), (0, 0)))
    ho = (h + 2 * pad - kh) // stride + 1
    wo = (w + 2 * pad - kw) // stride + 1
    patches = []
    for i in range(kh):
        for j in range(kw):
            patches.append(
                x[:, i:i + stride * ho:stride, j:j + stride * wo:stride, :])
    cols = jnp.concatenate(patches, axis=-1)           # (N,Ho,Wo, kh*kw*C)
    return cols.reshape(n * ho * wo, kh * kw * c), ho, wo


# ---------------------------------------------------------------------------
# Layer forwards (NHWC in / NHWC out); kernel geometry is static Python ints
# ---------------------------------------------------------------------------
def incept_conv(x, p, *, kh, kw, stride, pad, cout):
    n, h, w, c = x.shape
    xb = x.astype(jnp.bfloat16)                        # bf16 MXU operands
    if kh == 1 and kw == 1 and stride == 1 and pad == 0:
        cols, ho, wo = xb.reshape(n * h * w, c), h, w
    else:
        cols, ho, wo = _im2col_nhwc(xb, kh, kw, stride, pad)
    out = _pallas_conv_mm(cols, p["w"], p["b"], cout)
    return out.reshape(n, ho, wo, cout)


# ---------------------------------------------------------------------------
# Parameter construction (deterministic; BN folded into conv weights)
# ---------------------------------------------------------------------------
def _fold_conv_bn(key, c_in, c_out, kh, kw):
    k1, k2, k3, k4, k5 = jax.random.split(key, 5)
    w = jax.random.normal(k1, (c_out, c_in, kh, kw), jnp.float32) * 0.05
    gamma = jax.random.uniform(k2, (c_out,), jnp.float32, 0.5, 1.5)
    beta = jax.random.normal(k3, (c_out,), jnp.float32) * 0.1
    mean = jax.random.normal(k4, (c_out,), jnp.float32) * 0.1
    var = jax.random.uniform(k5, (c_out,), jnp.float32, 0.5, 1.5)
    scale = gamma / jnp.sqrt(var + 1e-3)               # BN eps = 0.001
    w_folded = w * scale[:, None, None, None]
    b_folded = beta - scale * mean
    # K ordering (kh, kw, cin) to match NHWC im2col
    w2 = jnp.transpose(w_folded, (2, 3, 1, 0)).reshape(kh * kw * c_in, c_out)
    return w2, b_folded


def _pack(w, b):
    """Pad Cout to a multiple of 128 (lane-dense stores) and cast w to bf16."""
    k, cout = w.shape
    cpad = _round_up(cout, 128)
    wp = jnp.zeros((k, cpad), jnp.bfloat16).at[:, :cout].set(w.astype(jnp.bfloat16))
    bp = jnp.zeros((1, cpad), jnp.float32).at[0, :cout].set(b)
    return {"w": wp, "b": bp}


def make_params(in_channels, seed=0):
    keys = jax.random.split(jax.random.PRNGKey(seed), 12)

    def conv(k, cin, cout, kh, kw):
        return _pack(*_fold_conv_bn(k, cin, cout, kh, kw))

    p = {}
    p["conv1"] = conv(keys[0], in_channels, 32, 3, 3)
    p["conv2"] = conv(keys[1], 32, 32, 3, 3)
    p["conv3"] = conv(keys[2], 32, 64, 3, 3)
    p["conv4"] = conv(keys[3], 64, 80, 1, 1)
    p["conv5"] = conv(keys[4], 80, 192, 3, 3)
    # InceptBlock5b: fuse the three shared-input 1x1 heads (96 + 48 + 64 = 208)
    w_b1, b_b1 = _fold_conv_bn(keys[5], 192, 96, 1, 1)
    w_b2, b_b2 = _fold_conv_bn(keys[6], 192, 48, 1, 1)
    w_b3, b_b3 = _fold_conv_bn(keys[8], 192, 64, 1, 1)
    p["head"] = _pack(jnp.concatenate([w_b1, w_b2, w_b3], axis=1),
                      jnp.concatenate([b_b1, b_b2, b_b3], axis=0))
    p["b2_conv2"] = conv(keys[7], 48, 64, 5, 5)
    p["b3_conv2"] = conv(keys[9], 64, 96, 3, 3)
    p["b3_conv3"] = conv(keys[10], 96, 96, 3, 3)
    p["b4_conv"] = conv(keys[11], 192, 64, 1, 1)
    return p


# ---------------------------------------------------------------------------
# Model: InceptInitBlock
# ---------------------------------------------------------------------------
def incept_block5b(x, p):
    # x: (N, H, W, 192) NHWC
    n, h, w, c = x.shape
    # fused 1x1 heads of branches 1/2/3 (one read of x, one lane-dense matmul)
    cols = x.astype(jnp.bfloat16).reshape(n * h * w, c)
    head = _pallas_conv_mm(cols, p["head"]["w"], p["head"]["b"], 208)
    head = head.reshape(n, h, w, 208)
    b1 = head[..., :96]                                 # branch1: 1x1 -> 96
    b2 = head[..., 96:144]                              # branch2 head: 1x1 -> 48
    b3 = head[..., 144:208]                             # branch3 head: 1x1 -> 64
    # branch2 tail: 5x5 pad 2 -> 64
    b2 = incept_conv(b2, p["b2_conv2"], kh=5, kw=5, stride=1, pad=2, cout=64)
    # branch3 tail: 3x3 pad 1 -> 96, 3x3 pad 1 -> 96
    b3 = incept_conv(b3, p["b3_conv2"], kh=3, kw=3, stride=1, pad=1, cout=96)
    b3 = incept_conv(b3, p["b3_conv3"], kh=3, kw=3, stride=1, pad=1, cout=96)
    # branch4: avgpool(3,1,1, count_include_pad=False) -> 1x1 -> 64
    b4 = avg_pool_3x3_s1_p1(x)
    b4 = incept_conv(b4, p["b4_conv"], kh=1, kw=1, stride=1, pad=0, cout=64)
    return jnp.concatenate([b1, b2, b3, b4], axis=-1)   # 96+64+96+64 = 320


@jax.jit
def incept_init_block(x, params):
    # NCHW -> NHWC at the boundary; everything internal is channels-last.
    x = jnp.transpose(x, (0, 2, 3, 1)).astype(jnp.float32)
    x = incept_conv(x, params["conv1"], kh=3, kw=3, stride=2, pad=0, cout=32)
    x = incept_conv(x, params["conv2"], kh=3, kw=3, stride=1, pad=0, cout=32)
    x = incept_conv(x, params["conv3"], kh=3, kw=3, stride=1, pad=1, cout=64)
    x = max_pool_3x3_s2(x)
    x = incept_conv(x, params["conv4"], kh=1, kw=1, stride=1, pad=0, cout=80)
    x = incept_conv(x, params["conv5"], kh=3, kw=3, stride=1, pad=0, cout=192)
    x = max_pool_3x3_s2(x)
    x = incept_block5b(x, params)
    return jnp.transpose(x, (0, 3, 1, 2))               # back to NCHW


if __name__ == "__main__":
    # Small input consistent with the module's stride/kernel structure
    # (needs spatial >= ~27 to survive the stride-2 stages; use 47).
    batch, in_channels, spatial = 2, 3, 47
    key = jax.random.PRNGKey(0)
    x = jax.random.normal(key, (batch, in_channels, spatial, spatial), jnp.float32)

    params = make_params(in_channels, seed=0)
    out = incept_init_block(x, params)
    out = jax.block_until_ready(out)

    # Expected: 47 -> conv1 23 -> conv2 21 -> conv3 21 -> pool1 10 -> conv4 10
    #           -> conv5 8 -> pool2 3; channels 96+64+96+64 = 320
    assert out.shape == (batch, 320, 3, 3), out.shape
    assert bool(jnp.all(jnp.isfinite(out)))
    print("KERNEL_OK")
</pallas_src>

<mosaic_0001>
module attributes {stable_mosaic.version = 11 : i64} {
  func.func @_conv_mm_kernel(%arg0: i32, %arg1: memref<256x27xbf16, #tpu.memory_space<vmem>>, %arg2: memref<27x128xbf16, #tpu.memory_space<vmem>>, %arg3: memref<1x128xf32, #tpu.memory_space<vmem>>, %arg4: memref<256x128xf32, #tpu.memory_space<vmem>>) attributes {dimension_semantics = [#tpu.dimension_semantics<parallel>], iteration_bounds = array<i64: 5>, scalar_prefetch = 0 : i64, scratch_operands = 0 : i64, tpu.core_type = #tpu.core_type<tc>, window_params = [{transform_indices = @transform_0, window_bounds = array<i64: 256, 27>}, {pipeline_mode = #tpu.pipeline_mode<synchronous>, transform_indices = @transform_1, window_bounds = array<i64: 27, 128>}, {pipeline_mode = #tpu.pipeline_mode<synchronous>, transform_indices = @transform_2, window_bounds = array<i64: 1, 128>}, {transform_indices = @transform_3, window_bounds = array<i64: 256, 128>}]} {
    %c0 = arith.constant 0 : index
    %c0_0 = arith.constant 0 : index
    %0 = vector.load %arg1[%c0, %c0_0] : memref<256x27xbf16, #tpu.memory_space<vmem>>, vector<256x27xbf16>
    %c0_1 = arith.constant 0 : index
    %c0_2 = arith.constant 0 : index
    %1 = vector.load %arg2[%c0_1, %c0_2] : memref<27x128xbf16, #tpu.memory_space<vmem>>, vector<27x128xbf16>
    %cst = arith.constant dense<0.000000e+00> : vector<256x128xf32>
    %2 = tpu.matmul %0, %1, %cst {dimension_numbers = #tpu.dot_dimension_numbers<[1], [0], [0], [1], [0, 0, 1, 1], [], []>} : vector<256x27xbf16>, vector<27x128xbf16>, vector<256x128xf32> -> vector<256x128xf32>
    %c0_3 = arith.constant 0 : index
    %c0_4 = arith.constant 0 : index
    %3 = vector.load %arg3[%c0_3, %c0_4] : memref<1x128xf32, #tpu.memory_space<vmem>>, vector<1x128xf32>
    %4 = vector.broadcast %3 : vector<1x128xf32> to vector<256x128xf32>
    %5 = arith.addf %2, %4 : vector<256x128xf32>
    %cst_5 = arith.constant 0.000000e+00 : f32
    %6 = vector.broadcast %cst_5 : f32 to vector<256x128xf32>
    %7 = arith.maximumf %5, %6 : vector<256x128xf32>
    %c0_6 = arith.constant 0 : index
    %c0_7 = arith.constant 0 : index
    %8 = vector.load %arg4[%c0_6, %c0_7] : memref<256x128xf32, #tpu.memory_space<vmem>>, vector<256x128xf32>
    tpu.vector_store %arg4[%c0_6, %c0_7], %7 {strides = array<i32>} : memref<256x128xf32, #tpu.memory_space<vmem>>, vector<256x128xf32>,
    return
  }
  func.func @transform_0(%arg0: i32) -> (i32, i32) {
    %c0_i32 = arith.constant 0 : i32
    %c0_i32_0 = arith.constant 0 : i32
    return %arg0, %c0_i32 : i32, i32
  }
  func.func @transform_1(%arg0: i32) -> (i32, i32) {
    %c0_i32 = arith.constant 0 : i32
    %c0_i32_0 = arith.constant 0 : i32
    %c0_i32_1 = arith.constant 0 : i32
    return %c0_i32, %c0_i32_0 : i32, i32
  }
  func.func @transform_2(%arg0: i32) -> (i32, i32) {
    %c0_i32 = arith.constant 0 : i32
    %c0_i32_0 = arith.constant 0 : i32
    %c0_i32_1 = arith.constant 0 : i32
    return %c0_i32, %c0_i32_0 : i32, i32
  }
  func.func @transform_3(%arg0: i32) -> (i32, i32) {
    %c0_i32 = arith.constant 0 : i32
    %c0_i32_0 = arith.constant 0 : i32
    return %arg0, %c0_i32 : i32, i32
  }
}

module attributes {stable_mosaic.version = 11 : i64} {
  func.func @_conv_mm_kernel(%arg0: i32, %arg1: memref<256x288xbf16, #tpu.memory_space<vmem>>, %arg2: memref<288x128xbf16, #tpu.memory_space<vmem>>, %arg3: memref<1x128xf32, #tpu.memory_space<vmem>>, %arg4: memref<256x128xf32, #tpu.memory_space<vmem>>) attributes {dimension_semantics = [#tpu.dimension_semantics<parallel>], iteration_bounds = array<i64: 4>, scalar_prefetch = 0 : i64, scratch_operands = 0 : i64, tpu.core_type = #tpu.core_type<tc>, window_params = [{transform_indices = @transform_0, window_bounds = array<i64: 256, 288>}, {pipeline_mode = #tpu.pipeline_mode<synchronous>, transform_indices = @transform_1, window_bounds = array<i64: 288, 128>}, {pipeline_mode = #tpu.pipeline_mode<synchronous>, transform_indices = @transform_2, window_bounds = array<i64: 1, 128>}, {transform_indices = @transform_3, window_bounds = array<i64: 256, 128>}]} {
    %c0 = arith.constant 0 : index
    %c0_0 = arith.constant 0 : index
    %0 = vector.load %arg1[%c0, %c0_0] : memref<256x288xbf16, #tpu.memory_space<vmem>>, vector<256x288xbf16>
    %c0_1 = arith.constant 0 : index
    %c0_2 = arith.constant 0 : index
    %1 = vector.load %arg2[%c0_1, %c0_2] : memref<288x128xbf16, #tpu.memory_space<vmem>>, vector<288x128xbf16>
    %cst = arith.constant dense<0.000000e+00> : vector<256x128xf32>
    %2 = tpu.matmul %0, %1, %cst {dimension_numbers = #tpu.dot_dimension_numbers<[1], [0], [0], [1], [0, 0, 1, 1], [], []>} : vector<256x288xbf16>, vector<288x128xbf16>, vector<256x128xf32> -> vector<256x128xf32>
    %c0_3 = arith.constant 0 : index
    %c0_4 = arith.constant 0 : index
    %3 = vector.load %arg3[%c0_3, %c0_4] : memref<1x128xf32, #tpu.memory_space<vmem>>, vector<1x128xf32>
    %4 = vector.broadcast %3 : vector<1x128xf32> to vector<256x128xf32>
    %5 = arith.addf %2, %4 : vector<256x128xf32>
    %cst_5 = arith.constant 0.000000e+00 : f32
    %6 = vector.broadcast %cst_5 : f32 to vector<256x128xf32>
    %7 = arith.maximumf %5, %6 : vector<256x128xf32>
    %c0_6 = arith.constant 0 : index
    %c0_7 = arith.constant 0 : index
    %8 = vector.load %arg4[%c0_6, %c0_7] : memref<256x128xf32, #tpu.memory_space<vmem>>, vector<256x128xf32>
    tpu.vector_store %arg4[%c0_6, %c0_7], %7 {strides = array<i32>} : memref<256x128xf32, #tpu.memory_space<vmem>>, vector<256x128xf32>,
    return
  }
  func.func @transform_0(%arg0: i32) -> (i32, i32) {
    %c0_i32 = arith.constant 0 : i32
    %c0_i32_0 = arith.constant 0 : i32
    return %arg0, %c0_i32 : i32, i32
  }
  func.func @transform_1(%arg0: i32) -> (i32, i32) {
    %c0_i32 = arith.constant 0 : i32
    %c0_i32_0 = arith.constant 0 : i32
    %c0_i32_1 = arith.constant 0 : i32
    return %c0_i32, %c0_i32_0 : i32, i32
  }
  func.func @transform_2(%arg0: i32) -> (i32, i32) {
    %c0_i32 = arith.constant 0 : i32
    %c0_i32_0 = arith.constant 0 : i32
    %c0_i32_1 = arith.constant 0 : i32
    return %c0_i32, %c0_i32_0 : i32, i32
  }
  func.func @transform_3(%arg0: i32) -> (i32, i32) {
    %c0_i32 = arith.constant 0 : i32
    %c0_i32_0 = arith.constant 0 : i32
    return %arg0, %c0_i32 : i32, i32
  }
}

module attributes {stable_mosaic.version = 11 : i64} {
  func.func @_maxpool3_kernel(%arg0: i32, %arg1: memref<1x21x21x64xf32, #tpu.memory_space<vmem>>, %arg2: memref<1x19x19x64xf32, #tpu.memory_space<vmem>>) attributes {dimension_semantics = [#tpu.dimension_semantics<parallel>], iteration_bounds = array<i64: 2>, scalar_prefetch = 0 : i64, scratch_operands = 0 : i64, tpu.core_type = #tpu.core_type<tc>, window_params = [{transform_indices = @transform_0, window_bounds = array<i64: 1, 21, 21, 64>}, {transform_indices = @transform_1, window_bounds = array<i64: 1, 19, 19, 64>}]} {
    %c0 = arith.constant 0 : index
    %c0_0 = arith.constant 0 : index
    %c0_1 = arith.constant 0 : index
    %c0_2 = arith.constant 0 : index
    %0 = vector.load %arg1[%c0, %c0_0, %c0_1, %c0_2] : memref<1x21x21x64xf32, #tpu.memory_space<vmem>>, vector<1x21x21x64xf32>
    %1 = vector.shape_cast %0 : vector<1x21x21x64xf32> to vector<21x21x64xf32>
    %2 = vector.extract_strided_slice %1 {offsets = [0, 0, 0], sizes = [19, 19, 64], strides = [1, 1, 1]} : vector<21x21x64xf32> to vector<19x19x64xf32>
    %3 = vector.extract_strided_slice %1 {offsets = [0, 1, 0], sizes = [19, 19, 64], strides = [1, 1, 1]} : vector<21x21x64xf32> to vector<19x19x64xf32>
    %4 = arith.maximumf %2, %3 : vector<19x19x64xf32>
    %5 = vector.extract_strided_slice %1 {offsets = [0, 2, 0], sizes = [19, 19, 64], strides = [1, 1, 1]} : vector<21x21x64xf32> to vector<19x19x64xf32>
    %6 = arith.maximumf %4, %5 : vector<19x19x64xf32>
    %7 = vector.extract_strided_slice %1 {offsets = [1, 0, 0], sizes = [19, 19, 64], strides = [1, 1, 1]} : vector<21x21x64xf32> to vector<19x19x64xf32>
    %8 = arith.maximumf %6, %7 : vector<19x19x64xf32>
    %9 = vector.extract_strided_slice %1 {offsets = [1, 1, 0], sizes = [19, 19, 64], strides = [1, 1, 1]} : vector<21x21x64xf32> to vector<19x19x64xf32>
    %10 = arith.maximumf %8, %9 : vector<19x19x64xf32>
    %11 = vector.extract_strided_slice %1 {offsets = [1, 2, 0], sizes = [19, 19, 64], strides = [1, 1, 1]} : vector<21x21x64xf32> to vector<19x19x64xf32>
    %12 = arith.maximumf %10, %11 : vector<19x19x64xf32>
    %13 = vector.extract_strided_slice %1 {offsets = [2, 0, 0], sizes = [19, 19, 64], strides = [1, 1, 1]} : vector<21x21x64xf32> to vector<19x19x64xf32>
    %14 = arith.maximumf %12, %13 : vector<19x19x64xf32>
    %15 = vector.extract_strided_slice %1 {offsets = [2, 1, 0], sizes = [19, 19, 64], strides = [1, 1, 1]} : vector<21x21x64xf32> to vector<19x19x64xf32>
    %16 = arith.maximumf %14, %15 : vector<19x19x64xf32>
    %17 = vector.extract_strided_slice %1 {offsets = [2, 2, 0], sizes = [19, 19, 64], strides = [1, 1, 1]} : vector<21x21x64xf32> to vector<19x19x64xf32>
    %18 = arith.maximumf %16, %17 : vector<19x19x64xf32>
    %c0_3 = arith.constant 0 : index
    %c0_4 = arith.constant 0 : index
    %c0_5 = arith.constant 0 : index
    %c0_6 = arith.constant 0 : index
    %19 = vector.load %arg2[%c0_3, %c0_4, %c0_5, %c0_6] : memref<1x19x19x64xf32, #tpu.memory_space<vmem>>, vector<1x19x19x64xf32>
    %20 = vector.shape_cast %19 : vector<1x19x19x64xf32> to vector<19x19x64xf32>
    %21 = vector.shape_cast %18 : vector<19x19x64xf32> to vector<1x19x19x64xf32>
    tpu.vector_store %arg2[%c0_3, %c0_4, %c0_5, %c0_6], %21 {strides = array<i32>} : memref<1x19x19x64xf32, #tpu.memory_space<vmem>>, vector<1x19x19x64xf32>,
    return
  }
  func.func @transform_0(%arg0: i32) -> (i32, i32, i32, i32) {
    %c0_i32 = arith.constant 0 : i32
    %c0_i32_0 = arith.constant 0 : i32
    %c0_i32_1 = arith.constant 0 : i32
    %c0_i32_2 = arith.constant 0 : i32
    return %arg0, %c0_i32, %c0_i32_0, %c0_i32_1 : i32, i32, i32, i32
  }
  func.func @transform_1(%arg0: i32) -> (i32, i32, i32, i32) {
    %c0_i32 = arith.constant 0 : i32
    %c0_i32_0 = arith.constant 0 : i32
    %c0_i32_1 = arith.constant 0 : i32
    %c0_i32_2 = arith.constant 0 : i32
    return %arg0, %c0_i32, %c0_i32_0, %c0_i32_1 : i32, i32, i32, i32
  }
}

module attributes {stable_mosaic.version = 11 : i64} {
  func.func @_conv_mm_kernel(%arg0: i32, %arg1: memref<200x64xbf16, #tpu.memory_space<vmem>>, %arg2: memref<64x128xbf16, #tpu.memory_space<vmem>>, %arg3: memref<1x128xf32, #tpu.memory_space<vmem>>, %arg4: memref<200x128xf32, #tpu.memory_space<vmem>>) attributes {dimension_semantics = [#tpu.dimension_semantics<parallel>], iteration_bounds = array<i64: 1>, scalar_prefetch = 0 : i64, scratch_operands = 0 : i64, tpu.core_type = #tpu.core_type<tc>, window_params = [{transform_indices = @transform_0, window_bounds = array<i64: 200, 64>}, {pipeline_mode = #tpu.pipeline_mode<synchronous>, transform_indices = @transform_1, window_bounds = array<i64: 64, 128>}, {pipeline_mode = #tpu.pipeline_mode<synchronous>, transform_indices = @transform_2, window_bounds = array<i64: 1, 128>}, {transform_indices = @transform_3, window_bounds = array<i64: 200, 128>}]} {
    %c0 = arith.constant 0 : index
    %c0_0 = arith.constant 0 : index
    %0 = vector.load %arg1[%c0, %c0_0] : memref<200x64xbf16, #tpu.memory_space<vmem>>, vector<200x64xbf16>
    %c0_1 = arith.constant 0 : index
    %c0_2 = arith.constant 0 : index
    %1 = vector.load %arg2[%c0_1, %c0_2] : memref<64x128xbf16, #tpu.memory_space<vmem>>, vector<64x128xbf16>
    %cst = arith.constant dense<0.000000e+00> : vector<200x128xf32>
    %2 = tpu.matmul %0, %1, %cst {dimension_numbers = #tpu.dot_dimension_numbers<[1], [0], [0], [1], [0, 0, 1, 1], [], []>} : vector<200x64xbf16>, vector<64x128xbf16>, vector<200x128xf32> -> vector<200x128xf32>
    %c0_3 = arith.constant 0 : index
    %c0_4 = arith.constant 0 : index
    %3 = vector.load %arg3[%c0_3, %c0_4] : memref<1x128xf32, #tpu.memory_space<vmem>>, vector<1x128xf32>
    %4 = vector.broadcast %3 : vector<1x128xf32> to vector<200x128xf32>
    %5 = arith.addf %2, %4 : vector<200x128xf32>
    %cst_5 = arith.constant 0.000000e+00 : f32
    %6 = vector.broadcast %cst_5 : f32 to vector<200x128xf32>
    %7 = arith.maximumf %5, %6 : vector<200x128xf32>
    %c0_6 = arith.constant 0 : index
    %c0_7 = arith.constant 0 : index
    %8 = vector.load %arg4[%c0_6, %c0_7] : memref<200x128xf32, #tpu.memory_space<vmem>>, vector<200x128xf32>
    tpu.vector_store %arg4[%c0_6, %c0_7], %7 {strides = array<i32>} : memref<200x128xf32, #tpu.memory_space<vmem>>, vector<200x128xf32>,
    return
  }
  func.func @transform_0(%arg0: i32) -> (i32, i32) {
    %c0_i32 = arith.constant 0 : i32
    %c0_i32_0 = arith.constant 0 : i32
    return %arg0, %c0_i32 : i32, i32
  }
  func.func @transform_1(%arg0: i32) -> (i32, i32) {
    %c0_i32 = arith.constant 0 : i32
    %c0_i32_0 = arith.constant 0 : i32
    %c0_i32_1 = arith.constant 0 : i32
    return %c0_i32, %c0_i32_0 : i32, i32
  }
  func.func @transform_2(%arg0: i32) -> (i32, i32) {
    %c0_i32 = arith.constant 0 : i32
    %c0_i32_0 = arith.constant 0 : i32
    %c0_i32_1 = arith.constant 0 : i32
    return %c0_i32, %c0_i32_0 : i32, i32
  }
  func.func @transform_3(%arg0: i32) -> (i32, i32) {
    %c0_i32 = arith.constant 0 : i32
    %c0_i32_0 = arith.constant 0 : i32
    return %arg0, %c0_i32 : i32, i32
  }
}

module attributes {stable_mosaic.version = 11 : i64} {
  func.func @_conv_mm_kernel(%arg0: i32, %arg1: memref<128x720xbf16, #tpu.memory_space<vmem>>, %arg2: memref<720x256xbf16, #tpu.memory_space<vmem>>, %arg3: memref<1x256xf32, #tpu.memory_space<vmem>>, %arg4: memref<128x256xf32, #tpu.memory_space<vmem>>) attributes {dimension_semantics = [#tpu.dimension_semantics<parallel>], iteration_bounds = array<i64: 1>, scalar_prefetch = 0 : i64, scratch_operands = 0 : i64, tpu.core_type = #tpu.core_type<tc>, window_params = [{transform_indices = @transform_0, window_bounds = array<i64: 128, 720>}, {pipeline_mode = #tpu.pipeline_mode<synchronous>, transform_indices = @transform_1, window_bounds = array<i64: 720, 256>}, {pipeline_mode = #tpu.pipeline_mode<synchronous>, transform_indices = @transform_2, window_bounds = array<i64: 1, 256>}, {transform_indices = @transform_3, window_bounds = array<i64: 128, 256>}]} {
    %c0 = arith.constant 0 : index
    %c0_0 = arith.constant 0 : index
    %0 = vector.load %arg1[%c0, %c0_0] : memref<128x720xbf16, #tpu.memory_space<vmem>>, vector<128x720xbf16>
    %c0_1 = arith.constant 0 : index
    %c0_2 = arith.constant 0 : index
    %1 = vector.load %arg2[%c0_1, %c0_2] : memref<720x256xbf16, #tpu.memory_space<vmem>>, vector<720x256xbf16>
    %cst = arith.constant dense<0.000000e+00> : vector<128x256xf32>
    %2 = tpu.matmul %0, %1, %cst {dimension_numbers = #tpu.dot_dimension_numbers<[1], [0], [0], [1], [0, 0, 1, 1], [], []>} : vector<128x720xbf16>, vector<720x256xbf16>, vector<128x256xf32> -> vector<128x256xf32>
    %c0_3 = arith.constant 0 : index
    %c0_4 = arith.constant 0 : index
    %3 = vector.load %arg3[%c0_3, %c0_4] : memref<1x256xf32, #tpu.memory_space<vmem>>, vector<1x256xf32>
    %4 = vector.broadcast %3 : vector<1x256xf32> to vector<128x256xf32>
    %5 = arith.addf %2, %4 : vector<128x256xf32>
    %cst_5 = arith.constant 0.000000e+00 : f32
    %6 = vector.broadcast %cst_5 : f32 to vector<128x256xf32>
    %7 = arith.maximumf %5, %6 : vector<128x256xf32>
    %c0_6 = arith.constant 0 : index
    %c0_7 = arith.constant 0 : index
    %8 = vector.load %arg4[%c0_6, %c0_7] : memref<128x256xf32, #tpu.memory_space<vmem>>, vector<128x256xf32>
    tpu.vector_store %arg4[%c0_6, %c0_7], %7 {strides = array<i32>} : memref<128x256xf32, #tpu.memory_space<vmem>>, vector<128x256xf32>,
    return
  }
  func.func @transform_0(%arg0: i32) -> (i32, i32) {
    %c0_i32 = arith.constant 0 : i32
    %c0_i32_0 = arith.constant 0 : i32
    return %arg0, %c0_i32 : i32, i32
  }
  func.func @transform_1(%arg0: i32) -> (i32, i32) {
    %c0_i32 = arith.constant 0 : i32
    %c0_i32_0 = arith.constant 0 : i32
    %c0_i32_1 = arith.constant 0 : i32
    return %c0_i32, %c0_i32_0 : i32, i32
  }
  func.func @transform_2(%arg0: i32) -> (i32, i32) {
    %c0_i32 = arith.constant 0 : i32
    %c0_i32_0 = arith.constant 0 : i32
    %c0_i32_1 = arith.constant 0 : i32
    return %c0_i32, %c0_i32_0 : i32, i32
  }
  func.func @transform_3(%arg0: i32) -> (i32, i32) {
    %c0_i32 = arith.constant 0 : i32
    %c0_i32_0 = arith.constant 0 : i32
    return %arg0, %c0_i32 : i32, i32
  }
}

module attributes {stable_mosaic.version = 11 : i64} {
  func.func @_maxpool3_kernel(%arg0: i32, %arg1: memref<1x8x8x192xf32, #tpu.memory_space<vmem>>, %arg2: memref<1x6x6x192xf32, #tpu.memory_space<vmem>>) attributes {dimension_semantics = [#tpu.dimension_semantics<parallel>], iteration_bounds = array<i64: 2>, scalar_prefetch = 0 : i64, scratch_operands = 0 : i64, tpu.core_type = #tpu.core_type<tc>, window_params = [{transform_indices = @transform_0, window_bounds = array<i64: 1, 8, 8, 192>}, {transform_indices = @transform_1, window_bounds = array<i64: 1, 6, 6, 192>}]} {
    %c0 = arith.constant 0 : index
    %c0_0 = arith.constant 0 : index
    %c0_1 = arith.constant 0 : index
    %c0_2 = arith.constant 0 : index
    %0 = vector.load %arg1[%c0, %c0_0, %c0_1, %c0_2] : memref<1x8x8x192xf32, #tpu.memory_space<vmem>>, vector<1x8x8x192xf32>
    %1 = vector.shape_cast %0 : vector<1x8x8x192xf32> to vector<8x8x192xf32>
    %2 = vector.extract_strided_slice %1 {offsets = [0, 0, 0], sizes = [6, 6, 192], strides = [1, 1, 1]} : vector<8x8x192xf32> to vector<6x6x192xf32>
    %3 = vector.extract_strided_slice %1 {offsets = [0, 1, 0], sizes = [6, 6, 192], strides = [1, 1, 1]} : vector<8x8x192xf32> to vector<6x6x192xf32>
    %4 = arith.maximumf %2, %3 : vector<6x6x192xf32>
    %5 = vector.extract_strided_slice %1 {offsets = [0, 2, 0], sizes = [6, 6, 192], strides = [1, 1, 1]} : vector<8x8x192xf32> to vector<6x6x192xf32>
    %6 = arith.maximumf %4, %5 : vector<6x6x192xf32>
    %7 = vector.extract_strided_slice %1 {offsets = [1, 0, 0], sizes = [6, 6, 192], strides = [1, 1, 1]} : vector<8x8x192xf32> to vector<6x6x192xf32>
    %8 = arith.maximumf %6, %7 : vector<6x6x192xf32>
    %9 = vector.extract_strided_slice %1 {offsets = [1, 1, 0], sizes = [6, 6, 192], strides = [1, 1, 1]} : vector<8x8x192xf32> to vector<6x6x192xf32>
    %10 = arith.maximumf %8, %9 : vector<6x6x192xf32>
    %11 = vector.extract_strided_slice %1 {offsets = [1, 2, 0], sizes = [6, 6, 192], strides = [1, 1, 1]} : vector<8x8x192xf32> to vector<6x6x192xf32>
    %12 = arith.maximumf %10, %11 : vector<6x6x192xf32>
    %13 = vector.extract_strided_slice %1 {offsets = [2, 0, 0], sizes = [6, 6, 192], strides = [1, 1, 1]} : vector<8x8x192xf32> to vector<6x6x192xf32>
    %14 = arith.maximumf %12, %13 : vector<6x6x192xf32>
    %15 = vector.extract_strided_slice %1 {offsets = [2, 1, 0], sizes = [6, 6, 192], strides = [1, 1, 1]} : vector<8x8x192xf32> to vector<6x6x192xf32>
    %16 = arith.maximumf %14, %15 : vector<6x6x192xf32>
    %17 = vector.extract_strided_slice %1 {offsets = [2, 2, 0], sizes = [6, 6, 192], strides = [1, 1, 1]} : vector<8x8x192xf32> to vector<6x6x192xf32>
    %18 = arith.maximumf %16, %17 : vector<6x6x192xf32>
    %c0_3 = arith.constant 0 : index
    %c0_4 = arith.constant 0 : index
    %c0_5 = arith.constant 0 : index
    %c0_6 = arith.constant 0 : index
    %19 = vector.load %arg2[%c0_3, %c0_4, %c0_5, %c0_6] : memref<1x6x6x192xf32, #tpu.memory_space<vmem>>, vector<1x6x6x192xf32>
    %20 = vector.shape_cast %19 : vector<1x6x6x192xf32> to vector<6x6x192xf32>
    %21 = vector.shape_cast %18 : vector<6x6x192xf32> to vector<1x6x6x192xf32>
    tpu.vector_store %arg2[%c0_3, %c0_4, %c0_5, %c0_6], %21 {strides = array<i32>} : memref<1x6x6x192xf32, #tpu.memory_space<vmem>>, vector<1x6x6x192xf32>,
    return
  }
  func.func @transform_0(%arg0: i32) -> (i32, i32, i32, i32) {
    %c0_i32 = arith.constant 0 : i32
    %c0_i32_0 = arith.constant 0 : i32
    %c0_i32_1 = arith.constant 0 : i32
    %c0_i32_2 = arith.constant 0 : i32
    return %arg0, %c0_i32, %c0_i32_0, %c0_i32_1 : i32, i32, i32, i32
  }
  func.func @transform_1(%arg0: i32) -> (i32, i32, i32, i32) {
    %c0_i32 = arith.constant 0 : i32
    %c0_i32_0 = arith.constant 0 : i32
    %c0_i32_1 = arith.constant 0 : i32
    %c0_i32_2 = arith.constant 0 : i32
    return %arg0, %c0_i32, %c0_i32_0, %c0_i32_1 : i32, i32, i32, i32
  }
}

module attributes {stable_mosaic.version = 11 : i64} {
  func.func @_conv_mm_kernel(%arg0: i32, %arg1: memref<24x192xbf16, #tpu.memory_space<vmem>>, %arg2: memref<192x256xbf16, #tpu.memory_space<vmem>>, %arg3: memref<1x256xf32, #tpu.memory_space<vmem>>, %arg4: memref<24x256xf32, #tpu.memory_space<vmem>>) attributes {dimension_semantics = [#tpu.dimension_semantics<parallel>], iteration_bounds = array<i64: 1>, scalar_prefetch = 0 : i64, scratch_operands = 0 : i64, tpu.core_type = #tpu.core_type<tc>, window_params = [{transform_indices = @transform_0, window_bounds = array<i64: 24, 192>}, {pipeline_mode = #tpu.pipeline_mode<synchronous>, transform_indices = @transform_1, window_bounds = array<i64: 192, 256>}, {pipeline_mode = #tpu.pipeline_mode<synchronous>, transform_indices = @transform_2, window_bounds = array<i64: 1, 256>}, {transform_indices = @transform_3, window_bounds = array<i64: 24, 256>}]} {
    %c0 = arith.constant 0 : index
    %c0_0 = arith.constant 0 : index
    %0 = vector.load %arg1[%c0, %c0_0] : memref<24x192xbf16, #tpu.memory_space<vmem>>, vector<24x192xbf16>
    %c0_1 = arith.constant 0 : index
    %c0_2 = arith.constant 0 : index
    %1 = vector.load %arg2[%c0_1, %c0_2] : memref<192x256xbf16, #tpu.memory_space<vmem>>, vector<192x256xbf16>
    %cst = arith.constant dense<0.000000e+00> : vector<24x256xf32>
    %2 = tpu.matmul %0, %1, %cst {dimension_numbers = #tpu.dot_dimension_numbers<[1], [0], [0], [1], [0, 0, 1, 1], [], []>} : vector<24x192xbf16>, vector<192x256xbf16>, vector<24x256xf32> -> vector<24x256xf32>
    %c0_3 = arith.constant 0 : index
    %c0_4 = arith.constant 0 : index
    %3 = vector.load %arg3[%c0_3, %c0_4] : memref<1x256xf32, #tpu.memory_space<vmem>>, vector<1x256xf32>
    %4 = vector.broadcast %3 : vector<1x256xf32> to vector<24x256xf32>
    %5 = arith.addf %2, %4 : vector<24x256xf32>
    %cst_5 = arith.constant 0.000000e+00 : f32
    %6 = vector.broadcast %cst_5 : f32 to vector<24x256xf32>
    %7 = arith.maximumf %5, %6 : vector<24x256xf32>
    %c0_6 = arith.constant 0 : index
    %c0_7 = arith.constant 0 : index
    %8 = vector.load %arg4[%c0_6, %c0_7] : memref<24x256xf32, #tpu.memory_space<vmem>>, vector<24x256xf32>
    tpu.vector_store %arg4[%c0_6, %c0_7], %7 {strides = array<i32>} : memref<24x256xf32, #tpu.memory_space<vmem>>, vector<24x256xf32>,
    return
  }
  func.func @transform_0(%arg0: i32) -> (i32, i32) {
    %c0_i32 = arith.constant 0 : i32
    %c0_i32_0 = arith.constant 0 : i32
    return %arg0, %c0_i32 : i32, i32
  }
  func.func @transform_1(%arg0: i32) -> (i32, i32) {
    %c0_i32 = arith.constant 0 : i32
    %c0_i32_0 = arith.constant 0 : i32
    %c0_i32_1 = arith.constant 0 : i32
    return %c0_i32, %c0_i32_0 : i32, i32
  }
  func.func @transform_2(%arg0: i32) -> (i32, i32) {
    %c0_i32 = arith.constant 0 : i32
    %c0_i32_0 = arith.constant 0 : i32
    %c0_i32_1 = arith.constant 0 : i32
    return %c0_i32, %c0_i32_0 : i32, i32
  }
  func.func @transform_3(%arg0: i32) -> (i32, i32) {
    %c0_i32 = arith.constant 0 : i32
    %c0_i32_0 = arith.constant 0 : i32
    return %arg0, %c0_i32 : i32, i32
  }
}

module attributes {stable_mosaic.version = 11 : i64} {
  func.func @_conv_mm_kernel(%arg0: i32, %arg1: memref<24x576xbf16, #tpu.memory_space<vmem>>, %arg2: memref<576x128xbf16, #tpu.memory_space<vmem>>, %arg3: memref<1x128xf32, #tpu.memory_space<vmem>>, %arg4: memref<24x128xf32, #tpu.memory_space<vmem>>) attributes {dimension_semantics = [#tpu.dimension_semantics<parallel>], iteration_bounds = array<i64: 1>, scalar_prefetch = 0 : i64, scratch_operands = 0 : i64, tpu.core_type = #tpu.core_type<tc>, window_params = [{transform_indices = @transform_0, window_bounds = array<i64: 24, 576>}, {pipeline_mode = #tpu.pipeline_mode<synchronous>, transform_indices = @transform_1, window_bounds = array<i64: 576, 128>}, {pipeline_mode = #tpu.pipeline_mode<synchronous>, transform_indices = @transform_2, window_bounds = array<i64: 1, 128>}, {transform_indices = @transform_3, window_bounds = array<i64: 24, 128>}]} {
    %c0 = arith.constant 0 : index
    %c0_0 = arith.constant 0 : index
    %0 = vector.load %arg1[%c0, %c0_0] : memref<24x576xbf16, #tpu.memory_space<vmem>>, vector<24x576xbf16>
    %c0_1 = arith.constant 0 : index
    %c0_2 = arith.constant 0 : index
    %1 = vector.load %arg2[%c0_1, %c0_2] : memref<576x128xbf16, #tpu.memory_space<vmem>>, vector<576x128xbf16>
    %cst = arith.constant dense<0.000000e+00> : vector<24x128xf32>
    %2 = tpu.matmul %0, %1, %cst {dimension_numbers = #tpu.dot_dimension_numbers<[1], [0], [0], [1], [0, 0, 1, 1], [], []>} : vector<24x576xbf16>, vector<576x128xbf16>, vector<24x128xf32> -> vector<24x128xf32>
    %c0_3 = arith.constant 0 : index
    %c0_4 = arith.constant 0 : index
    %3 = vector.load %arg3[%c0_3, %c0_4] : memref<1x128xf32, #tpu.memory_space<vmem>>, vector<1x128xf32>
    %4 = vector.broadcast %3 : vector<1x128xf32> to vector<24x128xf32>
    %5 = arith.addf %2, %4 : vector<24x128xf32>
    %cst_5 = arith.constant 0.000000e+00 : f32
    %6 = vector.broadcast %cst_5 : f32 to vector<24x128xf32>
    %7 = arith.maximumf %5, %6 : vector<24x128xf32>
    %c0_6 = arith.constant 0 : index
    %c0_7 = arith.constant 0 : index
    %8 = vector.load %arg4[%c0_6, %c0_7] : memref<24x128xf32, #tpu.memory_space<vmem>>, vector<24x128xf32>
    tpu.vector_store %arg4[%c0_6, %c0_7], %7 {strides = array<i32>} : memref<24x128xf32, #tpu.memory_space<vmem>>, vector<24x128xf32>,
    return
  }
  func.func @transform_0(%arg0: i32) -> (i32, i32) {
    %c0_i32 = arith.constant 0 : i32
    %c0_i32_0 = arith.constant 0 : i32
    return %arg0, %c0_i32 : i32, i32
  }
  func.func @transform_1(%arg0: i32) -> (i32, i32) {
    %c0_i32 = arith.constant 0 : i32
    %c0_i32_0 = arith.constant 0 : i32
    %c0_i32_1 = arith.constant 0 : i32
    return %c0_i32, %c0_i32_0 : i32, i32
  }
  func.func @transform_2(%arg0: i32) -> (i32, i32) {
    %c0_i32 = arith.constant 0 : i32
    %c0_i32_0 = arith.constant 0 : i32
    %c0_i32_1 = arith.constant 0 : i32
    return %c0_i32, %c0_i32_0 : i32, i32
  }
  func.func @transform_3(%arg0: i32) -> (i32, i32) {
    %c0_i32 = arith.constant 0 : i32
    %c0_i32_0 = arith.constant 0 : i32
    return %arg0, %c0_i32 : i32, i32
  }
}

module attributes {stable_mosaic.version = 11 : i64} {
  func.func @_conv_mm_kernel(%arg0: i32, %arg1: memref<24x864xbf16, #tpu.memory_space<vmem>>, %arg2: memref<864x128xbf16, #tpu.memory_space<vmem>>, %arg3: memref<1x128xf32, #tpu.memory_space<vmem>>, %arg4: memref<24x128xf32, #tpu.memory_space<vmem>>) attributes {dimension_semantics = [#tpu.dimension_semantics<parallel>], iteration_bounds = array<i64: 1>, scalar_prefetch = 0 : i64, scratch_operands = 0 : i64, tpu.core_type = #tpu.core_type<tc>, window_params = [{transform_indices = @transform_0, window_bounds = array<i64: 24, 864>}, {pipeline_mode = #tpu.pipeline_mode<synchronous>, transform_indices = @transform_1, window_bounds = array<i64: 864, 128>}, {pipeline_mode = #tpu.pipeline_mode<synchronous>, transform_indices = @transform_2, window_bounds = array<i64: 1, 128>}, {transform_indices = @transform_3, window_bounds = array<i64: 24, 128>}]} {
    %c0 = arith.constant 0 : index
    %c0_0 = arith.constant 0 : index
    %0 = vector.load %arg1[%c0, %c0_0] : memref<24x864xbf16, #tpu.memory_space<vmem>>, vector<24x864xbf16>
    %c0_1 = arith.constant 0 : index
    %c0_2 = arith.constant 0 : index
    %1 = vector.load %arg2[%c0_1, %c0_2] : memref<864x128xbf16, #tpu.memory_space<vmem>>, vector<864x128xbf16>
    %cst = arith.constant dense<0.000000e+00> : vector<24x128xf32>
    %2 = tpu.matmul %0, %1, %cst {dimension_numbers = #tpu.dot_dimension_numbers<[1], [0], [0], [1], [0, 0, 1, 1], [], []>} : vector<24x864xbf16>, vector<864x128xbf16>, vector<24x128xf32> -> vector<24x128xf32>
    %c0_3 = arith.constant 0 : index
    %c0_4 = arith.constant 0 : index
    %3 = vector.load %arg3[%c0_3, %c0_4] : memref<1x128xf32, #tpu.memory_space<vmem>>, vector<1x128xf32>
    %4 = vector.broadcast %3 : vector<1x128xf32> to vector<24x128xf32>
    %5 = arith.addf %2, %4 : vector<24x128xf32>
    %cst_5 = arith.constant 0.000000e+00 : f32
    %6 = vector.broadcast %cst_5 : f32 to vector<24x128xf32>
    %7 = arith.maximumf %5, %6 : vector<24x128xf32>
    %c0_6 = arith.constant 0 : index
    %c0_7 = arith.constant 0 : index
    %8 = vector.load %arg4[%c0_6, %c0_7] : memref<24x128xf32, #tpu.memory_space<vmem>>, vector<24x128xf32>
    tpu.vector_store %arg4[%c0_6, %c0_7], %7 {strides = array<i32>} : memref<24x128xf32, #tpu.memory_space<vmem>>, vector<24x128xf32>,
    return
  }
  func.func @transform_0(%arg0: i32) -> (i32, i32) {
    %c0_i32 = arith.constant 0 : i32
    %c0_i32_0 = arith.constant 0 : i32
    return %arg0, %c0_i32 : i32, i32
  }
  func.func @transform_1(%arg0: i32) -> (i32, i32) {
    %c0_i32 = arith.constant 0 : i32
    %c0_i32_0 = arith.constant 0 : i32
    %c0_i32_1 = arith.constant 0 : i32
    return %c0_i32, %c0_i32_0 : i32, i32
  }
  func.func @transform_2(%arg0: i32) -> (i32, i32) {
    %c0_i32 = arith.constant 0 : i32
    %c0_i32_0 = arith.constant 0 : i32
    %c0_i32_1 = arith.constant 0 : i32
    return %c0_i32, %c0_i32_0 : i32, i32
  }
  func.func @transform_3(%arg0: i32) -> (i32, i32) {
    %c0_i32 = arith.constant 0 : i32
    %c0_i32_0 = arith.constant 0 : i32
    return %arg0, %c0_i32 : i32, i32
  }
}

module attributes {stable_mosaic.version = 11 : i64} {
  func.func @_conv_mm_kernel(%arg0: i32, %arg1: memref<24x192xbf16, #tpu.memory_space<vmem>>, %arg2: memref<192x128xbf16, #tpu.memory_space<vmem>>, %arg3: memref<1x128xf32, #tpu.memory_space<vmem>>, %arg4: memref<24x128xf32, #tpu.memory_space<vmem>>) attributes {dimension_semantics = [#tpu.dimension_semantics<parallel>], iteration_bounds = array<i64: 1>, scalar_prefetch = 0 : i64, scratch_operands = 0 : i64, tpu.core_type = #tpu.core_type<tc>, window_params = [{transform_indices = @transform_0, window_bounds = array<i64: 24, 192>}, {pipeline_mode = #tpu.pipeline_mode<synchronous>, transform_indices = @transform_1, window_bounds = array<i64: 192, 128>}, {pipeline_mode = #tpu.pipeline_mode<synchronous>, transform_indices = @transform_2, window_bounds = array<i64: 1, 128>}, {transform_indices = @transform_3, window_bounds = array<i64: 24, 128>}]} {
    %c0 = arith.constant 0 : index
    %c0_0 = arith.constant 0 : index
    %0 = vector.load %arg1[%c0, %c0_0] : memref<24x192xbf16, #tpu.memory_space<vmem>>, vector<24x192xbf16>
    %c0_1 = arith.constant 0 : index
    %c0_2 = arith.constant 0 : index
    %1 = vector.load %arg2[%c0_1, %c0_2] : memref<192x128xbf16, #tpu.memory_space<vmem>>, vector<192x128xbf16>
    %cst = arith.constant dense<0.000000e+00> : vector<24x128xf32>
    %2 = tpu.matmul %0, %1, %cst {dimension_numbers = #tpu.dot_dimension_numbers<[1], [0], [0], [1], [0, 0, 1, 1], [], []>} : vector<24x192xbf16>, vector<192x128xbf16>, vector<24x128xf32> -> vector<24x128xf32>
    %c0_3 = arith.constant 0 : index
    %c0_4 = arith.constant 0 : index
    %3 = vector.load %arg3[%c0_3, %c0_4] : memref<1x128xf32, #tpu.memory_space<vmem>>, vector<1x128xf32>
    %4 = vector.broadcast %3 : vector<1x128xf32> to vector<24x128xf32>
    %5 = arith.addf %2, %4 : vector<24x128xf32>
    %cst_5 = arith.constant 0.000000e+00 : f32
    %6 = vector.broadcast %cst_5 : f32 to vector<24x128xf32>
    %7 = arith.maximumf %5, %6 : vector<24x128xf32>
    %c0_6 = arith.constant 0 : index
    %c0_7 = arith.constant 0 : index
    %8 = vector.load %arg4[%c0_6, %c0_7] : memref<24x128xf32, #tpu.memory_space<vmem>>, vector<24x128xf32>
    tpu.vector_store %arg4[%c0_6, %c0_7], %7 {strides = array<i32>} : memref<24x128xf32, #tpu.memory_space<vmem>>, vector<24x128xf32>,
    return
  }
  func.func @transform_0(%arg0: i32) -> (i32, i32) {
    %c0_i32 = arith.constant 0 : i32
    %c0_i32_0 = arith.constant 0 : i32
    return %arg0, %c0_i32 : i32, i32
  }
  func.func @transform_1(%arg0: i32) -> (i32, i32) {
    %c0_i32 = arith.constant 0 : i32
    %c0_i32_0 = arith.constant 0 : i32
    %c0_i32_1 = arith.constant 0 : i32
    return %c0_i32, %c0_i32_0 : i32, i32
  }
  func.func @transform_2(%arg0: i32) -> (i32, i32) {
    %c0_i32 = arith.constant 0 : i32
    %c0_i32_0 = arith.constant 0 : i32
    %c0_i32_1 = arith.constant 0 : i32
    return %c0_i32, %c0_i32_0 : i32, i32
  }
  func.func @transform_3(%arg0: i32) -> (i32, i32) {
    %c0_i32 = arith.constant 0 : i32
    %c0_i32_0 = arith.constant 0 : i32
    return %arg0, %c0_i32 : i32, i32
  }
}

module attributes {stable_mosaic.version = 11 : i64} {
  func.func @_avgpool3_kernel(%arg0: i32, %arg1: memref<1x5x5x192xf32, #tpu.memory_space<vmem>>, %arg2: memref<1x3x3x192xf32, #tpu.memory_space<vmem>>) attributes {dimension_semantics = [#tpu.dimension_semantics<parallel>], iteration_bounds = array<i64: 2>, scalar_prefetch = 0 : i64, scratch_operands = 0 : i64, tpu.core_type = #tpu.core_type<tc>, window_params = [{transform_indices = @transform_0, window_bounds = array<i64: 1, 5, 5, 192>}, {transform_indices = @transform_1, window_bounds = array<i64: 1, 3, 3, 192>}]} {
    %c0 = arith.constant 0 : index
    %c0_0 = arith.constant 0 : index
    %c0_1 = arith.constant 0 : index
    %c0_2 = arith.constant 0 : index
    %0 = vector.load %arg1[%c0, %c0_0, %c0_1, %c0_2] : memref<1x5x5x192xf32, #tpu.memory_space<vmem>>, vector<1x5x5x192xf32>
    %1 = vector.shape_cast %0 : vector<1x5x5x192xf32> to vector<5x5x192xf32>
    %cst = arith.constant 0.000000e+00 : f32
    %2 = vector.broadcast %cst : f32 to vector<3x3x192xf32>
    %3 = vector.extract_strided_slice %1 {offsets = [0, 0, 0], sizes = [3, 3, 192], strides = [1, 1, 1]} : vector<5x5x192xf32> to vector<3x3x192xf32>
    %4 = arith.addf %2, %3 : vector<3x3x192xf32>
    %5 = vector.extract_strided_slice %1 {offsets = [0, 1, 0], sizes = [3, 3, 192], strides = [1, 1, 1]} : vector<5x5x192xf32> to vector<3x3x192xf32>
    %6 = arith.addf %4, %5 : vector<3x3x192xf32>
    %7 = vector.extract_strided_slice %1 {offsets = [0, 2, 0], sizes = [3, 3, 192], strides = [1, 1, 1]} : vector<5x5x192xf32> to vector<3x3x192xf32>
    %8 = arith.addf %6, %7 : vector<3x3x192xf32>
    %9 = vector.extract_strided_slice %1 {offsets = [1, 0, 0], sizes = [3, 3, 192], strides = [1, 1, 1]} : vector<5x5x192xf32> to vector<3x3x192xf32>
    %10 = arith.addf %8, %9 : vector<3x3x192xf32>
    %11 = vector.extract_strided_slice %1 {offsets = [1, 1, 0], sizes = [3, 3, 192], strides = [1, 1, 1]} : vector<5x5x192xf32> to vector<3x3x192xf32>
    %12 = arith.addf %10, %11 : vector<3x3x192xf32>
    %13 = vector.extract_strided_slice %1 {offsets = [1, 2, 0], sizes = [3, 3, 192], strides = [1, 1, 1]} : vector<5x5x192xf32> to vector<3x3x192xf32>
    %14 = arith.addf %12, %13 : vector<3x3x192xf32>
    %15 = vector.extract_strided_slice %1 {offsets = [2, 0, 0], sizes = [3, 3, 192], strides = [1, 1, 1]} : vector<5x5x192xf32> to vector<3x3x192xf32>
    %16 = arith.addf %14, %15 : vector<3x3x192xf32>
    %17 = vector.extract_strided_slice %1 {offsets = [2, 1, 0], sizes = [3, 3, 192], strides = [1, 1, 1]} : vector<5x5x192xf32> to vector<3x3x192xf32>
    %18 = arith.addf %16, %17 : vector<3x3x192xf32>
    %19 = vector.extract_strided_slice %1 {offsets = [2, 2, 0], sizes = [3, 3, 192], strides = [1, 1, 1]} : vector<5x5x192xf32> to vector<3x3x192xf32>
    %20 = arith.addf %18, %19 : vector<3x3x192xf32>
    %21 = tpu.iota {dimensions = array<i32: 0>} : vector<3x3xi32>
    %22 = tpu.iota {dimensions = array<i32: 1>} : vector<3x3xi32>
    %c1_i32 = arith.constant 1 : i32
    %23 = vector.broadcast %c1_i32 : i32 to vector<3x3xi32>
    %24 = arith.addi %21, %23 : vector<3x3xi32>
    %c2_i32 = arith.constant 2 : i32
    %25 = vector.broadcast %c2_i32 : i32 to vector<3x3xi32>
    %26 = arith.minsi %24, %25 : vector<3x3xi32>
    %c1_i32_3 = arith.constant 1 : i32
    %27 = vector.broadcast %c1_i32_3 : i32 to vector<3x3xi32>
    %28 = arith.subi %21, %27 : vector<3x3xi32>
    %c0_i32 = arith.constant 0 : i32
    %29 = vector.broadcast %c0_i32 : i32 to vector<3x3xi32>
    %30 = arith.maxsi %28, %29 : vector<3x3xi32>
    %31 = arith.subi %26, %30 : vector<3x3xi32>
    %c1_i32_4 = arith.constant 1 : i32
    %32 = vector.broadcast %c1_i32_4 : i32 to vector<3x3xi32>
    %33 = arith.addi %31, %32 : vector<3x3xi32>
    %c1_i32_5 = arith.constant 1 : i32
    %34 = vector.broadcast %c1_i32_5 : i32 to vector<3x3xi32>
    %35 = arith.addi %22, %34 : vector<3x3xi32>
    %c2_i32_6 = arith.constant 2 : i32
    %36 = vector.broadcast %c2_i32_6 : i32 to vector<3x3xi32>
    %37 = arith.minsi %35, %36 : vector<3x3xi32>
    %c1_i32_7 = arith.constant 1 : i32
    %38 = vector.broadcast %c1_i32_7 : i32 to vector<3x3xi32>
    %39 = arith.subi %22, %38 : vector<3x3xi32>
    %c0_i32_8 = arith.constant 0 : i32
    %40 = vector.broadcast %c0_i32_8 : i32 to vector<3x3xi32>
    %41 = arith.maxsi %39, %40 : vector<3x3xi32>
    %42 = arith.subi %37, %41 : vector<3x3xi32>
    %c1_i32_9 = arith.constant 1 : i32
    %43 = vector.broadcast %c1_i32_9 : i32 to vector<3x3xi32>
    %44 = arith.addi %42, %43 : vector<3x3xi32>
    %45 = arith.muli %33, %44 : vector<3x3xi32>
    %46 = arith.sitofp %45 : vector<3x3xi32> to vector<3x3xf32>
    %cst_10 = arith.constant 1.000000e+00 : f32
    %47 = vector.broadcast %cst_10 : f32 to vector<3x3xf32>
    %48 = arith.divf %47, %46 : vector<3x3xf32>
    %49 = vector.shape_cast %48 : vector<3x3xf32> to vector<3x3x1xf32>
    %50 = vector.broadcast %49 : vector<3x3x1xf32> to vector<3x3x192xf32>
    %51 = arith.mulf %20, %50 : vector<3x3x192xf32>
    %c0_11 = arith.constant 0 : index
    %c0_12 = arith.constant 0 : index
    %c0_13 = arith.constant 0 : index
    %c0_14 = arith.constant 0 : index
    %52 = vector.load %arg2[%c0_11, %c0_12, %c0_13, %c0_14] : memref<1x3x3x192xf32, #tpu.memory_space<vmem>>, vector<1x3x3x192xf32>
    %53 = vector.shape_cast %52 : vector<1x3x3x192xf32> to vector<3x3x192xf32>
    %54 = vector.shape_cast %51 : vector<3x3x192xf32> to vector<1x3x3x192xf32>
    tpu.vector_store %arg2[%c0_11, %c0_12, %c0_13, %c0_14], %54 {strides = array<i32>} : memref<1x3x3x192xf32, #tpu.memory_space<vmem>>, vector<1x3x3x192xf32>,
    return
  }
  func.func @transform_0(%arg0: i32) -> (i32, i32, i32, i32) {
    %c0_i32 = arith.constant 0 : i32
    %c0_i32_0 = arith.constant 0 : i32
    %c0_i32_1 = arith.constant 0 : i32
    %c0_i32_2 = arith.constant 0 : i32
    return %arg0, %c0_i32, %c0_i32_0, %c0_i32_1 : i32, i32, i32, i32
  }
  func.func @transform_1(%arg0: i32) -> (i32, i32, i32, i32) {
    %c0_i32 = arith.constant 0 : i32
    %c0_i32_0 = arith.constant 0 : i32
    %c0_i32_1 = arith.constant 0 : i32
    %c0_i32_2 = arith.constant 0 : i32
    return %arg0, %c0_i32, %c0_i32_0, %c0_i32_1 : i32, i32, i32, i32
  }
}

module attributes {stable_mosaic.version = 11 : i64} {
  func.func @_conv_mm_kernel(%arg0: i32, %arg1: memref<24x1200xbf16, #tpu.memory_space<vmem>>, %arg2: memref<1200x128xbf16, #tpu.memory_space<vmem>>, %arg3: memref<1x128xf32, #tpu.memory_space<vmem>>, %arg4: memref<24x128xf32, #tpu.memory_space<vmem>>) attributes {dimension_semantics = [#tpu.dimension_semantics<parallel>], iteration_bounds = array<i64: 1>, scalar_prefetch = 0 : i64, scratch_operands = 0 : i64, tpu.core_type = #tpu.core_type<tc>, window_params = [{transform_indices = @transform_0, window_bounds = array<i64: 24, 1200>}, {pipeline_mode = #tpu.pipeline_mode<synchronous>, transform_indices = @transform_1, window_bounds = array<i64: 1200, 128>}, {pipeline_mode = #tpu.pipeline_mode<synchronous>, transform_indices = @transform_2, window_bounds = array<i64: 1, 128>}, {transform_indices = @transform_3, window_bounds = array<i64: 24, 128>}]} {
    %c0 = arith.constant 0 : index
    %c0_0 = arith.constant 0 : index
    %0 = vector.load %arg1[%c0, %c0_0] : memref<24x1200xbf16, #tpu.memory_space<vmem>>, vector<24x1200xbf16>
    %c0_1 = arith.constant 0 : index
    %c0_2 = arith.constant 0 : index
    %1 = vector.load %arg2[%c0_1, %c0_2] : memref<1200x128xbf16, #tpu.memory_space<vmem>>, vector<1200x128xbf16>
    %cst = arith.constant dense<0.000000e+00> : vector<24x128xf32>
    %2 = tpu.matmul %0, %1, %cst {dimension_numbers = #tpu.dot_dimension_numbers<[1], [0], [0], [1], [0, 0, 1, 1], [], []>} : vector<24x1200xbf16>, vector<1200x128xbf16>, vector<24x128xf32> -> vector<24x128xf32>
    %c0_3 = arith.constant 0 : index
    %c0_4 = arith.constant 0 : index
    %3 = vector.load %arg3[%c0_3, %c0_4] : memref<1x128xf32, #tpu.memory_space<vmem>>, vector<1x128xf32>
    %4 = vector.broadcast %3 : vector<1x128xf32> to vector<24x128xf32>
    %5 = arith.addf %2, %4 : vector<24x128xf32>
    %cst_5 = arith.constant 0.000000e+00 : f32
    %6 = vector.broadcast %cst_5 : f32 to vector<24x128xf32>
    %7 = arith.maximumf %5, %6 : vector<24x128xf32>
    %c0_6 = arith.constant 0 : index
    %c0_7 = arith.constant 0 : index
    %8 = vector.load %arg4[%c0_6, %c0_7] : memref<24x128xf32, #tpu.memory_space<vmem>>, vector<24x128xf32>
    tpu.vector_store %arg4[%c0_6, %c0_7], %7 {strides = array<i32>} : memref<24x128xf32, #tpu.memory_space<vmem>>, vector<24x128xf32>,
    return
  }
  func.func @transform_0(%arg0: i32) -> (i32, i32) {
    %c0_i32 = arith.constant 0 : i32
    %c0_i32_0 = arith.constant 0 : i32
    return %arg0, %c0_i32 : i32, i32
  }
  func.func @transform_1(%arg0: i32) -> (i32, i32) {
    %c0_i32 = arith.constant 0 : i32
    %c0_i32_0 = arith.constant 0 : i32
    %c0_i32_1 = arith.constant 0 : i32
    return %c0_i32, %c0_i32_0 : i32, i32
  }
  func.func @transform_2(%arg0: i32) -> (i32, i32) {
    %c0_i32 = arith.constant 0 : i32
    %c0_i32_0 = arith.constant 0 : i32
    %c0_i32_1 = arith.constant 0 : i32
    return %c0_i32, %c0_i32_0 : i32, i32
  }
  func.func @transform_3(%arg0: i32) -> (i32, i32) {
    %c0_i32 = arith.constant 0 : i32
    %c0_i32_0 = arith.constant 0 : i32
    return %arg0, %c0_i32 : i32, i32
  }
}

</mosaic_0001>

<bundles_post_ra>
// kernel: incept_init_block.13
= control target key start
LH: loop header
LB: loop body
LE: loop exit
PB: predicated region body
PF: predicated region fallthrough
CT: control target
= control target key end

     0   :  { %8 = vsyncpa [#allocation3], 0  ;;  %s1037_s0 = inlined_call_operand.vmem [shape: bf16[1280,27], index: 0, kind: input, shape index: {}]   ;;  %s1038_s1 = inlined_call_operand.hbm [shape: bf16[27,128], index: 1, kind: input, shape index: {}]   ;;  %s1039_s2 = inlined_call_operand.hbm [shape: f32[1,128], index: 2, kind: input, shape index: {}]   ;;  %s1040_s3 = inlined_call_operand.vmem [shape: f32[1280,128], index: 3, kind: output, shape index: {}]  }
   0x1   :  { %9 = vsyncpa [#allocation5], 0  ;;  %s886_s12 = smov 0  }
   0x2 LB: > { %s125_s15 = sshll.u32 %s1038_s1, 4  ;;  %s625_s16 = sadd.s32 4294967295, %s859_s12   ;;  %s859_s12 = sphi %s886_s12, %s15_s12   ;;  %s126_s15 = int_to_ptr.hbm [resolvable:$true] %s125_s15 }
   0x3   : > { %p627_p0 = scmp.ge.s32.totalorder %s859_s12, 1  ;;  %p114_p1 = scmp.lt.s32.totalorder %s859_s12, 6 }
   0x4   : > { %p897_p2 = scmp.eq.s32.totalorder %s625_s16, 0  ;;  %s861_s19 = smov [#allocation2]  }
   0x5   : > { %p901_p3 = pnand %p627_p0, %p114_p1  ;;  %s127_s20 = sshll.u32 %s861_s19, 4  ;;  %s128_s20 = int_to_ptr.vmem [resolvable:$true] %s127_s20 }
   0x6   : > { %s140_s23 = sshll.u32 %s1039_s2, 4  ;;  %s862_s24 = smov [#allocation4]   ;;  %s141_s23 = int_to_ptr.hbm [resolvable:$true] %s140_s23 }
   0x7   : > { %p760_p4 = pneg %p901_p3  ;;  %s142_s25 = sshll.u32 %s862_s24, 4  ;;  %s143_s25 = int_to_ptr.vmem [resolvable:$true] %s142_s25 }
   0x8   : > { %s863_s26 = smov 64   ;;  %s864_s27 = smov 4  }
   0x9   : > { %p761_p5 = pnand %p897_p2, %p760_p4  ;;  %164 = sbr.rel (%p901_p3) target bundleno = 225 (0xe1), region = 32 }
   0xb   : > { %763 = dma.hbm_to_vmem [thread:$0]  (!%p761_p5), %s126_s15, 256, %s128_s20, [#allocation3], %s863_s26, %s863_s26, %s864_s27  }
   0xc   : > { %766 = dma.hbm_to_vmem [thread:$0]  (!%p761_p5), %s141_s23, 16, %s143_s25, [#allocation5]  }
   0xe   : > { %850 = dma.done.wait (%p897_p2), [#allocation3], 256  }
   0xf   : > { %852 = vsyncadd (%p897_p2), [#allocation3], 4294967040 }
  0x10   : > { %854 = dma.done.wait (%p897_p2), [#allocation5], 16  }
  0x11   : > { %856 = vsyncadd (%p897_p2), [#allocation5], 4294967280  ;;  %s634_s28 = sshll.u32 %s625_s16, 5  ;;  %vm387_vm0 = vcmask 1044480   ;;  %vm388_vm1 = vcmask 1045504   ;;  %v865_v0 = vmov 65535  }
  0x12   : > { %p195_p6 = scmp.lt.s32.totalorder %s634_s28, 159  ;;  %v389_v1 = vsel %vm387_vm0, 4294967295, %v865_v0  ;;  %v708_v2 = vld [vmem:[#allocation2 + $0x8] sm:$0xf]  ;;  %v745_v3 = vld [vmem:[#allocation2 + $0x8] sm:$0x30] }
  0x13   : > { %v390_v4 = vsel %vm388_vm1, %v389_v1, 0  ;;  %v709_v5 = vor.u32 %v745_v3, %v708_v2  ;;  %v744_v7 = vld [vmem:[#allocation2] sm:$0xff]  ;;  %vm338_vm2 = vcmask 220160   ;;  %v962_v24 = vld [vmem:[#allocation4] ss:$0 sm:$0xff] }
  0x14   : > { %s1044_s28 = smov (!%p195_p6, %s634_s28), 159 }
  0x15   : > { %s635_s29 = sshll.u32 %s1044_s28, 2  ;;  %v392_v6 = vand.u32 %v709_v5, %v390_v4  ;;  %s637_s6 = sshll.u32 %s1044_s28, 3 }
  0x16   : > { %s928_s5 = scalar_lea.vmem %s1037_s0, %s635_s29  ;;  %s970_s9 = scalar_lea.vmem %s1040_s3, %s637_s6 }
  0x17   : > { %400 = vmatpush.bf16.msra.mxu0 %v392_v6  ;;  %746 = vmatpush.bf16.msra.mxu1 %v392_v6  ;;  %v728_v8 = vld [vmem:[%s928_s5] sm:$0xff]  ;;  %v729_v12 = vld [vmem:[%s928_s5 + $0x8] sm:$0xff]  ;;  %v730_v16 = vld [vmem:[%s928_s5 + $0x10] sm:$0xff] }
  0x18   : > { %747 = vmatpush.bf16.msra.mxu2 %v392_v6  ;;  %748 = vmatpush.bf16.msra.mxu3 %v392_v6  ;;  %v732_v9 = vld [vmem:[%s928_s5 + $0x20] sm:$0xff]  ;;  %v733_v13 = vld [vmem:[%s928_s5 + $0x28] sm:$0xff]  ;;  %v734_v17 = vld [vmem:[%s928_s5 + $0x30] sm:$0xff] }
  0x19   : > { %v736_v10 = vld [vmem:[%s928_s5 + $0x40] sm:$0xff]  ;;  %v737_v14 = vld [vmem:[%s928_s5 + $0x48] sm:$0xff]  ;;  %v738_v18 = vld [vmem:[%s928_s5 + $0x50] sm:$0xff] }
  0x1a   : > { %v740_v11 = vld [vmem:[%s928_s5 + $0x60] sm:$0xff]  ;;  %v741_v15 = vld [vmem:[%s928_s5 + $0x68] sm:$0xff]  ;;  %v742_v19 = vld [vmem:[%s928_s5 + $0x70] sm:$0xff] }
  0x1b   : > { %401 = vmatpush.bf16.msra.mxu0 %v744_v7  ;;  %749 = vmatpush.bf16.msra.mxu1 %v744_v7  ;;  %v731_v20 = vld [vmem:[%s928_s5 + $0x18] sm:$0xff] }
  0x1c   : > { %750 = vmatpush.bf16.msra.mxu2 %v744_v7  ;;  %751 = vmatpush.bf16.msra.mxu3 %v744_v7  ;;  %v735_v21 = vld [vmem:[%s928_s5 + $0x38] sm:$0xff] }
  0x1d   : > { %v739_v22 = vld [vmem:[%s928_s5 + $0x58] sm:$0xff] }
  0x1e   : > { %710 = vmatmul.msk.bf16.vlgmr.msra.gmra.mxu0 %vm338_vm2, %v728_v8  ;;  %714 = vmatmul.msk.bf16.vlgmr.msra.gmra.mxu1 %vm338_vm2, %v732_v9  ;;  %v743_v23 = vld [vmem:[%s928_s5 + $0x78] sm:$0xff] }
  0x1f   : > { %718 = vmatmul.msk.bf16.vlgmr.msra.gmra.mxu2 %vm338_vm2, %v736_v10  ;;  %722 = vmatmul.msk.bf16.vlgmr.msra.gmra.mxu3 %vm338_vm2, %v740_v11 }
  0x2e   : > { %711 = vmatmul.msk.bf16.gmra.mxu0 %vm338_vm2, %v729_v12  ;;  %715 = vmatmul.msk.bf16.gmra.mxu1 %vm338_vm2, %v733_v13 }
  0x2f   : > { %719 = vmatmul.msk.bf16.gmra.mxu2 %vm338_vm2, %v737_v14  ;;  %723 = vmatmul.msk.bf16.gmra.mxu3 %vm338_vm2, %v741_v15 }
  0x3e   : > { %712 = vmatmul.msk.bf16.gmra.mxu0 %vm338_vm2, %v730_v16  ;;  %716 = vmatmul.msk.bf16.gmra.mxu1 %vm338_vm2, %v734_v17 }
  0x3f   : > { %720 = vmatmul.msk.bf16.gmra.mxu2 %vm338_vm2, %v738_v18  ;;  %724 = vmatmul.msk.bf16.gmra.mxu3 %vm338_vm2, %v742_v19 }
  0x4e   : > { %713 = vmatmul.msk.bf16.gmra.mxu0 %vm338_vm2, %v731_v20  ;;  %717 = vmatmul.msk.bf16.gmra.mxu1 %vm338_vm2, %v735_v21 }
  0x4f   : > { %721 = vmatmul.msk.bf16.gmra.mxu2 %vm338_vm2, %v739_v22  ;;  %725 = vmatmul.msk.bf16.gmra.mxu3 %vm338_vm2, %v743_v23 }
  0x9b   : > { %v403_v25 = vpop.f32.mrf.mxu0  ;;  %v423_v26 = vpop.f32.mrf.mxu1 }
  0x9c   : > { %v404_v27 = vadd.f32 %v962_v24, %v403_v25  ;;  %v424_v28 = vadd.f32 %v962_v24, %v423_v26 }
  0x9e   : > { %v483_v29 = vmax.f32 %v404_v27, 0.0  ;;  %v491_v30 = vmax.f32 %v424_v28, 0.0 }
  0xa0   : > { %515 = vst [vmem:[%s970_s9] sm:$0xff] %v483_v29 }
  0xa1   : > { %523 = vst [vmem:[%s970_s9 + $0x40] sm:$0xff] %v491_v30 }
  0xa2   : > { %v443_v31 = vpop.f32.mrf.mxu2  ;;  %v463_v32 = vpop.f32.mrf.mxu3 }
  0xa3   : > { %v444_v33 = vadd.f32 %v962_v24, %v443_v31  ;;  %v464_v34 = vadd.f32 %v962_v24, %v463_v32  ;;  %v405_v35 = vpop.f32.mrf.mxu0  ;;  %v425_v36 = vpop.f32.mrf.mxu1 }
  0xa4   : > { %v406_v37 = vadd.f32 %v962_v24, %v405_v35  ;;  %v426_v38 = vadd.f32 %v962_v24, %v425_v36 }
  0xa5   : > { %v499_v39 = vmax.f32 %v444_v33, 0.0  ;;  %v507_v40 = vmax.f32 %v464_v34, 0.0 }
  0xa6   : > { %v484_v41 = vmax.f32 %v406_v37, 0.0  ;;  %v492_v42 = vmax.f32 %v426_v38, 0.0 }
  0xa7   : > { %531 = vst [vmem:[%s970_s9 + $0x80] sm:$0xff] %v499_v39 }
  0xa8   : > { %539 = vst [vmem:[%s970_s9 + $0xc0] sm:$0xff] %v507_v40 }
  0xa9   : > { %516 = vst [vmem:[%s970_s9 + $0x8] sm:$0xff] %v484_v41 }
  0xaa   : > { %524 = vst [vmem:[%s970_s9 + $0x48] sm:$0xff] %v492_v42  ;;  %v445_v43 = vpop.f32.mrf.mxu2  ;;  %v465_v44 = vpop.f32.mrf.mxu3 }
  0xab   : > { %v446_v45 = vadd.f32 %v962_v24, %v445_v43  ;;  %v466_v46 = vadd.f32 %v962_v24, %v465_v44  ;;  %v408_v47 = vpop.f32.mrf.mxu0  ;;  %v428_v48 = vpop.f32.mrf.mxu1 }
  0xac   : > { %v409_v49 = vadd.f32 %v962_v24, %v408_v47  ;;  %v429_v50 = vadd.f32 %v962_v24, %v428_v48 }
  0xad   : > { %v500_v51 = vmax.f32 %v446_v45, 0.0  ;;  %v508_v52 = vmax.f32 %v466_v46, 0.0 }
  0xae   : > { %v485_v53 = vmax.f32 %v409_v49, 0.0  ;;  %v493_v54 = vmax.f32 %v429_v50, 0.0 }
  0xaf   : > { %532 = vst [vmem:[%s970_s9 + $0x88] sm:$0xff] %v500_v51 }
  0xb0   : > { %540 = vst [vmem:[%s970_s9 + $0xc8] sm:$0xff] %v508_v52 }
  0xb1   : > { %517 = vst [vmem:[%s970_s9 + $0x10] sm:$0xff] %v485_v53 }
  0xb2   : > { %525 = vst [vmem:[%s970_s9 + $0x50] sm:$0xff] %v493_v54  ;;  %v448_v55 = vpop.f32.mrf.mxu2  ;;  %v468_v56 = vpop.f32.mrf.mxu3 }
  0xb3   : > { %v449_v57 = vadd.f32 %v962_v24, %v448_v55  ;;  %v469_v58 = vadd.f32 %v962_v24, %v468_v56  ;;  %v410_v59 = vpop.f32.mrf.mxu0  ;;  %v430_v60 = vpop.f32.mrf.mxu1 }
  0xb4   : > { %v411_v61 = vadd.f32 %v962_v24, %v410_v59  ;;  %v431_v62 = vadd.f32 %v962_v24, %v430_v60 }
  0xb5   : > { %v501_v63 = vmax.f32 %v449_v57, 0.0  ;;  %v509_v0 = vmax.f32 %v469_v58, 0.0 }
  0xb6   : > { %v486_v1 = vmax.f32 %v411_v61, 0.0  ;;  %v494_v2 = vmax.f32 %v431_v62, 0.0 }
  0xb7   : > { %533 = vst [vmem:[%s970_s9 + $0x90] sm:$0xff] %v501_v63 }
  0xb8   : > { %541 = vst [vmem:[%s970_s9 + $0xd0] sm:$0xff] %v509_v0 }
  0xb9   : > { %518 = vst [vmem:[%s970_s9 + $0x18] sm:$0xff] %v486_v1 }
  0xba   : > { %526 = vst [vmem:[%s970_s9 + $0x58] sm:$0xff] %v494_v2  ;;  %v450_v3 = vpop.f32.mrf.mxu2  ;;  %v470_v4 = vpop.f32.mrf.mxu3 }
  0xbb   : > { %v451_v5 = vadd.f32 %v962_v24, %v450_v3  ;;  %v471_v6 = vadd.f32 %v962_v24, %v470_v4  ;;  %v413_v7 = vpop.f32.mrf.mxu0  ;;  %v433_v8 = vpop.f32.mrf.mxu1 }
  0xbc   : > { %v414_v9 = vadd.f32 %v962_v24, %v413_v7  ;;  %v434_v10 = vadd.f32 %v962_v24, %v433_v8 }
  0xbd   : > { %v502_v11 = vmax.f32 %v451_v5, 0.0  ;;  %v510_v12 = vmax.f32 %v471_v6, 0.0 }
  0xbe   : > { %v487_v13 = vmax.f32 %v414_v9, 0.0  ;;  %v495_v14 = vmax.f32 %v434_v10, 0.0 }
  0xbf   : > { %534 = vst [vmem:[%s970_s9 + $0x98] sm:$0xff] %v502_v11 }
  0xc0   : > { %542 = vst [vmem:[%s970_s9 + $0xd8] sm:$0xff] %v510_v12 }
  0xc1   : > { %519 = vst [vmem:[%s970_s9 + $0x20] sm:$0xff] %v487_v13 }
  0xc2   : > { %527 = vst [vmem:[%s970_s9 + $0x60] sm:$0xff] %v495_v14  ;;  %v453_v15 = vpop.f32.mrf.mxu2  ;;  %v473_v16 = vpop.f32.mrf.mxu3 }
  0xc3   : > { %v454_v17 = vadd.f32 %v962_v24, %v453_v15  ;;  %v474_v18 = vadd.f32 %v962_v24, %v473_v16  ;;  %v415_v19 = vpop.f32.mrf.mxu0  ;;  %v435_v20 = vpop.f32.mrf.mxu1 }
  0xc4   : > { %v416_v21 = vadd.f32 %v962_v24, %v415_v19  ;;  %v436_v22 = vadd.f32 %v962_v24, %v435_v20 }
  0xc5   : > { %v503_v23 = vmax.f32 %v454_v17, 0.0  ;;  %v511_v25 = vmax.f32 %v474_v18, 0.0 }
  0xc6   : > { %v488_v26 = vmax.f32 %v416_v21, 0.0  ;;  %v496_v27 = vmax.f32 %v436_v22, 0.0 }
  0xc7   : > { %535 = vst [vmem:[%s970_s9 + $0xa0] sm:$0xff] %v503_v23 }
  0xc8   : > { %543 = vst [vmem:[%s970_s9 + $0xe0] sm:$0xff] %v511_v25 }
  0xc9   : > { %520 = vst [vmem:[%s970_s9 + $0x28] sm:$0xff] %v488_v26 }
  0xca   : > { %528 = vst [vmem:[%s970_s9 + $0x68] sm:$0xff] %v496_v27  ;;  %v455_v28 = vpop.f32.mrf.mxu2  ;;  %v475_v29 = vpop.f32.mrf.mxu3 }
  0xcb   : > { %v456_v30 = vadd.f32 %v962_v24, %v455_v28  ;;  %v476_v31 = vadd.f32 %v962_v24, %v475_v29  ;;  %v418_v32 = vpop.f32.mrf.mxu0  ;;  %v438_v33 = vpop.f32.mrf.mxu1 }
  0xcc   : > { %v419_v34 = vadd.f32 %v962_v24, %v418_v32  ;;  %v439_v35 = vadd.f32 %v962_v24, %v438_v33 }
  0xcd   : > { %v504_v36 = vmax.f32 %v456_v30, 0.0  ;;  %v512_v37 = vmax.f32 %v476_v31, 0.0 }
  0xce   : > { %v489_v38 = vmax.f32 %v419_v34, 0.0  ;;  %v497_v39 = vmax.f32 %v439_v35, 0.0 }
  0xcf   : > { %536 = vst [vmem:[%s970_s9 + $0xa8] sm:$0xff] %v504_v36 }
  0xd0   : > { %544 = vst [vmem:[%s970_s9 + $0xe8] sm:$0xff] %v512_v37 }
  0xd1   : > { %521 = vst [vmem:[%s970_s9 + $0x30] sm:$0xff] %v489_v38 }
  0xd2   : > { %529 = vst [vmem:[%s970_s9 + $0x70] sm:$0xff] %v497_v39  ;;  %v458_v40 = vpop.f32.mrf.mxu2  ;;  %v478_v41 = vpop.f32.mrf.mxu3 }
  0xd3   : > { %v459_v42 = vadd.f32 %v962_v24, %v458_v40  ;;  %v479_v43 = vadd.f32 %v962_v24, %v478_v41  ;;  %v420_v44 = vpop.f32.mrf.mxu0  ;;  %v440_v45 = vpop.f32.mrf.mxu1 }
  0xd4   : > { %v421_v46 = vadd.f32 %v962_v24, %v420_v44  ;;  %v441_v47 = vadd.f32 %v962_v24, %v440_v45 }
  0xd5   : > { %v505_v48 = vmax.f32 %v459_v42, 0.0  ;;  %v513_v49 = vmax.f32 %v479_v43, 0.0 }
  0xd6   : > { %v490_v50 = vmax.f32 %v421_v46, 0.0  ;;  %v498_v51 = vmax.f32 %v441_v47, 0.0 }
  0xd7   : > { %537 = vst [vmem:[%s970_s9 + $0xb0] sm:$0xff] %v505_v48 }
  0xd8   : > { %545 = vst [vmem:[%s970_s9 + $0xf0] sm:$0xff] %v513_v49 }
  0xd9   : > { %522 = vst [vmem:[%s970_s9 + $0x38] sm:$0xff] %v490_v50 }
  0xda   : > { %530 = vst [vmem:[%s970_s9 + $0x78] sm:$0xff] %v498_v51  ;;  %v460_v52 = vpop.f32.mrf.mxu2  ;;  %v480_v53 = vpop.f32.mrf.mxu3 }
  0xdb   : > { %v461_v54 = vadd.f32 %v962_v24, %v460_v52  ;;  %v481_v55 = vadd.f32 %v962_v24, %v480_v53 }
  0xdd   : > { %v506_v56 = vmax.f32 %v461_v54, 0.0  ;;  %v514_v57 = vmax.f32 %v481_v55, 0.0 }
  0xdf   : > { %538 = vst [vmem:[%s970_s9 + $0xb8] sm:$0xff] %v506_v56 }
  0xe0   : > { %546 = vst [vmem:[%s970_s9 + $0xf8] sm:$0xff] %v514_v57 }
  0xe1 PF: > { %s15_s12 = sadd.s32 1, %s859_s12  }
  0xe2   : > { %p12_p7 = scmp.ge.s32.totalorder %s15_s12, 7  }
  0xe4   :  { %14 = sbr.rel (!%p12_p7) target bundleno = 2 (0x2), region = 71 }
  0xe9   :  { %569 = vsyncpa [#allocation3], 1 }
  0xea   :  { %571 = vsyncpa [#allocation3 + $0x1], 1 }
  0xeb   :  { %572 = vsyncpa [#allocation5], 1 }

// kernel: incept_init_block.14
= control target key start
LH: loop header
LB: loop body
LE: loop exit
PB: predicated region body
PF: predicated region fallthrough
CT: control target
= control target key end

     0   :  { %s1479_s12 = smov 0   ;;  %s1787_s0 = inlined_call_operand.vmem [shape: bf16[1024,288], index: 0, kind: input, shape index: {}]   ;;  %s1788_s1 = inlined_call_operand.vmem [shape: bf16[288,128], index: 1, kind: input, shape index: {}]   ;;  %s1789_s2 = inlined_call_operand.vmem [shape: f32[1,128], index: 2, kind: input, shape index: {}]   ;;  %s1790_s3 = inlined_call_operand.vmem [shape: f32[1024,128], index: 3, kind: output, shape index: {}]  }
   0x1 LB: > { %s1066_s13 = sadd.s32 4294967295, %s1457_s12   ;;  %p1070_p0 = scmp.ge.s32.totalorder %s1457_s12, 1  ;;  %s1457_s12 = sphi %s1479_s12, %s13_s12  }
   0x2   : > { %p139_p1 = scmp.lt.s32.totalorder %s1457_s12, 5 }
   0x4   : > { %p140_p2 = pnand %p1070_p0, %p139_p1 }
   0x5   : > { %s1071_s20 = sshll.u32 (!%p140_p2), %s1066_s13, 5 }
   0x6   : > { %143 = sbr.rel (%p140_p2) target bundleno = 374 (0x176), region = 32  ;;  %p165_p3 = scmp.lt.s32.totalorder (!%p140_p2), %s1071_s20, 127 }
   0xb   : > { %v1412_v0 = vld [vmem:[%s1788_s1 + $0x38] sm:$0xff]  ;;  %v1493_v1 = vld [vmem:[%s1788_s1 + $0x88] sm:$0xff]  ;;  %v1411_v3 = vld [vmem:[%s1788_s1 + $0x30] sm:$0xff]  ;;  %s1792_s20 = smov (!%p165_p3, %s1071_s20), 127  ;;  %vm630_vm0 = vcmask 261120  }
   0xc   : > { %v1498_v2 = vld [vmem:[%s1788_s1 + $0x78] sm:$0xff]  ;;  %679 = vmatpush.bf16.msra.mxu0 %v1412_v0  ;;  %1423 = vmatpush.bf16.msra.mxu3 %v1412_v0  ;;  %v1508_v4 = vld [vmem:[%s1788_s1 + $0x80] sm:$0xff]  ;;  %v1419_v5 = vld [vmem:[%s1788_s1 + $0x70] sm:$0xff]  ;;  %s1441_s27 = smul.u32 12, %s1792_s20  ;;  %s1074_s6 = sshll.u32 %s1792_s20, 3 }
   0xd   : > { %863 = vmatpush.bf16.msra.mxu2 %v1493_v1  ;;  %768 = vmatpush.bf16.msra.mxu1 %v1498_v2  ;;  %v1410_v6 = vld [vmem:[%s1788_s1 + $0x28] sm:$0xff]  ;;  %v1409_v11 = vld [vmem:[%s1788_s1 + $0x20] sm:$0xff]  ;;  %v1408_v13 = vld [vmem:[%s1788_s1 + $0x18] sm:$0xff]  ;;  %s1656_s9 = scalar_lea.vmem %s1790_s3, %s1074_s6 }
   0xe   : > { %s1523_s5 = scalar_lea.vmem %s1787_s0, %s1441_s27  ;;  %v1418_v7 = vld [vmem:[%s1788_s1 + $0x68] sm:$0xff]  ;;  %v1417_v12 = vld [vmem:[%s1788_s1 + $0x60] sm:$0xff]  ;;  %v1416_v14 = vld [vmem:[%s1788_s1 + $0x58] sm:$0xff] }
   0xf   : > { %v1085_v8 = vld [vmem:[%s1523_s5 + $0x8] sm:$0xf]  ;;  %v1359_v9 = vld [vmem:[%s1523_s5 + $0x10] sm:$0xf0]  ;;  %v1097_v17 = vld [vmem:[%s1523_s5 + $0x20] sm:$0xf] }
  0x10   : > { %680 = vmatpush.bf16.msra.mxu0 %v1411_v3  ;;  %1424 = vmatpush.bf16.msra.mxu3 %v1411_v3  ;;  %v1086_v10 = vor.u32 %v1359_v9, %v1085_v8  ;;  %v1407_v15 = vld [vmem:[%s1788_s1 + $0x10] sm:$0xff]  ;;  %v1362_v18 = vld [vmem:[%s1523_s5 + $0x28] sm:$0xf0]  ;;  %v1405_v22 = vld [vmem:[%s1788_s1] sm:$0xff] }
  0x11   : > { %864 = vmatpush.bf16.msra.mxu2 %v1508_v4  ;;  %769 = vmatpush.bf16.msra.mxu1 %v1419_v5  ;;  %v1415_v16 = vld [vmem:[%s1788_s1 + $0x50] sm:$0xff]  ;;  %v1406_v19 = vld [vmem:[%s1788_s1 + $0x8] sm:$0xff]  ;;  %v1098_v20 = vor.u32 %v1362_v18, %v1097_v17  ;;  %v1077_v23 = vld [vmem:[%s1523_s5] sm:$0xf] }
  0x12   : > { %v1414_v21 = vld [vmem:[%s1788_s1 + $0x48] sm:$0xff]  ;;  %v1221_v25 = vld [vmem:[%s1523_s5 + $0x120] sm:$0xf]  ;;  %v1357_v28 = vld [vmem:[%s1523_s5 + $0x4] sm:$0xf] }
  0x13   : > { %v1358_v24 = vld [vmem:[%s1523_s5 + $0x8] sm:$0xf0]  ;;  %v1413_v27 = vld [vmem:[%s1788_s1 + $0x40] sm:$0xff]  ;;  %v1079_v29 = vld [vmem:[%s1523_s5 + $0xc] sm:$0xf0] }
  0x14   : > { %681 = vmatpush.bf16.msra.mxu0 %v1410_v6  ;;  %1425 = vmatpush.bf16.msra.mxu3 %v1410_v6  ;;  %v1394_v26 = vld [vmem:[%s1523_s5 + $0x128] sm:$0xf0]  ;;  %v1078_v30 = vor.u32 %v1358_v24, %v1077_v23  ;;  %v1082_v32 = vor.u32 %v1357_v28, %v1079_v29  ;;  %v1109_v33 = vld [vmem:[%s1523_s5 + $0x38] sm:$0xf]  ;;  %v1365_v34 = vld [vmem:[%s1523_s5 + $0x40] sm:$0xf0] }
  0x15   : > { %1339 = vmatmul.msk.bf16.vlgmr.msra.gmra.mxu2 %vm630_vm0, %v1086_v10  ;;  %770 = vmatpush.bf16.msra.mxu1 %v1418_v7  ;;  %v1222_v31 = vor.u32 %v1394_v26, %v1221_v25  ;;  %v1110_v35 = vor.u32 %v1365_v34, %v1109_v33  ;;  %v1089_v36 = vld [vmem:[%s1523_s5 + $0x18] sm:$0xf]  ;;  %v1361_v37 = vld [vmem:[%s1523_s5 + $0x20] sm:$0xf0]  ;;  %v1360_v40 = vld [vmem:[%s1523_s5 + $0x1c] sm:$0xf] }
  0x16   : > { %v1233_v38 = vld [vmem:[%s1523_s5 + $0x138] sm:$0xf]  ;;  %v1397_v39 = vld [vmem:[%s1523_s5 + $0x140] sm:$0xf0]  ;;  %v1091_v41 = vld [vmem:[%s1523_s5 + $0x24] sm:$0xf0]  ;;  %v1090_v42 = vor.u32 %v1361_v37, %v1089_v36 }
  0x17   : > { %v1234_v43 = vor.u32 %v1397_v39, %v1233_v38  ;;  %v1094_v44 = vor.u32 %v1360_v40, %v1091_v41  ;;  %v1121_v45 = vld [vmem:[%s1523_s5 + $0x50] sm:$0xf]  ;;  %v1368_v46 = vld [vmem:[%s1523_s5 + $0x58] sm:$0xf0]  ;;  %v1363_v52 = vld [vmem:[%s1523_s5 + $0x34] sm:$0xf] }
  0x18   : > { %682 = vmatpush.bf16.msra.mxu0 %v1409_v11  ;;  %1426 = vmatpush.bf16.msra.mxu3 %v1409_v11  ;;  %v1122_v47 = vor.u32 %v1368_v46, %v1121_v45  ;;  %v1101_v48 = vld [vmem:[%s1523_s5 + $0x30] sm:$0xf]  ;;  %v1364_v49 = vld [vmem:[%s1523_s5 + $0x38] sm:$0xf0]  ;;  %v1103_v53 = vld [vmem:[%s1523_s5 + $0x3c] sm:$0xf0] }
  0x19   : > { %771 = vmatpush.bf16.msra.mxu1 %v1417_v12  ;;  %v1245_v50 = vld [vmem:[%s1523_s5 + $0x150] sm:$0xf]  ;;  %v1400_v51 = vld [vmem:[%s1523_s5 + $0x158] sm:$0xf0]  ;;  %v1102_v54 = vor.u32 %v1364_v49, %v1101_v48  ;;  %v1106_v56 = vor.u32 %v1363_v52, %v1103_v53  ;;  %v1133_v57 = vld [vmem:[%s1523_s5 + $0x68] sm:$0xf] }
  0x1a   : > { %v1246_v55 = vor.u32 %v1400_v51, %v1245_v50  ;;  %v1371_v58 = vld [vmem:[%s1523_s5 + $0x70] sm:$0xf0]  ;;  %v1113_v60 = vld [vmem:[%s1523_s5 + $0x48] sm:$0xf]  ;;  %v1366_v0 = vld [vmem:[%s1523_s5 + $0x4c] sm:$0xf] }
  0x1b   : > { %v1134_v59 = vor.u32 %v1371_v58, %v1133_v57  ;;  %v1367_v61 = vld [vmem:[%s1523_s5 + $0x50] sm:$0xf0]  ;;  %v1257_v62 = vld [vmem:[%s1523_s5 + $0x168] sm:$0xf]  ;;  %v1374_v6 = vld [vmem:[%s1523_s5 + $0x88] sm:$0xf0] }
  0x1c   : > { %683 = vmatpush.bf16.msra.mxu0 %v1408_v13  ;;  %1427 = vmatpush.bf16.msra.mxu3 %v1408_v13  ;;  %v1403_v63 = vld [vmem:[%s1523_s5 + $0x170] sm:$0xf0]  ;;  %v1125_v8 = vld [vmem:[%s1523_s5 + $0x60] sm:$0xf]  ;;  %v1370_v9 = vld [vmem:[%s1523_s5 + $0x68] sm:$0xf0] }
  0x1d   : > { %772 = vmatpush.bf16.msra.mxu1 %v1416_v14  ;;  %v1258_v3 = vor.u32 %v1403_v63, %v1257_v62  ;;  %v1393_v10 = vld [vmem:[%s1523_s5 + $0x124] sm:$0xf]  ;;  %v1223_v11 = vld [vmem:[%s1523_s5 + $0x12c] sm:$0xf0]  ;;  %v1157_v17 = vld [vmem:[%s1523_s5 + $0x98] sm:$0xf] }
  0x1e   : > { %v1127_v13 = vld [vmem:[%s1523_s5 + $0x6c] sm:$0xf0]  ;;  %v1377_v18 = vld [vmem:[%s1523_s5 + $0xa0] sm:$0xf0]  ;;  %v1235_v23 = vld [vmem:[%s1523_s5 + $0x144] sm:$0xf0] }
  0x1f   : > { %v1372_v24 = vld [vmem:[%s1523_s5 + $0x7c] sm:$0xf]  ;;  %v1139_v25 = vld [vmem:[%s1523_s5 + $0x84] sm:$0xf0]  ;;  %v1169_v29 = vld [vmem:[%s1523_s5 + $0xb0] sm:$0xf] }
  0x20   : > { %684 = vmatpush.bf16.msra.mxu0 %v1407_v15  ;;  %1428 = vmatpush.bf16.msra.mxu3 %v1407_v15  ;;  %v1226_v15 = vor.u32 %v1393_v10, %v1223_v11  ;;  %v1142_v28 = vor.u32 %v1372_v24, %v1139_v25  ;;  %v1376_v33 = vld [vmem:[%s1523_s5 + $0x98] sm:$0xf0]  ;;  %v1399_v34 = vld [vmem:[%s1523_s5 + $0x154] sm:$0xf]  ;;  %v1151_v37 = vld [vmem:[%s1523_s5 + $0x9c] sm:$0xf0] }
  0x21   : > { %773 = vmatpush.bf16.msra.mxu1 %v1415_v16  ;;  %v1375_v36 = vld [vmem:[%s1523_s5 + $0x94] sm:$0xf]  ;;  %v1181_v41 = vld [vmem:[%s1523_s5 + $0xc8] sm:$0xf]  ;;  %v1402_v46 = vld [vmem:[%s1523_s5 + $0x16c] sm:$0xf] }
  0x22   : > { %v1154_v40 = vor.u32 %v1375_v36, %v1151_v37  ;;  %v1379_v45 = vld [vmem:[%s1523_s5 + $0xb0] sm:$0xf0]  ;;  %v1378_v48 = vld [vmem:[%s1523_s5 + $0xac] sm:$0xf]  ;;  %v1163_v49 = vld [vmem:[%s1523_s5 + $0xb4] sm:$0xf0] }
  0x23   : > { %v1166_v53 = vor.u32 %v1378_v48, %v1163_v49  ;;  %v1173_v58 = vld [vmem:[%s1523_s5 + $0xc0] sm:$0xf]  ;;  %v1381_v63 = vld [vmem:[%s1523_s5 + $0xc4] sm:$0xf]  ;;  %v1205_v11 = vld [vmem:[%s1523_s5 + $0xf8] sm:$0xf] }
  0x24   : > { %685 = vmatpush.bf16.msra.mxu0 %v1406_v19  ;;  %1429 = vmatpush.bf16.msra.mxu3 %v1406_v19  ;;  %v1158_v19 = vor.u32 %v1377_v18, %v1157_v17  ;;  %v1646_v62 = vld [vmem:[%s1789_s2] ss:$0 sm:$0xff]  ;;  %v1384_v25 = vld [vmem:[%s1523_s5 + $0xdc] sm:$0xf]  ;;  %v1197_v48 = vld [vmem:[%s1523_s5 + $0xf0] sm:$0xf] }
  0x25   : > { %1340 = vmatmul.msk.bf16.gmra.mxu2 %vm630_vm0, %v1098_v20  ;;  %774 = vmatpush.bf16.msra.mxu1 %v1414_v21  ;;  %v1137_v20 = vld [vmem:[%s1523_s5 + $0x78] sm:$0xf]  ;;  %v1388_v49 = vld [vmem:[%s1523_s5 + $0xf8] sm:$0xf0] }
  0x28   : > { %686 = vmatpush.bf16.msra.mxu0 %v1405_v22  ;;  %1430 = vmatpush.bf16.msra.mxu3 %v1405_v22  ;;  %v1396_v22 = vld [vmem:[%s1523_s5 + $0x13c] sm:$0xf] }
  0x29   : > { %775 = vmatpush.bf16.msra.mxu1 %v1413_v27 }
  0x2b   : > { %687 = vmatmul.bf16.vlgmr.msra.gmra.mxu0 %v1078_v30  ;;  %747 = vmatmul.bf16.vlgmr.msra.gmra.mxu3 %v1222_v31  ;;  %v1380_v30 = vld [vmem:[%s1523_s5 + $0xb8] sm:$0xf0] }
  0x2c   : > { %1431 = vmatpush.bf16.msrb.mxu3 %v1498_v2  ;;  %776 = vmatmul.bf16.vlgmr.msra.gmra.mxu1 %v1082_v32  ;;  %v1114_v2 = vor.u32 %v1367_v61, %v1113_v60  ;;  %v1170_v31 = vor.u32 %v1380_v30, %v1169_v29  ;;  %v1149_v32 = vld [vmem:[%s1523_s5 + $0x90] sm:$0xf]  ;;  %v1253_v60 = vld [vmem:[%s1523_s5 + $0x158] sm:$0xf]  ;;  %v1401_v61 = vld [vmem:[%s1523_s5 + $0x160] sm:$0xf0] }
  0x2d   : > { %v1150_v38 = vor.u32 %v1376_v33, %v1149_v32 }
  0x30   : > { %1432 = vmatpush.bf16.msrb.mxu3 %v1419_v5  ;;  %v1145_v5 = vld [vmem:[%s1523_s5 + $0x80] sm:$0xf] }
  0x34   : > { %1433 = vmatpush.bf16.msrb.mxu3 %v1418_v7  ;;  %v1146_v7 = vor.u32 %v1374_v6, %v1145_v5 }
  0x35   : > { %1341 = vmatmul.msk.bf16.gmra.mxu2 %vm630_vm0, %v1110_v35  ;;  %v1247_v35 = vld [vmem:[%s1523_s5 + $0x15c] sm:$0xf0] }
  0x36   : > { %v1250_v39 = vor.u32 %v1399_v34, %v1247_v35 }
  0x38   : > { %1434 = vmatpush.bf16.msrb.mxu3 %v1417_v12  ;;  %v1369_v12 = vld [vmem:[%s1523_s5 + $0x64] sm:$0xf] }
  0x3b   : > { %692 = vmatmul.bf16.gmra.mxu0 %v1090_v42  ;;  %752 = vmatmul.bf16.gmra.mxu3 %v1234_v43  ;;  %v1383_v42 = vld [vmem:[%s1523_s5 + $0xd0] sm:$0xf0] }
  0x3c   : > { %1435 = vmatpush.bf16.msrb.mxu3 %v1416_v14  ;;  %781 = vmatmul.bf16.gmra.mxu1 %v1094_v44  ;;  %v1126_v14 = vor.u32 %v1370_v9, %v1125_v8  ;;  %v1182_v43 = vor.u32 %v1383_v42, %v1181_v41  ;;  %v1161_v44 = vld [vmem:[%s1523_s5 + $0xa8] sm:$0xf] }
  0x3d   : > { %v1162_v50 = vor.u32 %v1379_v45, %v1161_v44 }
  0x40   : > { %1436 = vmatpush.bf16.msrb.mxu3 %v1415_v16  ;;  %v1130_v16 = vor.u32 %v1369_v12, %v1127_v13  ;;  %v1389_v12 = vld [vmem:[%s1523_s5 + $0x100] sm:$0xf0] }
  0x41   : > { %v1206_v18 = vor.u32 %v1389_v12, %v1205_v11  ;;  %v1209_v11 = vld [vmem:[%s1523_s5 + $0x108] sm:$0xf]  ;;  %v1391_v12 = vld [vmem:[%s1523_s5 + $0x110] sm:$0xf0] }
  0x44   : > { %1437 = vmatpush.bf16.msrb.mxu3 %v1414_v21  ;;  %v1373_v21 = vld [vmem:[%s1523_s5 + $0x80] sm:$0xf0] }
  0x45   : > { %1342 = vmatmul.msk.bf16.gmra.mxu2 %vm630_vm0, %v1122_v47  ;;  %v1138_v26 = vor.u32 %v1373_v21, %v1137_v20  ;;  %v1259_v47 = vld [vmem:[%s1523_s5 + $0x174] sm:$0xf0]  ;;  %v1385_v21 = vld [vmem:[%s1523_s5 + $0xe0] sm:$0xf0] }
  0x46   : > { %v1262_v51 = vor.u32 %v1402_v46, %v1259_v47  ;;  %v1185_v20 = vld [vmem:[%s1523_s5 + $0xd8] sm:$0xf] }
  0x47   : > { %v1186_v29 = vor.u32 %v1385_v21, %v1185_v20 }
  0x48   : > { %1438 = vmatpush.bf16.msrb.mxu3 %v1413_v27  ;;  %v1238_v27 = vor.u32 %v1396_v22, %v1235_v23  ;;  %v1265_v22 = vld [vmem:[%s1523_s5 + $0x170] sm:$0xf]  ;;  %v1404_v23 = vld [vmem:[%s1523_s5 + $0x178] sm:$0xf0] }
  0x49   : > { %v1266_v30 = vor.u32 %v1404_v23, %v1265_v22 }
  0x4b   : > { %697 = vmatmul.bf16.gmra.mxu0 %v1102_v54  ;;  %757 = vmatmul.bf16.gmra.mxu3 %v1246_v55  ;;  %v1193_v54 = vld [vmem:[%s1523_s5 + $0xe0] sm:$0xf]  ;;  %v1386_v55 = vld [vmem:[%s1523_s5 + $0xe8] sm:$0xf0] }
  0x4c   : > { %1439 = vmatpush.bf16.msra.mxu3 %v1493_v1  ;;  %786 = vmatmul.bf16.gmra.mxu1 %v1106_v56  ;;  %v1115_v1 = vld [vmem:[%s1523_s5 + $0x54] sm:$0xf0]  ;;  %v1194_v57 = vor.u32 %v1386_v55, %v1193_v54  ;;  %v1198_v55 = vor.u32 %v1388_v49, %v1197_v48 }
  0x50   : > { %1440 = vmatpush.bf16.msra.mxu3 %v1508_v4  ;;  %v1118_v4 = vor.u32 %v1366_v0, %v1115_v1  ;;  %v1175_v0 = vld [vmem:[%s1523_s5 + $0xcc] sm:$0xf0] }
  0x51   : > { %v1178_v5 = vor.u32 %v1381_v63, %v1175_v0 }
  0x55   : > { %1343 = vmatmul.msk.bf16.gmra.mxu2 %vm630_vm0, %v1134_v59  ;;  %v1382_v59 = vld [vmem:[%s1523_s5 + $0xc8] sm:$0xf0] }
  0x56   : > { %v1174_v1 = vor.u32 %v1382_v59, %v1173_v58 }
  0x5b   : > { %702 = vmatmul.bf16.gmra.mxu0 %v1114_v2  ;;  %762 = vmatmul.bf16.gmra.mxu3 %v1258_v3  ;;  %v1254_v2 = vor.u32 %v1401_v61, %v1253_v60 }
  0x5c   : > { %791 = vmatmul.bf16.gmra.mxu1 %v1118_v4 }
  0x65   : > { %1344 = vmatmul.msk.bf16.gmra.mxu2 %vm630_vm0, %v1146_v7 }
  0x6b   : > { %707 = vmatmul.bf16.gmra.mxu0 %v1126_v14  ;;  %836 = vmatmul.bf16.vlgmr.msrb.gmra.mxu3 %v1226_v15 }
  0x6c   : > { %796 = vmatmul.bf16.gmra.mxu1 %v1130_v16 }
  0x75   : > { %1345 = vmatmul.msk.bf16.gmra.mxu2 %vm630_vm0, %v1158_v19 }
  0x7b   : > { %712 = vmatmul.bf16.gmra.mxu0 %v1138_v26  ;;  %841 = vmatmul.bf16.gmra.mxu3 %v1238_v27  ;;  %v1187_v26 = vld [vmem:[%s1523_s5 + $0xe4] sm:$0xf0] }
  0x7c   : > { %801 = vmatmul.bf16.gmra.mxu1 %v1142_v28  ;;  %v1190_v33 = vor.u32 %v1384_v25, %v1187_v26 }
  0x85   : > { %1346 = vmatmul.msk.bf16.gmra.mxu2 %vm630_vm0, %v1170_v31 }
  0x8b   : > { %717 = vmatmul.bf16.gmra.mxu0 %v1150_v38  ;;  %846 = vmatmul.bf16.gmra.mxu3 %v1250_v39  ;;  %v1217_v39 = vld [vmem:[%s1523_s5 + $0x110] sm:$0xf] }
  0x8c   : > { %806 = vmatmul.bf16.gmra.mxu1 %v1154_v40  ;;  %v1392_v40 = vld [vmem:[%s1523_s5 + $0x118] sm:$0xf0] }
  0x8d   : > { %v1218_v46 = vor.u32 %v1392_v40, %v1217_v39 }
  0x95   : > { %1347 = vmatmul.msk.bf16.gmra.mxu2 %vm630_vm0, %v1182_v43 }
  0x98   : > { %v866_v52 = vpop.f32.mrf.mxu2 }
  0x9b   : > { %722 = vmatmul.bf16.gmra.mxu0 %v1162_v50  ;;  %851 = vmatmul.bf16.gmra.mxu3 %v1262_v51  ;;  %v1387_v51 = vld [vmem:[%s1523_s5 + $0xf4] sm:$0xf] }
  0x9c   : > { %811 = vmatmul.bf16.gmra.mxu1 %v1166_v53 }
  0xa0   : > { %v868_v56 = vpop.f32.mrf.mxu2 }
  0xa5   : > { %1348 = vmatmul.msk.bf16.gmra.mxu2 %vm630_vm0, %v1194_v57 }
  0xa8   : > { %v871_v3 = vpop.f32.mrf.mxu2  ;;  %v688_v4 = vpop.f32.mrf.mxu0 }
  0xa9   : > { %v689_v6 = vadd.f32 %v1646_v62, %v688_v4  ;;  %v777_v7 = vpop.f32.mrf.mxu1 }
  0xab   : > { %v778_v8 = vadd.f32 %v777_v7, %v689_v6  ;;  %727 = vmatmul.bf16.gmra.mxu0 %v1174_v1  ;;  %1353 = vmatmul.msk.bf16.vlgmr.msra.gmra.mxu3 %vm630_vm0, %v1254_v2  ;;  %v1229_v1 = vld [vmem:[%s1523_s5 + $0x128] sm:$0xf]  ;;  %v1395_v2 = vld [vmem:[%s1523_s5 + $0x130] sm:$0xf0] }
  0xac   : > { %816 = vmatmul.bf16.gmra.mxu1 %v1178_v5 }
  0xad   : > { %v867_v9 = vadd.f32 %v866_v52, %v778_v8  ;;  %v1199_v52 = vld [vmem:[%s1523_s5 + $0xfc] sm:$0xf0]  ;;  %v1230_v8 = vor.u32 %v1395_v2, %v1229_v1 }
  0xae   : > { %v1658_v10 = vpop.f32.mrf.mxu3  ;;  %v1202_v58 = vor.u32 %v1387_v51, %v1199_v52 }
  0xaf   : > { %v946_v13 = vmax.f32 %v867_v9, 0.0 }
  0xb0   : > { %v873_v14 = vpop.f32.mrf.mxu2  ;;  %v690_v15 = vpop.f32.mrf.mxu0 }
  0xb1   : > { %978 = vst [vmem:[%s1656_s9] sm:$0xff] %v946_v13  ;;  %v691_v16 = vadd.f32 %v1646_v62, %v690_v15  ;;  %v779_v17 = vpop.f32.mrf.mxu1  ;;  %v1211_v15 = vld [vmem:[%s1523_s5 + $0x114] sm:$0xf0] }
  0xb3   : > { %v780_v19 = vadd.f32 %v779_v17, %v691_v16 }
  0xb5   : > { %v869_v24 = vadd.f32 %v868_v56, %v780_v19  ;;  %1349 = vmatmul.msk.bf16.gmra.mxu2 %vm630_vm0, %v1206_v18  ;;  %v1210_v18 = vor.u32 %v1391_v12, %v1209_v11 }
  0xb6   : > { %v1671_v27 = vpop.f32.mrf.mxu3 }
  0xb7   : > { %v947_v28 = vmax.f32 %v869_v24, 0.0 }
  0xb8   : > { %v876_v31 = vpop.f32.mrf.mxu2  ;;  %v693_v32 = vpop.f32.mrf.mxu0 }
  0xb9   : > { %979 = vst [vmem:[%s1656_s9 + $0x8] sm:$0xff] %v947_v28  ;;  %v694_v34 = vadd.f32 %v1646_v62, %v693_v32  ;;  %v782_v35 = vpop.f32.mrf.mxu1  ;;  %v1241_v28 = vld [vmem:[%s1523_s5 + $0x140] sm:$0xf] }
  0xbb   : > { %v783_v36 = vadd.f32 %v782_v35, %v694_v34  ;;  %732 = vmatmul.bf16.gmra.mxu0 %v1186_v29  ;;  %1354 = vmatmul.msk.bf16.gmra.mxu3 %vm630_vm0, %v1266_v30  ;;  %v1398_v29 = vld [vmem:[%s1523_s5 + $0x148] sm:$0xf0] }
  0xbc   : > { %821 = vmatmul.bf16.gmra.mxu1 %v1190_v33  ;;  %v1242_v35 = vor.u32 %v1398_v29, %v1241_v28 }
  0xbd   : > { %v872_v37 = vadd.f32 %v871_v3, %v783_v36 }
  0xbe   : > { %v1676_v38 = vpop.f32.mrf.mxu3 }
  0xbf   : > { %v948_v41 = vmax.f32 %v872_v37, 0.0 }
  0xc0   : > { %v878_v42 = vpop.f32.mrf.mxu2  ;;  %v695_v43 = vpop.f32.mrf.mxu0 }
  0xc1   : > { %980 = vst [vmem:[%s1656_s9 + $0x10] sm:$0xff] %v948_v41  ;;  %v696_v44 = vadd.f32 %v1646_v62, %v695_v43  ;;  %v784_v45 = vpop.f32.mrf.mxu1 }
  0xc3   : > { %v785_v47 = vadd.f32 %v784_v45, %v696_v44 }
  0xc5   : > { %v874_v50 = vadd.f32 %v873_v14, %v785_v47  ;;  %1350 = vmatmul.msk.bf16.gmra.mxu2 %vm630_vm0, %v1218_v46  ;;  %v1390_v14 = vld [vmem:[%s1523_s5 + $0x10c] sm:$0xf]  ;;  %v749_v46 = vadd.f32 %v1646_v62, %v1658_v10 }
  0xc6   : > { %v1687_v53 = vpop.f32.mrf.mxu3  ;;  %v1214_v21 = vor.u32 %v1390_v14, %v1211_v15 }
  0xc7   : > { %v949_v54 = vmax.f32 %v874_v50, 0.0  ;;  %v756_v14 = vadd.f32 %v1646_v62, %v1687_v53 }
  0xc8   : > { %v881_v56 = vpop.f32.mrf.mxu2  ;;  %v698_v57 = vpop.f32.mrf.mxu0 }
  0xc9   : > { %981 = vst [vmem:[%s1656_s9 + $0x18] sm:$0xff] %v949_v54  ;;  %v699_v59 = vadd.f32 %v1646_v62, %v698_v57  ;;  %v787_v60 = vpop.f32.mrf.mxu1  ;;  %v751_v57 = vadd.f32 %v1646_v62, %v1671_v27 }
  0xcb   : > { %v788_v61 = vadd.f32 %v787_v60, %v699_v59  ;;  %737 = vmatmul.bf16.gmra.mxu0 %v1198_v55 }
  0xcc   : > { %826 = vmatmul.bf16.gmra.mxu1 %v1202_v58 }
  0xcd   : > { %v877_v63 = vadd.f32 %v876_v31, %v788_v61 }
  0xce   : > { %v1691_v0 = vpop.f32.mrf.mxu3 }
  0xcf   : > { %v950_v3 = vmax.f32 %v877_v63, 0.0 }
  0xd0   : > { %v883_v4 = vpop.f32.mrf.mxu2  ;;  %v700_v5 = vpop.f32.mrf.mxu0 }
  0xd1   : > { %982 = vst [vmem:[%s1656_s9 + $0x20] sm:$0xff] %v950_v3  ;;  %v701_v6 = vadd.f32 %v1646_v62, %v700_v5  ;;  %v789_v7 = vpop.f32.mrf.mxu1 }
  0xd3   : > { %v790_v9 = vadd.f32 %v789_v7, %v701_v6 }
  0xd5   : > { %v879_v13 = vadd.f32 %v878_v42, %v790_v9  ;;  %1351 = vmatmul.msk.bf16.gmra.mxu2 %vm630_vm0, %v1230_v8 }
  0xd6   : > { %v1702_v16 = vpop.f32.mrf.mxu3 }
  0xd7   : > { %v951_v17 = vmax.f32 %v879_v13, 0.0 }
  0xd8   : > { %v886_v19 = vpop.f32.mrf.mxu2  ;;  %v703_v20 = vpop.f32.mrf.mxu0 }
  0xd9   : > { %983 = vst [vmem:[%s1656_s9 + $0x28] sm:$0xff] %v951_v17  ;;  %v704_v22 = vadd.f32 %v1646_v62, %v703_v20  ;;  %v792_v23 = vpop.f32.mrf.mxu1 }
  0xdb   : > { %v793_v24 = vadd.f32 %v792_v23, %v704_v22  ;;  %742 = vmatmul.bf16.gmra.mxu0 %v1210_v18 }
  0xdc   : > { %831 = vmatmul.bf16.gmra.mxu1 %v1214_v21 }
  0xdd   : > { %v882_v25 = vadd.f32 %v881_v56, %v793_v24 }
  0xde   : > { %v1706_v26 = vpop.f32.mrf.mxu3 }
  0xdf   : > { %v952_v30 = vmax.f32 %v882_v25, 0.0 }
  0xe0   : > { %v888_v31 = vpop.f32.mrf.mxu2  ;;  %v705_v32 = vpop.f32.mrf.mxu0 }
  0xe1   : > { %984 = vst [vmem:[%s1656_s9 + $0x30] sm:$0xff] %v952_v30  ;;  %v706_v33 = vadd.f32 %v1646_v62, %v705_v32  ;;  %v794_v34 = vpop.f32.mrf.mxu1 }
  0xe3   : > { %v795_v36 = vadd.f32 %v794_v34, %v706_v33 }
  0xe5   : > { %v884_v37 = vadd.f32 %v883_v4, %v795_v36  ;;  %1352 = vmatmul.msk.bf16.gmra.mxu2 %vm630_vm0, %v1242_v35  ;;  %v754_v4 = vadd.f32 %v1646_v62, %v1676_v38 }
  0xe6   : > { %v1713_v39 = vpop.f32.mrf.mxu3 }
  0xe7   : > { %v953_v40 = vmax.f32 %v884_v37, 0.0 }
  0xe8   : > { %v891_v41 = vpop.f32.mrf.mxu2  ;;  %v708_v42 = vpop.f32.mrf.mxu0 }
  0xe9   : > { %985 = vst [vmem:[%s1656_s9 + $0x38] sm:$0xff] %v953_v40  ;;  %v709_v43 = vadd.f32 %v1646_v62, %v708_v42  ;;  %v797_v44 = vpop.f32.mrf.mxu1 }
  0xeb   : > { %v798_v45 = vadd.f32 %v797_v44, %v709_v43 }
  0xed   : > { %v887_v47 = vadd.f32 %v886_v19, %v798_v45 }
  0xee   : > { %v837_v48 = vpop.f32.mrf.mxu3 }
  0xef   : > { %v954_v49 = vmax.f32 %v887_v47, 0.0  ;;  %v1719_v50 = vadd.f32 %v837_v48, %v749_v46 }
  0xf0   : > { %v893_v51 = vpop.f32.mrf.mxu2  ;;  %v710_v52 = vpop.f32.mrf.mxu0 }
  0xf1   : > { %986 = vst [vmem:[%s1656_s9 + $0x40] sm:$0xff] %v954_v49  ;;  %v711_v54 = vadd.f32 %v1646_v62, %v710_v52  ;;  %v799_v55 = vpop.f32.mrf.mxu1 }
  0xf3   : > { %v800_v56 = vadd.f32 %v799_v55, %v711_v54 }
  0xf5   : > { %v889_v58 = vadd.f32 %v888_v31, %v800_v56 }
  0xf6   : > { %v839_v59 = vpop.f32.mrf.mxu3 }
  0xf7   : > { %v955_v10 = vmax.f32 %v889_v58, 0.0  ;;  %v1725_v60 = vadd.f32 %v839_v59, %v751_v57 }
  0xf8   : > { %v896_v61 = vpop.f32.mrf.mxu2  ;;  %v713_v63 = vpop.f32.mrf.mxu0 }
  0xf9   : > { %987 = vst [vmem:[%s1656_s9 + $0x48] sm:$0xff] %v955_v10  ;;  %v714_v1 = vadd.f32 %v1646_v62, %v713_v63  ;;  %v802_v2 = vpop.f32.mrf.mxu1  ;;  %v759_v10 = vadd.f32 %v1646_v62, %v1691_v0 }
  0xfb   : > { %v803_v3 = vadd.f32 %v802_v2, %v714_v1 }
  0xfd   : > { %v892_v5 = vadd.f32 %v891_v41, %v803_v3 }
  0xfe   : > { %v842_v6 = vpop.f32.mrf.mxu3 }
  0xff   : > { %v956_v27 = vmax.f32 %v892_v5, 0.0  ;;  %v1731_v7 = vadd.f32 %v842_v6, %v754_v4 }
 0x100   : > { %v898_v8 = vpop.f32.mrf.mxu2  ;;  %v715_v9 = vpop.f32.mrf.mxu0 }
 0x101   : > { %988 = vst [vmem:[%s1656_s9 + $0x50] sm:$0xff] %v956_v27  ;;  %v716_v11 = vadd.f32 %v1646_v62, %v715_v9  ;;  %v804_v12 = vpop.f32.mrf.mxu1 }
 0x103   : > { %v805_v13 = vadd.f32 %v804_v12, %v716_v11  ;;  %v761_v11 = vadd.f32 %v1646_v62, %v1702_v16 }
 0x105   : > { %v894_v15 = vadd.f32 %v893_v51, %v805_v13 }
 0x106   : > { %v844_v17 = vpop.f32.mrf.mxu3 }
 0x107   : > { %v957_v38 = vmax.f32 %v894_v15, 0.0  ;;  %v1737_v18 = vadd.f32 %v844_v17, %v756_v14 }
 0x108   : > { %v901_v19 = vpop.f32.mrf.mxu2  ;;  %v718_v20 = vpop.f32.mrf.mxu0 }
 0x109   : > { %989 = vst [vmem:[%s1656_s9 + $0x58] sm:$0xff] %v957_v38  ;;  %v719_v21 = vadd.f32 %v1646_v62, %v718_v20  ;;  %v807_v22 = vpop.f32.mrf.mxu1 }
 0x10b   : > { %v808_v23 = vadd.f32 %v807_v22, %v719_v21 }
 0x10d   : > { %v897_v24 = vadd.f32 %v896_v61, %v808_v23  ;;  %v764_v23 = vadd.f32 %v1646_v62, %v1706_v26 }
 0x10e   : > { %v847_v25 = vpop.f32.mrf.mxu3 }
 0x10f   : > { %v958_v28 = vmax.f32 %v897_v24, 0.0  ;;  %v848_v63 = vadd.f32 %v847_v25, %v759_v10 }
 0x110   : > { %v903_v29 = vpop.f32.mrf.mxu2  ;;  %v720_v30 = vpop.f32.mrf.mxu0 }
 0x111   : > { %990 = vst [vmem:[%s1656_s9 + $0x60] sm:$0xff] %v958_v28  ;;  %v721_v53 = vadd.f32 %v1646_v62, %v720_v30  ;;  %v809_v31 = vpop.f32.mrf.mxu1 }
 0x113   : > { %v810_v32 = vadd.f32 %v809_v31, %v721_v53 }
 0x115   : > { %v899_v33 = vadd.f32 %v898_v8, %v810_v32 }
 0x116   : > { %v849_v34 = vpop.f32.mrf.mxu3 }
 0x117   : > { %v959_v35 = vmax.f32 %v899_v33, 0.0  ;;  %v850_v12 = vadd.f32 %v849_v34, %v761_v11 }
 0x118   : > { %v906_v36 = vpop.f32.mrf.mxu2  ;;  %v723_v37 = vpop.f32.mrf.mxu0 }
 0x119   : > { %991 = vst [vmem:[%s1656_s9 + $0x68] sm:$0xff] %v959_v35  ;;  %v724_v40 = vadd.f32 %v1646_v62, %v723_v37  ;;  %v812_v41 = vpop.f32.mrf.mxu1  ;;  %v766_v35 = vadd.f32 %v1646_v62, %v1713_v39 }
 0x11b   : > { %v813_v42 = vadd.f32 %v812_v41, %v724_v40 }
 0x11d   : > { %v902_v43 = vadd.f32 %v901_v19, %v813_v42 }
 0x11e   : > { %v852_v44 = vpop.f32.mrf.mxu3 }
 0x11f   : > { %v960_v45 = vmax.f32 %v902_v43, 0.0  ;;  %v853_v24 = vadd.f32 %v852_v44, %v764_v23 }
 0x120   : > { %v908_v46 = vpop.f32.mrf.mxu2  ;;  %v725_v47 = vpop.f32.mrf.mxu0 }
 0x121   : > { %992 = vst [vmem:[%s1656_s9 + $0x70] sm:$0xff] %v960_v45  ;;  %v726_v48 = vadd.f32 %v1646_v62, %v725_v47  ;;  %v814_v49 = vpop.f32.mrf.mxu1 }
 0x123   : > { %v815_v51 = vadd.f32 %v814_v49, %v726_v48 }
 0x125   : > { %v904_v52 = vadd.f32 %v903_v29, %v815_v51 }
 0x126   : > { %v854_v54 = vpop.f32.mrf.mxu3 }
 0x127   : > { %v961_v55 = vmax.f32 %v904_v52, 0.0 }
 0x128   : > { %v911_v56 = vpop.f32.mrf.mxu2  ;;  %v728_v57 = vpop.f32.mrf.mxu0 }
 0x129   : > { %993 = vst [vmem:[%s1656_s9 + $0x78] sm:$0xff] %v961_v55  ;;  %v729_v58 = vadd.f32 %v1646_v62, %v728_v57  ;;  %v817_v59 = vpop.f32.mrf.mxu1 }
 0x12b   : > { %v818_v61 = vadd.f32 %v817_v59, %v729_v58 }
 0x12d   : > { %v907_v1 = vadd.f32 %v906_v36, %v818_v61  ;;  %v855_v36 = vadd.f32 %v854_v54, %v766_v35 }
 0x12e   : > { %v936_v2 = vpop.f32.mrf.mxu3 }
 0x12f   : > { %v962_v3 = vmax.f32 %v907_v1, 0.0  ;;  %v937_v4 = vadd.f32 %v936_v2, %v848_v63 }
 0x130   : > { %v913_v5 = vpop.f32.mrf.mxu2  ;;  %v730_v6 = vpop.f32.mrf.mxu0 }
 0x131   : > { %994 = vst [vmem:[%s1656_s9 + $0x80] sm:$0xff] %v962_v3  ;;  %v974_v27 = vmax.f32 %v937_v4, 0.0  ;;  %v731_v8 = vadd.f32 %v1646_v62, %v730_v6  ;;  %v819_v9 = vpop.f32.mrf.mxu1 }
 0x133   : > { %1006 = vst [vmem:[%s1656_s9 + $0xe0] sm:$0xff] %v974_v27  ;;  %v820_v0 = vadd.f32 %v819_v9, %v731_v8 }
 0x135   : > { %v909_v13 = vadd.f32 %v908_v46, %v820_v0 }
 0x136   : > { %v938_v14 = vpop.f32.mrf.mxu3 }
 0x137   : > { %v963_v15 = vmax.f32 %v909_v13, 0.0  ;;  %v939_v17 = vadd.f32 %v938_v14, %v850_v12 }
 0x138   : > { %v916_v38 = vpop.f32.mrf.mxu2  ;;  %v733_v19 = vpop.f32.mrf.mxu0 }
 0x139   : > { %995 = vst [vmem:[%s1656_s9 + $0x88] sm:$0xff] %v963_v15  ;;  %v975_v20 = vmax.f32 %v939_v17, 0.0  ;;  %v734_v21 = vadd.f32 %v1646_v62, %v733_v19  ;;  %v822_v22 = vpop.f32.mrf.mxu1 }
 0x13b   : > { %1007 = vst [vmem:[%s1656_s9 + $0xe8] sm:$0xff] %v975_v20  ;;  %v823_v16 = vadd.f32 %v822_v22, %v734_v21 }
 0x13d   : > { %v912_v25 = vadd.f32 %v911_v56, %v823_v16 }
 0x13e   : > { %v941_v28 = vpop.f32.mrf.mxu3 }
 0x13f   : > { %v964_v29 = vmax.f32 %v912_v25, 0.0  ;;  %v942_v30 = vadd.f32 %v941_v28, %v853_v24 }
 0x140   : > { %v918_v53 = vpop.f32.mrf.mxu2  ;;  %v735_v31 = vpop.f32.mrf.mxu0 }
 0x141   : > { %996 = vst [vmem:[%s1656_s9 + $0x90] sm:$0xff] %v964_v29  ;;  %v976_v32 = vmax.f32 %v942_v30, 0.0  ;;  %v736_v33 = vadd.f32 %v1646_v62, %v735_v31  ;;  %v824_v34 = vpop.f32.mrf.mxu1 }
 0x143   : > { %1008 = vst [vmem:[%s1656_s9 + $0xf0] sm:$0xff] %v976_v32  ;;  %v825_v26 = vadd.f32 %v824_v34, %v736_v33 }
 0x145   : > { %v914_v37 = vadd.f32 %v913_v5, %v825_v26 }
 0x146   : > { %v943_v40 = vpop.f32.mrf.mxu3 }
 0x147   : > { %v965_v41 = vmax.f32 %v914_v37, 0.0  ;;  %v944_v42 = vadd.f32 %v943_v40, %v855_v36 }
 0x148   : > { %v921_v43 = vpop.f32.mrf.mxu2  ;;  %v738_v44 = vpop.f32.mrf.mxu0 }
 0x149   : > { %997 = vst [vmem:[%s1656_s9 + $0x98] sm:$0xff] %v965_v41  ;;  %v977_v45 = vmax.f32 %v944_v42, 0.0  ;;  %v739_v46 = vadd.f32 %v1646_v62, %v738_v44  ;;  %v827_v47 = vpop.f32.mrf.mxu1 }
 0x14b   : > { %1009 = vst [vmem:[%s1656_s9 + $0xf8] sm:$0xff] %v977_v45  ;;  %v828_v48 = vadd.f32 %v827_v47, %v739_v46 }
 0x14d   : > { %v917_v49 = vadd.f32 %v916_v38, %v828_v48 }
 0x14f   : > { %v966_v39 = vmax.f32 %v917_v49, 0.0 }
 0x150   : > { %v923_v51 = vpop.f32.mrf.mxu2  ;;  %v740_v52 = vpop.f32.mrf.mxu0 }
 0x151   : > { %998 = vst [vmem:[%s1656_s9 + $0xa0] sm:$0xff] %v966_v39  ;;  %v741_v54 = vadd.f32 %v1646_v62, %v740_v52  ;;  %v829_v55 = vpop.f32.mrf.mxu1 }
 0x153   : > { %v830_v56 = vadd.f32 %v829_v55, %v741_v54 }
 0x155   : > { %v919_v57 = vadd.f32 %v918_v53, %v830_v56 }
 0x157   : > { %v967_v58 = vmax.f32 %v919_v57, 0.0 }
 0x158   : > { %v926_v59 = vpop.f32.mrf.mxu2  ;;  %v743_v10 = vpop.f32.mrf.mxu0 }
 0x159   : > { %999 = vst [vmem:[%s1656_s9 + $0xa8] sm:$0xff] %v967_v58  ;;  %v927_v61 = vadd.f32 %v926_v59, %v1719_v50  ;;  %v744_v63 = vadd.f32 %v1646_v62, %v743_v10  ;;  %v832_v1 = vpop.f32.mrf.mxu1 }
 0x15b   : > { %v970_v2 = vmax.f32 %v927_v61, 0.0  ;;  %v833_v3 = vadd.f32 %v832_v1, %v744_v63 }
 0x15d   : > { %1002 = vst [vmem:[%s1656_s9 + $0xc0] sm:$0xff] %v970_v2  ;;  %v922_v4 = vadd.f32 %v921_v43, %v833_v3 }
 0x15f   : > { %v968_v5 = vmax.f32 %v922_v4, 0.0 }
 0x160   : > { %v928_v6 = vpop.f32.mrf.mxu2  ;;  %v745_v27 = vpop.f32.mrf.mxu0 }
 0x161   : > { %1000 = vst [vmem:[%s1656_s9 + $0xb0] sm:$0xff] %v968_v5  ;;  %v929_v8 = vadd.f32 %v928_v6, %v1725_v60  ;;  %v746_v9 = vadd.f32 %v1646_v62, %v745_v27  ;;  %v834_v50 = vpop.f32.mrf.mxu1 }
 0x163   : > { %v971_v11 = vmax.f32 %v929_v8, 0.0  ;;  %v835_v0 = vadd.f32 %v834_v50, %v746_v9 }
 0x165   : > { %1003 = vst [vmem:[%s1656_s9 + $0xc8] sm:$0xff] %v971_v11  ;;  %v924_v12 = vadd.f32 %v923_v51, %v835_v0 }
 0x167   : > { %v969_v13 = vmax.f32 %v924_v12, 0.0 }
 0x168   : > { %v931_v14 = vpop.f32.mrf.mxu2 }
 0x169   : > { %1001 = vst [vmem:[%s1656_s9 + $0xb8] sm:$0xff] %v969_v13  ;;  %v932_v15 = vadd.f32 %v931_v14, %v1731_v7 }
 0x16b   : > { %v972_v17 = vmax.f32 %v932_v15, 0.0 }
 0x16d   : > { %1004 = vst [vmem:[%s1656_s9 + $0xd0] sm:$0xff] %v972_v17 }
 0x170   : > { %v933_v38 = vpop.f32.mrf.mxu2 }
 0x171   : > { %v934_v19 = vadd.f32 %v933_v38, %v1737_v18 }
 0x173   : > { %v973_v20 = vmax.f32 %v934_v19, 0.0 }
 0x175   : > { %1005 = vst [vmem:[%s1656_s9 + $0xd8] sm:$0xff] %v973_v20 }
 0x176 PF: > { %s13_s12 = sadd.s32 1, %s1457_s12  }
 0x177   : > { %p10_p4 = scmp.ge.s32.totalorder %s13_s12, 6  }
 0x179   :  { %12 = sbr.rel (!%p10_p4) target bundleno = 1 (0x1), region = 62 }

// kernel: incept_init_block.17
= control target key start
LH: loop header
LB: loop body
LE: loop exit
PB: predicated region body
PF: predicated region fallthrough
CT: control target
= control target key end

     0   :  { %vm139_vm0 = vcmask 523264   ;;  %s601_s1 = inlined_call_operand.vmem [shape: bf16[64,128], index: 1, kind: input, shape index: {}]   ;;  %s602_s2 = inlined_call_operand.vmem [shape: f32[1,128], index: 2, kind: input, shape index: {}]   ;;  %s603_s0 = inlined_call_operand.vmem [shape: bf16[200,64], index: 0, kind: input, shape index: {}]   ;;  %s604_s3 = inlined_call_operand.vmem [shape: f32[200,128], index: 3, kind: output, shape index: {}]  }
   0x1   :  { %v398_v0 = vld [vmem:[%s601_s1 + $0x18] sm:$0xff]  ;;  %v397_v1 = vld [vmem:[%s601_s1 + $0x10] sm:$0xff]  ;;  %v396_v2 = vld [vmem:[%s601_s1 + $0x8] sm:$0xff] }
   0x2   :  { %400 = vmatpush.bf16.msra.mxu2 %v398_v0  ;;  %401 = vmatpush.bf16.msra.mxu3 %v398_v0  ;;  %v395_v3 = vld [vmem:[%s601_s1] sm:$0xff]  ;;  %v389_v4 = vld [vmem:[%s603_s0 + $0x30] sm:$0xff]  ;;  %v386_v7 = vld [vmem:[%s603_s0 + $0x18] sm:$0xff] }
   0x3   :  { %183 = vmatpush.bf16.msra.mxu0 %v398_v0  ;;  %399 = vmatpush.bf16.msra.mxu1 %v398_v0  ;;  %v393_v5 = vld [vmem:[%s603_s0 + $0x50] sm:$0xff]  ;;  %v383_v6 = vld [vmem:[%s603_s0] sm:$0xff]  ;;  %v390_v8 = vld [vmem:[%s603_s0 + $0x38] sm:$0xff] }
   0x4   :  { %v394_v9 = vld [vmem:[%s603_s0 + $0x58] sm:$0xff]  ;;  %v384_v10 = vld [vmem:[%s603_s0 + $0x8] sm:$0xff]  ;;  %v387_v11 = vld [vmem:[%s603_s0 + $0x20] sm:$0xff] }
   0x5   :  { %v39_v12 = vld [vmem:[%s603_s0 + $0x60] sm:$0xf]  ;;  %v385_v16 = vld [vmem:[%s603_s0 + $0x10] sm:$0xff]  ;;  %v388_v17 = vld [vmem:[%s603_s0 + $0x28] sm:$0xff] }
   0x6   :  { %403 = vmatpush.bf16.msra.mxu2 %v397_v1  ;;  %404 = vmatpush.bf16.msra.mxu3 %v397_v1  ;;  %v101_v13 = vunpack.c.l.b16 %v39_v12  ;;  %v391_v14 = vld [vmem:[%s603_s0 + $0x40] sm:$0xff]  ;;  %v392_v18 = vld [vmem:[%s603_s0 + $0x48] sm:$0xff] }
   0x7   :  { %184 = vmatpush.bf16.msra.mxu0 %v397_v1  ;;  %402 = vmatpush.bf16.msra.mxu1 %v397_v1  ;;  %v499_v19 = vld [vmem:[%s602_s2] ss:$0 sm:$0xff] }
   0x8   :  { %v114_v15 = vpack.c.b16 %v101_v13, %v101_v13 }
   0xa   :  { %406 = vmatpush.bf16.msra.mxu2 %v396_v2  ;;  %407 = vmatpush.bf16.msra.mxu3 %v396_v2 }
   0xb   :  { %185 = vmatpush.bf16.msra.mxu0 %v396_v2  ;;  %405 = vmatpush.bf16.msra.mxu1 %v396_v2 }
   0xe   :  { %409 = vmatpush.bf16.msra.mxu2 %v395_v3  ;;  %410 = vmatpush.bf16.msra.mxu3 %v395_v3 }
   0xf   :  { %186 = vmatpush.bf16.msra.mxu0 %v395_v3  ;;  %408 = vmatpush.bf16.msra.mxu1 %v395_v3 }
  0x11   :  { %376 = vmatmul.msk.bf16.vlgmr.msra.gmra.mxu2 %vm139_vm0, %v389_v4  ;;  %380 = vmatmul.msk.bf16.vlgmr.msra.gmra.mxu3 %vm139_vm0, %v393_v5 }
  0x12   :  { %370 = vmatmul.msk.bf16.vlgmr.msra.gmra.mxu0 %vm139_vm0, %v383_v6  ;;  %373 = vmatmul.msk.bf16.vlgmr.msra.gmra.mxu1 %vm139_vm0, %v386_v7 }
  0x21   :  { %377 = vmatmul.msk.bf16.gmra.mxu2 %vm139_vm0, %v390_v8  ;;  %381 = vmatmul.msk.bf16.gmra.mxu3 %vm139_vm0, %v394_v9 }
  0x22   :  { %371 = vmatmul.msk.bf16.gmra.mxu0 %vm139_vm0, %v384_v10  ;;  %374 = vmatmul.msk.bf16.gmra.mxu1 %vm139_vm0, %v387_v11 }
  0x31   :  { %378 = vmatmul.msk.bf16.gmra.mxu2 %vm139_vm0, %v391_v14  ;;  %382 = vmatmul.msk.bf16.gmra.mxu3 %vm139_vm0, %v114_v15 }
  0x32   :  { %372 = vmatmul.msk.bf16.gmra.mxu0 %vm139_vm0, %v385_v16  ;;  %375 = vmatmul.msk.bf16.gmra.mxu1 %vm139_vm0, %v388_v17 }
  0x41   :  { %379 = vmatmul.msk.bf16.gmra.mxu2 %vm139_vm0, %v392_v18 }
  0x8f   :  { %v188_v20 = vpop.f32.mrf.mxu0  ;;  %v203_v21 = vpop.f32.mrf.mxu1 }
  0x90   :  { %v189_v22 = vadd.f32 %v499_v19, %v188_v20  ;;  %v204_v23 = vadd.f32 %v499_v19, %v203_v21 }
  0x92   :  { %v252_v24 = vmax.f32 %v189_v22, 0.0  ;;  %v258_v25 = vmax.f32 %v204_v23, 0.0 }
  0x94   :  { %v218_v26 = vpop.f32.mrf.mxu2  ;;  %277 = vst [vmem:[%s604_s3] sm:$0xff] %v252_v24  ;;  %v238_v27 = vpop.f32.mrf.mxu3 }
  0x95   :  { %v219_v28 = vadd.f32 %v499_v19, %v218_v26  ;;  %283 = vst [vmem:[%s604_s3 + $0x30] sm:$0xff] %v258_v25  ;;  %v239_v29 = vadd.f32 %v499_v19, %v238_v27 }
  0x97   :  { %v264_v30 = vmax.f32 %v219_v28, 0.0  ;;  %v272_v31 = vmax.f32 %v239_v29, 0.0  ;;  %v190_v32 = vpop.f32.mrf.mxu0  ;;  %v205_v33 = vpop.f32.mrf.mxu1 }
  0x98   :  { %v191_v34 = vadd.f32 %v499_v19, %v190_v32  ;;  %v206_v35 = vadd.f32 %v499_v19, %v205_v33 }
  0x99   :  { %289 = vst [vmem:[%s604_s3 + $0x60] sm:$0xff] %v264_v30 }
  0x9a   :  { %297 = vst [vmem:[%s604_s3 + $0xa0] sm:$0xff] %v272_v31  ;;  %v253_v36 = vmax.f32 %v191_v34, 0.0  ;;  %v259_v37 = vmax.f32 %v206_v35, 0.0 }
  0x9c   :  { %v220_v38 = vpop.f32.mrf.mxu2  ;;  %278 = vst [vmem:[%s604_s3 + $0x8] sm:$0xff] %v253_v36  ;;  %v240_v39 = vpop.f32.mrf.mxu3 }
  0x9d   :  { %v221_v40 = vadd.f32 %v499_v19, %v220_v38  ;;  %284 = vst [vmem:[%s604_s3 + $0x38] sm:$0xff] %v259_v37  ;;  %v241_v41 = vadd.f32 %v499_v19, %v240_v39 }
  0x9f   :  { %v265_v42 = vmax.f32 %v221_v40, 0.0  ;;  %v273_v43 = vmax.f32 %v241_v41, 0.0  ;;  %v193_v44 = vpop.f32.mrf.mxu0  ;;  %v208_v45 = vpop.f32.mrf.mxu1 }
  0xa0   :  { %v194_v46 = vadd.f32 %v499_v19, %v193_v44  ;;  %v209_v47 = vadd.f32 %v499_v19, %v208_v45 }
  0xa1   :  { %290 = vst [vmem:[%s604_s3 + $0x68] sm:$0xff] %v265_v42 }
  0xa2   :  { %298 = vst [vmem:[%s604_s3 + $0xa8] sm:$0xff] %v273_v43  ;;  %v254_v48 = vmax.f32 %v194_v46, 0.0  ;;  %v260_v49 = vmax.f32 %v209_v47, 0.0 }
  0xa4   :  { %v223_v50 = vpop.f32.mrf.mxu2  ;;  %279 = vst [vmem:[%s604_s3 + $0x10] sm:$0xff] %v254_v48  ;;  %v243_v51 = vpop.f32.mrf.mxu3 }
  0xa5   :  { %v224_v52 = vadd.f32 %v499_v19, %v223_v50  ;;  %285 = vst [vmem:[%s604_s3 + $0x40] sm:$0xff] %v260_v49  ;;  %v244_v53 = vadd.f32 %v499_v19, %v243_v51 }
  0xa7   :  { %v266_v54 = vmax.f32 %v224_v52, 0.0  ;;  %v274_v55 = vmax.f32 %v244_v53, 0.0  ;;  %v195_v56 = vpop.f32.mrf.mxu0  ;;  %v210_v57 = vpop.f32.mrf.mxu1 }
  0xa8   :  { %v196_v58 = vadd.f32 %v499_v19, %v195_v56  ;;  %v211_v59 = vadd.f32 %v499_v19, %v210_v57 }
  0xa9   :  { %291 = vst [vmem:[%s604_s3 + $0x70] sm:$0xff] %v266_v54 }
  0xaa   :  { %299 = vst [vmem:[%s604_s3 + $0xb0] sm:$0xff] %v274_v55  ;;  %v255_v60 = vmax.f32 %v196_v58, 0.0  ;;  %v261_v61 = vmax.f32 %v211_v59, 0.0 }
  0xac   :  { %v225_v62 = vpop.f32.mrf.mxu2  ;;  %280 = vst [vmem:[%s604_s3 + $0x18] sm:$0xff] %v255_v60  ;;  %v245_v63 = vpop.f32.mrf.mxu3 }
  0xad   :  { %v226_v0 = vadd.f32 %v499_v19, %v225_v62  ;;  %286 = vst [vmem:[%s604_s3 + $0x48] sm:$0xff] %v261_v61  ;;  %v246_v1 = vadd.f32 %v499_v19, %v245_v63 }
  0xaf   :  { %v267_v2 = vmax.f32 %v226_v0, 0.0  ;;  %v275_v3 = vmax.f32 %v246_v1, 0.0  ;;  %v198_v4 = vpop.f32.mrf.mxu0  ;;  %v213_v5 = vpop.f32.mrf.mxu1 }
  0xb0   :  { %v199_v6 = vadd.f32 %v499_v19, %v198_v4  ;;  %v214_v7 = vadd.f32 %v499_v19, %v213_v5 }
  0xb1   :  { %292 = vst [vmem:[%s604_s3 + $0x78] sm:$0xff] %v267_v2 }
  0xb2   :  { %300 = vst [vmem:[%s604_s3 + $0xb8] sm:$0xff] %v275_v3  ;;  %v256_v8 = vmax.f32 %v199_v6, 0.0  ;;  %v262_v9 = vmax.f32 %v214_v7, 0.0 }
  0xb4   :  { %v228_v10 = vpop.f32.mrf.mxu2  ;;  %281 = vst [vmem:[%s604_s3 + $0x20] sm:$0xff] %v256_v8  ;;  %v248_v11 = vpop.f32.mrf.mxu3 }
  0xb5   :  { %v229_v12 = vadd.f32 %v499_v19, %v228_v10  ;;  %287 = vst [vmem:[%s604_s3 + $0x50] sm:$0xff] %v262_v9  ;;  %v249_v13 = vadd.f32 %v499_v19, %v248_v11 }
  0xb7   :  { %v268_v14 = vmax.f32 %v229_v12, 0.0  ;;  %v276_v15 = vmax.f32 %v249_v13, 0.0  ;;  %v200_v16 = vpop.f32.mrf.mxu0  ;;  %v215_v17 = vpop.f32.mrf.mxu1 }
  0xb8   :  { %v201_v18 = vadd.f32 %v499_v19, %v200_v16  ;;  %v216_v20 = vadd.f32 %v499_v19, %v215_v17 }
  0xb9   :  { %293 = vst [vmem:[%s604_s3 + $0x80] sm:$0xff] %v268_v14 }
  0xba   :  { %301 = vst [vmem:[%s604_s3 + $0xc0] sm:$0xff] %v276_v15  ;;  %v257_v21 = vmax.f32 %v201_v18, 0.0  ;;  %v263_v22 = vmax.f32 %v216_v20, 0.0 }
  0xbc   :  { %v230_v23 = vpop.f32.mrf.mxu2  ;;  %282 = vst [vmem:[%s604_s3 + $0x28] sm:$0xff] %v257_v21  ;;  %v250_v24 = vpop.f32.mrf.mxu3 }
  0xbd   :  { %v231_v25 = vadd.f32 %v499_v19, %v230_v23  ;;  %288 = vst [vmem:[%s604_s3 + $0x58] sm:$0xff] %v263_v22 }
  0xbf   :  { %v269_v26 = vmax.f32 %v231_v25, 0.0 }
  0xc1   :  { %294 = vst [vmem:[%s604_s3 + $0x88] sm:$0xff] %v269_v26 }
  0xc4   :  { %v233_v27 = vpop.f32.mrf.mxu2 }
  0xc5   :  { %v234_v28 = vadd.f32 %v499_v19, %v233_v27 }
  0xc7   :  { %v270_v29 = vmax.f32 %v234_v28, 0.0 }
  0xc9   :  { %295 = vst [vmem:[%s604_s3 + $0x90] sm:$0xff] %v270_v29 }
  0xcc   :  { %v235_v30 = vpop.f32.mrf.mxu2 }
  0xcd   :  { %v236_v31 = vadd.f32 %v499_v19, %v235_v30 }
  0xcf   :  { %v271_v32 = vmax.f32 %v236_v31, 0.0 }
  0xd1   :  { %296 = vst [vmem:[%s604_s3 + $0x98] sm:$0xff] %v271_v32 }

// kernel: incept_init_block.16
= control target key start
LH: loop header
LB: loop body
LE: loop exit
PB: predicated region body
PF: predicated region fallthrough
CT: control target
= control target key end

     0   :  { %s1188_s6 = smov 0   ;;  %s1849_s0 = inlined_call_operand.vmem [shape: f32[2,21,21,64], index: 0, kind: input, shape index: {}]   ;;  %s1850_s1 = inlined_call_operand.vmem [shape: f32[2,19,19,64], index: 1, kind: output, shape index: {}]  }
   0x1 LB: > { %s1151_s7 = sadd.s32 4294967295, %s1176_s6   ;;  %p1155_p0 = scmp.ge.s32.totalorder %s1176_s6, 1  ;;  %s1176_s6 = sphi %s1188_s6, %s11_s6  }
   0x2   : > { %p87_p1 = scmp.lt.s32.totalorder %s1176_s6, 3 }
   0x4   : > { %p88_p2 = pnand %p1155_p0, %p87_p1 }
   0x5   : > { %p107_p3 = scmp.lt.s32.totalorder (!%p88_p2), %s1151_s7, 1 }
   0x6   : > { %91 = sbr.rel (%p88_p2) target bundleno = 195 (0xc3), region = 24 }
   0xb   : > { %s1852_s7 = smov (!%p107_p3, %s1151_s7), 1  ;;  %vm237_vm0 = vcmask 1046528   ;;  %vm447_vm1 = vcmask 1045504   ;;  %vm1037_vm2 = vcmask 523264   ;;  %vm1040_vm3 = vcmask 518144  }
   0xc   : > { %s1160_s8 = smul.u32 504, %s1852_s7 }
   0xd   : > { %s1161_s12 = smul.u32 456, %s1852_s7 }
   0xe   : > { %s1202_s11 = scalar_lea.vmem %s1849_s0, %s1160_s8 }
   0xf   : > { %v117_v0 = vld [vmem:[%s1202_s11] sm:$0xff]  ;;  %v118_v1 = vld [vmem:[%s1202_s11 + $0x8] sm:$0xff]  ;;  %v120_v2 = vld [vmem:[%s1202_s11 + $0x18] sm:$0xff]  ;;  %s1281_s15 = scalar_lea.vmem %s1850_s1, %s1161_s12 }
  0x10   : > { %v1208_v3 = vld [vmem:[%s1202_s11 + $0x20] sm:$0xff]  ;;  %v123_v4 = vld [vmem:[%s1202_s11 + $0x30] sm:$0xff]  ;;  %v1212_v5 = vld [vmem:[%s1202_s11 + $0x38] sm:$0xff]  ;;  %v238_v6 = vrot.slane %v117_v0, 1  ;;  %v239_v7 = vrot.slane %v118_v1, 1  ;;  %v243_v8 = vrot.slane %v120_v2, 1 }
  0x11   : > { %v244_v9 = vrot.slane %v1208_v3, 1  ;;  %v248_v10 = vrot.slane %v123_v4, 1  ;;  %v249_v11 = vrot.slane %v1212_v5, 1  ;;  %v448_v12 = vrot.slane %v117_v0, 2  ;;  %v119_v17 = vld [vmem:[%s1202_s11 + $0x10] sm:$0x1f] }
  0x12   : > { %v240_v13 = vsel %vm237_vm0, %v238_v6, %v239_v7  ;;  %v449_v14 = vrot.slane %v118_v1, 2  ;;  %v453_v15 = vrot.slane %v120_v2, 2  ;;  %v454_v16 = vrot.slane %v1208_v3, 2  ;;  %v1224_v22 = vld [vmem:[%s1202_s11 + $0x28] sm:$0x1f]  ;;  %v1252_v46 = vld [vmem:[%s1202_s11 + $0x50] sm:$0xff] }
  0x13   : > { %v245_v18 = vsel %vm237_vm0, %v243_v8, %v244_v9  ;;  %v1221_v19 = vsel %vm237_vm0, %v248_v10, %v249_v11  ;;  %v390_v20 = vmax.f32 %v117_v0, %v240_v13  ;;  %v458_v21 = vrot.slane %v123_v4, 2  ;;  %v1227_v23 = vld [vmem:[%s1202_s11 + $0x40] sm:$0x1f]  ;;  %v126_v44 = vld [vmem:[%s1202_s11 + $0x48] sm:$0xff]  ;;  %v1276_v13 = vld [vmem:[%s1202_s11 + $0x58] sm:$0x1f] }
  0x14   : > { %v393_v24 = vmax.f32 %v120_v2, %v245_v18  ;;  %v396_v25 = vmax.f32 %v123_v4, %v1221_v19  ;;  %v450_v26 = vsel %vm447_vm1, %v448_v12, %v449_v14  ;;  %v455_v27 = vsel %vm447_vm1, %v453_v15, %v454_v16 }
  0x15   : > { %v459_v28 = vrot.slane %v1212_v5, 2  ;;  %v600_v29 = vmax.f32 %v390_v20, %v450_v26  ;;  %v241_v30 = vrot.slane %v119_v17, 1  ;;  %v1234_v31 = vrot.slane %v1224_v22, 1 }
  0x16   : > { %v603_v32 = vmax.f32 %v393_v24, %v455_v27  ;;  %v1237_v33 = vrot.slane %v1227_v23, 1  ;;  %v451_v34 = vrot.slane %v119_v17, 2  ;;  %v1240_v35 = vrot.slane %v1224_v22, 2 }
  0x17   : > { %v460_v36 = vsel %vm447_vm1, %v458_v21, %v459_v28  ;;  %v657_v37 = vmax.f32 %v600_v29, %v120_v2  ;;  %v242_v38 = vsel %vm237_vm0, %v239_v7, %v241_v30  ;;  %v247_v39 = vsel %vm237_vm0, %v244_v9, %v1234_v31 }
  0x18   : > { %v606_v40 = vmax.f32 %v396_v25, %v460_v36  ;;  %v660_v41 = vmax.f32 %v603_v32, %v123_v4  ;;  %v1248_v42 = vsel %vm237_vm0, %v249_v11, %v1237_v33  ;;  %v391_v43 = vmax.f32 %v118_v1, %v242_v38 }
  0x19   : > { %v725_v45 = vmax.f32 %v657_v37, %v245_v18  ;;  %v394_v47 = vmax.f32 %v1208_v3, %v247_v39  ;;  %v397_v48 = vmax.f32 %v1212_v5, %v1248_v42  ;;  %v452_v49 = vsel %vm447_vm1, %v449_v14, %v451_v34 }
  0x1a   : > { %v663_v50 = vmax.f32 %v606_v40, %v126_v44  ;;  %v728_v51 = vmax.f32 %v660_v41, %v1221_v19  ;;  %v457_v52 = vsel %vm447_vm1, %v454_v16, %v1240_v35  ;;  %v1262_v53 = vrot.slane %v1227_v23, 2 }
  0x1b   : > { %v790_v54 = vmax.f32 %v725_v45, %v455_v27  ;;  %v601_v55 = vmax.f32 %v391_v43, %v452_v49  ;;  %v604_v56 = vmax.f32 %v394_v47, %v457_v52  ;;  %v392_v57 = vmax.f32 %v119_v17, %v241_v30  ;;  %v129_v27 = vld [vmem:[%s1202_s11 + $0x60] sm:$0xff] }
  0x1c   : > { %v793_v58 = vmax.f32 %v728_v51, %v460_v36  ;;  %v462_v59 = vsel %vm447_vm1, %v459_v28, %v1262_v53  ;;  %v253_v60 = vrot.slane %v126_v44, 1  ;;  %v254_v61 = vrot.slane %v1252_v46, 1 }
  0x1d   : > { %v847_v62 = vmax.f32 %v790_v54, %v123_v4  ;;  %v607_v63 = vmax.f32 %v397_v48, %v462_v59  ;;  %v658_v0 = vmax.f32 %v601_v55, %v1208_v3  ;;  %v661_v1 = vmax.f32 %v604_v56, %v1212_v5 }
  0x1e   : > { %v602_v2 = vmax.f32 %v392_v57, %v451_v34  ;;  %v255_v6 = vsel %vm237_vm0, %v253_v60, %v254_v61  ;;  %v463_v7 = vrot.slane %v126_v44, 2  ;;  %v464_v8 = vrot.slane %v1252_v46, 2 }
  0x1f   : > { %v915_v9 = vmax.f32 %v847_v62, %v1221_v19  ;;  %v664_v10 = vmax.f32 %v607_v63, %v1252_v46  ;;  %v726_v11 = vmax.f32 %v658_v0, %v247_v39  ;;  %v729_v12 = vmax.f32 %v661_v1, %v1248_v42 }
  0x20   : > { %v659_v3 = vmax.f32 %v602_v2, %v1224_v22  ;;  %v399_v4 = vmax.f32 %v126_v44, %v255_v6  ;;  %v465_v14 = vsel %vm447_vm1, %v463_v7, %v464_v8  ;;  %v731_v15 = vmax.f32 %v663_v50, %v255_v6  ;;  %v132_v2 = vld [vmem:[%s1202_s11 + $0x78] sm:$0xff] }
  0x21   : > { %v980_v16 = vmax.f32 %v915_v9, %v460_v36  ;;  %v791_v17 = vmax.f32 %v726_v11, %v457_v52  ;;  %v794_v18 = vmax.f32 %v729_v12, %v462_v59  ;;  %v850_v19 = vmax.f32 %v793_v58, %v126_v44  ;;  %v130_v36 = vld [vmem:[%s1202_s11 + $0x68] sm:$0xff]  ;;  %v1314_v52 = vld [vmem:[%s1202_s11 + $0x70] sm:$0x1f] }
  0x22   : > { %v727_v20 = vmax.f32 %v659_v3, %v1234_v31  ;;  %v609_v21 = vmax.f32 %v399_v4, %v465_v14  ;;  %v796_v24 = vmax.f32 %v731_v15, %v465_v14  ;;  %v1287_v25 = vrot.slane %v1276_v13, 1 }
  0x23   : > { %1038 = vst.msk [vmem:[%s1281_s15] sm:$0xff] %vm1037_vm2, %v980_v16  ;;  %v848_v26 = vmax.f32 %v791_v17, %v1212_v5  ;;  %v918_v28 = vmax.f32 %v850_v19, %v255_v6  ;;  %v1294_v29 = vrot.slane %v1276_v13, 2  ;;  %v851_v30 = vmax.f32 %v794_v18, %v1252_v46 }
  0x24   : > { %v792_v32 = vmax.f32 %v727_v20, %v1240_v35  ;;  %v666_v34 = vmax.f32 %v609_v21, %v129_v27  ;;  %v257_v37 = vsel %vm237_vm0, %v254_v61, %v1287_v25  ;;  %v395_v38 = vmax.f32 %v1224_v22, %v1234_v31 }
  0x25   : > { %v916_v5 = vmax.f32 %v848_v26, %v1248_v42  ;;  %v983_v39 = vmax.f32 %v918_v28, %v465_v14  ;;  %v400_v40 = vmax.f32 %v1252_v46, %v257_v37  ;;  %v467_v41 = vsel %vm447_vm1, %v464_v8, %v1294_v29 }
  0x26   : > { %v849_v43 = vmax.f32 %v792_v32, %v1227_v23  ;;  %v732_v44 = vmax.f32 %v664_v10, %v257_v37  ;;  %v919_v45 = vmax.f32 %v851_v30, %v257_v37  ;;  %v605_v47 = vmax.f32 %v395_v38, %v1240_v35  ;;  %v133_v10 = vld [vmem:[%s1202_s11 + $0x80] sm:$0xff]  ;;  %v1348_v32 = vld [vmem:[%s1202_s11 + $0x88] sm:$0x1f] }
  0x27   : > { %v981_v48 = vmax.f32 %v916_v5, %v462_v59  ;;  %1042 = vst.msk [vmem:[%s1281_s15 + $0x18] sm:$0xff] %vm1037_vm2, %v983_v39  ;;  %v610_v22 = vmax.f32 %v400_v40, %v467_v41  ;;  %v258_v31 = vrot.slane %v129_v27, 1  ;;  %v259_v42 = vrot.slane %v130_v36, 1  ;;  %v135_v5 = vld [vmem:[%s1202_s11 + $0x90] sm:$0xff] }
  0x28   : > { %v917_v49 = vmax.f32 %v849_v43, %v1237_v33  ;;  %v797_v46 = vmax.f32 %v732_v44, %v467_v41  ;;  %v984_v50 = vmax.f32 %v919_v45, %v467_v41  ;;  %v662_v51 = vmax.f32 %v605_v47, %v1227_v23 }
  0x29   : > { %1039 = vst.msk [vmem:[%s1281_s15 + $0x8] sm:$0xff] %vm1037_vm2, %v981_v48  ;;  %v667_v35 = vmax.f32 %v610_v22, %v130_v36  ;;  %v260_v54 = vsel %vm237_vm0, %v258_v31, %v259_v42  ;;  %v468_v55 = vrot.slane %v129_v27, 2  ;;  %v469_v56 = vrot.slane %v130_v36, 2 }
  0x2a   : > { %v982_v57 = vmax.f32 %v917_v49, %v1262_v53  ;;  %1043 = vst.msk [vmem:[%s1281_s15 + $0x20] sm:$0xff] %vm1037_vm2, %v984_v50  ;;  %v730_v58 = vmax.f32 %v662_v51, %v1237_v33  ;;  %v402_v59 = vmax.f32 %v129_v27, %v260_v54  ;;  %v734_v60 = vmax.f32 %v666_v34, %v260_v54 }
  0x2b   : > { %v470_v61 = vsel %vm447_vm1, %v468_v55, %v469_v56  ;;  %v853_v62 = vmax.f32 %v796_v24, %v129_v27  ;;  %v1325_v63 = vrot.slane %v1314_v52, 1  ;;  %v1328_v0 = vrot.slane %v1314_v52, 2 }
  0x2c   : > { %1041 = vst.msk [vmem:[%s1281_s15 + $0x10] sm:$0x7] %vm1040_vm3, %v982_v57  ;;  %v795_v1 = vmax.f32 %v730_v58, %v1262_v53  ;;  %v612_v6 = vmax.f32 %v402_v59, %v470_v61  ;;  %v799_v7 = vmax.f32 %v734_v60, %v470_v61  ;;  %v854_v8 = vmax.f32 %v797_v46, %v130_v36 }
  0x2d   : > { %v921_v9 = vmax.f32 %v853_v62, %v260_v54  ;;  %v262_v11 = vsel %vm237_vm0, %v259_v42, %v1325_v63  ;;  %v472_v12 = vsel %vm447_vm1, %v469_v56, %v1328_v0  ;;  %v398_v3 = vmax.f32 %v1227_v23, %v1237_v33  ;;  %v136_v42 = vld [vmem:[%s1202_s11 + $0x98] sm:$0xff] }
  0x2e   : > { %v852_v4 = vmax.f32 %v795_v1, %v1276_v13  ;;  %v669_v14 = vmax.f32 %v612_v6, %v132_v2  ;;  %v403_v15 = vmax.f32 %v130_v36, %v262_v11  ;;  %v735_v16 = vmax.f32 %v667_v35, %v262_v11 }
  0x2f   : > { %v986_v17 = vmax.f32 %v921_v9, %v470_v61  ;;  %v922_v18 = vmax.f32 %v854_v8, %v262_v11  ;;  %v608_v19 = vmax.f32 %v398_v3, %v1262_v53  ;;  %v263_v20 = vrot.slane %v132_v2, 1 }
  0x30   : > { %v920_v21 = vmax.f32 %v852_v4, %v1287_v25  ;;  %v613_v24 = vmax.f32 %v403_v15, %v472_v12  ;;  %v800_v26 = vmax.f32 %v735_v16, %v472_v12  ;;  %v264_v27 = vrot.slane %v133_v10, 1  ;;  %v138_v16 = vld [vmem:[%s1202_s11 + $0xa8] sm:$0xff] }
  0x31   : > { %1045 = vst.msk [vmem:[%s1281_s15 + $0x30] sm:$0xff] %vm1037_vm2, %v986_v17  ;;  %v987_v23 = vmax.f32 %v922_v18, %v472_v12  ;;  %v665_v33 = vmax.f32 %v608_v19, %v1276_v13  ;;  %v473_v28 = vrot.slane %v132_v2, 2  ;;  %v474_v30 = vrot.slane %v133_v10, 2 }
  0x32   : > { %v985_v53 = vmax.f32 %v920_v21, %v1294_v29  ;;  %v670_v34 = vmax.f32 %v613_v24, %v133_v10  ;;  %v265_v36 = vsel %vm237_vm0, %v263_v20, %v264_v27  ;;  %v856_v37 = vmax.f32 %v799_v7, %v132_v2 }
  0x33   : > { %1046 = vst.msk [vmem:[%s1281_s15 + $0x38] sm:$0xff] %vm1037_vm2, %v987_v23  ;;  %v733_v38 = vmax.f32 %v665_v33, %v1287_v25  ;;  %v405_v39 = vmax.f32 %v132_v2, %v265_v36  ;;  %v475_v40 = vsel %vm447_vm1, %v473_v28, %v474_v30  ;;  %v737_v41 = vmax.f32 %v669_v14, %v265_v36  ;;  %v1379_v2 = vld [vmem:[%s1202_s11 + $0xa0] sm:$0x1f] }
  0x34   : > { %1044 = vst.msk [vmem:[%s1281_s15 + $0x28] sm:$0x7] %vm1040_vm3, %v985_v53  ;;  %v924_v43 = vmax.f32 %v856_v37, %v265_v36  ;;  %v1360_v44 = vrot.slane %v1348_v32, 1  ;;  %v1363_v45 = vrot.slane %v1348_v32, 2  ;;  %v857_v47 = vmax.f32 %v800_v26, %v133_v10  ;;  %v1410_v37 = vld [vmem:[%s1202_s11 + $0xb8] sm:$0x1f] }
  0x35   : > { %v798_v48 = vmax.f32 %v733_v38, %v1294_v29  ;;  %v615_v22 = vmax.f32 %v405_v39, %v475_v40  ;;  %v802_v31 = vmax.f32 %v737_v41, %v475_v40  ;;  %v401_v49 = vmax.f32 %v1276_v13, %v1287_v25 }
  0x36   : > { %v989_v46 = vmax.f32 %v924_v43, %v475_v40  ;;  %v267_v50 = vsel %vm237_vm0, %v264_v27, %v1360_v44  ;;  %v477_v51 = vsel %vm447_vm1, %v474_v30, %v1363_v45  ;;  %v268_v35 = vrot.slane %v135_v5, 1  ;;  %v139_v27 = vld [vmem:[%s1202_s11 + $0xb0] sm:$0xff] }
  0x37   : > { %v855_v54 = vmax.f32 %v798_v48, %v1314_v52  ;;  %v672_v55 = vmax.f32 %v615_v22, %v135_v5  ;;  %v406_v56 = vmax.f32 %v133_v10, %v267_v50  ;;  %v738_v57 = vmax.f32 %v670_v34, %v267_v50 }
  0x38   : > { %1048 = vst.msk [vmem:[%s1281_s15 + $0x48] sm:$0xff] %vm1037_vm2, %v989_v46  ;;  %v925_v58 = vmax.f32 %v857_v47, %v267_v50  ;;  %v611_v59 = vmax.f32 %v401_v49, %v1294_v29  ;;  %v269_v13 = vrot.slane %v136_v42, 1  ;;  %v478_v25 = vrot.slane %v135_v5, 2 }
  0x39   : > { %v923_v60 = vmax.f32 %v855_v54, %v1325_v63  ;;  %v616_v61 = vmax.f32 %v406_v56, %v477_v51  ;;  %v803_v62 = vmax.f32 %v738_v57, %v477_v51  ;;  %v479_v1 = vrot.slane %v136_v42, 2 }
  0x3a   : > { %v990_v6 = vmax.f32 %v925_v58, %v477_v51  ;;  %v668_v7 = vmax.f32 %v611_v59, %v1314_v52  ;;  %v270_v8 = vsel %vm237_vm0, %v268_v35, %v269_v13  ;;  %v859_v9 = vmax.f32 %v802_v31, %v135_v5  ;;  %v141_v58 = vld [vmem:[%s1202_s11 + $0xc0] sm:$0xff] }
  0x3b   : > { %v988_v29 = vmax.f32 %v923_v60, %v1328_v0  ;;  %v673_v10 = vmax.f32 %v616_v61, %v136_v42  ;;  %v408_v11 = vmax.f32 %v135_v5, %v270_v8  ;;  %v480_v12 = vsel %vm447_vm1, %v478_v25, %v479_v1 }
  0x3c   : > { %1049 = vst.msk [vmem:[%s1281_s15 + $0x50] sm:$0xff] %vm1037_vm2, %v990_v6  ;;  %v736_v3 = vmax.f32 %v668_v7, %v1325_v63  ;;  %v740_v4 = vmax.f32 %v672_v55, %v270_v8  ;;  %v927_v14 = vmax.f32 %v859_v9, %v270_v8  ;;  %v1389_v15 = vrot.slane %v1379_v2, 1 }
  0x3d   : > { %1047 = vst.msk [vmem:[%s1281_s15 + $0x40] sm:$0x7] %vm1040_vm3, %v988_v29  ;;  %v618_v17 = vmax.f32 %v408_v11, %v480_v12  ;;  %v1395_v18 = vrot.slane %v1379_v2, 2  ;;  %v860_v19 = vmax.f32 %v803_v62, %v136_v42  ;;  %v404_v20 = vmax.f32 %v1314_v52, %v1325_v63 }
  0x3e   : > { %v801_v21 = vmax.f32 %v736_v3, %v1328_v0  ;;  %v805_v24 = vmax.f32 %v740_v4, %v480_v12  ;;  %v992_v26 = vmax.f32 %v927_v14, %v480_v12  ;;  %v272_v23 = vsel %vm237_vm0, %v269_v13, %v1389_v15  ;;  %v142_v13 = vld [vmem:[%s1202_s11 + $0xc8] sm:$0xff] }
  0x3f   : > { %v675_v33 = vmax.f32 %v618_v17, %v138_v16  ;;  %v409_v28 = vmax.f32 %v136_v42, %v272_v23  ;;  %v482_v30 = vsel %vm447_vm1, %v479_v1, %v1395_v18  ;;  %v741_v53 = vmax.f32 %v673_v10, %v272_v23 }
  0x40   : > { %v858_v34 = vmax.f32 %v801_v21, %v1348_v32  ;;  %1051 = vst.msk [vmem:[%s1281_s15 + $0x60] sm:$0xff] %vm1037_vm2, %v992_v26  ;;  %v928_v36 = vmax.f32 %v860_v19, %v272_v23  ;;  %v614_v52 = vmax.f32 %v404_v20, %v1328_v0  ;;  %v273_v63 = vrot.slane %v138_v16, 1  ;;  %v1442_v19 = vld [vmem:[%s1202_s11 + $0xd0] sm:$0x1f] }
  0x41   : > { %v619_v38 = vmax.f32 %v409_v28, %v482_v30  ;;  %v806_v5 = vmax.f32 %v741_v53, %v482_v30  ;;  %v274_v39 = vrot.slane %v139_v27, 1  ;;  %v483_v40 = vrot.slane %v138_v16, 2  ;;  %v144_v53 = vld [vmem:[%s1202_s11 + $0xd8] sm:$0xff] }
  0x42   : > { %v926_v41 = vmax.f32 %v858_v34, %v1360_v44  ;;  %v993_v43 = vmax.f32 %v928_v36, %v482_v30  ;;  %v671_v47 = vmax.f32 %v614_v52, %v1348_v32  ;;  %v484_v48 = vrot.slane %v139_v27, 2  ;;  %v145_v52 = vld [vmem:[%s1202_s11 + $0xe0] sm:$0xff] }
  0x43   : > { %v676_v22 = vmax.f32 %v619_v38, %v139_v27  ;;  %v275_v31 = vsel %vm237_vm0, %v273_v63, %v274_v39  ;;  %v862_v0 = vmax.f32 %v805_v24, %v138_v16  ;;  %v1416_v42 = vrot.slane %v1410_v37, 1 }
  0x44   : > { %v991_v49 = vmax.f32 %v926_v41, %v1363_v45  ;;  %1052 = vst.msk [vmem:[%s1281_s15 + $0x68] sm:$0xff] %vm1037_vm2, %v993_v43  ;;  %v739_v46 = vmax.f32 %v671_v47, %v1360_v44  ;;  %v411_v50 = vmax.f32 %v138_v16, %v275_v31  ;;  %v485_v51 = vsel %vm447_vm1, %v483_v40, %v484_v48 }
  0x45   : > { %v743_v35 = vmax.f32 %v675_v33, %v275_v31  ;;  %v930_v54 = vmax.f32 %v862_v0, %v275_v31  ;;  %v277_v55 = vsel %vm237_vm0, %v274_v39, %v1416_v42  ;;  %v1426_v56 = vrot.slane %v1410_v37, 2 }
  0x46   : > { %1050 = vst.msk [vmem:[%s1281_s15 + $0x58] sm:$0x7] %vm1040_vm3, %v991_v49  ;;  %v804_v57 = vmax.f32 %v739_v46, %v1363_v45  ;;  %v621_v59 = vmax.f32 %v411_v50, %v485_v51  ;;  %v412_v25 = vmax.f32 %v139_v27, %v277_v55  ;;  %v744_v60 = vmax.f32 %v676_v22, %v277_v55 }
  0x47   : > { %v808_v61 = vmax.f32 %v743_v35, %v485_v51  ;;  %v995_v62 = vmax.f32 %v930_v54, %v485_v51  ;;  %v487_v1 = vsel %vm447_vm1, %v484_v48, %v1426_v56  ;;  %v863_v6 = vmax.f32 %v806_v5, %v139_v27  ;;  %v1473_v35 = vld [vmem:[%s1202_s11 + $0xe8] sm:$0x1f] }
  0x48   : > { %v861_v7 = vmax.f32 %v804_v57, %v1379_v2  ;;  %v678_v8 = vmax.f32 %v621_v59, %v141_v58  ;;  %v622_v9 = vmax.f32 %v412_v25, %v487_v1  ;;  %v809_v29 = vmax.f32 %v744_v60, %v487_v1 }
  0x49   : > { %1054 = vst.msk [vmem:[%s1281_s15 + $0x78] sm:$0xff] %vm1037_vm2, %v995_v62  ;;  %v931_v10 = vmax.f32 %v863_v6, %v277_v55  ;;  %v407_v11 = vmax.f32 %v1348_v32, %v1360_v44  ;;  %v278_v12 = vrot.slane %v141_v58, 1  ;;  %v279_v3 = vrot.slane %v142_v13, 1 }
  0x4a   : > { %v929_v4 = vmax.f32 %v861_v7, %v1389_v15  ;;  %v679_v14 = vmax.f32 %v622_v9, %v142_v13  ;;  %v488_v16 = vrot.slane %v141_v58, 2  ;;  %v489_v17 = vrot.slane %v142_v13, 2 }
  0x4b   : > { %v996_v20 = vmax.f32 %v931_v10, %v487_v1  ;;  %v617_v21 = vmax.f32 %v407_v11, %v1363_v45  ;;  %v280_v24 = vsel %vm237_vm0, %v278_v12, %v279_v3  ;;  %v865_v26 = vmax.f32 %v808_v61, %v141_v58  ;;  %v147_v11 = vld [vmem:[%s1202_s11 + $0xf0] sm:$0xff]  ;;  %v148_v12 = vld [vmem:[%s1202_s11 + $0xf8] sm:$0xff] }
  0x4c   : > { %v994_v32 = vmax.f32 %v929_v4, %v1395_v18  ;;  %v414_v44 = vmax.f32 %v141_v58, %v280_v24  ;;  %v490_v27 = vsel %vm447_vm1, %v488_v16, %v489_v17  ;;  %v746_v23 = vmax.f32 %v678_v8, %v280_v24 }
  0x4d   : > { %1055 = vst.msk [vmem:[%s1281_s15 + $0x80] sm:$0xff] %vm1037_vm2, %v996_v20  ;;  %v674_v33 = vmax.f32 %v617_v21, %v1379_v2  ;;  %v933_v28 = vmax.f32 %v865_v26, %v280_v24  ;;  %v1452_v30 = vrot.slane %v1442_v19, 1  ;;  %v1455_v45 = vrot.slane %v1442_v19, 2 }
  0x4e   : > { %1053 = vst.msk [vmem:[%s1281_s15 + $0x70] sm:$0x7] %vm1040_vm3, %v994_v32  ;;  %v624_v34 = vmax.f32 %v414_v44, %v490_v27  ;;  %v811_v36 = vmax.f32 %v746_v23, %v490_v27  ;;  %v866_v63 = vmax.f32 %v809_v29, %v142_v13  ;;  %v410_v38 = vmax.f32 %v1379_v2, %v1389_v15 }
  0x4f   : > { %v742_v5 = vmax.f32 %v674_v33, %v1389_v15  ;;  %v998_v39 = vmax.f32 %v933_v28, %v490_v27  ;;  %v282_v40 = vsel %vm237_vm0, %v279_v3, %v1452_v30  ;;  %v492_v41 = vsel %vm447_vm1, %v489_v17, %v1455_v45 }
  0x50   : > { %v681_v43 = vmax.f32 %v624_v34, %v144_v53  ;;  %v415_v47 = vmax.f32 %v142_v13, %v282_v40  ;;  %v747_v48 = vmax.f32 %v679_v14, %v282_v40  ;;  %v934_v22 = vmax.f32 %v866_v63, %v282_v40 }
  0x51   : > { %v807_v31 = vmax.f32 %v742_v5, %v1395_v18  ;;  %1057 = vst.msk [vmem:[%s1281_s15 + $0x90] sm:$0xff] %vm1037_vm2, %v998_v39  ;;  %v620_v2 = vmax.f32 %v410_v38, %v1395_v18  ;;  %v283_v15 = vrot.slane %v144_v53, 1  ;;  %v284_v0 = vrot.slane %v145_v52, 1 }
  0x52   : > { %v625_v49 = vmax.f32 %v415_v47, %v492_v41  ;;  %v812_v46 = vmax.f32 %v747_v48, %v492_v41  ;;  %v999_v50 = vmax.f32 %v934_v22, %v492_v41  ;;  %v493_v51 = vrot.slane %v144_v53, 2 }
  0x53   : > { %v864_v54 = vmax.f32 %v807_v31, %v1410_v37  ;;  %v677_v55 = vmax.f32 %v620_v2, %v1410_v37  ;;  %v285_v57 = vsel %vm237_vm0, %v283_v15, %v284_v0  ;;  %v494_v58 = vrot.slane %v145_v52, 2  ;;  %v150_v31 = vld [vmem:[%s1202_s11 + $0x108] sm:$0xff] }
  0x54   : > { %v682_v59 = vmax.f32 %v625_v49, %v145_v52  ;;  %1058 = vst.msk [vmem:[%s1281_s15 + $0x98] sm:$0xff] %vm1037_vm2, %v999_v50  ;;  %v417_v18 = vmax.f32 %v144_v53, %v285_v57  ;;  %v749_v13 = vmax.f32 %v681_v43, %v285_v57  ;;  %v868_v25 = vmax.f32 %v811_v36, %v144_v53 }
  0x55   : > { %v932_v60 = vmax.f32 %v864_v54, %v1416_v42  ;;  %v745_v61 = vmax.f32 %v677_v55, %v1416_v42  ;;  %v495_v62 = vsel %vm447_vm1, %v493_v51, %v494_v58  ;;  %v1484_v1 = vrot.slane %v1473_v35, 1 }
  0x56   : > { %v627_v6 = vmax.f32 %v417_v18, %v495_v62  ;;  %v814_v7 = vmax.f32 %v749_v13, %v495_v62  ;;  %v936_v8 = vmax.f32 %v868_v25, %v285_v57  ;;  %v1487_v9 = vrot.slane %v1473_v35, 2 }
  0x57   : > { %v997_v29 = vmax.f32 %v932_v60, %v1426_v56  ;;  %v810_v10 = vmax.f32 %v745_v61, %v1426_v56  ;;  %v287_v3 = vsel %vm237_vm0, %v284_v0, %v1484_v1  ;;  %v869_v4 = vmax.f32 %v812_v46, %v145_v52  ;;  %v151_v0 = vld [vmem:[%s1202_s11 + $0x110] sm:$0xff] }
  0x58   : > { %v684_v14 = vmax.f32 %v627_v6, %v147_v11  ;;  %v1001_v16 = vmax.f32 %v936_v8, %v495_v62  ;;  %v418_v17 = vmax.f32 %v145_v52, %v287_v3  ;;  %v497_v20 = vsel %vm447_vm1, %v494_v58, %v1487_v9  ;;  %v1507_v52 = vld [vmem:[%s1202_s11 + $0x100] sm:$0x1f]  ;;  %v1538_v8 = vld [vmem:[%s1202_s11 + $0x118] sm:$0x1f] }
  0x59   : > { %1056 = vst.msk [vmem:[%s1281_s15 + $0x88] sm:$0x7] %vm1040_vm3, %v997_v29  ;;  %v867_v21 = vmax.f32 %v810_v10, %v1442_v19  ;;  %v750_v24 = vmax.f32 %v682_v59, %v287_v3  ;;  %v937_v26 = vmax.f32 %v869_v4, %v287_v3  ;;  %v413_v32 = vmax.f32 %v1410_v37, %v1416_v42 }
  0x5a   : > { %1060 = vst.msk [vmem:[%s1281_s15 + $0xa8] sm:$0xff] %vm1037_vm2, %v1001_v16  ;;  %v628_v44 = vmax.f32 %v418_v17, %v497_v20  ;;  %v288_v27 = vrot.slane %v147_v11, 1  ;;  %v289_v23 = vrot.slane %v148_v12, 1  ;;  %v498_v33 = vrot.slane %v147_v11, 2 }
  0x5b   : > { %v935_v28 = vmax.f32 %v867_v21, %v1452_v30  ;;  %v815_v53 = vmax.f32 %v750_v24, %v497_v20  ;;  %v1002_v34 = vmax.f32 %v937_v26, %v497_v20  ;;  %v623_v36 = vmax.f32 %v413_v32, %v1426_v56 }
  0x5c   : > { %v685_v63 = vmax.f32 %v628_v44, %v148_v12  ;;  %v290_v37 = vsel %vm237_vm0, %v288_v27, %v289_v23  ;;  %v499_v42 = vrot.slane %v148_v12, 2  ;;  %v871_v38 = vmax.f32 %v814_v7, %v147_v11  ;;  %v153_v44 = vld [vmem:[%s1202_s11 + $0x120] sm:$0xff] }
  0x5d   : > { %v1000_v5 = vmax.f32 %v935_v28, %v1455_v45  ;;  %1061 = vst.msk [vmem:[%s1281_s15 + $0xb0] sm:$0xff] %vm1037_vm2, %v1002_v34  ;;  %v680_v39 = vmax.f32 %v623_v36, %v1442_v19  ;;  %v420_v40 = vmax.f32 %v147_v11, %v290_v37  ;;  %v752_v41 = vmax.f32 %v684_v14, %v290_v37 }
  0x5e   : > { %v500_v43 = vsel %vm447_vm1, %v498_v33, %v499_v42  ;;  %v939_v56 = vmax.f32 %v871_v38, %v290_v37  ;;  %v1516_v47 = vrot.slane %v1507_v52, 1  ;;  %v1519_v48 = vrot.slane %v1507_v52, 2 }
  0x5f   : > { %1059 = vst.msk [vmem:[%s1281_s15 + $0xa0] sm:$0x7] %vm1040_vm3, %v1000_v5  ;;  %v748_v22 = vmax.f32 %v680_v39, %v1452_v30  ;;  %v630_v2 = vmax.f32 %v420_v40, %v500_v43  ;;  %v817_v15 = vmax.f32 %v752_v41, %v500_v43  ;;  %v872_v49 = vmax.f32 %v815_v53, %v148_v12 }
  0x60   : > { %v1004_v46 = vmax.f32 %v939_v56, %v500_v43  ;;  %v292_v50 = vsel %vm237_vm0, %v289_v23, %v1516_v47  ;;  %v502_v51 = vsel %vm447_vm1, %v499_v42, %v1519_v48  ;;  %v416_v54 = vmax.f32 %v1442_v19, %v1452_v30  ;;  %v154_v23 = vld [vmem:[%s1202_s11 + $0x128] sm:$0xff] }
  0x61   : > { %v813_v55 = vmax.f32 %v748_v22, %v1455_v45  ;;  %v687_v57 = vmax.f32 %v630_v2, %v150_v31  ;;  %v421_v58 = vmax.f32 %v148_v12, %v292_v50  ;;  %v753_v59 = vmax.f32 %v685_v63, %v292_v50 }
  0x62   : > { %1063 = vst.msk [vmem:[%s1281_s15 + $0xc0] sm:$0xff] %vm1037_vm2, %v1004_v46  ;;  %v940_v18 = vmax.f32 %v872_v49, %v292_v50  ;;  %v626_v13 = vmax.f32 %v416_v54, %v1455_v45  ;;  %v293_v25 = vrot.slane %v150_v31, 1  ;;  %v294_v60 = vrot.slane %v151_v0, 1 }
  0x63   : > { %v870_v61 = vmax.f32 %v813_v55, %v1473_v35  ;;  %v631_v62 = vmax.f32 %v421_v58, %v502_v51  ;;  %v818_v6 = vmax.f32 %v753_v59, %v502_v51  ;;  %v503_v7 = vrot.slane %v150_v31, 2 }
  0x64   : > { %v1005_v19 = vmax.f32 %v940_v18, %v502_v51  ;;  %v683_v30 = vmax.f32 %v626_v13, %v1473_v35  ;;  %v295_v29 = vsel %vm237_vm0, %v293_v25, %v294_v60  ;;  %v504_v10 = vrot.slane %v151_v0, 2  ;;  %v156_v18 = vld [vmem:[%s1202_s11 + $0x138] sm:$0xff] }
  0x65   : > { %v938_v11 = vmax.f32 %v870_v61, %v1484_v1  ;;  %v688_v45 = vmax.f32 %v631_v62, %v151_v0  ;;  %v423_v12 = vmax.f32 %v150_v31, %v295_v29  ;;  %v755_v3 = vmax.f32 %v687_v57, %v295_v29 }
  0x66   : > { %1064 = vst.msk [vmem:[%s1281_s15 + $0xc8] sm:$0xff] %vm1037_vm2, %v1005_v19  ;;  %v751_v4 = vmax.f32 %v683_v30, %v1484_v1  ;;  %v505_v14 = vsel %vm447_vm1, %v503_v7, %v504_v10  ;;  %v874_v16 = vmax.f32 %v817_v15, %v150_v31  ;;  %v1548_v17 = vrot.slane %v1538_v8, 1  ;;  %v1571_v15 = vld [vmem:[%s1202_s11 + $0x130] sm:$0x1f] }
  0x67   : > { %v1003_v20 = vmax.f32 %v938_v11, %v1487_v9  ;;  %v633_v21 = vmax.f32 %v423_v12, %v505_v14  ;;  %v820_v24 = vmax.f32 %v755_v3, %v505_v14  ;;  %v1552_v26 = vrot.slane %v1538_v8, 2 }
  0x68   : > { %v816_v32 = vmax.f32 %v751_v4, %v1487_v9  ;;  %v942_v27 = vmax.f32 %v874_v16, %v295_v29  ;;  %v297_v33 = vsel %vm237_vm0, %v294_v60, %v1548_v17  ;;  %v875_v28 = vmax.f32 %v818_v6, %v151_v0  ;;  %v157_v60 = vld [vmem:[%s1202_s11 + $0x140] sm:$0xff] }
  0x69   : > { %1062 = vst.msk [vmem:[%s1281_s15 + $0xb8] sm:$0x7] %vm1040_vm3, %v1003_v20  ;;  %v690_v53 = vmax.f32 %v633_v21, %v153_v44  ;;  %v424_v34 = vmax.f32 %v151_v0, %v297_v33  ;;  %v507_v36 = vsel %vm447_vm1, %v504_v10, %v1552_v26  ;;  %v756_v63 = vmax.f32 %v688_v45, %v297_v33 }
  0x6a   : > { %v873_v37 = vmax.f32 %v816_v32, %v1507_v52  ;;  %v1007_v42 = vmax.f32 %v942_v27, %v505_v14  ;;  %v943_v38 = vmax.f32 %v875_v28, %v297_v33  ;;  %v419_v5 = vmax.f32 %v1473_v35, %v1484_v1 }
  0x6b   : > { %v634_v39 = vmax.f32 %v424_v34, %v507_v36  ;;  %v821_v40 = vmax.f32 %v756_v63, %v507_v36  ;;  %v298_v41 = vrot.slane %v153_v44, 1  ;;  %v299_v43 = vrot.slane %v154_v23, 1 }
  0x6c   : > { %v941_v56 = vmax.f32 %v873_v37, %v1516_v47  ;;  %1066 = vst.msk [vmem:[%s1281_s15 + $0xd8] sm:$0xff] %vm1037_vm2, %v1007_v42  ;;  %v1008_v22 = vmax.f32 %v943_v38, %v507_v36  ;;  %v629_v31 = vmax.f32 %v419_v5, %v1487_v9  ;;  %v508_v2 = vrot.slane %v153_v44, 2 }
  0x6d   : > { %v691_v0 = vmax.f32 %v634_v39, %v154_v23  ;;  %v300_v35 = vsel %vm237_vm0, %v298_v41, %v299_v43  ;;  %v509_v1 = vrot.slane %v154_v23, 2  ;;  %v877_v49 = vmax.f32 %v820_v24, %v153_v44  ;;  %v1602_v24 = vld [vmem:[%s1202_s11 + $0x148] sm:$0x1f]  ;;  %v159_v39 = vld [vmem:[%s1202_s11 + $0x150] sm:$0xff]  ;;  %v160_v41 = vld [vmem:[%s1202_s11 + $0x158] sm:$0xff] }
  0x6e   : > { %v1006_v46 = vmax.f32 %v941_v56, %v1519_v48  ;;  %1067 = vst.msk [vmem:[%s1281_s15 + $0xe0] sm:$0xff] %vm1037_vm2, %v1008_v22  ;;  %v686_v50 = vmax.f32 %v629_v31, %v1507_v52  ;;  %v426_v51 = vmax.f32 %v153_v44, %v300_v35  ;;  %v758_v54 = vmax.f32 %v690_v53, %v300_v35 }
  0x6f   : > { %v510_v9 = vsel %vm447_vm1, %v508_v2, %v509_v1  ;;  %v945_v55 = vmax.f32 %v877_v49, %v300_v35  ;;  %v1580_v57 = vrot.slane %v1571_v15, 1  ;;  %v1583_v58 = vrot.slane %v1571_v15, 2 }
  0x70   : > { %1065 = vst.msk [vmem:[%s1281_s15 + $0xd0] sm:$0x7] %vm1040_vm3, %v1006_v46  ;;  %v754_v59 = vmax.f32 %v686_v50, %v1516_v47  ;;  %v636_v13 = vmax.f32 %v426_v51, %v510_v9  ;;  %v823_v25 = vmax.f32 %v758_v54, %v510_v9  ;;  %v878_v61 = vmax.f32 %v821_v40, %v154_v23 }
  0x71   : > { %v1010_v62 = vmax.f32 %v945_v55, %v510_v9  ;;  %v302_v6 = vsel %vm237_vm0, %v299_v43, %v1580_v57  ;;  %v512_v7 = vsel %vm447_vm1, %v509_v1, %v1583_v58  ;;  %v422_v19 = vmax.f32 %v1507_v52, %v1516_v47 }
  0x72   : > { %v819_v30 = vmax.f32 %v754_v59, %v1519_v48  ;;  %v693_v29 = vmax.f32 %v636_v13, %v156_v18  ;;  %v427_v10 = vmax.f32 %v154_v23, %v302_v6  ;;  %v759_v11 = vmax.f32 %v691_v0, %v302_v6 }
  0x73   : > { %1069 = vst.msk [vmem:[%s1281_s15 + $0xf0] sm:$0xff] %vm1037_vm2, %v1010_v62  ;;  %v946_v45 = vmax.f32 %v878_v61, %v302_v6  ;;  %v632_v12 = vmax.f32 %v422_v19, %v1519_v48  ;;  %v303_v3 = vrot.slane %v156_v18, 1  ;;  %v304_v4 = vrot.slane %v157_v60, 1 }
  0x74   : > { %v876_v14 = vmax.f32 %v819_v30, %v1538_v8  ;;  %v637_v16 = vmax.f32 %v427_v10, %v512_v7  ;;  %v824_v20 = vmax.f32 %v759_v11, %v512_v7  ;;  %v513_v21 = vrot.slane %v156_v18, 2 }
  0x75   : > { %v1011_v52 = vmax.f32 %v946_v45, %v512_v7  ;;  %v689_v47 = vmax.f32 %v632_v12, %v1538_v8  ;;  %v305_v32 = vsel %vm237_vm0, %v303_v3, %v304_v4  ;;  %v514_v44 = vrot.slane %v157_v60, 2  ;;  %v162_v45 = vld [vmem:[%s1202_s11 + $0x168] sm:$0xff] }
  0x76   : > { %v944_v27 = vmax.f32 %v876_v14, %v1548_v17  ;;  %v694_v48 = vmax.f32 %v637_v16, %v157_v60  ;;  %v429_v23 = vmax.f32 %v156_v18, %v305_v32  ;;  %v761_v33 = vmax.f32 %v693_v29, %v305_v32 }
  0x77   : > { %1070 = vst.msk [vmem:[%s1281_s15 + $0xf8] sm:$0xff] %vm1037_vm2, %v1011_v52  ;;  %v757_v28 = vmax.f32 %v689_v47, %v1548_v17  ;;  %v515_v53 = vsel %vm447_vm1, %v513_v21, %v514_v44  ;;  %v880_v34 = vmax.f32 %v823_v25, %v156_v18  ;;  %v1612_v36 = vrot.slane %v1602_v24, 1  ;;  %v1635_v25 = vld [vmem:[%s1202_s11 + $0x160] sm:$0x1f] }
  0x78   : > { %v1009_v63 = vmax.f32 %v944_v27, %v1552_v26  ;;  %v639_v37 = vmax.f32 %v429_v23, %v515_v53  ;;  %v826_v42 = vmax.f32 %v761_v33, %v515_v53  ;;  %v1616_v38 = vrot.slane %v1602_v24, 2 }
  0x79   : > { %v822_v5 = vmax.f32 %v757_v28, %v1552_v26  ;;  %v948_v40 = vmax.f32 %v880_v34, %v305_v32  ;;  %v307_v43 = vsel %vm237_vm0, %v304_v4, %v1612_v36  ;;  %v881_v56 = vmax.f32 %v824_v20, %v157_v60  ;;  %v163_v4 = vld [vmem:[%s1202_s11 + $0x170] sm:$0xff] }
  0x7a   : > { %1068 = vst.msk [vmem:[%s1281_s15 + $0xe8] sm:$0x7] %vm1040_vm3, %v1009_v63  ;;  %v696_v22 = vmax.f32 %v639_v37, %v159_v39  ;;  %v430_v31 = vmax.f32 %v157_v60, %v307_v43  ;;  %v517_v2 = vsel %vm447_vm1, %v514_v44, %v1616_v38  ;;  %v762_v0 = vmax.f32 %v694_v48, %v307_v43 }
  0x7b   : > { %v879_v35 = vmax.f32 %v822_v5, %v1571_v15  ;;  %v1013_v1 = vmax.f32 %v948_v40, %v515_v53  ;;  %v949_v49 = vmax.f32 %v881_v56, %v307_v43  ;;  %v425_v46 = vmax.f32 %v1538_v8, %v1548_v17 }
  0x7c   : > { %v640_v50 = vmax.f32 %v430_v31, %v517_v2  ;;  %v827_v51 = vmax.f32 %v762_v0, %v517_v2  ;;  %v308_v54 = vrot.slane %v159_v39, 1  ;;  %v309_v9 = vrot.slane %v160_v41, 1 }
  0x7d   : > { %v947_v55 = vmax.f32 %v879_v35, %v1580_v57  ;;  %1072 = vst.msk [vmem:[%s1281_s15 + $0x108] sm:$0xff] %vm1037_vm2, %v1013_v1  ;;  %v1014_v59 = vmax.f32 %v949_v49, %v517_v2  ;;  %v635_v18 = vmax.f32 %v425_v46, %v1552_v26  ;;  %v518_v13 = vrot.slane %v159_v39, 2 }
  0x7e   : > { %v697_v60 = vmax.f32 %v640_v50, %v160_v41  ;;  %v310_v8 = vsel %vm237_vm0, %v308_v54, %v309_v9  ;;  %v519_v17 = vrot.slane %v160_v41, 2  ;;  %v883_v61 = vmax.f32 %v826_v42, %v159_v39  ;;  %v1666_v42 = vld [vmem:[%s1202_s11 + $0x178] sm:$0x1f]  ;;  %v165_v50 = vld [vmem:[%s1202_s11 + $0x180] sm:$0xff]  ;;  %v166_v54 = vld [vmem:[%s1202_s11 + $0x188] sm:$0xff] }
  0x7f   : > { %v1012_v62 = vmax.f32 %v947_v55, %v1583_v58  ;;  %1073 = vst.msk [vmem:[%s1281_s15 + $0x110] sm:$0xff] %vm1037_vm2, %v1014_v59  ;;  %v692_v6 = vmax.f32 %v635_v18, %v1571_v15  ;;  %v432_v7 = vmax.f32 %v159_v39, %v310_v8  ;;  %v764_v19 = vmax.f32 %v696_v22, %v310_v8 }
  0x80   : > { %v520_v26 = vsel %vm447_vm1, %v518_v13, %v519_v17  ;;  %v951_v30 = vmax.f32 %v883_v61, %v310_v8  ;;  %v1644_v29 = vrot.slane %v1635_v25, 1  ;;  %v1647_v10 = vrot.slane %v1635_v25, 2 }
  0x81   : > { %1071 = vst.msk [vmem:[%s1281_s15 + $0x100] sm:$0x7] %vm1040_vm3, %v1012_v62  ;;  %v760_v11 = vmax.f32 %v692_v6, %v1580_v57  ;;  %v642_v12 = vmax.f32 %v432_v7, %v520_v26  ;;  %v829_v3 = vmax.f32 %v764_v19, %v520_v26  ;;  %v884_v14 = vmax.f32 %v827_v51, %v160_v41 }
  0x82   : > { %v1016_v16 = vmax.f32 %v951_v30, %v520_v26  ;;  %v312_v20 = vsel %vm237_vm0, %v309_v9, %v1644_v29  ;;  %v522_v21 = vsel %vm447_vm1, %v519_v17, %v1647_v10  ;;  %v428_v52 = vmax.f32 %v1571_v15, %v1580_v57 }
  0x83   : > { %v825_v47 = vmax.f32 %v760_v11, %v1583_v58  ;;  %v699_v32 = vmax.f32 %v642_v12, %v162_v45  ;;  %v433_v44 = vmax.f32 %v160_v41, %v312_v20  ;;  %v765_v27 = vmax.f32 %v697_v60, %v312_v20 }
  0x84   : > { %1075 = vst.msk [vmem:[%s1281_s15 + $0x120] sm:$0xff] %vm1037_vm2, %v1016_v16  ;;  %v952_v48 = vmax.f32 %v884_v14, %v312_v20  ;;  %v638_v23 = vmax.f32 %v428_v52, %v1583_v58  ;;  %v313_v33 = vrot.slane %v162_v45, 1  ;;  %v314_v28 = vrot.slane %v163_v4, 1 }
  0x85   : > { %v882_v53 = vmax.f32 %v825_v47, %v1602_v24  ;;  %v643_v34 = vmax.f32 %v433_v44, %v522_v21  ;;  %v830_v63 = vmax.f32 %v765_v27, %v522_v21  ;;  %v523_v37 = vrot.slane %v162_v45, 2 }
  0x86   : > { %v1017_v15 = vmax.f32 %v952_v48, %v522_v21  ;;  %v695_v57 = vmax.f32 %v638_v23, %v1602_v24  ;;  %v315_v5 = vsel %vm237_vm0, %v313_v33, %v314_v28  ;;  %v524_v39 = vrot.slane %v163_v4, 2  ;;  %v168_v48 = vld [vmem:[%s1202_s11 + $0x198] sm:$0xff] }
  0x87   : > { %v950_v40 = vmax.f32 %v882_v53, %v1612_v36  ;;  %v700_v58 = vmax.f32 %v643_v34, %v163_v4  ;;  %v435_v41 = vmax.f32 %v162_v45, %v315_v5  ;;  %v767_v43 = vmax.f32 %v699_v32, %v315_v5 }
  0x88   : > { %1076 = vst.msk [vmem:[%s1281_s15 + $0x128] sm:$0xff] %vm1037_vm2, %v1017_v15  ;;  %v763_v56 = vmax.f32 %v695_v57, %v1612_v36  ;;  %v525_v22 = vsel %vm447_vm1, %v523_v37, %v524_v39  ;;  %v886_v31 = vmax.f32 %v829_v3, %v162_v45  ;;  %v1676_v2 = vrot.slane %v1666_v42, 1  ;;  %v1699_v3 = vld [vmem:[%s1202_s11 + $0x190] sm:$0x1f] }
  0x89   : > { %v1015_v0 = vmax.f32 %v950_v40, %v1616_v38  ;;  %v645_v35 = vmax.f32 %v435_v41, %v525_v22  ;;  %v832_v1 = vmax.f32 %v767_v43, %v525_v22  ;;  %v1680_v49 = vrot.slane %v1666_v42, 2 }
  0x8a   : > { %v828_v46 = vmax.f32 %v763_v56, %v1616_v38  ;;  %v954_v51 = vmax.f32 %v886_v31, %v315_v5  ;;  %v317_v9 = vsel %vm237_vm0, %v314_v28, %v1676_v2  ;;  %v887_v55 = vmax.f32 %v830_v63, %v163_v4  ;;  %v169_v28 = vld [vmem:[%s1202_s11 + $0x1a0] sm:$0xff] }
  0x8b   : > { %1074 = vst.msk [vmem:[%s1281_s15 + $0x118] sm:$0x7] %vm1040_vm3, %v1015_v0  ;;  %v702_v59 = vmax.f32 %v645_v35, %v165_v50  ;;  %v436_v18 = vmax.f32 %v163_v4, %v317_v9  ;;  %v527_v13 = vsel %vm447_vm1, %v524_v39, %v1680_v49  ;;  %v768_v60 = vmax.f32 %v700_v58, %v317_v9 }
  0x8c   : > { %v885_v8 = vmax.f32 %v828_v46, %v1635_v25  ;;  %v1019_v17 = vmax.f32 %v954_v51, %v525_v22  ;;  %v955_v61 = vmax.f32 %v887_v55, %v317_v9  ;;  %v431_v62 = vmax.f32 %v1602_v24, %v1612_v36 }
  0x8d   : > { %v646_v6 = vmax.f32 %v436_v18, %v527_v13  ;;  %v833_v7 = vmax.f32 %v768_v60, %v527_v13  ;;  %v318_v19 = vrot.slane %v165_v50, 1  ;;  %v319_v26 = vrot.slane %v166_v54, 1 }
  0x8e   : > { %v953_v30 = vmax.f32 %v885_v8, %v1644_v29  ;;  %1078 = vst.msk [vmem:[%s1281_s15 + $0x138] sm:$0xff] %vm1037_vm2, %v1019_v17  ;;  %v1020_v11 = vmax.f32 %v955_v61, %v527_v13  ;;  %v641_v45 = vmax.f32 %v431_v62, %v1616_v38  ;;  %v528_v12 = vrot.slane %v165_v50, 2 }
  0x8f   : > { %v703_v4 = vmax.f32 %v646_v6, %v166_v54  ;;  %v320_v24 = vsel %vm237_vm0, %v318_v19, %v319_v26  ;;  %v529_v36 = vrot.slane %v166_v54, 2  ;;  %v889_v14 = vmax.f32 %v832_v1, %v165_v50  ;;  %v1730_v1 = vld [vmem:[%s1202_s11 + $0x1a8] sm:$0x1f]  ;;  %v171_v6 = vld [vmem:[%s1202_s11 + $0x1b0] sm:$0xff]  ;;  %v172_v19 = vld [vmem:[%s1202_s11 + $0x1b8] sm:$0xff] }
  0x90   : > { %v1018_v16 = vmax.f32 %v953_v30, %v1647_v10  ;;  %1079 = vst.msk [vmem:[%s1281_s15 + $0x140] sm:$0xff] %vm1037_vm2, %v1020_v11  ;;  %v698_v20 = vmax.f32 %v641_v45, %v1635_v25  ;;  %v438_v21 = vmax.f32 %v165_v50, %v320_v24  ;;  %v770_v52 = vmax.f32 %v702_v59, %v320_v24 }
  0x91   : > { %v530_v38 = vsel %vm447_vm1, %v528_v12, %v529_v36  ;;  %v957_v47 = vmax.f32 %v889_v14, %v320_v24  ;;  %v1708_v32 = vrot.slane %v1699_v3, 1  ;;  %v1711_v44 = vrot.slane %v1699_v3, 2 }
  0x92   : > { %1077 = vst.msk [vmem:[%s1281_s15 + $0x130] sm:$0x7] %vm1040_vm3, %v1018_v16  ;;  %v766_v27 = vmax.f32 %v698_v20, %v1644_v29  ;;  %v648_v23 = vmax.f32 %v438_v21, %v530_v38  ;;  %v835_v33 = vmax.f32 %v770_v52, %v530_v38  ;;  %v890_v53 = vmax.f32 %v833_v7, %v166_v54 }
  0x93   : > { %v1022_v34 = vmax.f32 %v957_v47, %v530_v38  ;;  %v322_v63 = vsel %vm237_vm0, %v319_v26, %v1708_v32  ;;  %v532_v37 = vsel %vm447_vm1, %v529_v36, %v1711_v44  ;;  %v434_v15 = vmax.f32 %v1635_v25, %v1644_v29 }
  0x94   : > { %v831_v57 = vmax.f32 %v766_v27, %v1647_v10  ;;  %v705_v5 = vmax.f32 %v648_v23, %v168_v48  ;;  %v439_v39 = vmax.f32 %v166_v54, %v322_v63  ;;  %v771_v40 = vmax.f32 %v703_v4, %v322_v63 }
  0x95   : > { %1081 = vst.msk [vmem:[%s1281_s15 + $0x150] sm:$0xff] %vm1037_vm2, %v1022_v34  ;;  %v958_v58 = vmax.f32 %v890_v53, %v322_v63  ;;  %v644_v41 = vmax.f32 %v434_v15, %v1647_v10  ;;  %v323_v43 = vrot.slane %v168_v48, 1  ;;  %v324_v56 = vrot.slane %v169_v28, 1 }
  0x96   : > { %v888_v22 = vmax.f32 %v831_v57, %v1666_v42  ;;  %v649_v31 = vmax.f32 %v439_v39, %v532_v37  ;;  %v836_v0 = vmax.f32 %v771_v40, %v532_v37  ;;  %v533_v35 = vrot.slane %v168_v48, 2 }
  0x97   : > { %v1023_v25 = vmax.f32 %v958_v58, %v532_v37  ;;  %v701_v29 = vmax.f32 %v644_v41, %v1666_v42  ;;  %v325_v46 = vsel %vm237_vm0, %v323_v43, %v324_v56  ;;  %v534_v50 = vrot.slane %v169_v28, 2 }
  0x98   : > { %v956_v51 = vmax.f32 %v888_v22, %v1676_v2  ;;  %v706_v10 = vmax.f32 %v649_v31, %v169_v28  ;;  %v441_v54 = vmax.f32 %v168_v48, %v325_v46  ;;  %v773_v9 = vmax.f32 %v705_v5, %v325_v46  ;;  %v175_v22 = vld [vmem:[%s1202_s11 + $0x1d0] sm:$0xff] }
  0x99   : > { %1082 = vst.msk [vmem:[%s1281_s15 + $0x158] sm:$0xff] %vm1037_vm2, %v1023_v25  ;;  %v769_v55 = vmax.f32 %v701_v29, %v1676_v2  ;;  %v535_v59 = vsel %vm447_vm1, %v533_v35, %v534_v50  ;;  %v892_v18 = vmax.f32 %v835_v33, %v168_v48  ;;  %v1740_v13 = vrot.slane %v1730_v1, 1  ;;  %v1763_v33 = vld [vmem:[%s1202_s11 + $0x1c0] sm:$0x1f] }
  0x9a   : > { %v1021_v60 = vmax.f32 %v956_v51, %v1680_v49  ;;  %v651_v8 = vmax.f32 %v441_v54, %v535_v59  ;;  %v838_v17 = vmax.f32 %v773_v9, %v535_v59  ;;  %v1744_v61 = vrot.slane %v1730_v1, 2 }
  0x9b   : > { %v834_v62 = vmax.f32 %v769_v55, %v1680_v49  ;;  %v960_v7 = vmax.f32 %v892_v18, %v325_v46  ;;  %v327_v26 = vsel %vm237_vm0, %v324_v56, %v1740_v13  ;;  %v893_v30 = vmax.f32 %v836_v0, %v169_v28  ;;  %v174_v56 = vld [vmem:[%s1202_s11 + $0x1c8] sm:$0xff] }
  0x9c   : > { %1080 = vst.msk [vmem:[%s1281_s15 + $0x148] sm:$0x7] %vm1040_vm3, %v1021_v60  ;;  %v708_v11 = vmax.f32 %v651_v8, %v171_v6  ;;  %v442_v45 = vmax.f32 %v169_v28, %v327_v26  ;;  %v537_v12 = vsel %vm447_vm1, %v534_v50, %v1744_v61  ;;  %v774_v4 = vmax.f32 %v706_v10, %v327_v26 }
  0x9d   : > { %v891_v24 = vmax.f32 %v834_v62, %v1699_v3  ;;  %v1025_v36 = vmax.f32 %v960_v7, %v535_v59  ;;  %v961_v14 = vmax.f32 %v893_v30, %v327_v26  ;;  %v437_v16 = vmax.f32 %v1666_v42, %v1676_v2 }
  0x9e   : > { %v652_v20 = vmax.f32 %v442_v45, %v537_v12  ;;  %v839_v21 = vmax.f32 %v774_v4, %v537_v12  ;;  %v328_v52 = vrot.slane %v171_v6, 1  ;;  %v329_v38 = vrot.slane %v172_v19, 1  ;;  %v177_v4 = vld [vmem:[%s1202_s11 + $0x1e0] sm:$0xff] }
  0x9f   : > { %v959_v47 = vmax.f32 %v891_v24, %v1708_v32  ;;  %1084 = vst.msk [vmem:[%s1281_s15 + $0x168] sm:$0xff] %vm1037_vm2, %v1025_v36  ;;  %v1026_v27 = vmax.f32 %v961_v14, %v537_v12  ;;  %v647_v48 = vmax.f32 %v437_v16, %v1680_v49  ;;  %v538_v23 = vrot.slane %v171_v6, 2 }
  0xa0   : > { %v709_v28 = vmax.f32 %v652_v20, %v172_v19  ;;  %v330_v53 = vsel %vm237_vm0, %v328_v52, %v329_v38  ;;  %v539_v42 = vrot.slane %v172_v19, 2  ;;  %v895_v2 = vmax.f32 %v838_v17, %v171_v6  ;;  %v178_v20 = vld [vmem:[%s1202_s11 + $0x1e8] sm:$0xff] }
  0xa1   : > { %v1024_v34 = vmax.f32 %v959_v47, %v1711_v44  ;;  %1085 = vst.msk [vmem:[%s1281_s15 + $0x170] sm:$0xff] %vm1037_vm2, %v1026_v27  ;;  %v704_v63 = vmax.f32 %v647_v48, %v1699_v3  ;;  %v444_v37 = vmax.f32 %v171_v6, %v330_v53  ;;  %v776_v15 = vmax.f32 %v708_v11, %v330_v53 }
  0xa2   : > { %v540_v49 = vsel %vm447_vm1, %v538_v23, %v539_v42  ;;  %v963_v57 = vmax.f32 %v895_v2, %v330_v53  ;;  %v1772_v5 = vrot.slane %v1763_v33, 1  ;;  %v1775_v39 = vrot.slane %v1763_v33, 2  ;;  %v179_v53 = vld [vmem:[%s1202_s11 + $0x1f0] sm:$0x1f] }
  0xa3   : > { %1083 = vst.msk [vmem:[%s1281_s15 + $0x160] sm:$0x7] %vm1040_vm3, %v1024_v34  ;;  %v772_v40 = vmax.f32 %v704_v63, %v1708_v32  ;;  %v654_v58 = vmax.f32 %v444_v37, %v540_v49  ;;  %v841_v41 = vmax.f32 %v776_v15, %v540_v49  ;;  %v896_v43 = vmax.f32 %v839_v21, %v172_v19 }
  0xa4   : > { %v1028_v31 = vmax.f32 %v963_v57, %v540_v49  ;;  %v332_v0 = vsel %vm237_vm0, %v329_v38, %v1772_v5  ;;  %v542_v35 = vsel %vm447_vm1, %v539_v42, %v1775_v39  ;;  %v440_v25 = vmax.f32 %v1699_v3, %v1708_v32  ;;  %v1794_v3 = vld [vmem:[%s1202_s11 + $0x1d8] sm:$0x1f] }
  0xa5   : > { %v837_v29 = vmax.f32 %v772_v40, %v1711_v44  ;;  %v445_v46 = vmax.f32 %v172_v19, %v332_v0  ;;  %v777_v50 = vmax.f32 %v709_v28, %v332_v0  ;;  %v964_v51 = vmax.f32 %v896_v43, %v332_v0 }
  0xa6   : > { %1087 = vst.msk [vmem:[%s1281_s15 + $0x180] sm:$0xff] %vm1037_vm2, %v1028_v31  ;;  %v650_v10 = vmax.f32 %v440_v25, %v1711_v44  ;;  %v711_v54 = vmax.f32 %v654_v58, %v174_v56  ;;  %v717_v9 = vrot.slane %v174_v56, 1  ;;  %v718_v55 = vrot.slane %v175_v22, 1 }
  0xa7   : > { %v894_v59 = vmax.f32 %v837_v29, %v1730_v1  ;;  %v655_v18 = vmax.f32 %v445_v46, %v542_v35  ;;  %v842_v60 = vmax.f32 %v777_v50, %v542_v35  ;;  %v1029_v8 = vmax.f32 %v964_v51, %v542_v35 }
  0xa8   : > { %v707_v32 = vmax.f32 %v650_v10, %v1730_v1  ;;  %v719_v17 = vsel %vm237_vm0, %v717_v9, %v718_v55  ;;  %v782_v62 = vrot.slane %v174_v56, 2  ;;  %v783_v6 = vrot.slane %v175_v22, 2 }
  0xa9   : > { %v962_v44 = vmax.f32 %v894_v59, %v1740_v13  ;;  %1088 = vst.msk [vmem:[%s1281_s15 + $0x188] sm:$0xff] %vm1037_vm2, %v1029_v8  ;;  %v779_v7 = vmax.f32 %v711_v54, %v719_v17  ;;  %v898_v19 = vmax.f32 %v841_v41, %v174_v56  ;;  %v712_v26 = vmax.f32 %v655_v18, %v175_v22 }
  0xaa   : > { %v775_v30 = vmax.f32 %v707_v32, %v1740_v13  ;;  %v784_v11 = vsel %vm447_vm1, %v782_v62, %v783_v6  ;;  %v720_v45 = vrot.slane %v1794_v3, 1  ;;  %v785_v12 = vrot.slane %v1794_v3, 2 }
  0xab   : > { %v1027_v24 = vmax.f32 %v962_v44, %v1744_v61  ;;  %v844_v36 = vmax.f32 %v779_v7, %v784_v11  ;;  %v966_v14 = vmax.f32 %v898_v19, %v719_v17  ;;  %v899_v16 = vmax.f32 %v842_v60, %v175_v22 }
  0xac   : > { %v840_v21 = vmax.f32 %v775_v30, %v1744_v61  ;;  %v721_v52 = vsel %vm237_vm0, %v718_v55, %v720_v45  ;;  %v786_v38 = vsel %vm447_vm1, %v783_v6, %v785_v12  ;;  %v443_v47 = vmax.f32 %v1730_v1, %v1740_v13 }
  0xad   : > { %1086 = vst.msk [vmem:[%s1281_s15 + $0x178] sm:$0x7] %vm1040_vm3, %v1027_v24  ;;  %v1031_v27 = vmax.f32 %v966_v14, %v784_v11  ;;  %v780_v48 = vmax.f32 %v712_v26, %v721_v52  ;;  %v967_v23 = vmax.f32 %v899_v16, %v721_v52  ;;  %v901_v28 = vmax.f32 %v844_v36, %v177_v4 }
  0xae   : > { %v897_v42 = vmax.f32 %v840_v21, %v1763_v33  ;;  %v653_v2 = vmax.f32 %v443_v47, %v1744_v61  ;;  %v907_v34 = vrot.slane %v177_v4, 1  ;;  %v908_v63 = vrot.slane %v178_v20, 1 }
  0xaf   : > { %1090 = vst.msk [vmem:[%s1281_s15 + $0x198] sm:$0xff] %vm1037_vm2, %v1031_v27  ;;  %v845_v37 = vmax.f32 %v780_v48, %v786_v38  ;;  %v1032_v15 = vmax.f32 %v967_v23, %v786_v38  ;;  %v972_v49 = vrot.slane %v177_v4, 2  ;;  %v973_v1 = vrot.slane %v178_v20, 2 }
  0xb0   : > { %v965_v13 = vmax.f32 %v897_v42, %v1772_v5  ;;  %v710_v57 = vmax.f32 %v653_v2, %v1763_v33  ;;  %v909_v40 = vsel %vm237_vm0, %v907_v34, %v908_v63  ;;  %v910_v58 = vrot.slane %v179_v53, 1 }
  0xb1   : > { %1091 = vst.msk [vmem:[%s1281_s15 + $0x1a0] sm:$0xff] %vm1037_vm2, %v1032_v15  ;;  %v969_v61 = vmax.f32 %v901_v28, %v909_v40  ;;  %v974_v41 = vsel %vm447_vm1, %v972_v49, %v973_v1  ;;  %v902_v43 = vmax.f32 %v845_v37, %v178_v20  ;;  %v975_v56 = vrot.slane %v179_v53, 2 }
  0xb2   : > { %v1030_v22 = vmax.f32 %v965_v13, %v1775_v39  ;;  %v778_v31 = vmax.f32 %v710_v57, %v1772_v5  ;;  %v911_v0 = vsel %vm237_vm0, %v908_v63, %v910_v58  ;;  %v446_v35 = vmax.f32 %v1763_v33, %v1772_v5 }
  0xb3   : > { %v1034_v25 = vmax.f32 %v969_v61, %v974_v41  ;;  %v970_v29 = vmax.f32 %v902_v43, %v911_v0  ;;  %v976_v46 = vsel %vm447_vm1, %v973_v1, %v975_v56 }
  0xb4   : > { %1089 = vst.msk [vmem:[%s1281_s15 + $0x190] sm:$0x7] %vm1040_vm3, %v1030_v22  ;;  %v843_v50 = vmax.f32 %v778_v31, %v1775_v39  ;;  %v656_v51 = vmax.f32 %v446_v35, %v1775_v39 }
  0xb5   : > { %1093 = vst.msk [vmem:[%s1281_s15 + $0x1b0] sm:$0xff] %vm1037_vm2, %v1034_v25  ;;  %v1035_v10 = vmax.f32 %v970_v29, %v976_v46 }
  0xb6   : > { %v900_v54 = vmax.f32 %v843_v50, %v1794_v3  ;;  %v713_v9 = vmax.f32 %v656_v51, %v1794_v3 }
  0xb7   : > { %1094 = vst.msk [vmem:[%s1281_s15 + $0x1b8] sm:$0xff] %vm1037_vm2, %v1035_v10 }
  0xb8   : > { %v968_v33 = vmax.f32 %v900_v54, %v720_v45  ;;  %v781_v5 = vmax.f32 %v713_v9, %v720_v45 }
  0xba   : > { %v1033_v55 = vmax.f32 %v968_v33, %v785_v12  ;;  %v846_v59 = vmax.f32 %v781_v5, %v785_v12 }
  0xbc   : > { %1092 = vst.msk [vmem:[%s1281_s15 + $0x1a8] sm:$0x7] %vm1040_vm3, %v1033_v55  ;;  %v903_v18 = vmax.f32 %v846_v59, %v179_v53 }
  0xbe   : > { %v971_v60 = vmax.f32 %v903_v18, %v910_v58 }
  0xc0   : > { %v1036_v8 = vmax.f32 %v971_v60, %v975_v56 }
  0xc2   : > { %1095 = vst.msk [vmem:[%s1281_s15 + $0x1c0] sm:$0x7] %vm1040_vm3, %v1036_v8 }
  0xc3 PF: > { %s11_s6 = sadd.s32 1, %s1176_s6  }
  0xc4   : > { %p8_p4 = scmp.ge.s32.totalorder %s11_s6, 4  }
  0xc6   :  { %10 = sbr.rel (!%p8_p4) target bundleno = 1 (0x1), region = 54 }

// kernel: incept_init_block.19
= control target key start
LH: loop header
LB: loop body
LE: loop exit
PB: predicated region body
PF: predicated region fallthrough
CT: control target
= control target key end

     0   :  { %s415_s6 = smov 0   ;;  %s515_s0 = inlined_call_operand.vmem [shape: f32[2,8,8,192], index: 0, kind: input, shape index: {}]   ;;  %s516_s1 = inlined_call_operand.vmem [shape: f32[2,6,6,192], index: 1, kind: output, shape index: {}]  }
   0x1 LB: > { %s377_s7 = sadd.s32 4294967295, %s403_s6   ;;  %p381_p0 = scmp.ge.s32.totalorder %s403_s6, 1  ;;  %s403_s6 = sphi %s415_s6, %s11_s6  }
   0x2   : > { %p87_p1 = scmp.lt.s32.totalorder %s403_s6, 3 }
   0x4   : > { %p88_p2 = pnand %p381_p0, %p87_p1 }
   0x5   : > { %p107_p3 = scmp.lt.s32.totalorder (!%p88_p2), %s377_s7, 1 }
   0x6   : > { %91 = sbr.rel (%p88_p2) target bundleno = 53 (0x35), region = 24 }
   0xb   : > { %s518_s7 = smov (!%p107_p3, %s377_s7), 1  ;;  %vm310_vm0 = vcmask 521216  }
   0xc   : > { %s387_s8 = sshll.u32 %s518_s7, 7  ;;  %s388_s12 = smul.u32 96, %s518_s7 }
   0xd   : > { %s429_s11 = scalar_lea.vmem %s515_s0, %s387_s8 }
   0xe   : > { %v117_v0 = vld [vmem:[%s429_s11] sm:$0xff]  ;;  %v119_v1 = vld [vmem:[%s429_s11 + $0x10] sm:$0xff]  ;;  %v118_v7 = vld [vmem:[%s429_s11 + $0x8] sm:$0xff]  ;;  %s481_s15 = scalar_lea.vmem %s516_s1, %s388_s12 }
   0xf   : > { %v434_v2 = vld [vmem:[%s429_s11 + $0x20] sm:$0xff]  ;;  %v145_v3 = vrot.slane %v117_v0, 1  ;;  %v147_v4 = vrot.slane %v119_v1, 1  ;;  %v181_v6 = vrot.slane %v117_v0, 2  ;;  %v120_v8 = vld [vmem:[%s429_s11 + $0x18] sm:$0xff]  ;;  %v183_v9 = vrot.slane %v119_v1, 2 }
  0x10   : > { %v437_v5 = vrot.slane %v434_v2, 1  ;;  %v442_v10 = vrot.slane %v434_v2, 2  ;;  %v445_v11 = vld [vmem:[%s429_s11 + $0x28] sm:$0xff]  ;;  %v146_v12 = vrot.slane %v118_v7, 1  ;;  %v148_v13 = vrot.slane %v120_v8, 1  ;;  %v123_v18 = vld [vmem:[%s429_s11 + $0x30] sm:$0xff] }
  0x11   : > { %v169_v14 = vmax.f32 %v117_v0, %v145_v3  ;;  %v171_v15 = vmax.f32 %v119_v1, %v147_v4  ;;  %v150_v17 = vrot.slane %v445_v11, 1  ;;  %v182_v21 = vrot.slane %v118_v7, 2  ;;  %v124_v23 = vld [vmem:[%s429_s11 + $0x38] sm:$0xff]  ;;  %v459_v36 = vld [vmem:[%s429_s11 + $0x40] sm:$0xff]  ;;  %v126_v45 = vld [vmem:[%s429_s11 + $0x48] sm:$0xff] }
  0x12   : > { %v173_v16 = vmax.f32 %v434_v2, %v437_v5  ;;  %v170_v19 = vmax.f32 %v118_v7, %v146_v12  ;;  %v172_v20 = vmax.f32 %v120_v8, %v148_v13  ;;  %v184_v22 = vrot.slane %v120_v8, 2  ;;  %v127_v62 = vld [vmem:[%s429_s11 + $0x50] sm:$0xff] }
  0x13   : > { %v205_v24 = vmax.f32 %v169_v14, %v181_v6  ;;  %v207_v25 = vmax.f32 %v171_v15, %v183_v9  ;;  %v174_v27 = vmax.f32 %v445_v11, %v150_v17  ;;  %v455_v28 = vrot.slane %v445_v11, 2 }
  0x14   : > { %v209_v26 = vmax.f32 %v173_v16, %v442_v10  ;;  %v206_v29 = vmax.f32 %v170_v19, %v182_v21  ;;  %v208_v30 = vmax.f32 %v172_v20, %v184_v22  ;;  %v151_v31 = vrot.slane %v123_v18, 1 }
  0x15   : > { %v217_v32 = vmax.f32 %v205_v24, %v119_v1  ;;  %v187_v33 = vrot.slane %v123_v18, 2  ;;  %v219_v34 = vmax.f32 %v207_v25, %v434_v2  ;;  %v152_v35 = vrot.slane %v124_v23, 1  ;;  %v129_v25 = vld [vmem:[%s429_s11 + $0x60] sm:$0xff] }
  0x16   : > { %v210_v37 = vmax.f32 %v174_v27, %v455_v28  ;;  %v218_v38 = vmax.f32 %v206_v29, %v120_v8  ;;  %v175_v39 = vmax.f32 %v123_v18, %v151_v31  ;;  %v188_v40 = vrot.slane %v124_v23, 2 }
  0x17   : > { %v235_v41 = vmax.f32 %v217_v32, %v147_v4  ;;  %v237_v42 = vmax.f32 %v219_v34, %v437_v5  ;;  %v176_v43 = vmax.f32 %v124_v23, %v152_v35  ;;  %v220_v44 = vmax.f32 %v208_v30, %v445_v11 }
  0x18   : > { %v236_v46 = vmax.f32 %v218_v38, %v148_v13  ;;  %v211_v47 = vmax.f32 %v175_v39, %v187_v33  ;;  %v153_v48 = vrot.slane %v459_v36, 1  ;;  %v467_v49 = vrot.slane %v459_v36, 2  ;;  %v128_v13 = vld [vmem:[%s429_s11 + $0x58] sm:$0xff] }
  0x19   : > { %v251_v50 = vmax.f32 %v235_v41, %v183_v9  ;;  %v253_v51 = vmax.f32 %v237_v42, %v442_v10  ;;  %v212_v52 = vmax.f32 %v176_v43, %v188_v40  ;;  %v238_v53 = vmax.f32 %v220_v44, %v150_v17 }
  0x1a   : > { %v252_v54 = vmax.f32 %v236_v46, %v184_v22  ;;  %v177_v55 = vmax.f32 %v459_v36, %v153_v48  ;;  %v221_v56 = vmax.f32 %v209_v26, %v123_v18  ;;  %v154_v57 = vrot.slane %v126_v45, 1  ;;  %v131_v46 = vld [vmem:[%s429_s11 + $0x70] sm:$0xff] }
  0x1b   : > { %v263_v58 = vmax.f32 %v251_v50, %v434_v2  ;;  %v265_v59 = vmax.f32 %v253_v51, %v123_v18  ;;  %v254_v60 = vmax.f32 %v238_v53, %v455_v28  ;;  %v190_v61 = vrot.slane %v126_v45, 2 }
  0x1c   : > { %v264_v63 = vmax.f32 %v252_v54, %v445_v11  ;;  %v213_v0 = vmax.f32 %v177_v55, %v467_v49  ;;  %v239_v1 = vmax.f32 %v221_v56, %v151_v31  ;;  %v178_v3 = vmax.f32 %v126_v45, %v154_v57  ;;  %v132_v56 = vld [vmem:[%s429_s11 + $0x78] sm:$0xff] }
  0x1d   : > { %v281_v4 = vmax.f32 %v263_v58, %v437_v5  ;;  %v283_v6 = vmax.f32 %v265_v59, %v151_v31  ;;  %v266_v7 = vmax.f32 %v254_v60, %v124_v23  ;;  %v222_v8 = vmax.f32 %v210_v37, %v124_v23  ;;  %v130_v37 = vld [vmem:[%s429_s11 + $0x68] sm:$0xff] }
  0x1e   : > { %v282_v2 = vmax.f32 %v264_v63, %v150_v17  ;;  %v255_v9 = vmax.f32 %v239_v1, %v187_v33  ;;  %v214_v12 = vmax.f32 %v178_v3, %v190_v61  ;;  %v155_v11 = vrot.slane %v127_v62, 1 }
  0x1f   : > { %v297_v14 = vmax.f32 %v281_v4, %v442_v10  ;;  %v299_v15 = vmax.f32 %v283_v6, %v187_v33  ;;  %v284_v5 = vmax.f32 %v266_v7, %v152_v35  ;;  %v240_v16 = vmax.f32 %v222_v8, %v152_v35 }
  0x20   : > { %v298_v18 = vmax.f32 %v282_v2, %v455_v28  ;;  %v267_v19 = vmax.f32 %v255_v9, %v459_v36  ;;  %v179_v20 = vmax.f32 %v127_v62, %v155_v11  ;;  %v191_v21 = vrot.slane %v127_v62, 2 }
  0x21   : > { %309 = vst [vmem:[%s481_s15] sm:$0x3f] %v297_v14  ;;  %v300_v17 = vmax.f32 %v284_v5, %v188_v40  ;;  %v256_v22 = vmax.f32 %v240_v16, %v188_v40  ;;  %v223_v23 = vmax.f32 %v211_v47, %v459_v36  ;;  %v156_v24 = vrot.slane %v128_v13, 1 }
  0x22   : > { %311 = vst.msk [vmem:[%s481_s15 + $0x8] sm:$0x3f] %vm310_vm0, %v298_v18  ;;  %v285_v10 = vmax.f32 %v267_v19, %v153_v48  ;;  %v215_v26 = vmax.f32 %v179_v20, %v191_v21  ;;  %v192_v27 = vrot.slane %v128_v13, 2  ;;  %v224_v29 = vmax.f32 %v212_v52, %v126_v45 }
  0x23   : > { %312 = vst [vmem:[%s481_s15 + $0x10] sm:$0x3f] %v299_v15  ;;  %v268_v28 = vmax.f32 %v256_v22, %v126_v45  ;;  %v241_v30 = vmax.f32 %v223_v23, %v153_v48  ;;  %v180_v31 = vmax.f32 %v128_v13, %v156_v24  ;;  %v225_v32 = vmax.f32 %v213_v0, %v127_v62 }
  0x24   : > { %313 = vst.msk [vmem:[%s481_s15 + $0x18] sm:$0x3f] %vm310_vm0, %v300_v17  ;;  %v301_v33 = vmax.f32 %v285_v10, %v467_v49  ;;  %v242_v34 = vmax.f32 %v224_v29, %v154_v57  ;;  %v227_v35 = vmax.f32 %v215_v26, %v129_v25  ;;  %v231_v36 = vrot.slane %v129_v25, 1 }
  0x25   : > { %v286_v38 = vmax.f32 %v268_v28, %v154_v57  ;;  %v257_v39 = vmax.f32 %v241_v30, %v467_v49  ;;  %v216_v40 = vmax.f32 %v180_v31, %v192_v27  ;;  %v243_v41 = vmax.f32 %v225_v32, %v155_v11 }
  0x26   : > { %314 = vst [vmem:[%s481_s15 + $0x20] sm:$0x3f] %v301_v33  ;;  %v258_v42 = vmax.f32 %v242_v34, %v190_v61  ;;  %v245_v43 = vmax.f32 %v227_v35, %v231_v36  ;;  %v247_v44 = vrot.slane %v129_v25, 2  ;;  %v226_v45 = vmax.f32 %v214_v12, %v128_v13 }
  0x27   : > { %v302_v47 = vmax.f32 %v286_v38, %v190_v61  ;;  %v269_v48 = vmax.f32 %v257_v39, %v127_v62  ;;  %v259_v50 = vmax.f32 %v243_v41, %v191_v21  ;;  %v228_v51 = vmax.f32 %v216_v40, %v130_v37 }
  0x28   : > { %v270_v52 = vmax.f32 %v258_v42, %v128_v13  ;;  %v261_v53 = vmax.f32 %v245_v43, %v247_v44  ;;  %v232_v54 = vrot.slane %v130_v37, 1  ;;  %v244_v55 = vmax.f32 %v226_v45, %v156_v24 }
  0x29   : > { %315 = vst.msk [vmem:[%s481_s15 + $0x28] sm:$0x3f] %vm310_vm0, %v302_v47  ;;  %v287_v49 = vmax.f32 %v269_v48, %v155_v11  ;;  %v271_v57 = vmax.f32 %v259_v50, %v129_v25  ;;  %v248_v58 = vrot.slane %v130_v37, 2  ;;  %v277_v59 = vrot.slane %v131_v46, 1 }
  0x2a   : > { %v288_v60 = vmax.f32 %v270_v52, %v156_v24  ;;  %v246_v63 = vmax.f32 %v228_v51, %v232_v54  ;;  %v260_v0 = vmax.f32 %v244_v55, %v192_v27  ;;  %v273_v61 = vmax.f32 %v261_v53, %v131_v46 }
  0x2b   : > { %v303_v62 = vmax.f32 %v287_v49, %v191_v21  ;;  %v289_v1 = vmax.f32 %v271_v57, %v231_v36  ;;  %v293_v3 = vrot.slane %v131_v46, 2  ;;  %v278_v4 = vrot.slane %v132_v56, 1 }
  0x2c   : > { %v304_v6 = vmax.f32 %v288_v60, %v192_v27  ;;  %v262_v7 = vmax.f32 %v246_v63, %v248_v58  ;;  %v272_v8 = vmax.f32 %v260_v0, %v130_v37  ;;  %v291_v2 = vmax.f32 %v273_v61, %v277_v59 }
  0x2d   : > { %316 = vst [vmem:[%s481_s15 + $0x30] sm:$0x3f] %v303_v62  ;;  %v305_v9 = vmax.f32 %v289_v1, %v247_v44  ;;  %v294_v14 = vrot.slane %v132_v56, 2 }
  0x2e   : > { %317 = vst.msk [vmem:[%s481_s15 + $0x38] sm:$0x3f] %vm310_vm0, %v304_v6  ;;  %v290_v12 = vmax.f32 %v272_v8, %v232_v54  ;;  %v307_v11 = vmax.f32 %v291_v2, %v293_v3  ;;  %v274_v13 = vmax.f32 %v262_v7, %v132_v56 }
  0x2f   : > { %318 = vst [vmem:[%s481_s15 + $0x40] sm:$0x3f] %v305_v9 }
  0x30   : > { %v306_v15 = vmax.f32 %v290_v12, %v248_v58  ;;  %320 = vst [vmem:[%s481_s15 + $0x50] sm:$0x3f] %v307_v11  ;;  %v292_v5 = vmax.f32 %v274_v13, %v278_v4 }
  0x32   : > { %319 = vst.msk [vmem:[%s481_s15 + $0x48] sm:$0x3f] %vm310_vm0, %v306_v15  ;;  %v308_v16 = vmax.f32 %v292_v5, %v294_v14 }
  0x34   : > { %321 = vst.msk [vmem:[%s481_s15 + $0x58] sm:$0x3f] %vm310_vm0, %v308_v16 }
  0x35 PF: > { %s11_s6 = sadd.s32 1, %s403_s6  }
  0x36   : > { %p8_p4 = scmp.ge.s32.totalorder %s11_s6, 4  }
  0x38   :  { %10 = sbr.rel (!%p8_p4) target bundleno = 1 (0x1), region = 54 }

// kernel: incept_init_block.18
= control target key start
LH: loop header
LB: loop body
LE: loop exit
PB: predicated region body
PF: predicated region fallthrough
CT: control target
= control target key end

     0   :  { %vm841_vm0 = vcmask 654336   ;;  %s3519_s1 = inlined_call_operand.vmem [shape: bf16[720,256], index: 1, kind: input, shape index: {}]   ;;  %s3520_s0 = inlined_call_operand.vmem [shape: bf16[128,720], index: 0, kind: input, shape index: {}]   ;;  %s3521_s2 = inlined_call_operand.vmem [shape: f32[1,256], index: 2, kind: input, shape index: {}]   ;;  %s3522_s3 = inlined_call_operand.vmem [shape: f32[128,256], index: 3, kind: output, shape index: {}]  }
   0x1   :  { %v1772_v0 = vld [vmem:[%s3519_s1 + $0x70] sm:$0xf]  ;;  %v2153_v1 = vld [vmem:[%s3519_s1 + $0x74] sm:$0xf0]  ;;  %v1764_v11 = vld [vmem:[%s3519_s1 + $0x60] sm:$0xf] }
   0x2   :  { %v1836_v2 = vld [vmem:[%s3519_s1 + $0xf0] sm:$0xf]  ;;  %v1773_v3 = vor.u32 %v2153_v1, %v1772_v0  ;;  %v2169_v4 = vld [vmem:[%s3519_s1 + $0xf4] sm:$0xf0]  ;;  %v2151_v13 = vld [vmem:[%s3519_s1 + $0x64] sm:$0xf0] }
   0x3   :  { %v1900_v5 = vld [vmem:[%s3519_s1 + $0x170] sm:$0xf]  ;;  %v2185_v6 = vld [vmem:[%s3519_s1 + $0x174] sm:$0xf0]  ;;  %v1837_v7 = vor.u32 %v2169_v4, %v1836_v2  ;;  %v1828_v14 = vld [vmem:[%s3519_s1 + $0xe0] sm:$0xf]  ;;  %v1765_v16 = vor.u32 %v2151_v13, %v1764_v11 }
   0x4   :  { %v1901_v8 = vor.u32 %v2185_v6, %v1900_v5  ;;  %v1964_v9 = vld [vmem:[%s3519_s1 + $0x1f0] sm:$0xf]  ;;  %v2201_v10 = vld [vmem:[%s3519_s1 + $0x1f4] sm:$0xf0]  ;;  %866 = vmatpush.bf16.msra.mxu0 %v1773_v3  ;;  %v2167_v15 = vld [vmem:[%s3519_s1 + $0xe4] sm:$0xf0] }
   0x5   :  { %v1965_v12 = vor.u32 %v2201_v10, %v1964_v9  ;;  %915 = vmatpush.bf16.msra.mxu1 %v1837_v7  ;;  %v1829_v17 = vor.u32 %v2167_v15, %v1828_v14  ;;  %v1892_v18 = vld [vmem:[%s3519_s1 + $0x160] sm:$0xf]  ;;  %v2183_v19 = vld [vmem:[%s3519_s1 + $0x164] sm:$0xf0]  ;;  %v1756_v23 = vld [vmem:[%s3519_s1 + $0x50] sm:$0xf] }
   0x6   :  { %964 = vmatpush.bf16.msra.mxu2 %v1901_v8  ;;  %v1956_v20 = vld [vmem:[%s3519_s1 + $0x1e0] sm:$0xf]  ;;  %v1893_v21 = vor.u32 %v2183_v19, %v1892_v18  ;;  %v2199_v22 = vld [vmem:[%s3519_s1 + $0x1e4] sm:$0xf0]  ;;  %v2149_v24 = vld [vmem:[%s3519_s1 + $0x54] sm:$0xf0] }
   0x7   :  { %1013 = vmatpush.bf16.msra.mxu3 %v1965_v12  ;;  %v1957_v25 = vor.u32 %v2199_v22, %v1956_v20  ;;  %v1820_v26 = vld [vmem:[%s3519_s1 + $0xd0] sm:$0xf]  ;;  %v2165_v27 = vld [vmem:[%s3519_s1 + $0xd4] sm:$0xf0]  ;;  %v1757_v29 = vor.u32 %v2149_v24, %v1756_v23  ;;  %v1748_v35 = vld [vmem:[%s3519_s1 + $0x40] sm:$0xf] }
   0x8   :  { %v1884_v28 = vld [vmem:[%s3519_s1 + $0x150] sm:$0xf]  ;;  %867 = vmatpush.bf16.msra.mxu0 %v1765_v16  ;;  %v2181_v30 = vld [vmem:[%s3519_s1 + $0x154] sm:$0xf0]  ;;  %v1821_v33 = vor.u32 %v2165_v27, %v1820_v26  ;;  %v2147_v36 = vld [vmem:[%s3519_s1 + $0x44] sm:$0xf0] }
   0x9   :  { %v1948_v31 = vld [vmem:[%s3519_s1 + $0x1d0] sm:$0xf]  ;;  %v2197_v32 = vld [vmem:[%s3519_s1 + $0x1d4] sm:$0xf0]  ;;  %916 = vmatpush.bf16.msra.mxu1 %v1829_v17  ;;  %v1885_v34 = vor.u32 %v2181_v30, %v1884_v28  ;;  %v1812_v37 = vld [vmem:[%s3519_s1 + $0xc0] sm:$0xf]  ;;  %v1749_v44 = vor.u32 %v2147_v36, %v1748_v35 }
   0xa   :  { %965 = vmatpush.bf16.msra.mxu2 %v1893_v21  ;;  %v1949_v38 = vor.u32 %v2197_v32, %v1948_v31  ;;  %v2163_v39 = vld [vmem:[%s3519_s1 + $0xc4] sm:$0xf0]  ;;  %v1876_v40 = vld [vmem:[%s3519_s1 + $0x140] sm:$0xf]  ;;  %v1740_v47 = vld [vmem:[%s3519_s1 + $0x30] sm:$0xf] }
   0xb   :  { %1014 = vmatpush.bf16.msra.mxu3 %v1957_v25  ;;  %v2179_v41 = vld [vmem:[%s3519_s1 + $0x144] sm:$0xf0]  ;;  %v1940_v42 = vld [vmem:[%s3519_s1 + $0x1c0] sm:$0xf]  ;;  %v1813_v45 = vor.u32 %v2163_v39, %v1812_v37  ;;  %v2145_v48 = vld [vmem:[%s3519_s1 + $0x34] sm:$0xf0] }
   0xc   :  { %v2195_v43 = vld [vmem:[%s3519_s1 + $0x1c4] sm:$0xf0]  ;;  %868 = vmatpush.bf16.msra.mxu0 %v1757_v29  ;;  %v1877_v46 = vor.u32 %v2179_v41, %v1876_v40  ;;  %v1804_v49 = vld [vmem:[%s3519_s1 + $0xb0] sm:$0xf]  ;;  %v2161_v51 = vld [vmem:[%s3519_s1 + $0xb4] sm:$0xf0]  ;;  %v1741_v56 = vor.u32 %v2145_v48, %v1740_v47 }
   0xd   :  { %917 = vmatpush.bf16.msra.mxu1 %v1821_v33  ;;  %v1941_v50 = vor.u32 %v2195_v43, %v1940_v42  ;;  %v1868_v52 = vld [vmem:[%s3519_s1 + $0x130] sm:$0xf]  ;;  %v2177_v53 = vld [vmem:[%s3519_s1 + $0x134] sm:$0xf0]  ;;  %v1805_v57 = vor.u32 %v2161_v51, %v1804_v49  ;;  %v1732_v59 = vld [vmem:[%s3519_s1 + $0x20] sm:$0xf] }
   0xe   :  { %966 = vmatpush.bf16.msra.mxu2 %v1885_v34  ;;  %v1932_v54 = vld [vmem:[%s3519_s1 + $0x1b0] sm:$0xf]  ;;  %v2193_v55 = vld [vmem:[%s3519_s1 + $0x1b4] sm:$0xf0]  ;;  %v1869_v58 = vor.u32 %v2177_v53, %v1868_v52  ;;  %v2143_v60 = vld [vmem:[%s3519_s1 + $0x24] sm:$0xf0] }
   0xf   :  { %1015 = vmatpush.bf16.msra.mxu3 %v1949_v38  ;;  %v1796_v61 = vld [vmem:[%s3519_s1 + $0xa0] sm:$0xf]  ;;  %v1933_v62 = vor.u32 %v2193_v55, %v1932_v54  ;;  %v2159_v63 = vld [vmem:[%s3519_s1 + $0xa4] sm:$0xf0]  ;;  %v1733_v4 = vor.u32 %v2143_v60, %v1732_v59  ;;  %v1724_v7 = vld [vmem:[%s3519_s1 + $0x10] sm:$0xf] }
  0x10   :  { %869 = vmatpush.bf16.msra.mxu0 %v1749_v44  ;;  %v1860_v0 = vld [vmem:[%s3519_s1 + $0x120] sm:$0xf]  ;;  %v2175_v1 = vld [vmem:[%s3519_s1 + $0x124] sm:$0xf0]  ;;  %v1797_v5 = vor.u32 %v2159_v63, %v1796_v61  ;;  %v2141_v8 = vld [vmem:[%s3519_s1 + $0x14] sm:$0xf0] }
  0x11   :  { %918 = vmatpush.bf16.msra.mxu1 %v1813_v45  ;;  %v1924_v2 = vld [vmem:[%s3519_s1 + $0x1a0] sm:$0xf]  ;;  %v2191_v3 = vld [vmem:[%s3519_s1 + $0x1a4] sm:$0xf0]  ;;  %v1861_v6 = vor.u32 %v2175_v1, %v1860_v0  ;;  %v1788_v9 = vld [vmem:[%s3519_s1 + $0x90] sm:$0xf]  ;;  %v1725_v17 = vor.u32 %v2141_v8, %v1724_v7 }
  0x12   :  { %967 = vmatpush.bf16.msra.mxu2 %v1877_v46  ;;  %v1925_v10 = vor.u32 %v2191_v3, %v1924_v2  ;;  %v2157_v11 = vld [vmem:[%s3519_s1 + $0x94] sm:$0xf0]  ;;  %v1852_v12 = vld [vmem:[%s3519_s1 + $0x110] sm:$0xf]  ;;  %v1716_v16 = vld [vmem:[%s3519_s1] sm:$0xf] }
  0x13   :  { %1016 = vmatpush.bf16.msra.mxu3 %v1941_v50  ;;  %v2173_v13 = vld [vmem:[%s3519_s1 + $0x114] sm:$0xf0]  ;;  %v1916_v14 = vld [vmem:[%s3519_s1 + $0x190] sm:$0xf]  ;;  %v2139_v18 = vld [vmem:[%s3519_s1 + $0x4] sm:$0xf0]  ;;  %v1789_v21 = vor.u32 %v2157_v11, %v1788_v9 }
  0x14   :  { %870 = vmatpush.bf16.msra.mxu0 %v1741_v56  ;;  %v2189_v15 = vld [vmem:[%s3519_s1 + $0x194] sm:$0xf0]  ;;  %v1780_v19 = vld [vmem:[%s3519_s1 + $0x80] sm:$0xf]  ;;  %v2155_v20 = vld [vmem:[%s3519_s1 + $0x84] sm:$0xf0]  ;;  %v1853_v22 = vor.u32 %v2173_v13, %v1852_v12  ;;  %v1717_v34 = vor.u32 %v2139_v18, %v1716_v16 }
  0x15   :  { %919 = vmatpush.bf16.msra.mxu1 %v1805_v57  ;;  %v1844_v23 = vld [vmem:[%s3519_s1 + $0x100] sm:$0xf]  ;;  %v2171_v24 = vld [vmem:[%s3519_s1 + $0x104] sm:$0xf0]  ;;  %v1917_v26 = vor.u32 %v2189_v15, %v1916_v14  ;;  %v2093_v29 = vld [vmem:[%s3520_s0 + $0x14] sm:$0xf0]  ;;  %v1781_v38 = vor.u32 %v2155_v20, %v1780_v19 }
  0x16   :  { %968 = vmatpush.bf16.msra.mxu2 %v1869_v58  ;;  %v1908_v25 = vld [vmem:[%s3519_s1 + $0x180] sm:$0xf]  ;;  %v2187_v27 = vld [vmem:[%s3519_s1 + $0x184] sm:$0xf0]  ;;  %v2090_v30 = vld [vmem:[%s3520_s0 + $0x4] sm:$0xf]  ;;  %v1845_v39 = vor.u32 %v2171_v24, %v1844_v23 }
  0x17   :  { %1017 = vmatpush.bf16.msra.mxu3 %v1933_v62  ;;  %v1524_v28 = vld [vmem:[%s3520_s0] sm:$0xf]  ;;  %v1526_v31 = vld [vmem:[%s3520_s0 + $0x18] sm:$0xf0]  ;;  %v2152_v32 = vld [vmem:[%s3519_s1 + $0x74] sm:$0xf]  ;;  %v1909_v43 = vor.u32 %v2187_v27, %v1908_v25 }
  0x18   :  { %871 = vmatpush.bf16.msra.mxu0 %v1733_v4  ;;  %v1774_v33 = vld [vmem:[%s3519_s1 + $0x78] sm:$0xf0]  ;;  %v1532_v35 = vld [vmem:[%s3520_s0 + $0x8] sm:$0xf]  ;;  %v2168_v36 = vld [vmem:[%s3519_s1 + $0xf4] sm:$0xf]  ;;  %v2485_v48 = vor.u32 %v2093_v29, %v1524_v28  ;;  %v2496_v53 = vor.u32 %v2090_v30, %v1526_v31 }
  0x19   :  { %920 = vmatpush.bf16.msra.mxu1 %v1797_v5  ;;  %v1838_v37 = vld [vmem:[%s3519_s1 + $0xf8] sm:$0xf0]  ;;  %v2094_v40 = vld [vmem:[%s3520_s0 + $0x1c] sm:$0xf0]  ;;  %v2091_v41 = vld [vmem:[%s3520_s0 + $0xc] sm:$0xf]  ;;  %v1777_v44 = vor.u32 %v2152_v32, %v1774_v33 }
  0x1a   :  { %969 = vmatpush.bf16.msra.mxu2 %v1861_v6  ;;  %v1534_v42 = vld [vmem:[%s3520_s0 + $0x20] sm:$0xf0]  ;;  %v2028_v45 = vld [vmem:[%s3519_s1 + $0x270] sm:$0xf]  ;;  %v2217_v46 = vld [vmem:[%s3519_s1 + $0x274] sm:$0xf0]  ;;  %v1841_v49 = vor.u32 %v2168_v36, %v1838_v37  ;;  %v2498_v54 = vor.u32 %v2094_v40, %v1532_v35 }
  0x1b   :  { %1018 = vmatpush.bf16.msra.mxu3 %v1925_v10  ;;  %v2068_v47 = vld [vmem:[%s3519_s1 + $0x2c0] sm:$0xf]  ;;  %v2227_v50 = vld [vmem:[%s3519_s1 + $0x2c4] sm:$0xf0]  ;;  %v2150_v51 = vld [vmem:[%s3519_s1 + $0x64] sm:$0xf]  ;;  %v2506_v57 = vor.u32 %v2091_v41, %v1534_v42  ;;  %v2029_v58 = vor.u32 %v2217_v46, %v2028_v45 }
  0x1c   :  { %872 = vmatpush.bf16.msra.mxu0 %v1725_v17  ;;  %v1766_v52 = vld [vmem:[%s3519_s1 + $0x68] sm:$0xf0]  ;;  %v2166_v55 = vld [vmem:[%s3519_s1 + $0xe4] sm:$0xf]  ;;  %v2069_v59 = vor.u32 %v2227_v50, %v2068_v47  ;;  %v2020_v61 = vld [vmem:[%s3519_s1 + $0x260] sm:$0xf] }
  0x1d   :  { %921 = vmatpush.bf16.msra.mxu1 %v1789_v21  ;;  %v1830_v56 = vld [vmem:[%s3519_s1 + $0xe8] sm:$0xf0]  ;;  %v1769_v60 = vor.u32 %v2150_v51, %v1766_v52  ;;  %v2215_v62 = vld [vmem:[%s3519_s1 + $0x264] sm:$0xf0]  ;;  %v2060_v0 = vld [vmem:[%s3519_s1 + $0x2b0] sm:$0xf] }
  0x1e   :  { %970 = vmatpush.bf16.msra.mxu2 %v1853_v22  ;;  %v1833_v63 = vor.u32 %v2166_v55, %v1830_v56  ;;  %v2225_v1 = vld [vmem:[%s3519_s1 + $0x2b4] sm:$0xf0]  ;;  %v2021_v2 = vor.u32 %v2215_v62, %v2020_v61  ;;  %v2148_v3 = vld [vmem:[%s3519_s1 + $0x54] sm:$0xf]  ;;  %v1758_v4 = vld [vmem:[%s3519_s1 + $0x58] sm:$0xf0] }
  0x1f   :  { %1019 = vmatpush.bf16.msra.mxu3 %v1917_v26  ;;  %v2012_v5 = vld [vmem:[%s3519_s1 + $0x250] sm:$0xf]  ;;  %v2061_v6 = vor.u32 %v2225_v1, %v2060_v0  ;;  %v1761_v7 = vor.u32 %v2148_v3, %v1758_v4  ;;  %v2213_v8 = vld [vmem:[%s3519_s1 + $0x254] sm:$0xf0]  ;;  %v2164_v9 = vld [vmem:[%s3519_s1 + $0xd4] sm:$0xf] }
  0x20   :  { %873 = vmatpush.bf16.msra.mxu0 %v1717_v34  ;;  %v1822_v10 = vld [vmem:[%s3519_s1 + $0xd8] sm:$0xf0]  ;;  %v2013_v12 = vor.u32 %v2213_v8, %v2012_v5  ;;  %v1548_v13 = vld [vmem:[%s3520_s0 + $0x30] sm:$0xf]  ;;  %v2099_v14 = vld [vmem:[%s3520_s0 + $0x44] sm:$0xf0] }
  0x21   :  { %922 = vmatpush.bf16.msra.mxu1 %v1781_v38  ;;  %v1825_v11 = vor.u32 %v2164_v9, %v1822_v10  ;;  %v2096_v15 = vld [vmem:[%s3520_s0 + $0x34] sm:$0xf]  ;;  %v1550_v16 = vld [vmem:[%s3520_s0 + $0x48] sm:$0xf0]  ;;  %v1556_v17 = vld [vmem:[%s3520_s0 + $0x38] sm:$0xf]  ;;  %v2566_v21 = vor.u32 %v2099_v14, %v1548_v13 }
  0x22   :  { %971 = vmatpush.bf16.msra.mxu2 %v1845_v39  ;;  %v2100_v18 = vld [vmem:[%s3520_s0 + $0x4c] sm:$0xf0]  ;;  %v2097_v19 = vld [vmem:[%s3520_s0 + $0x3c] sm:$0xf]  ;;  %v1558_v20 = vld [vmem:[%s3520_s0 + $0x50] sm:$0xf0]  ;;  %v2568_v22 = vor.u32 %v2096_v15, %v1550_v16 }
  0x23   :  { %1020 = vmatpush.bf16.msra.mxu3 %v1909_v43  ;;  %874 = vmatmul.bf16.vlgmr.msra.gmra.mxu0 %v2485_v48  ;;  %v2570_v23 = vor.u32 %v2100_v18, %v1556_v17  ;;  %v2572_v24 = vor.u32 %v2097_v19, %v1558_v20  ;;  %v2146_v25 = vld [vmem:[%s3519_s1 + $0x44] sm:$0xf]  ;;  %v1750_v26 = vld [vmem:[%s3519_s1 + $0x48] sm:$0xf0]  ;;  %v2004_v27 = vld [vmem:[%s3519_s1 + $0x240] sm:$0xf] }
  0x24   :  { %923 = vmatmul.bf16.vlgmr.msra.gmra.mxu1 %v2496_v53  ;;  %1062 = vmatpush.bf16.msrb.mxu0 %v2029_v58  ;;  %v1753_v28 = vor.u32 %v2146_v25, %v1750_v26  ;;  %v2211_v29 = vld [vmem:[%s3519_s1 + $0x244] sm:$0xf0]  ;;  %v2162_v30 = vld [vmem:[%s3519_s1 + $0xc4] sm:$0xf]  ;;  %v1814_v31 = vld [vmem:[%s3519_s1 + $0xc8] sm:$0xf0] }
  0x25   :  { %972 = vmatmul.bf16.vlgmr.msra.gmra.mxu2 %v2498_v54  ;;  %1114 = vmatpush.bf16.msrb.mxu1 %v2069_v59  ;;  %v2005_v32 = vor.u32 %v2211_v29, %v2004_v27  ;;  %v1817_v33 = vor.u32 %v2162_v30, %v1814_v31  ;;  %v2052_v34 = vld [vmem:[%s3519_s1 + $0x2a0] sm:$0xf]  ;;  %v2223_v35 = vld [vmem:[%s3519_s1 + $0x2a4] sm:$0xf0]  ;;  %v2105_v38 = vld [vmem:[%s3520_s0 + $0x74] sm:$0xf0] }
  0x26   :  { %1160 = vmatpush.bf16.msrb.mxu2 %v1777_v44  ;;  %1021 = vmatmul.bf16.vlgmr.msra.gmra.mxu3 %v2506_v57  ;;  %v2053_v36 = vor.u32 %v2223_v35, %v2052_v34  ;;  %v1572_v37 = vld [vmem:[%s3520_s0 + $0x60] sm:$0xf]  ;;  %v2102_v39 = vld [vmem:[%s3520_s0 + $0x64] sm:$0xf]  ;;  %v1574_v40 = vld [vmem:[%s3520_s0 + $0x78] sm:$0xf0] }
  0x27   :  { %1209 = vmatpush.bf16.msrb.mxu3 %v1841_v49  ;;  %v1580_v41 = vld [vmem:[%s3520_s0 + $0x68] sm:$0xf]  ;;  %v2106_v42 = vld [vmem:[%s3520_s0 + $0x7c] sm:$0xf0]  ;;  %v2103_v43 = vld [vmem:[%s3520_s0 + $0x6c] sm:$0xf]  ;;  %v2626_v45 = vor.u32 %v2105_v38, %v1572_v37  ;;  %v2628_v46 = vor.u32 %v2102_v39, %v1574_v40 }
  0x28   :  { %1063 = vmatpush.bf16.msrb.mxu0 %v2021_v2  ;;  %v1582_v44 = vld [vmem:[%s3520_s0 + $0x80] sm:$0xf0]  ;;  %v2630_v47 = vor.u32 %v2106_v42, %v1580_v41  ;;  %v2144_v50 = vld [vmem:[%s3519_s1 + $0x34] sm:$0xf]  ;;  %v1742_v51 = vld [vmem:[%s3519_s1 + $0x38] sm:$0xf0] }
  0x29   :  { %1115 = vmatpush.bf16.msrb.mxu1 %v2061_v6  ;;  %v2632_v49 = vor.u32 %v2103_v43, %v1582_v44  ;;  %v1996_v52 = vld [vmem:[%s3519_s1 + $0x230] sm:$0xf]  ;;  %v1745_v55 = vor.u32 %v2144_v50, %v1742_v51  ;;  %v2209_v56 = vld [vmem:[%s3519_s1 + $0x234] sm:$0xf0]  ;;  %v2160_v58 = vld [vmem:[%s3519_s1 + $0xb4] sm:$0xf] }
  0x2a   :  { %1161 = vmatpush.bf16.msrb.mxu2 %v1769_v60  ;;  %v1806_v59 = vld [vmem:[%s3519_s1 + $0xb8] sm:$0xf0]  ;;  %v1997_v60 = vor.u32 %v2209_v56, %v1996_v52  ;;  %v1596_v62 = vld [vmem:[%s3520_s0 + $0x90] sm:$0xf]  ;;  %v2108_v0 = vld [vmem:[%s3520_s0 + $0x94] sm:$0xf] }
  0x2b   :  { %1210 = vmatpush.bf16.msrb.mxu3 %v1833_v63  ;;  %v1809_v61 = vor.u32 %v2160_v58, %v1806_v59  ;;  %v2111_v63 = vld [vmem:[%s3520_s0 + $0xa4] sm:$0xf0]  ;;  %v1598_v1 = vld [vmem:[%s3520_s0 + $0xa8] sm:$0xf0]  ;;  %v1604_v2 = vld [vmem:[%s3520_s0 + $0x98] sm:$0xf] }
  0x2c   :  { %1064 = vmatpush.bf16.msrb.mxu0 %v2013_v12  ;;  %v2112_v3 = vld [vmem:[%s3520_s0 + $0xac] sm:$0xf0]  ;;  %v2109_v4 = vld [vmem:[%s3520_s0 + $0x9c] sm:$0xf]  ;;  %v1606_v5 = vld [vmem:[%s3520_s0 + $0xb0] sm:$0xf0]  ;;  %v2680_v6 = vor.u32 %v2111_v63, %v1596_v62 }
  0x2d   :  { %1116 = vmatpush.bf16.msrb.mxu1 %v2053_v36  ;;  %v2684_v8 = vor.u32 %v2112_v3, %v1604_v2  ;;  %v2686_v9 = vor.u32 %v2109_v4, %v1606_v5  ;;  %v2142_v10 = vld [vmem:[%s3519_s1 + $0x24] sm:$0xf]  ;;  %v2044_v12 = vld [vmem:[%s3519_s1 + $0x290] sm:$0xf]  ;;  %v2221_v14 = vld [vmem:[%s3519_s1 + $0x294] sm:$0xf0] }
  0x2e   :  { %1162 = vmatpush.bf16.msrb.mxu2 %v1761_v7  ;;  %v2682_v7 = vor.u32 %v2108_v0, %v1598_v1  ;;  %v1988_v15 = vld [vmem:[%s3519_s1 + $0x220] sm:$0xf]  ;;  %v2207_v16 = vld [vmem:[%s3519_s1 + $0x224] sm:$0xf0]  ;;  %v2045_v17 = vor.u32 %v2221_v14, %v2044_v12  ;;  %v2158_v19 = vld [vmem:[%s3519_s1 + $0xa4] sm:$0xf] }
  0x2f   :  { %1211 = vmatpush.bf16.msrb.mxu3 %v1825_v11  ;;  %v1734_v11 = vld [vmem:[%s3519_s1 + $0x28] sm:$0xf0]  ;;  %v1989_v18 = vor.u32 %v2207_v16, %v1988_v15  ;;  %v1620_v26 = vld [vmem:[%s3520_s0 + $0xc0] sm:$0xf]  ;;  %v2117_v27 = vld [vmem:[%s3520_s0 + $0xd4] sm:$0xf0] }
  0x30   :  { %1065 = vmatpush.bf16.msrb.mxu0 %v2005_v32  ;;  %v1737_v13 = vor.u32 %v2142_v10, %v1734_v11  ;;  %v1798_v20 = vld [vmem:[%s3519_s1 + $0xa8] sm:$0xf0]  ;;  %v1622_v29 = vld [vmem:[%s3520_s0 + $0xd8] sm:$0xf0]  ;;  %v1628_v30 = vld [vmem:[%s3520_s0 + $0xc8] sm:$0xf]  ;;  %v2740_v34 = vor.u32 %v2117_v27, %v1620_v26 }
  0x31   :  { %v1801_v25 = vor.u32 %v2158_v19, %v1798_v20  ;;  %1117 = vmatpush.bf16.msrb.mxu1 %v2045_v17  ;;  %v2118_v31 = vld [vmem:[%s3520_s0 + $0xdc] sm:$0xf0]  ;;  %v2115_v32 = vld [vmem:[%s3520_s0 + $0xcc] sm:$0xf]  ;;  %v2140_v38 = vld [vmem:[%s3519_s1 + $0x14] sm:$0xf] }
  0x32   :  { %1163 = vmatpush.bf16.msrb.mxu2 %v1753_v28  ;;  %v2114_v28 = vld [vmem:[%s3520_s0 + $0xc4] sm:$0xf]  ;;  %v2744_v36 = vor.u32 %v2118_v31, %v1628_v30  ;;  %v1726_v39 = vld [vmem:[%s3519_s1 + $0x18] sm:$0xf0]  ;;  %v1980_v40 = vld [vmem:[%s3519_s1 + $0x210] sm:$0xf] }
  0x33   :  { %879 = vmatmul.bf16.gmra.mxu0 %v2566_v21  ;;  %1212 = vmatpush.bf16.msrb.mxu3 %v1817_v33  ;;  %v1630_v33 = vld [vmem:[%s3520_s0 + $0xe0] sm:$0xf0]  ;;  %v2742_v35 = vor.u32 %v2114_v28, %v1622_v29  ;;  %v1729_v41 = vor.u32 %v2140_v38, %v1726_v39  ;;  %v2205_v42 = vld [vmem:[%s3519_s1 + $0x214] sm:$0xf0]  ;;  %v2156_v43 = vld [vmem:[%s3519_s1 + $0x94] sm:$0xf] }
  0x34   :  { %928 = vmatmul.bf16.gmra.mxu1 %v2568_v22  ;;  %1066 = vmatpush.bf16.msrb.mxu0 %v1997_v60  ;;  %v2746_v37 = vor.u32 %v2115_v32, %v1630_v33  ;;  %v1790_v44 = vld [vmem:[%s3519_s1 + $0x98] sm:$0xf0]  ;;  %v1981_v50 = vor.u32 %v2205_v42, %v1980_v40  ;;  %v2036_v52 = vld [vmem:[%s3519_s1 + $0x280] sm:$0xf]  ;;  %v1644_v58 = vld [vmem:[%s3520_s0 + $0xf0] sm:$0xf] }
  0x35   :  { %977 = vmatmul.bf16.gmra.mxu2 %v2570_v23  ;;  %v1793_v51 = vor.u32 %v2156_v43, %v1790_v44  ;;  %v2123_v59 = vld [vmem:[%s3520_s0 + $0x104] sm:$0xf0]  ;;  %v2120_v60 = vld [vmem:[%s3520_s0 + $0xf4] sm:$0xf]  ;;  %v1652_v62 = vld [vmem:[%s3520_s0 + $0xf8] sm:$0xf] }
  0x36   :  { %1026 = vmatmul.bf16.gmra.mxu3 %v2572_v24  ;;  %1164 = vmatpush.bf16.msrb.mxu2 %v1745_v55  ;;  %v2219_v55 = vld [vmem:[%s3519_s1 + $0x284] sm:$0xf0]  ;;  %v2124_v63 = vld [vmem:[%s3520_s0 + $0x10c] sm:$0xf0]  ;;  %v2121_v0 = vld [vmem:[%s3520_s0 + $0xfc] sm:$0xf]  ;;  %v2800_v2 = vor.u32 %v2123_v59, %v1644_v58 }
  0x37   :  { %1213 = vmatpush.bf16.msrb.mxu3 %v1809_v61  ;;  %v2037_v56 = vor.u32 %v2219_v55, %v2036_v52  ;;  %v1646_v61 = vld [vmem:[%s3520_s0 + $0x108] sm:$0xf0]  ;;  %v1654_v1 = vld [vmem:[%s3520_s0 + $0x110] sm:$0xf0]  ;;  %v2804_v4 = vor.u32 %v2124_v63, %v1652_v62  ;;  %v2138_v10 = vld [vmem:[%s3519_s1 + $0x4] sm:$0xf] }
  0x38   :  { %1067 = vmatpush.bf16.msrb.mxu0 %v1989_v18  ;;  %v2802_v3 = vor.u32 %v2120_v60, %v1646_v61  ;;  %v2806_v5 = vor.u32 %v2121_v0, %v1654_v1  ;;  %v1718_v11 = vld [vmem:[%s3519_s1 + $0x8] sm:$0xf0]  ;;  %v1972_v12 = vld [vmem:[%s3519_s1 + $0x200] sm:$0xf]  ;;  %v2203_v14 = vld [vmem:[%s3519_s1 + $0x204] sm:$0xf0] }
  0x39   :  { %1118 = vmatpush.bf16.msrb.mxu1 %v2037_v56  ;;  %v2154_v15 = vld [vmem:[%s3519_s1 + $0x84] sm:$0xf]  ;;  %v1782_v16 = vld [vmem:[%s3519_s1 + $0x88] sm:$0xf0]  ;;  %v1973_v17 = vor.u32 %v2203_v14, %v1972_v12  ;;  %v1668_v19 = vld [vmem:[%s3520_s0 + $0x120] sm:$0xf] }
  0x3a   :  { %1165 = vmatpush.bf16.msrb.mxu2 %v1737_v13  ;;  %v1721_v13 = vor.u32 %v2138_v10, %v1718_v11  ;;  %v1785_v18 = vor.u32 %v2154_v15, %v1782_v16  ;;  %v2129_v20 = vld [vmem:[%s3520_s0 + $0x134] sm:$0xf0]  ;;  %v1670_v26 = vld [vmem:[%s3520_s0 + $0x138] sm:$0xf0]  ;;  %v1676_v27 = vld [vmem:[%s3520_s0 + $0x128] sm:$0xf] }
  0x3b   :  { %1214 = vmatpush.bf16.msrb.mxu3 %v1801_v25  ;;  %v2126_v25 = vld [vmem:[%s3520_s0 + $0x124] sm:$0xf]  ;;  %v2130_v28 = vld [vmem:[%s3520_s0 + $0x13c] sm:$0xf0]  ;;  %v2127_v29 = vld [vmem:[%s3520_s0 + $0x12c] sm:$0xf]  ;;  %v2854_v31 = vor.u32 %v2129_v20, %v1668_v19 }
  0x3c   :  { %1068 = vmatpush.bf16.msrb.mxu0 %v1981_v50  ;;  %v1678_v30 = vld [vmem:[%s3520_s0 + $0x140] sm:$0xf0]  ;;  %v2856_v32 = vor.u32 %v2126_v25, %v1670_v26  ;;  %v2858_v33 = vor.u32 %v2130_v28, %v1676_v27  ;;  %v2216_v39 = vld [vmem:[%s3519_s1 + $0x274] sm:$0xf]  ;;  %v2030_v40 = vld [vmem:[%s3519_s1 + $0x278] sm:$0xf0] }
  0x3d   :  { %v2860_v38 = vor.u32 %v2127_v29, %v1678_v30  ;;  %v2033_v42 = vor.u32 %v2216_v39, %v2030_v40  ;;  %v1902_v43 = vld [vmem:[%s3519_s1 + $0x178] sm:$0xf0]  ;;  %v2226_v44 = vld [vmem:[%s3519_s1 + $0x2c4] sm:$0xf]  ;;  %v2070_v50 = vld [vmem:[%s3519_s1 + $0x2c8] sm:$0xf0] }
  0x3e   :  { %1166 = vmatpush.bf16.msrb.mxu2 %v1729_v41  ;;  %v2184_v41 = vld [vmem:[%s3519_s1 + $0x174] sm:$0xf]  ;;  %v2073_v52 = vor.u32 %v2226_v44, %v2070_v50  ;;  %v1966_v56 = vld [vmem:[%s3519_s1 + $0x1f8] sm:$0xf0]  ;;  %v1692_v59 = vld [vmem:[%s3520_s0 + $0x150] sm:$0xf] }
  0x3f   :  { %1215 = vmatpush.bf16.msrb.mxu3 %v1793_v51  ;;  %v1905_v51 = vor.u32 %v2184_v41, %v1902_v43  ;;  %v2200_v55 = vld [vmem:[%s3519_s1 + $0x1f4] sm:$0xf]  ;;  %v2135_v60 = vld [vmem:[%s3520_s0 + $0x164] sm:$0xf0]  ;;  %v1694_v62 = vld [vmem:[%s3520_s0 + $0x168] sm:$0xf0] }
  0x40   :  { %1069 = vmatpush.bf16.msrb.mxu0 %v1973_v17  ;;  %v1969_v58 = vor.u32 %v2200_v55, %v1966_v56  ;;  %v2132_v61 = vld [vmem:[%s3520_s0 + $0x154] sm:$0xf]  ;;  %v1700_v63 = vld [vmem:[%s3520_s0 + $0x158] sm:$0xf]  ;;  %v2136_v0 = vld [vmem:[%s3520_s0 + $0x16c] sm:$0xf0]  ;;  %v2914_v11 = vor.u32 %v2135_v60, %v1692_v59 }
  0x41   :  { %v2133_v1 = vld [vmem:[%s3520_s0 + $0x15c] sm:$0xf]  ;;  %v1702_v10 = vld [vmem:[%s3520_s0 + $0x170] sm:$0xf0]  ;;  %v2916_v12 = vor.u32 %v2132_v61, %v1694_v62  ;;  %v2214_v15 = vld [vmem:[%s3519_s1 + $0x264] sm:$0xf] }
  0x42   :  { %1167 = vmatpush.bf16.msrb.mxu2 %v1721_v13  ;;  %1307 = vmatpush.bf16.msra.mxu1 %v1969_v58  ;;  %v2918_v13 = vor.u32 %v2136_v0, %v1700_v63  ;;  %v2920_v14 = vor.u32 %v2133_v1, %v1702_v10  ;;  %v2022_v16 = vld [vmem:[%s3519_s1 + $0x268] sm:$0xf0]  ;;  %v2182_v17 = vld [vmem:[%s3519_s1 + $0x164] sm:$0xf]  ;;  %v2941_v25 = vld [vmem:[%s3521_s2] sm:$0x3] }
  0x43   :  { %884 = vmatmul.bf16.gmra.mxu0 %v2626_v45  ;;  %1216 = vmatpush.bf16.msrb.mxu3 %v1785_v18  ;;  %v2025_v18 = vor.u32 %v2214_v15, %v2022_v16  ;;  %v1894_v19 = vld [vmem:[%s3519_s1 + $0x168] sm:$0xf0]  ;;  %v2198_v26 = vld [vmem:[%s3519_s1 + $0x1e4] sm:$0xf]  ;;  %v1540_v29 = vld [vmem:[%s3520_s0 + $0x10] sm:$0xf] }
  0x44   :  { %933 = vmatmul.bf16.gmra.mxu1 %v2628_v46  ;;  %1258 = vmatpush.bf16.msra.mxu0 %v1905_v51  ;;  %v1897_v20 = vor.u32 %v2182_v17, %v1894_v19  ;;  %v1958_v27 = vld [vmem:[%s3519_s1 + $0x1e8] sm:$0xf0]  ;;  %v2095_v30 = vld [vmem:[%s3520_s0 + $0x24] sm:$0xf0]  ;;  %v2956_v39 = vperm.slane %v2941_v25, 0 }
  0x45   :  { %982 = vmatmul.bf16.gmra.mxu2 %v2630_v47  ;;  %v1961_v28 = vor.u32 %v2198_v26, %v1958_v27  ;;  %v2092_v40 = vld [vmem:[%s3520_s0 + $0x14] sm:$0xf]  ;;  %v1542_v41 = vld [vmem:[%s3520_s0 + $0x28] sm:$0xf0]  ;;  %v2062_v55 = vld [vmem:[%s3519_s1 + $0x2b8] sm:$0xf0] }
  0x46   :  { %1031 = vmatmul.bf16.gmra.mxu3 %v2632_v49  ;;  %1356 = vmatpush.bf16.msra.mxu2 %v2033_v42  ;;  %v2964_v42 = vor.u32 %v2095_v30, %v1540_v29  ;;  %v2966_v44 = vor.u32 %v2092_v40, %v1542_v41  ;;  %v2212_v59 = vld [vmem:[%s3519_s1 + $0x254] sm:$0xf]  ;;  %v2014_v60 = vld [vmem:[%s3519_s1 + $0x258] sm:$0xf0]  ;;  %v1564_v27 = vld [vmem:[%s3520_s0 + $0x40] sm:$0xf] }
  0x47   :  { %1408 = vmatpush.bf16.msra.mxu3 %v2073_v52  ;;  %1308 = vmatpush.bf16.msra.mxu1 %v1961_v28  ;;  %v2224_v52 = vld [vmem:[%s3519_s1 + $0x2b4] sm:$0xf]  ;;  %v2017_v62 = vor.u32 %v2212_v59, %v2014_v60  ;;  %v1950_v19 = vld [vmem:[%s3519_s1 + $0x1d8] sm:$0xf0]  ;;  %v2101_v28 = vld [vmem:[%s3520_s0 + $0x54] sm:$0xf0] }
  0x48   :  { %1259 = vmatpush.bf16.msra.mxu0 %v1897_v20  ;;  %v2065_v58 = vor.u32 %v2224_v52, %v2062_v55  ;;  %v2180_v61 = vld [vmem:[%s3519_s1 + $0x154] sm:$0xf]  ;;  %v2098_v29 = vld [vmem:[%s3520_s0 + $0x44] sm:$0xf]  ;;  %v1566_v30 = vld [vmem:[%s3520_s0 + $0x58] sm:$0xf0]  ;;  %v3013_v41 = vor.u32 %v2101_v28, %v1564_v27 }
  0x49   :  { %v3015_v52 = vor.u32 %v2098_v29, %v1566_v30  ;;  %v2210_v60 = vld [vmem:[%s3519_s1 + $0x244] sm:$0xf]  ;;  %v2054_v28 = vld [vmem:[%s3519_s1 + $0x2a8] sm:$0xf0]  ;;  %v1588_v29 = vld [vmem:[%s3520_s0 + $0x70] sm:$0xf] }
  0x4a   :  { %1357 = vmatpush.bf16.msra.mxu2 %v2025_v18  ;;  %v2196_v18 = vld [vmem:[%s3519_s1 + $0x1d4] sm:$0xf]  ;;  %v2222_v27 = vld [vmem:[%s3519_s1 + $0x2a4] sm:$0xf]  ;;  %v2107_v30 = vld [vmem:[%s3520_s0 + $0x84] sm:$0xf0] }
  0x4b   :  { %1409 = vmatpush.bf16.msra.mxu3 %v2065_v58  ;;  %v1953_v26 = vor.u32 %v2196_v18, %v1950_v19  ;;  %v2194_v18 = vld [vmem:[%s3519_s1 + $0x1c4] sm:$0xf]  ;;  %v1942_v19 = vld [vmem:[%s3519_s1 + $0x1c8] sm:$0xf0] }
  0x4d   :  { %1309 = vmatpush.bf16.msra.mxu1 %v1953_v26  ;;  %v1945_v26 = vor.u32 %v2194_v18, %v1942_v19 }
  0x4e   :  { %1358 = vmatpush.bf16.msra.mxu2 %v2017_v62  ;;  %v2178_v62 = vld [vmem:[%s3519_s1 + $0x144] sm:$0xf] }
  0x51   :  { %1310 = vmatpush.bf16.msra.mxu1 %v1945_v26 }
  0x53   :  { %889 = vmatmul.bf16.gmra.mxu0 %v2680_v6 }
  0x54   :  { %938 = vmatmul.bf16.gmra.mxu1 %v2682_v7 }
  0x55   :  { %987 = vmatmul.bf16.gmra.mxu2 %v2684_v8 }
  0x56   :  { %1036 = vmatmul.bf16.gmra.mxu3 %v2686_v9 }
  0x63   :  { %894 = vmatmul.bf16.gmra.mxu0 %v2740_v34 }
  0x64   :  { %943 = vmatmul.bf16.gmra.mxu1 %v2742_v35 }
  0x65   :  { %992 = vmatmul.bf16.gmra.mxu2 %v2744_v36 }
  0x66   :  { %1041 = vmatmul.bf16.gmra.mxu3 %v2746_v37 }
  0x73   :  { %899 = vmatmul.bf16.gmra.mxu0 %v2800_v2 }
  0x74   :  { %948 = vmatmul.bf16.gmra.mxu1 %v2802_v3 }
  0x75   :  { %997 = vmatmul.bf16.gmra.mxu2 %v2804_v4 }
  0x76   :  { %1046 = vmatmul.bf16.gmra.mxu3 %v2806_v5 }
  0x83   :  { %904 = vmatmul.bf16.gmra.mxu0 %v2854_v31 }
  0x84   :  { %953 = vmatmul.bf16.gmra.mxu1 %v2856_v32 }
  0x85   :  { %1002 = vmatmul.bf16.gmra.mxu2 %v2858_v33 }
  0x86   :  { %1051 = vmatmul.bf16.gmra.mxu3 %v2860_v38 }
  0x93   :  { %909 = vmatmul.bf16.gmra.mxu0 %v2914_v11 }
  0x94   :  { %958 = vmatmul.bf16.gmra.mxu1 %v2916_v12 }
  0x95   :  { %1007 = vmatmul.bf16.gmra.mxu2 %v2918_v13 }
  0x96   :  { %1056 = vmatmul.bf16.gmra.mxu3 %v2920_v14 }
  0xa0   :  { %v875_v43 = vpop.f32.mrf.mxu0 }
  0xa1   :  { %v876_v50 = vadd.f32 %v875_v43, %v2956_v39  ;;  %v924_v51 = vpop.f32.mrf.mxu1 }
  0xa3   :  { %v925_v56 = vadd.f32 %v924_v51, %v876_v50  ;;  %1070 = vmatmul.bf16.vlgmr.msrb.gmra.mxu0 %v2964_v42 }
  0xa4   :  { %2074 = vmatmul.msk.bf16.vlgmr.msrb.gmra.mxu1 %vm841_vm0, %v2966_v44 }
  0xa5   :  { %1168 = vmatmul.bf16.vlgmr.msrb.gmra.mxu2 %v2485_v48  ;;  %v1886_v48 = vld [vmem:[%s3519_s1 + $0x158] sm:$0xf0] }
  0xa6   :  { %1217 = vmatmul.bf16.vlgmr.msrb.gmra.mxu3 %v2496_v53  ;;  %v1889_v53 = vor.u32 %v2180_v61, %v1886_v48  ;;  %v2006_v61 = vld [vmem:[%s3519_s1 + $0x248] sm:$0xf0] }
  0xa7   :  { %v2009_v48 = vor.u32 %v2210_v60, %v2006_v61 }
  0xa8   :  { %v973_v63 = vpop.f32.mrf.mxu2  ;;  %v877_v10 = vpop.f32.mrf.mxu0  ;;  %1260 = vmatpush.bf16.msra.mxu0 %v1889_v53 }
  0xa9   :  { %v974_v0 = vadd.f32 %v973_v63, %v925_v56  ;;  %v1022_v1 = vpop.f32.mrf.mxu3  ;;  %v878_v15 = vadd.f32 %v877_v10, %v2956_v39  ;;  %v926_v16 = vpop.f32.mrf.mxu1  ;;  %v1878_v63 = vld [vmem:[%s3519_s1 + $0x148] sm:$0xf0]  ;;  %1359 = vmatpush.bf16.msra.mxu2 %v2009_v48 }
  0xaa   :  { %v1881_v53 = vor.u32 %v2178_v62, %v1878_v63 }
  0xab   :  { %v2993_v17 = vadd.f32 %v1022_v1, %v974_v0  ;;  %v927_v20 = vadd.f32 %v926_v16, %v878_v15 }
  0xac   :  { %1261 = vmatpush.bf16.msra.mxu0 %v1881_v53  ;;  %v2208_v53 = vld [vmem:[%s3519_s1 + $0x234] sm:$0xf] }
  0xb0   :  { %v975_v40 = vpop.f32.mrf.mxu2  ;;  %v880_v51 = vpop.f32.mrf.mxu0 }
  0xb1   :  { %v976_v43 = vadd.f32 %v975_v40, %v927_v20  ;;  %v1024_v50 = vpop.f32.mrf.mxu3  ;;  %v881_v55 = vadd.f32 %v880_v51, %v2956_v39  ;;  %v929_v56 = vpop.f32.mrf.mxu1  ;;  %v2057_v40 = vor.u32 %v2222_v27, %v2054_v28  ;;  %v2192_v28 = vld [vmem:[%s3519_s1 + $0x1b4] sm:$0xf] }
  0xb3   :  { %v3018_v58 = vadd.f32 %v1024_v50, %v976_v43  ;;  %v930_v59 = vadd.f32 %v929_v56, %v881_v55  ;;  %1075 = vmatmul.bf16.gmra.mxu0 %v3013_v41  ;;  %v2104_v43 = vld [vmem:[%s3520_s0 + $0x74] sm:$0xf]  ;;  %v1590_v50 = vld [vmem:[%s3520_s0 + $0x88] sm:$0xf0]  ;;  %1410 = vmatpush.bf16.msra.mxu3 %v2057_v40  ;;  %v3064_v55 = vor.u32 %v2107_v30, %v1588_v29  ;;  %v1934_v29 = vld [vmem:[%s3519_s1 + $0x1b8] sm:$0xf0] }
  0xb4   :  { %2075 = vmatmul.msk.bf16.gmra.mxu1 %vm841_vm0, %v3015_v52  ;;  %v3066_v61 = vor.u32 %v2104_v43, %v1590_v50  ;;  %v1937_v40 = vor.u32 %v2192_v28, %v1934_v29  ;;  %v1612_v43 = vld [vmem:[%s3520_s0 + $0xa0] sm:$0xf]  ;;  %v2113_v50 = vld [vmem:[%s3520_s0 + $0xb4] sm:$0xf0] }
  0xb5   :  { %1173 = vmatmul.bf16.gmra.mxu2 %v2566_v21 }
  0xb6   :  { %1222 = vmatmul.bf16.gmra.mxu3 %v2568_v22  ;;  %1311 = vmatpush.bf16.msra.mxu1 %v1937_v40 }
  0xb8   :  { %v978_v21 = vpop.f32.mrf.mxu2  ;;  %v882_v1 = vpop.f32.mrf.mxu0 }
  0xb9   :  { %v979_v22 = vadd.f32 %v978_v21, %v930_v59  ;;  %v1027_v0 = vpop.f32.mrf.mxu3  ;;  %v883_v10 = vadd.f32 %v882_v1, %v2956_v39  ;;  %v931_v15 = vpop.f32.mrf.mxu1 }
  0xbb   :  { %v3038_v16 = vadd.f32 %v1027_v0, %v979_v22  ;;  %v932_v20 = vadd.f32 %v931_v15, %v883_v10  ;;  %v1998_v22 = vld [vmem:[%s3519_s1 + $0x238] sm:$0xf0]  ;;  %v2176_v0 = vld [vmem:[%s3519_s1 + $0x134] sm:$0xf] }
  0xbc   :  { %v2001_v1 = vor.u32 %v2208_v53, %v1998_v22  ;;  %v1870_v10 = vld [vmem:[%s3519_s1 + $0x138] sm:$0xf0] }
  0xbd   :  { %v1873_v15 = vor.u32 %v2176_v0, %v1870_v10 }
  0xbe   :  { %1360 = vmatpush.bf16.msra.mxu2 %v2001_v1 }
  0xbf   :  { %1262 = vmatpush.bf16.msra.mxu0 %v1873_v15  ;;  %v2046_v15 = vld [vmem:[%s3519_s1 + $0x298] sm:$0xf0] }
  0xc0   :  { %v980_v51 = vpop.f32.mrf.mxu2  ;;  %v885_v60 = vpop.f32.mrf.mxu0 }
  0xc1   :  { %v981_v56 = vadd.f32 %v980_v51, %v932_v20  ;;  %v1029_v59 = vpop.f32.mrf.mxu3  ;;  %v886_v62 = vadd.f32 %v885_v60, %v2956_v39  ;;  %v934_v48 = vpop.f32.mrf.mxu1  ;;  %v2110_v51 = vld [vmem:[%s3520_s0 + $0xa4] sm:$0xf]  ;;  %v3109_v60 = vor.u32 %v2113_v50, %v1612_v43 }
  0xc3   :  { %v3069_v63 = vadd.f32 %v1029_v59, %v981_v56  ;;  %v935_v21 = vadd.f32 %v934_v48, %v886_v62  ;;  %1080 = vmatmul.bf16.gmra.mxu0 %v3064_v55  ;;  %v1614_v56 = vld [vmem:[%s3520_s0 + $0xb8] sm:$0xf0] }
  0xc4   :  { %2076 = vmatmul.msk.bf16.gmra.mxu1 %vm841_vm0, %v3066_v61  ;;  %v3111_v53 = vor.u32 %v2110_v51, %v1614_v56  ;;  %v2190_v56 = vld [vmem:[%s3519_s1 + $0x1a4] sm:$0xf] }
  0xc5   :  { %1178 = vmatmul.bf16.gmra.mxu2 %v2626_v45 }
  0xc6   :  { %1227 = vmatmul.bf16.gmra.mxu3 %v2628_v46 }
  0xc8   :  { %v983_v45 = vpop.f32.mrf.mxu2  ;;  %v887_v19 = vpop.f32.mrf.mxu0 }
  0xc9   :  { %v984_v46 = vadd.f32 %v983_v45, %v935_v21  ;;  %v1032_v18 = vpop.f32.mrf.mxu3  ;;  %v888_v20 = vadd.f32 %v887_v19, %v2956_v39  ;;  %v936_v26 = vpop.f32.mrf.mxu1  ;;  %v2220_v45 = vld [vmem:[%s3519_s1 + $0x294] sm:$0xf]  ;;  %v1990_v19 = vld [vmem:[%s3519_s1 + $0x228] sm:$0xf0] }
  0xcb   :  { %v3089_v27 = vadd.f32 %v1032_v18, %v984_v46  ;;  %v937_v30 = vadd.f32 %v936_v26, %v888_v20  ;;  %v2049_v46 = vor.u32 %v2220_v45, %v2046_v15  ;;  %v2206_v18 = vld [vmem:[%s3519_s1 + $0x224] sm:$0xf] }
  0xcc   :  { %v2174_v20 = vld [vmem:[%s3519_s1 + $0x124] sm:$0xf]  ;;  %v1993_v26 = vor.u32 %v2206_v18, %v1990_v19 }
  0xcd   :  { %1411 = vmatpush.bf16.msra.mxu3 %v2049_v46 }
  0xce   :  { %1361 = vmatpush.bf16.msra.mxu2 %v1993_v26 }
  0xd0   :  { %v985_v59 = vpop.f32.mrf.mxu2  ;;  %v890_v21 = vpop.f32.mrf.mxu0 }
  0xd1   :  { %v986_v62 = vadd.f32 %v985_v59, %v937_v30  ;;  %v1034_v48 = vpop.f32.mrf.mxu3  ;;  %v891_v22 = vadd.f32 %v890_v21, %v2956_v39  ;;  %v939_v0 = vpop.f32.mrf.mxu1  ;;  %v1926_v59 = vld [vmem:[%s3519_s1 + $0x1a8] sm:$0xf0]  ;;  %v1636_v21 = vld [vmem:[%s3520_s0 + $0xd0] sm:$0xf] }
  0xd3   :  { %v3114_v1 = vadd.f32 %v1034_v48, %v986_v62  ;;  %v940_v10 = vadd.f32 %v939_v0, %v891_v22  ;;  %1085 = vmatmul.bf16.gmra.mxu0 %v3109_v60  ;;  %v1929_v48 = vor.u32 %v2190_v56, %v1926_v59  ;;  %v2119_v22 = vld [vmem:[%s3520_s0 + $0xe4] sm:$0xf0]  ;;  %v2116_v0 = vld [vmem:[%s3520_s0 + $0xd4] sm:$0xf] }
  0xd4   :  { %2077 = vmatmul.msk.bf16.gmra.mxu1 %vm841_vm0, %v3111_v53  ;;  %v3160_v15 = vor.u32 %v2119_v22, %v1636_v21 }
  0xd5   :  { %1183 = vmatmul.bf16.gmra.mxu2 %v2680_v6  ;;  %v1862_v6 = vld [vmem:[%s3519_s1 + $0x128] sm:$0xf0]  ;;  %1312 = vmatpush.bf16.msra.mxu1 %v1929_v48 }
  0xd6   :  { %1232 = vmatmul.bf16.gmra.mxu3 %v2682_v7  ;;  %v1865_v7 = vor.u32 %v2174_v20, %v1862_v6 }
  0xd8   :  { %v988_v28 = vpop.f32.mrf.mxu2  ;;  %v892_v40 = vpop.f32.mrf.mxu0  ;;  %1263 = vmatpush.bf16.msra.mxu0 %v1865_v7 }
  0xd9   :  { %v989_v29 = vadd.f32 %v988_v28, %v940_v10  ;;  %v1037_v30 = vpop.f32.mrf.mxu3  ;;  %v893_v43 = vadd.f32 %v892_v40, %v2956_v39  ;;  %v941_v50 = vpop.f32.mrf.mxu1  ;;  %v1638_v10 = vld [vmem:[%s3520_s0 + $0xe8] sm:$0xf0]  ;;  %v2172_v40 = vld [vmem:[%s3519_s1 + $0x114] sm:$0xf] }
  0xda   :  { %v3162_v20 = vor.u32 %v2116_v0, %v1638_v10  ;;  %v2188_v0 = vld [vmem:[%s3519_s1 + $0x194] sm:$0xf]  ;;  %v1918_v10 = vld [vmem:[%s3519_s1 + $0x198] sm:$0xf0] }
  0xdb   :  { %v3140_v51 = vadd.f32 %v1037_v30, %v989_v29  ;;  %v942_v62 = vadd.f32 %v941_v50, %v893_v43  ;;  %v2204_v29 = vld [vmem:[%s3519_s1 + $0x214] sm:$0xf]  ;;  %v1982_v30 = vld [vmem:[%s3519_s1 + $0x218] sm:$0xf0] }
  0xdc   :  { %v1985_v43 = vor.u32 %v2204_v29, %v1982_v30  ;;  %v1854_v50 = vld [vmem:[%s3519_s1 + $0x118] sm:$0xf0]  ;;  %v2122_v29 = vld [vmem:[%s3520_s0 + $0x104] sm:$0xf] }
  0xdd   :  { %v1857_v56 = vor.u32 %v2172_v40, %v1854_v50  ;;  %v1662_v30 = vld [vmem:[%s3520_s0 + $0x118] sm:$0xf0] }
  0xde   :  { %1362 = vmatpush.bf16.msra.mxu2 %v1985_v43 }
  0xdf   :  { %1264 = vmatpush.bf16.msra.mxu0 %v1857_v56 }
  0xe0   :  { %v990_v45 = vpop.f32.mrf.mxu2  ;;  %v895_v19 = vpop.f32.mrf.mxu0 }
  0xe1   :  { %v991_v46 = vadd.f32 %v990_v45, %v942_v62  ;;  %v1039_v18 = vpop.f32.mrf.mxu3  ;;  %v896_v26 = vadd.f32 %v895_v19, %v2956_v39  ;;  %v944_v6 = vpop.f32.mrf.mxu1  ;;  %v2038_v19 = vld [vmem:[%s3519_s1 + $0x288] sm:$0xf0] }
  0xe3   :  { %v3165_v28 = vadd.f32 %v1039_v18, %v991_v46  ;;  %v945_v7 = vadd.f32 %v944_v6, %v896_v26  ;;  %1090 = vmatmul.bf16.gmra.mxu0 %v3160_v15  ;;  %v1921_v46 = vor.u32 %v2188_v0, %v1918_v10  ;;  %v2218_v18 = vld [vmem:[%s3519_s1 + $0x284] sm:$0xf]  ;;  %v1660_v26 = vld [vmem:[%s3520_s0 + $0x100] sm:$0xf]  ;;  %v2125_v6 = vld [vmem:[%s3520_s0 + $0x114] sm:$0xf0] }
  0xe4   :  { %2078 = vmatmul.msk.bf16.gmra.mxu1 %vm841_vm0, %v3162_v20  ;;  %v3211_v43 = vor.u32 %v2125_v6, %v1660_v26  ;;  %v2202_v0 = vld [vmem:[%s3519_s1 + $0x204] sm:$0xf]  ;;  %v1974_v10 = vld [vmem:[%s3519_s1 + $0x208] sm:$0xf0] }
  0xe5   :  { %1188 = vmatmul.bf16.gmra.mxu2 %v2740_v34  ;;  %1313 = vmatpush.bf16.msra.mxu1 %v1921_v46  ;;  %v1977_v46 = vor.u32 %v2202_v0, %v1974_v10  ;;  %v1686_v0 = vld [vmem:[%s3520_s0 + $0x148] sm:$0xf0] }
  0xe6   :  { %1237 = vmatmul.bf16.gmra.mxu3 %v2742_v35 }
  0xe7   :  { %1363 = vmatpush.bf16.msra.mxu2 %v1977_v46 }
  0xe8   :  { %v993_v34 = vpop.f32.mrf.mxu2  ;;  %v897_v62 = vpop.f32.mrf.mxu0 }
  0xe9   :  { %v994_v35 = vadd.f32 %v993_v34, %v945_v7  ;;  %v1042_v59 = vpop.f32.mrf.mxu3  ;;  %v898_v48 = vadd.f32 %v897_v62, %v2956_v39  ;;  %v946_v21 = vpop.f32.mrf.mxu1  ;;  %v2041_v7 = vor.u32 %v2218_v18, %v2038_v19  ;;  %v1846_v18 = vld [vmem:[%s3519_s1 + $0x108] sm:$0xf0] }
  0xeb   :  { %v3185_v22 = vadd.f32 %v1042_v59, %v994_v35  ;;  %v947_v45 = vadd.f32 %v946_v21, %v898_v48  ;;  %1412 = vmatpush.bf16.msra.mxu3 %v2041_v7  ;;  %v3213_v35 = vor.u32 %v2122_v29, %v1662_v30 }
  0xf0   :  { %v995_v40 = vpop.f32.mrf.mxu2  ;;  %v900_v56 = vpop.f32.mrf.mxu0 }
  0xf1   :  { %v996_v50 = vadd.f32 %v995_v40, %v947_v45  ;;  %v1044_v34 = vpop.f32.mrf.mxu3  ;;  %v901_v59 = vadd.f32 %v900_v56, %v2956_v39  ;;  %v949_v62 = vpop.f32.mrf.mxu1  ;;  %v2170_v45 = vld [vmem:[%s3519_s1 + $0x104] sm:$0xf] }
  0xf2   :  { %v1849_v19 = vor.u32 %v2170_v45, %v1846_v18  ;;  %v2186_v40 = vld [vmem:[%s3519_s1 + $0x184] sm:$0xf] }
  0xf3   :  { %v3216_v48 = vadd.f32 %v1044_v34, %v996_v50  ;;  %v950_v21 = vadd.f32 %v949_v62, %v901_v59  ;;  %1095 = vmatmul.bf16.gmra.mxu0 %v3211_v43  ;;  %v1910_v50 = vld [vmem:[%s3519_s1 + $0x188] sm:$0xf0]  ;;  %v1684_v59 = vld [vmem:[%s3520_s0 + $0x130] sm:$0xf]  ;;  %v2131_v62 = vld [vmem:[%s3520_s0 + $0x144] sm:$0xf0] }
  0xf4   :  { %2079 = vmatmul.msk.bf16.gmra.mxu1 %vm841_vm0, %v3213_v35  ;;  %1265 = vmatpush.bf16.msra.mxu0 %v1849_v19  ;;  %v1913_v56 = vor.u32 %v2186_v40, %v1910_v50  ;;  %v3256_v45 = vor.u32 %v2131_v62, %v1684_v59 }
  0xf5   :  { %1193 = vmatmul.bf16.gmra.mxu2 %v2800_v2 }
  0xf6   :  { %1242 = vmatmul.bf16.gmra.mxu3 %v2802_v3  ;;  %1314 = vmatpush.bf16.msra.mxu1 %v1913_v56 }
  0xf8   :  { %v998_v2 = vpop.f32.mrf.mxu2  ;;  %v902_v6 = vpop.f32.mrf.mxu0 }
  0xf9   :  { %v999_v3 = vadd.f32 %v998_v2, %v950_v21  ;;  %v1047_v26 = vpop.f32.mrf.mxu3  ;;  %v903_v7 = vadd.f32 %v902_v6, %v2956_v39  ;;  %v951_v29 = vpop.f32.mrf.mxu1  ;;  %v2128_v21 = vld [vmem:[%s3520_s0 + $0x134] sm:$0xf] }
  0xfa   :  { %v3258_v19 = vor.u32 %v2128_v21, %v1686_v0  ;;  %v1708_v0 = vld [vmem:[%s3520_s0 + $0x160] sm:$0xf] }
  0xfb   :  { %v3236_v30 = vadd.f32 %v1047_v26, %v999_v3  ;;  %v952_v34 = vadd.f32 %v951_v29, %v903_v7 }
 0x100   :  { %v1000_v10 = vpop.f32.mrf.mxu2  ;;  %v905_v2 = vpop.f32.mrf.mxu0 }
 0x101   :  { %v1001_v46 = vadd.f32 %v1000_v10, %v952_v34  ;;  %v1049_v18 = vpop.f32.mrf.mxu3  ;;  %v906_v3 = vadd.f32 %v905_v2, %v2956_v39  ;;  %v954_v26 = vpop.f32.mrf.mxu1  ;;  %v1710_v10 = vld [vmem:[%s3520_s0 + $0x178] sm:$0xf0] }
 0x103   :  { %v3261_v6 = vadd.f32 %v1049_v18, %v1001_v46  ;;  %v955_v7 = vadd.f32 %v954_v26, %v906_v3  ;;  %1100 = vmatmul.bf16.gmra.mxu0 %v3256_v45 }
 0x104   :  { %2080 = vmatmul.msk.bf16.gmra.mxu1 %vm841_vm0, %v3258_v19 }
 0x105   :  { %1198 = vmatmul.bf16.gmra.mxu2 %v2854_v31  ;;  %v2137_v31 = vld [vmem:[%s3520_s0 + $0x174] sm:$0xf0] }
 0x106   :  { %1247 = vmatmul.bf16.gmra.mxu3 %v2856_v32  ;;  %v2134_v32 = vld [vmem:[%s3520_s0 + $0x164] sm:$0xf]  ;;  %v3283_v18 = vor.u32 %v2137_v31, %v1708_v0 }
 0x108   :  { %v1003_v29 = vpop.f32.mrf.mxu2  ;;  %v907_v34 = vpop.f32.mrf.mxu0 }
 0x109   :  { %v1004_v40 = vadd.f32 %v1003_v29, %v955_v7  ;;  %v1052_v50 = vpop.f32.mrf.mxu3  ;;  %v908_v56 = vadd.f32 %v907_v34, %v2956_v39  ;;  %v956_v59 = vpop.f32.mrf.mxu1  ;;  %v3285_v7 = vor.u32 %v2134_v32, %v1710_v10 }
 0x10b   :  { %v3269_v62 = vadd.f32 %v1052_v50, %v1004_v40  ;;  %v957_v21 = vadd.f32 %v956_v59, %v908_v56  ;;  %3524 = vst [vmem:[#allocation2_spill] sm:$0xff] %v3285_v7 }
 0x110   :  { %v1005_v46 = vpop.f32.mrf.mxu2  ;;  %v910_v26 = vpop.f32.mrf.mxu0 }
 0x111   :  { %v1006_v2 = vadd.f32 %v1005_v46, %v957_v21  ;;  %v1054_v3 = vpop.f32.mrf.mxu3  ;;  %v911_v29 = vadd.f32 %v910_v26, %v2956_v39  ;;  %v959_v40 = vpop.f32.mrf.mxu1 }
 0x113   :  { %v3288_v50 = vadd.f32 %v1054_v3, %v1006_v2  ;;  %v960_v34 = vadd.f32 %v959_v40, %v911_v29  ;;  %1105 = vmatmul.bf16.gmra.mxu0 %v3283_v18 }
 0x114   :  { %2081 = vmatmul.msk.bf16.gmra.mxu1 %vm841_vm0, %v3285_v7 }
 0x115   :  { %1203 = vmatmul.bf16.gmra.mxu2 %v2914_v11 }
 0x116   :  { %1252 = vmatmul.bf16.gmra.mxu3 %v2916_v12 }
 0x118   :  { %v1008_v56 = vpop.f32.mrf.mxu2  ;;  %v912_v0 = vpop.f32.mrf.mxu0 }
 0x119   :  { %v1009_v59 = vadd.f32 %v1008_v56, %v960_v34  ;;  %v1057_v21 = vpop.f32.mrf.mxu3  ;;  %v913_v31 = vadd.f32 %v912_v0, %v2956_v39  ;;  %v961_v32 = vpop.f32.mrf.mxu1  ;;  %v3305_v39 = vperm.slane %v2941_v25, 1 }
 0x11b   :  { %v3296_v10 = vadd.f32 %v1057_v21, %v1009_v59  ;;  %v962_v46 = vadd.f32 %v961_v32, %v913_v31 }
 0x120   :  { %v1010_v2 = vpop.f32.mrf.mxu2  ;;  %v1071_v29 = vpop.f32.mrf.mxu0 }
 0x121   :  { %v1011_v3 = vadd.f32 %v1010_v2, %v962_v46  ;;  %v1059_v26 = vpop.f32.mrf.mxu3  ;;  %v1072_v40 = vadd.f32 %v1071_v29, %v2993_v17  ;;  %v1120_v7 = vpop.f32.mrf.mxu1 }
 0x123   :  { %v3299_v11 = vadd.f32 %v1059_v26, %v1011_v3  ;;  %v1121_v12 = vadd.f32 %v1120_v7, %v1072_v40  ;;  %1266 = vmatmul.bf16.vlgmr.msra.gmra.mxu0 %v2498_v54 }
 0x124   :  { %1315 = vmatmul.bf16.vlgmr.msra.gmra.mxu1 %v2506_v57 }
 0x125   :  { %1364 = vmatmul.bf16.vlgmr.msra.gmra.mxu2 %v2964_v42  ;;  %v1454_v34 = vmax.f32 %v1121_v12, 0.0 }
 0x126   :  { %2082 = vmatmul.msk.bf16.vlgmr.msra.gmra.mxu3 %vm841_vm0, %v2966_v44 }
 0x127   :  { %1486 = vst [vmem:[%s3522_s3] sm:$0xff] %v1454_v34 }
 0x128   :  { %v1169_v17 = vpop.f32.mrf.mxu2  ;;  %v1073_v54 = vpop.f32.mrf.mxu0 }
 0x129   :  { %v1170_v7 = vadd.f32 %v1169_v17, %v3305_v39  ;;  %v1218_v56 = vpop.f32.mrf.mxu3  ;;  %v1074_v57 = vadd.f32 %v1073_v54, %v3018_v58  ;;  %v1122_v59 = vpop.f32.mrf.mxu1 }
 0x12b   :  { %v3314_v42 = vadd.f32 %v1218_v56, %v1170_v7  ;;  %v1123_v25 = vadd.f32 %v1122_v59, %v1074_v57 }
 0x12d   :  { %v1456_v21 = vmax.f32 %v1123_v25, 0.0 }
 0x12f   :  { %1488 = vst [vmem:[%s3522_s3 + $0x10] sm:$0xff] %v1456_v21 }
 0x130   :  { %v1171_v44 = vpop.f32.mrf.mxu2  ;;  %v1076_v32 = vpop.f32.mrf.mxu0 }
 0x131   :  { %v1172_v0 = vadd.f32 %v1171_v44, %v3305_v39  ;;  %v1220_v31 = vpop.f32.mrf.mxu3  ;;  %v1077_v46 = vadd.f32 %v1076_v32, %v3038_v16  ;;  %v1125_v2 = vpop.f32.mrf.mxu1 }
 0x133   :  { %v3321_v3 = vadd.f32 %v1220_v31, %v1172_v0  ;;  %v1126_v58 = vadd.f32 %v1125_v2, %v1077_v46  ;;  %1271 = vmatmul.bf16.gmra.mxu0 %v2570_v23 }
 0x134   :  { %1320 = vmatmul.bf16.gmra.mxu1 %v2572_v24 }
 0x135   :  { %1369 = vmatmul.bf16.gmra.mxu2 %v3013_v41  ;;  %v1458_v26 = vmax.f32 %v1126_v58, 0.0 }
 0x136   :  { %2083 = vmatmul.msk.bf16.gmra.mxu3 %vm841_vm0, %v3015_v52 }
 0x137   :  { %1490 = vst [vmem:[%s3522_s3 + $0x20] sm:$0xff] %v1458_v26 }
 0x138   :  { %v1174_v29 = vpop.f32.mrf.mxu2  ;;  %v1078_v12 = vpop.f32.mrf.mxu0 }
 0x139   :  { %v1175_v16 = vadd.f32 %v1174_v29, %v3305_v39  ;;  %v1223_v40 = vpop.f32.mrf.mxu3  ;;  %v1079_v34 = vadd.f32 %v1078_v12, %v3069_v63  ;;  %v1127_v23 = vpop.f32.mrf.mxu1 }
 0x13b   :  { %v3333_v17 = vadd.f32 %v1223_v40, %v1175_v16  ;;  %v1128_v24 = vadd.f32 %v1127_v23, %v1079_v34 }
 0x13d   :  { %v1460_v41 = vmax.f32 %v1128_v24, 0.0 }
 0x13f   :  { %1492 = vst [vmem:[%s3522_s3 + $0x30] sm:$0xff] %v1460_v41 }
 0x140   :  { %v1176_v52 = vpop.f32.mrf.mxu2  ;;  %v1081_v54 = vpop.f32.mrf.mxu0 }
 0x141   :  { %v1177_v7 = vadd.f32 %v1176_v52, %v3305_v39  ;;  %v1225_v56 = vpop.f32.mrf.mxu3  ;;  %v1082_v57 = vadd.f32 %v1081_v54, %v3089_v27  ;;  %v1130_v59 = vpop.f32.mrf.mxu1 }
 0x143   :  { %v3340_v25 = vadd.f32 %v1225_v56, %v1177_v7  ;;  %v1131_v63 = vadd.f32 %v1130_v59, %v1082_v57  ;;  %1276 = vmatmul.bf16.gmra.mxu0 %v2630_v47 }
 0x144   :  { %1325 = vmatmul.bf16.gmra.mxu1 %v2632_v49 }
 0x145   :  { %1374 = vmatmul.bf16.gmra.mxu2 %v3064_v55  ;;  %v1462_v21 = vmax.f32 %v1131_v63, 0.0 }
 0x146   :  { %2084 = vmatmul.msk.bf16.gmra.mxu3 %vm841_vm0, %v3066_v61 }
 0x147   :  { %1494 = vst [vmem:[%s3522_s3 + $0x40] sm:$0xff] %v1462_v21 }
 0x148   :  { %v1179_v44 = vpop.f32.mrf.mxu2  ;;  %v1083_v31 = vpop.f32.mrf.mxu0 }
 0x149   :  { %v1180_v27 = vadd.f32 %v1179_v44, %v3305_v39  ;;  %v1228_v0 = vpop.f32.mrf.mxu3  ;;  %v1084_v32 = vadd.f32 %v1083_v31, %v3114_v1  ;;  %v1132_v47 = vpop.f32.mrf.mxu1 }
 0x14b   :  { %v3352_v46 = vadd.f32 %v1228_v0, %v1180_v27  ;;  %v1133_v49 = vadd.f32 %v1132_v47, %v1084_v32 }
 0x14d   :  { %v1464_v55 = vmax.f32 %v1133_v49, 0.0 }
 0x14f   :  { %1496 = vst [vmem:[%s3522_s3 + $0x50] sm:$0xff] %v1464_v55 }
 0x150   :  { %v1181_v61 = vpop.f32.mrf.mxu2  ;;  %v1086_v26 = vpop.f32.mrf.mxu0 }
 0x151   :  { %v1182_v2 = vadd.f32 %v1181_v61, %v3305_v39  ;;  %v1230_v58 = vpop.f32.mrf.mxu3  ;;  %v1087_v29 = vadd.f32 %v1086_v26, %v3140_v51  ;;  %v1135_v16 = vpop.f32.mrf.mxu1 }
 0x153   :  { %v3359_v40 = vadd.f32 %v1230_v58, %v1182_v2  ;;  %v1136_v1 = vadd.f32 %v1135_v16, %v1087_v29  ;;  %1281 = vmatmul.bf16.gmra.mxu0 %v2684_v8 }
 0x154   :  { %1330 = vmatmul.bf16.gmra.mxu1 %v2686_v9 }
 0x155   :  { %1379 = vmatmul.bf16.gmra.mxu2 %v3109_v60  ;;  %v1466_v12 = vmax.f32 %v1136_v1, 0.0 }
 0x156   :  { %2085 = vmatmul.msk.bf16.gmra.mxu3 %vm841_vm0, %v3111_v53 }
 0x157   :  { %1498 = vst [vmem:[%s3522_s3 + $0x60] sm:$0xff] %v1466_v12 }
 0x158   :  { %v1184_v34 = vpop.f32.mrf.mxu2  ;;  %v1088_v24 = vpop.f32.mrf.mxu0 }
 0x159   :  { %v1185_v51 = vadd.f32 %v1184_v34, %v3305_v39  ;;  %v1233_v23 = vpop.f32.mrf.mxu3  ;;  %v1089_v41 = vadd.f32 %v1088_v24, %v3165_v28  ;;  %v1137_v8 = vpop.f32.mrf.mxu1 }
 0x15b   :  { %v3371_v52 = vadd.f32 %v1233_v23, %v1185_v51  ;;  %v1138_v9 = vadd.f32 %v1137_v8, %v1089_v41 }
 0x15d   :  { %v1468_v60 = vmax.f32 %v1138_v9, 0.0 }
 0x15f   :  { %1500 = vst [vmem:[%s3522_s3 + $0x70] sm:$0xff] %v1468_v60 }
 0x160   :  { %v1186_v53 = vpop.f32.mrf.mxu2  ;;  %v1091_v54 = vpop.f32.mrf.mxu0 }
 0x161   :  { %v1187_v7 = vadd.f32 %v1186_v53, %v3305_v39  ;;  %v1235_v56 = vpop.f32.mrf.mxu3  ;;  %v1092_v57 = vadd.f32 %v1091_v54, %v3185_v22  ;;  %v1140_v59 = vpop.f32.mrf.mxu1 }
 0x163   :  { %v3378_v63 = vadd.f32 %v1235_v56, %v1187_v7  ;;  %v1141_v28 = vadd.f32 %v1140_v59, %v1092_v57  ;;  %1286 = vmatmul.bf16.gmra.mxu0 %v2744_v36 }
 0x164   :  { %1335 = vmatmul.bf16.gmra.mxu1 %v2746_v37 }
 0x165   :  { %1384 = vmatmul.bf16.gmra.mxu2 %v3160_v15  ;;  %v1470_v21 = vmax.f32 %v1141_v28, 0.0 }
 0x166   :  { %2086 = vmatmul.msk.bf16.gmra.mxu3 %vm841_vm0, %v3162_v20 }
 0x167   :  { %1502 = vst [vmem:[%s3522_s3 + $0x80] sm:$0xff] %v1470_v21 }
 0x168   :  { %v1189_v44 = vpop.f32.mrf.mxu2  ;;  %v1093_v0 = vpop.f32.mrf.mxu0 }
 0x169   :  { %v1190_v22 = vadd.f32 %v1189_v44, %v3305_v39  ;;  %v1238_v27 = vpop.f32.mrf.mxu3  ;;  %v1094_v31 = vadd.f32 %v1093_v0, %v3216_v48  ;;  %v1142_v36 = vpop.f32.mrf.mxu1 }
 0x16b   :  { %v3390_v32 = vadd.f32 %v1238_v27, %v1190_v22  ;;  %v1143_v37 = vadd.f32 %v1142_v36, %v1094_v31  ;;  %v3525_v31 = vld [vmem:[#allocation2_spill] sm:$0xff] }
 0x16d   :  { %v1472_v15 = vmax.f32 %v1143_v37, 0.0 }
 0x16f   :  { %1504 = vst [vmem:[%s3522_s3 + $0x90] sm:$0xff] %v1472_v15 }
 0x170   :  { %v1191_v20 = vpop.f32.mrf.mxu2  ;;  %v1096_v55 = vpop.f32.mrf.mxu0 }
 0x171   :  { %v1192_v47 = vadd.f32 %v1191_v20, %v3305_v39  ;;  %v1240_v49 = vpop.f32.mrf.mxu3  ;;  %v1097_v61 = vadd.f32 %v1096_v55, %v3236_v30  ;;  %v1145_v2 = vpop.f32.mrf.mxu1 }
 0x173   :  { %v3397_v58 = vadd.f32 %v1240_v49, %v1192_v47  ;;  %v1146_v48 = vadd.f32 %v1145_v2, %v1097_v61  ;;  %1291 = vmatmul.bf16.gmra.mxu0 %v2804_v4 }
 0x174   :  { %1340 = vmatmul.bf16.gmra.mxu1 %v2806_v5 }
 0x175   :  { %1389 = vmatmul.bf16.gmra.mxu2 %v3211_v43  ;;  %v1474_v26 = vmax.f32 %v1146_v48, 0.0 }
 0x176   :  { %2087 = vmatmul.msk.bf16.gmra.mxu3 %vm841_vm0, %v3213_v35 }
 0x177   :  { %1506 = vst [vmem:[%s3522_s3 + $0xa0] sm:$0xff] %v1474_v26 }
 0x178   :  { %v1194_v29 = vpop.f32.mrf.mxu2  ;;  %v1098_v1 = vpop.f32.mrf.mxu0 }
 0x179   :  { %v1195_v30 = vadd.f32 %v1194_v29, %v3305_v39  ;;  %v1243_v16 = vpop.f32.mrf.mxu3  ;;  %v1099_v12 = vadd.f32 %v1098_v1, %v3261_v6  ;;  %v1147_v4 = vpop.f32.mrf.mxu1 }
 0x17b   :  { %v3409_v34 = vadd.f32 %v1243_v16, %v1195_v30  ;;  %v1148_v5 = vadd.f32 %v1147_v4, %v1099_v12 }
 0x17d   :  { %v1476_v43 = vmax.f32 %v1148_v5, 0.0 }
 0x17f   :  { %1508 = vst [vmem:[%s3522_s3 + $0xb0] sm:$0xff] %v1476_v43 }
 0x180   :  { %v1196_v35 = vpop.f32.mrf.mxu2  ;;  %v1101_v24 = vpop.f32.mrf.mxu0 }
 0x181   :  { %v1197_v51 = vadd.f32 %v1196_v35, %v3305_v39  ;;  %v1245_v23 = vpop.f32.mrf.mxu3  ;;  %v1102_v41 = vadd.f32 %v1101_v24, %v3269_v62  ;;  %v1150_v8 = vpop.f32.mrf.mxu1 }
 0x183   :  { %v3416_v9 = vadd.f32 %v1245_v23, %v1197_v51  ;;  %v1151_v6 = vadd.f32 %v1150_v8, %v1102_v41  ;;  %1296 = vmatmul.bf16.gmra.mxu0 %v2858_v33 }
 0x184   :  { %1345 = vmatmul.bf16.gmra.mxu1 %v2860_v38 }
 0x185   :  { %1394 = vmatmul.bf16.gmra.mxu2 %v3256_v45  ;;  %v1478_v60 = vmax.f32 %v1151_v6, 0.0 }
 0x186   :  { %2088 = vmatmul.msk.bf16.gmra.mxu3 %vm841_vm0, %v3258_v19 }
 0x187   :  { %1510 = vst [vmem:[%s3522_s3 + $0xc0] sm:$0xff] %v1478_v60 }
 0x188   :  { %v1199_v53 = vpop.f32.mrf.mxu2  ;;  %v1103_v56 = vpop.f32.mrf.mxu0 }
 0x189   :  { %v1200_v62 = vadd.f32 %v1199_v53, %v3305_v39  ;;  %v1248_v7 = vpop.f32.mrf.mxu3  ;;  %v1104_v54 = vadd.f32 %v1103_v56, %v3288_v50  ;;  %v1152_v33 = vpop.f32.mrf.mxu1 }
 0x18b   :  { %v3428_v57 = vadd.f32 %v1248_v7, %v1200_v62  ;;  %v1153_v38 = vadd.f32 %v1152_v33, %v1104_v54 }
 0x18d   :  { %v1480_v45 = vmax.f32 %v1153_v38, 0.0 }
 0x18f   :  { %1512 = vst [vmem:[%s3522_s3 + $0xd0] sm:$0xff] %v1480_v45 }
 0x190   :  { %v1201_v19 = vpop.f32.mrf.mxu2  ;;  %v1106_v21 = vpop.f32.mrf.mxu0 }
 0x191   :  { %v1202_v59 = vadd.f32 %v1201_v19, %v3305_v39  ;;  %v1250_v28 = vpop.f32.mrf.mxu3  ;;  %v1107_v44 = vadd.f32 %v1106_v21, %v3296_v10  ;;  %v1155_v22 = vpop.f32.mrf.mxu1 }
 0x193   :  { %v3435_v27 = vadd.f32 %v1250_v28, %v1202_v59  ;;  %v1156_v50 = vadd.f32 %v1155_v22, %v1107_v44  ;;  %1301 = vmatmul.bf16.gmra.mxu0 %v2918_v13 }
 0x194   :  { %1350 = vmatmul.bf16.gmra.mxu1 %v2920_v14 }
 0x195   :  { %1399 = vmatmul.bf16.gmra.mxu2 %v3283_v18  ;;  %v1482_v0 = vmax.f32 %v1156_v50, 0.0 }
 0x196   :  { %2089 = vmatmul.msk.bf16.gmra.mxu3 %vm841_vm0, %v3525_v31 }
 0x197   :  { %1514 = vst [vmem:[%s3522_s3 + $0xe0] sm:$0xff] %v1482_v0 }
 0x198   :  { %v1204_v36 = vpop.f32.mrf.mxu2  ;;  %v1108_v15 = vpop.f32.mrf.mxu0 }
 0x199   :  { %v1205_v10 = vadd.f32 %v1204_v36, %v3305_v39  ;;  %v1253_v37 = vpop.f32.mrf.mxu3  ;;  %v1109_v20 = vadd.f32 %v1108_v15, %v3299_v11  ;;  %v1157_v13 = vpop.f32.mrf.mxu1 }
 0x19b   :  { %v3447_v47 = vadd.f32 %v1253_v37, %v1205_v10  ;;  %v1158_v14 = vadd.f32 %v1157_v13, %v1109_v20 }
 0x19d   :  { %v1484_v18 = vmax.f32 %v1158_v14, 0.0 }
 0x19f   :  { %1516 = vst [vmem:[%s3522_s3 + $0xf0] sm:$0xff] %v1484_v18 }
 0x1a0   :  { %v1206_v49 = vpop.f32.mrf.mxu2  ;;  %v1267_v2 = vpop.f32.mrf.mxu0 }
 0x1a1   :  { %v1207_v55 = vadd.f32 %v1206_v49, %v3305_v39  ;;  %v1255_v61 = vpop.f32.mrf.mxu3  ;;  %v1316_v48 = vpop.f32.mrf.mxu1  ;;  %v1268_v29 = vadd.f32 %v1267_v2, %v3314_v42 }
 0x1a3   :  { %v3453_v26 = vadd.f32 %v1255_v61, %v1207_v55  ;;  %v1317_v11 = vadd.f32 %v1316_v48, %v1268_v29 }
 0x1a8   :  { %v1365_v30 = vpop.f32.mrf.mxu2  ;;  %v1269_v12 = vpop.f32.mrf.mxu0 }
 0x1a9   :  { %v1366_v16 = vadd.f32 %v1365_v30, %v1317_v11  ;;  %v1414_v1 = vpop.f32.mrf.mxu3  ;;  %v1318_v4 = vpop.f32.mrf.mxu1  ;;  %v1270_v43 = vadd.f32 %v1269_v12, %v3321_v3 }
 0x1ab   :  { %v1415_v5 = vadd.f32 %v1414_v1, %v1366_v16  ;;  %v1319_v39 = vadd.f32 %v1318_v4, %v1270_v43 }
 0x1ad   :  { %v1455_v35 = vmax.f32 %v1415_v5, 0.0 }
 0x1af   :  { %1487 = vst [vmem:[%s3522_s3 + $0x8] sm:$0xff] %v1455_v35 }
 0x1b0   :  { %v1367_v51 = vpop.f32.mrf.mxu2  ;;  %v1272_v41 = vpop.f32.mrf.mxu0 }
 0x1b1   :  { %v1368_v23 = vadd.f32 %v1367_v51, %v1319_v39  ;;  %v1416_v24 = vpop.f32.mrf.mxu3  ;;  %v1321_v42 = vpop.f32.mrf.mxu1  ;;  %v1273_v6 = vadd.f32 %v1272_v41, %v3333_v17 }
 0x1b3   :  { %v1417_v8 = vadd.f32 %v1416_v24, %v1368_v23  ;;  %v1322_v3 = vadd.f32 %v1321_v42, %v1273_v6 }
 0x1b5   :  { %v1457_v60 = vmax.f32 %v1417_v8, 0.0 }
 0x1b7   :  { %1489 = vst [vmem:[%s3522_s3 + $0x18] sm:$0xff] %v1457_v60 }
 0x1b8   :  { %v1370_v53 = vpop.f32.mrf.mxu2  ;;  %v1274_v56 = vpop.f32.mrf.mxu0 }
 0x1b9   :  { %v1371_v62 = vadd.f32 %v1370_v53, %v1322_v3  ;;  %v1419_v7 = vpop.f32.mrf.mxu3  ;;  %v1323_v54 = vpop.f32.mrf.mxu1  ;;  %v1275_v38 = vadd.f32 %v1274_v56, %v3340_v25 }
 0x1bb   :  { %v1420_v33 = vadd.f32 %v1419_v7, %v1371_v62  ;;  %v1324_v17 = vadd.f32 %v1323_v54, %v1275_v38 }
 0x1bd   :  { %v1459_v45 = vmax.f32 %v1420_v33, 0.0 }
 0x1bf   :  { %1491 = vst [vmem:[%s3522_s3 + $0x28] sm:$0xff] %v1459_v45 }
 0x1c0   :  { %v1372_v19 = vpop.f32.mrf.mxu2  ;;  %v1277_v21 = vpop.f32.mrf.mxu0 }
 0x1c1   :  { %v1373_v59 = vadd.f32 %v1372_v19, %v1324_v17  ;;  %v1421_v28 = vpop.f32.mrf.mxu3  ;;  %v1326_v44 = vpop.f32.mrf.mxu1  ;;  %v1278_v50 = vadd.f32 %v1277_v21, %v3352_v46 }
 0x1c3   :  { %v1422_v22 = vadd.f32 %v1421_v28, %v1373_v59  ;;  %v1327_v25 = vadd.f32 %v1326_v44, %v1278_v50 }
 0x1c5   :  { %v1461_v0 = vmax.f32 %v1422_v22, 0.0 }
 0x1c7   :  { %1493 = vst [vmem:[%s3522_s3 + $0x38] sm:$0xff] %v1461_v0 }
 0x1c8   :  { %v1375_v31 = vpop.f32.mrf.mxu2  ;;  %v1279_v37 = vpop.f32.mrf.mxu0 }
 0x1c9   :  { %v1376_v36 = vadd.f32 %v1375_v31, %v1327_v25  ;;  %v1424_v10 = vpop.f32.mrf.mxu3  ;;  %v1328_v15 = vpop.f32.mrf.mxu1  ;;  %v1280_v13 = vadd.f32 %v1279_v37, %v3359_v40 }
 0x1cb   :  { %v1425_v20 = vadd.f32 %v1424_v10, %v1376_v36  ;;  %v1329_v46 = vadd.f32 %v1328_v15, %v1280_v13 }
 0x1cd   :  { %v1463_v14 = vmax.f32 %v1425_v20, 0.0 }
 0x1cf   :  { %1495 = vst [vmem:[%s3522_s3 + $0x48] sm:$0xff] %v1463_v14 }
 0x1d0   :  { %v1377_v18 = vpop.f32.mrf.mxu2  ;;  %v1282_v61 = vpop.f32.mrf.mxu0 }
 0x1d1   :  { %v1378_v49 = vadd.f32 %v1377_v18, %v1329_v46  ;;  %v1426_v55 = vpop.f32.mrf.mxu3  ;;  %v1331_v2 = vpop.f32.mrf.mxu1  ;;  %v1283_v29 = vadd.f32 %v1282_v61, %v3371_v52 }
 0x1d3   :  { %v1427_v48 = vadd.f32 %v1426_v55, %v1378_v49  ;;  %v1332_v40 = vadd.f32 %v1331_v2, %v1283_v29 }
 0x1d5   :  { %v1465_v11 = vmax.f32 %v1427_v48, 0.0 }
 0x1d7   :  { %1497 = vst [vmem:[%s3522_s3 + $0x58] sm:$0xff] %v1465_v11 }
 0x1d8   :  { %v1380_v30 = vpop.f32.mrf.mxu2  ;;  %v1284_v12 = vpop.f32.mrf.mxu0 }
 0x1d9   :  { %v1381_v16 = vadd.f32 %v1380_v30, %v1332_v40  ;;  %v1429_v1 = vpop.f32.mrf.mxu3  ;;  %v1333_v4 = vpop.f32.mrf.mxu1  ;;  %v1285_v43 = vadd.f32 %v1284_v12, %v3378_v63 }
 0x1db   :  { %v1430_v5 = vadd.f32 %v1429_v1, %v1381_v16  ;;  %v1334_v52 = vadd.f32 %v1333_v4, %v1285_v43 }
 0x1dd   :  { %v1467_v35 = vmax.f32 %v1430_v5, 0.0 }
 0x1df   :  { %1499 = vst [vmem:[%s3522_s3 + $0x68] sm:$0xff] %v1467_v35 }
 0x1e0   :  { %v1382_v39 = vpop.f32.mrf.mxu2  ;;  %v1287_v24 = vpop.f32.mrf.mxu0 }
 0x1e1   :  { %v1383_v51 = vadd.f32 %v1382_v39, %v1334_v52  ;;  %v1431_v23 = vpop.f32.mrf.mxu3  ;;  %v1336_v41 = vpop.f32.mrf.mxu1  ;;  %v1288_v8 = vadd.f32 %v1287_v24, %v3390_v32 }
 0x1e3   :  { %v1432_v42 = vadd.f32 %v1431_v23, %v1383_v51  ;;  %v1337_v63 = vadd.f32 %v1336_v41, %v1288_v8 }
 0x1e5   :  { %v1469_v6 = vmax.f32 %v1432_v42, 0.0 }
 0x1e7   :  { %1501 = vst [vmem:[%s3522_s3 + $0x78] sm:$0xff] %v1469_v6 }
 0x1e8   :  { %v1385_v60 = vpop.f32.mrf.mxu2  ;;  %v1289_v62 = vpop.f32.mrf.mxu0 }
 0x1e9   :  { %v1386_v3 = vadd.f32 %v1385_v60, %v1337_v63  ;;  %v1434_v53 = vpop.f32.mrf.mxu3  ;;  %v1338_v7 = vpop.f32.mrf.mxu1  ;;  %v1290_v54 = vadd.f32 %v1289_v62, %v3397_v58 }
 0x1eb   :  { %v1435_v56 = vadd.f32 %v1434_v53, %v1386_v3  ;;  %v1339_v32 = vadd.f32 %v1338_v7, %v1290_v54 }
 0x1ed   :  { %v1471_v33 = vmax.f32 %v1435_v56, 0.0 }
 0x1ef   :  { %1503 = vst [vmem:[%s3522_s3 + $0x88] sm:$0xff] %v1471_v33 }
 0x1f0   :  { %v1387_v38 = vpop.f32.mrf.mxu2  ;;  %v1292_v19 = vpop.f32.mrf.mxu0 }
 0x1f1   :  { %v1388_v45 = vadd.f32 %v1387_v38, %v1339_v32  ;;  %v1436_v17 = vpop.f32.mrf.mxu3  ;;  %v1341_v59 = vpop.f32.mrf.mxu1  ;;  %v1293_v21 = vadd.f32 %v1292_v19, %v3409_v34 }
 0x1f3   :  { %v1437_v28 = vadd.f32 %v1436_v17, %v1388_v45  ;;  %v1342_v58 = vadd.f32 %v1341_v59, %v1293_v21 }
 0x1f5   :  { %v1473_v44 = vmax.f32 %v1437_v28, 0.0 }
 0x1f7   :  { %1505 = vst [vmem:[%s3522_s3 + $0x98] sm:$0xff] %v1473_v44 }
 0x1f8   :  { %v1390_v22 = vpop.f32.mrf.mxu2  ;;  %v1294_v25 = vpop.f32.mrf.mxu0 }
 0x1f9   :  { %v1391_v50 = vadd.f32 %v1390_v22, %v1342_v58  ;;  %v1439_v0 = vpop.f32.mrf.mxu3  ;;  %v1343_v31 = vpop.f32.mrf.mxu1  ;;  %v1295_v10 = vadd.f32 %v1294_v25, %v3416_v9 }
 0x1fb   :  { %v1440_v36 = vadd.f32 %v1439_v0, %v1391_v50  ;;  %v1344_v34 = vadd.f32 %v1343_v31, %v1295_v10 }
 0x1fd   :  { %v1475_v37 = vmax.f32 %v1440_v36, 0.0 }
 0x1ff   :  { %1507 = vst [vmem:[%s3522_s3 + $0xa8] sm:$0xff] %v1475_v37 }
 0x200   :  { %v1392_v15 = vpop.f32.mrf.mxu2  ;;  %v1297_v14 = vpop.f32.mrf.mxu0 }
 0x201   :  { %v1393_v20 = vadd.f32 %v1392_v15, %v1344_v34  ;;  %v1441_v13 = vpop.f32.mrf.mxu3  ;;  %v1346_v46 = vpop.f32.mrf.mxu1  ;;  %v1298_v49 = vadd.f32 %v1297_v14, %v3428_v57 }
 0x203   :  { %v1442_v18 = vadd.f32 %v1441_v13, %v1393_v20  ;;  %v1347_v9 = vadd.f32 %v1346_v46, %v1298_v49 }
 0x205   :  { %v1477_v55 = vmax.f32 %v1442_v18, 0.0 }
 0x207   :  { %1509 = vst [vmem:[%s3522_s3 + $0xb8] sm:$0xff] %v1477_v55 }
 0x208   :  { %v1395_v61 = vpop.f32.mrf.mxu2  ;;  %v1299_v29 = vpop.f32.mrf.mxu0 }
 0x209   :  { %v1396_v2 = vadd.f32 %v1395_v61, %v1347_v9  ;;  %v1444_v48 = vpop.f32.mrf.mxu3  ;;  %v1348_v11 = vpop.f32.mrf.mxu1  ;;  %v1300_v30 = vadd.f32 %v1299_v29, %v3435_v27 }
 0x20b   :  { %v1445_v40 = vadd.f32 %v1444_v48, %v1396_v2  ;;  %v1349_v57 = vadd.f32 %v1348_v11, %v1300_v30 }
 0x20d   :  { %v1479_v16 = vmax.f32 %v1445_v40, 0.0 }
 0x20f   :  { %1511 = vst [vmem:[%s3522_s3 + $0xc8] sm:$0xff] %v1479_v16 }
 0x210   :  { %v1397_v1 = vpop.f32.mrf.mxu2  ;;  %v1302_v5 = vpop.f32.mrf.mxu0 }
 0x211   :  { %v1398_v12 = vadd.f32 %v1397_v1, %v1349_v57  ;;  %v1446_v4 = vpop.f32.mrf.mxu3  ;;  %v1303_v35 = vadd.f32 %v1302_v5, %v3447_v47  ;;  %v1351_v52 = vpop.f32.mrf.mxu1 }
 0x213   :  { %v1447_v43 = vadd.f32 %v1446_v4, %v1398_v12  ;;  %v1352_v27 = vadd.f32 %v1351_v52, %v1303_v35 }
 0x215   :  { %v1481_v39 = vmax.f32 %v1447_v43, 0.0 }
 0x217   :  { %1513 = vst [vmem:[%s3522_s3 + $0xd8] sm:$0xff] %v1481_v39 }
 0x218   :  { %v1400_v51 = vpop.f32.mrf.mxu2  ;;  %v1304_v41 = vpop.f32.mrf.mxu0 }
 0x219   :  { %v1401_v23 = vadd.f32 %v1400_v51, %v1352_v27  ;;  %v1449_v24 = vpop.f32.mrf.mxu3  ;;  %v1305_v8 = vadd.f32 %v1304_v41, %v3453_v26  ;;  %v1353_v63 = vpop.f32.mrf.mxu1 }
 0x21b   :  { %v1450_v42 = vadd.f32 %v1449_v24, %v1401_v23  ;;  %v1354_v47 = vadd.f32 %v1353_v63, %v1305_v8 }
 0x21d   :  { %v1483_v6 = vmax.f32 %v1450_v42, 0.0 }
 0x21f   :  { %1515 = vst [vmem:[%s3522_s3 + $0xe8] sm:$0xff] %v1483_v6 }
 0x220   :  { %v1402_v60 = vpop.f32.mrf.mxu2 }
 0x221   :  { %v1403_v3 = vadd.f32 %v1402_v60, %v1354_v47  ;;  %v1451_v53 = vpop.f32.mrf.mxu3 }
 0x223   :  { %v1452_v62 = vadd.f32 %v1451_v53, %v1403_v3 }
 0x225   :  { %v1485_v7 = vmax.f32 %v1452_v62, 0.0 }
 0x227   :  { %1517 = vst [vmem:[%s3522_s3 + $0xf8] sm:$0xff] %v1485_v7 }

// kernel: incept_init_block.20
= control target key start
LH: loop header
LB: loop body
LE: loop exit
PB: predicated region body
PF: predicated region fallthrough
CT: control target
= control target key end

     0   :  { %vm183_vm0 = vcmask 523264   ;;  %s616_s1 = inlined_call_operand.vmem [shape: bf16[192,256], index: 1, kind: input, shape index: {}]   ;;  %s617_s0 = inlined_call_operand.vmem [shape: bf16[24,192], index: 0, kind: input, shape index: {}]   ;;  %s618_s2 = inlined_call_operand.vmem [shape: f32[1,256], index: 2, kind: input, shape index: {}]   ;;  %s619_s3 = inlined_call_operand.vmem [shape: f32[24,256], index: 3, kind: output, shape index: {}]  }
   0x1   :  { %v344_v0 = vld [vmem:[%s616_s1 + $0x70] sm:$0xf]  ;;  %v403_v1 = vld [vmem:[%s616_s1 + $0x74] sm:$0xf0]  ;;  %v402_v2 = vld [vmem:[%s616_s1 + $0x74] sm:$0xf] }
   0x2   :  { %v345_v3 = vor.u32 %v403_v1, %v344_v0  ;;  %v346_v4 = vld [vmem:[%s616_s1 + $0x78] sm:$0xf0]  ;;  %v336_v5 = vld [vmem:[%s616_s1 + $0x60] sm:$0xf]  ;;  %v401_v6 = vld [vmem:[%s616_s1 + $0x64] sm:$0xf0] }
   0x3   :  { %v349_v7 = vor.u32 %v402_v2, %v346_v4  ;;  %v400_v8 = vld [vmem:[%s616_s1 + $0x64] sm:$0xf]  ;;  %v338_v9 = vld [vmem:[%s616_s1 + $0x68] sm:$0xf0]  ;;  %v337_v10 = vor.u32 %v401_v6, %v336_v5  ;;  %v328_v11 = vld [vmem:[%s616_s1 + $0x50] sm:$0xf] }
   0x4   :  { %190 = vmatpush.bf16.msra.mxu0 %v345_v3  ;;  %v341_v12 = vor.u32 %v400_v8, %v338_v9  ;;  %v399_v13 = vld [vmem:[%s616_s1 + $0x54] sm:$0xf0]  ;;  %v410_v14 = vld [vmem:[%s616_s1 + $0xb4] sm:$0xf]  ;;  %v378_v15 = vld [vmem:[%s616_s1 + $0xb8] sm:$0xf0] }
   0x5   :  { %226 = vmatpush.bf16.msra.mxu2 %v349_v7  ;;  %v398_v16 = vld [vmem:[%s616_s1 + $0x54] sm:$0xf]  ;;  %v330_v17 = vld [vmem:[%s616_s1 + $0x58] sm:$0xf0]  ;;  %v381_v18 = vor.u32 %v410_v14, %v378_v15  ;;  %v408_v19 = vld [vmem:[%s616_s1 + $0xa4] sm:$0xf]  ;;  %v329_v22 = vor.u32 %v399_v13, %v328_v11 }
   0x6   :  { %v370_v20 = vld [vmem:[%s616_s1 + $0xa8] sm:$0xf0]  ;;  %v376_v21 = vld [vmem:[%s616_s1 + $0xb0] sm:$0xf]  ;;  %v320_v23 = vld [vmem:[%s616_s1 + $0x40] sm:$0xf]  ;;  %v333_v27 = vor.u32 %v398_v16, %v330_v17 }
   0x7   :  { %248 = vmatpush.bf16.msra.mxu3 %v381_v18  ;;  %v397_v24 = vld [vmem:[%s616_s1 + $0x44] sm:$0xf0]  ;;  %v373_v25 = vor.u32 %v408_v19, %v370_v20  ;;  %v411_v26 = vld [vmem:[%s616_s1 + $0xb4] sm:$0xf0]  ;;  %v396_v28 = vld [vmem:[%s616_s1 + $0x44] sm:$0xf] }
   0x8   :  { %191 = vmatpush.bf16.msra.mxu0 %v337_v10  ;;  %v322_v29 = vld [vmem:[%s616_s1 + $0x48] sm:$0xf0]  ;;  %v377_v30 = vor.u32 %v411_v26, %v376_v21  ;;  %v406_v31 = vld [vmem:[%s616_s1 + $0x94] sm:$0xf]  ;;  %v362_v32 = vld [vmem:[%s616_s1 + $0x98] sm:$0xf0]  ;;  %v321_v36 = vor.u32 %v397_v24, %v320_v23 }
   0x9   :  { %227 = vmatpush.bf16.msra.mxu2 %v341_v12  ;;  %v368_v33 = vld [vmem:[%s616_s1 + $0xa0] sm:$0xf]  ;;  %v409_v34 = vld [vmem:[%s616_s1 + $0xa4] sm:$0xf0]  ;;  %v312_v37 = vld [vmem:[%s616_s1 + $0x30] sm:$0xf]  ;;  %v365_v39 = vor.u32 %v406_v31, %v362_v32  ;;  %v325_v41 = vor.u32 %v396_v28, %v322_v29 }
   0xa   :  { %212 = vmatpush.bf16.msra.mxu1 %v377_v30  ;;  %v369_v35 = vor.u32 %v409_v34, %v368_v33  ;;  %v395_v38 = vld [vmem:[%s616_s1 + $0x34] sm:$0xf0]  ;;  %v404_v40 = vld [vmem:[%s616_s1 + $0x84] sm:$0xf]  ;;  %v354_v42 = vld [vmem:[%s616_s1 + $0x88] sm:$0xf0] }
   0xb   :  { %249 = vmatpush.bf16.msra.mxu3 %v373_v25  ;;  %v360_v43 = vld [vmem:[%s616_s1 + $0x90] sm:$0xf]  ;;  %v407_v44 = vld [vmem:[%s616_s1 + $0x94] sm:$0xf0]  ;;  %v394_v45 = vld [vmem:[%s616_s1 + $0x34] sm:$0xf]  ;;  %v313_v49 = vor.u32 %v395_v38, %v312_v37  ;;  %v357_v50 = vor.u32 %v404_v40, %v354_v42 }
   0xc   :  { %192 = vmatpush.bf16.msra.mxu0 %v329_v22  ;;  %v314_v46 = vld [vmem:[%s616_s1 + $0x38] sm:$0xf0]  ;;  %v361_v47 = vor.u32 %v407_v44, %v360_v43  ;;  %v386_v48 = vld [vmem:[%s617_s0 + $0x4] sm:$0xf]  ;;  %v282_v51 = vld [vmem:[%s617_s0 + $0x8] sm:$0xf0] }
   0xd   :  { %228 = vmatpush.bf16.msra.mxu2 %v333_v27  ;;  %v352_v52 = vld [vmem:[%s616_s1 + $0x80] sm:$0xf]  ;;  %v405_v53 = vld [vmem:[%s616_s1 + $0x84] sm:$0xf0]  ;;  %v317_v54 = vor.u32 %v394_v45, %v314_v46  ;;  %v392_v57 = vld [vmem:[%s616_s1 + $0x24] sm:$0xf]  ;;  %v285_v59 = vor.u32 %v386_v48, %v282_v51 }
   0xe   :  { %213 = vmatpush.bf16.msra.mxu1 %v369_v35  ;;  %v304_v55 = vld [vmem:[%s616_s1 + $0x20] sm:$0xf]  ;;  %v393_v56 = vld [vmem:[%s616_s1 + $0x24] sm:$0xf0]  ;;  %v306_v58 = vld [vmem:[%s616_s1 + $0x28] sm:$0xf0]  ;;  %v353_v60 = vor.u32 %v405_v53, %v352_v52 }
   0xf   :  { %250 = vmatpush.bf16.msra.mxu3 %v365_v39  ;;  %v305_v61 = vor.u32 %v393_v56, %v304_v55  ;;  %v309_v62 = vor.u32 %v392_v57, %v306_v58  ;;  %v296_v63 = vld [vmem:[%s616_s1 + $0x10] sm:$0xf]  ;;  %v391_v0 = vld [vmem:[%s616_s1 + $0x14] sm:$0xf0]  ;;  %v390_v1 = vld [vmem:[%s616_s1 + $0x14] sm:$0xf] }
  0x10   :  { %193 = vmatpush.bf16.msra.mxu0 %v321_v36  ;;  %v298_v2 = vld [vmem:[%s616_s1 + $0x18] sm:$0xf0]  ;;  %v297_v3 = vor.u32 %v391_v0, %v296_v63  ;;  %v288_v5 = vld [vmem:[%s616_s1] sm:$0xf]  ;;  %v389_v6 = vld [vmem:[%s616_s1 + $0x4] sm:$0xf0] }
  0x11   :  { %229 = vmatpush.bf16.msra.mxu2 %v325_v41  ;;  %v301_v4 = vor.u32 %v390_v1, %v298_v2  ;;  %v388_v7 = vld [vmem:[%s616_s1 + $0x4] sm:$0xf]  ;;  %v290_v8 = vld [vmem:[%s616_s1 + $0x8] sm:$0xf0]  ;;  %v289_v9 = vor.u32 %v389_v6, %v288_v5  ;;  %v280_v10 = vld [vmem:[%s617_s0] sm:$0xf] }
  0x12   :  { %214 = vmatpush.bf16.msra.mxu1 %v361_v47  ;;  %v387_v11 = vld [vmem:[%s617_s0 + $0x4] sm:$0xf0]  ;;  %v17_v12 = vld [vmem:[%s617_s0 + $0x10] sm:$0xff]  ;;  %v293_v13 = vor.u32 %v388_v7, %v290_v8  ;;  %v42_v21 = vld [vmem:[%s618_s2] sm:$0x3] }
  0x13   :  { %251 = vmatpush.bf16.msra.mxu3 %v357_v50  ;;  %v281_v14 = vor.u32 %v387_v11, %v280_v10  ;;  %v56_v15 = vunpack.c.h.b16 %v17_v12  ;;  %v55_v17 = vunpack.c.l.b16 %v17_v12  ;;  %v44_v22 = vperm.slane %v42_v21, 0 }
  0x14   :  { %194 = vmatpush.bf16.msra.mxu0 %v313_v49  ;;  %v45_v28 = vperm.slane %v42_v21, 1 }
  0x15   :  { %230 = vmatpush.bf16.msra.mxu2 %v317_v54  ;;  %v60_v16 = vpack.c.b16 %v56_v15, %v56_v15  ;;  %v59_v18 = vpack.c.b16 %v55_v17, %v55_v17 }
  0x16   :  { %384 = vmatmul.msk.bf16.vlgmr.msra.gmra.mxu3 %vm183_vm0, %v285_v59  ;;  %215 = vmatpush.bf16.msra.mxu1 %v353_v60 }
  0x18   :  { %195 = vmatpush.bf16.msra.mxu0 %v305_v61 }
  0x19   :  { %231 = vmatpush.bf16.msra.mxu2 %v309_v62  ;;  %382 = vmatmul.msk.bf16.vlgmr.msra.gmra.mxu1 %vm183_vm0, %v285_v59 }
  0x1c   :  { %196 = vmatpush.bf16.msra.mxu0 %v297_v3 }
  0x1d   :  { %232 = vmatpush.bf16.msra.mxu2 %v301_v4 }
  0x20   :  { %197 = vmatpush.bf16.msra.mxu0 %v289_v9 }
  0x21   :  { %233 = vmatpush.bf16.msra.mxu2 %v293_v13 }
  0x23   :  { %198 = vmatmul.bf16.vlgmr.msra.gmra.mxu0 %v281_v14 }
  0x24   :  { %234 = vmatmul.bf16.vlgmr.msra.gmra.mxu2 %v281_v14 }
  0x26   :  { %385 = vmatmul.msk.bf16.gmra.mxu3 %vm183_vm0, %v60_v16 }
  0x29   :  { %383 = vmatmul.msk.bf16.gmra.mxu1 %vm183_vm0, %v60_v16 }
  0x33   :  { %203 = vmatmul.bf16.gmra.mxu0 %v59_v18 }
  0x34   :  { %239 = vmatmul.bf16.gmra.mxu2 %v59_v18 }
  0x96   :  { %v217_v19 = vpop.f32.mrf.mxu1 }
  0x99   :  { %v253_v20 = vpop.f32.mrf.mxu3 }
  0x9e   :  { %v219_v23 = vpop.f32.mrf.mxu1 }
  0xa0   :  { %v199_v24 = vpop.f32.mrf.mxu0 }
  0xa1   :  { %v200_v25 = vadd.f32 %v199_v24, %v44_v22  ;;  %v255_v26 = vpop.f32.mrf.mxu3 }
  0xa3   :  { %v218_v27 = vadd.f32 %v217_v19, %v200_v25 }
  0xa5   :  { %v262_v29 = vmax.f32 %v218_v27, 0.0 }
  0xa6   :  { %v222_v31 = vpop.f32.mrf.mxu1 }
  0xa7   :  { %268 = vst [vmem:[%s619_s3] sm:$0xff] %v262_v29  ;;  %v235_v30 = vpop.f32.mrf.mxu2 }
  0xa8   :  { %v236_v32 = vadd.f32 %v235_v30, %v45_v28  ;;  %v201_v33 = vpop.f32.mrf.mxu0 }
  0xa9   :  { %v202_v34 = vadd.f32 %v201_v33, %v44_v22  ;;  %v258_v36 = vpop.f32.mrf.mxu3 }
  0xaa   :  { %v254_v35 = vadd.f32 %v253_v20, %v236_v32 }
  0xab   :  { %v220_v37 = vadd.f32 %v219_v23, %v202_v34 }
  0xac   :  { %v263_v38 = vmax.f32 %v254_v35, 0.0 }
  0xad   :  { %v264_v39 = vmax.f32 %v220_v37, 0.0 }
  0xae   :  { %269 = vst [vmem:[%s619_s3 + $0x8] sm:$0xff] %v263_v38  ;;  %v224_v41 = vpop.f32.mrf.mxu1 }
  0xaf   :  { %270 = vst [vmem:[%s619_s3 + $0x10] sm:$0xff] %v264_v39  ;;  %v237_v40 = vpop.f32.mrf.mxu2 }
  0xb0   :  { %v238_v42 = vadd.f32 %v237_v40, %v45_v28  ;;  %v204_v43 = vpop.f32.mrf.mxu0 }
  0xb1   :  { %v205_v44 = vadd.f32 %v204_v43, %v44_v22  ;;  %v260_v46 = vpop.f32.mrf.mxu3 }
  0xb2   :  { %v256_v45 = vadd.f32 %v255_v26, %v238_v42 }
  0xb3   :  { %v223_v47 = vadd.f32 %v222_v31, %v205_v44 }
  0xb4   :  { %v265_v48 = vmax.f32 %v256_v45, 0.0 }
  0xb5   :  { %v266_v49 = vmax.f32 %v223_v47, 0.0 }
  0xb6   :  { %271 = vst [vmem:[%s619_s3 + $0x18] sm:$0xff] %v265_v48 }
  0xb7   :  { %272 = vst [vmem:[%s619_s3 + $0x20] sm:$0xff] %v266_v49  ;;  %v240_v50 = vpop.f32.mrf.mxu2 }
  0xb8   :  { %v241_v51 = vadd.f32 %v240_v50, %v45_v28  ;;  %v206_v52 = vpop.f32.mrf.mxu0 }
  0xba   :  { %v259_v53 = vadd.f32 %v258_v36, %v241_v51 }
  0xbc   :  { %v267_v54 = vmax.f32 %v259_v53, 0.0 }
  0xbe   :  { %273 = vst [vmem:[%s619_s3 + $0x28] sm:$0xff] %v267_v54 }
  0xbf   :  { %v242_v55 = vpop.f32.mrf.mxu2 }

// kernel: incept_init_block.22
= control target key start
LH: loop header
LB: loop body
LE: loop exit
PB: predicated region body
PF: predicated region fallthrough
CT: control target
= control target key end

     0   :  { %vm358_vm0 = vcmask 523264   ;;  %s856_s1 = inlined_call_operand.vmem [shape: bf16[576,128], index: 1, kind: input, shape index: {}]   ;;  %s857_s2 = inlined_call_operand.vmem [shape: f32[1,128], index: 2, kind: input, shape index: {}]   ;;  %s858_s0 = inlined_call_operand.vmem [shape: bf16[24,576], index: 0, kind: input, shape index: {}]   ;;  %s859_s3 = inlined_call_operand.vmem [shape: f32[24,128], index: 3, kind: output, shape index: {}]  }
   0x1   :  { %v643_v0 = vld [vmem:[%s856_s1 + $0x38] sm:$0xff]  ;;  %v642_v4 = vld [vmem:[%s856_s1 + $0x30] sm:$0xff]  ;;  %v641_v8 = vld [vmem:[%s856_s1 + $0x28] sm:$0xff] }
   0x2   :  { %v651_v1 = vld [vmem:[%s856_s1 + $0x78] sm:$0xff]  ;;  %365 = vmatpush.bf16.msra.mxu0 %v643_v0  ;;  %v650_v5 = vld [vmem:[%s856_s1 + $0x70] sm:$0xff]  ;;  %v649_v9 = vld [vmem:[%s856_s1 + $0x68] sm:$0xff] }
   0x3   :  { %v659_v2 = vld [vmem:[%s856_s1 + $0xb8] sm:$0xff]  ;;  %383 = vmatpush.bf16.msra.mxu1 %v651_v1  ;;  %v658_v6 = vld [vmem:[%s856_s1 + $0xb0] sm:$0xff]  ;;  %v657_v10 = vld [vmem:[%s856_s1 + $0xa8] sm:$0xff] }
   0x4   :  { %v667_v3 = vld [vmem:[%s856_s1 + $0xf8] sm:$0xff]  ;;  %401 = vmatpush.bf16.msra.mxu2 %v659_v2  ;;  %v666_v7 = vld [vmem:[%s856_s1 + $0xf0] sm:$0xff]  ;;  %v665_v11 = vld [vmem:[%s856_s1 + $0xe8] sm:$0xff] }
   0x5   :  { %419 = vmatpush.bf16.msra.mxu3 %v667_v3  ;;  %v640_v12 = vld [vmem:[%s856_s1 + $0x20] sm:$0xff]  ;;  %v639_v16 = vld [vmem:[%s856_s1 + $0x18] sm:$0xff]  ;;  %v638_v20 = vld [vmem:[%s856_s1 + $0x10] sm:$0xff] }
   0x6   :  { %366 = vmatpush.bf16.msra.mxu0 %v642_v4  ;;  %v648_v13 = vld [vmem:[%s856_s1 + $0x60] sm:$0xff]  ;;  %v647_v17 = vld [vmem:[%s856_s1 + $0x58] sm:$0xff]  ;;  %v646_v21 = vld [vmem:[%s856_s1 + $0x50] sm:$0xff] }
   0x7   :  { %384 = vmatpush.bf16.msra.mxu1 %v650_v5  ;;  %v656_v14 = vld [vmem:[%s856_s1 + $0xa0] sm:$0xff]  ;;  %v655_v18 = vld [vmem:[%s856_s1 + $0x98] sm:$0xff]  ;;  %v654_v22 = vld [vmem:[%s856_s1 + $0x90] sm:$0xff] }
   0x8   :  { %402 = vmatpush.bf16.msra.mxu2 %v658_v6  ;;  %v664_v15 = vld [vmem:[%s856_s1 + $0xe0] sm:$0xff]  ;;  %v663_v19 = vld [vmem:[%s856_s1 + $0xd8] sm:$0xff]  ;;  %v662_v23 = vld [vmem:[%s856_s1 + $0xd0] sm:$0xff] }
   0x9   :  { %420 = vmatpush.bf16.msra.mxu3 %v666_v7  ;;  %v637_v24 = vld [vmem:[%s856_s1 + $0x8] sm:$0xff]  ;;  %v636_v28 = vld [vmem:[%s856_s1] sm:$0xff]  ;;  %v633_v33 = vld [vmem:[%s858_s0 + $0x10] sm:$0xf0] }
   0xa   :  { %367 = vmatpush.bf16.msra.mxu0 %v641_v8  ;;  %v645_v25 = vld [vmem:[%s856_s1 + $0x48] sm:$0xff]  ;;  %v644_v29 = vld [vmem:[%s856_s1 + $0x40] sm:$0xff]  ;;  %v469_v35 = vld [vmem:[%s858_s0 + $0x14] sm:$0xf0] }
   0xb   :  { %385 = vmatpush.bf16.msra.mxu1 %v649_v9  ;;  %v653_v26 = vld [vmem:[%s856_s1 + $0x88] sm:$0xff]  ;;  %v652_v30 = vld [vmem:[%s856_s1 + $0x80] sm:$0xff]  ;;  %v634_v37 = vld [vmem:[%s858_s0 + $0x18] sm:$0xf0] }
   0xc   :  { %403 = vmatpush.bf16.msra.mxu2 %v657_v10  ;;  %v661_v27 = vld [vmem:[%s856_s1 + $0xc8] sm:$0xff]  ;;  %v660_v31 = vld [vmem:[%s856_s1 + $0xc0] sm:$0xff]  ;;  %v671_v40 = vld [vmem:[%s856_s1 + $0x118] sm:$0xff] }
   0xd   :  { %421 = vmatpush.bf16.msra.mxu3 %v665_v11  ;;  %v467_v32 = vld [vmem:[%s858_s0] sm:$0xf]  ;;  %v631_v34 = vld [vmem:[%s858_s0 + $0x4] sm:$0xf]  ;;  %v475_v36 = vld [vmem:[%s858_s0 + $0x8] sm:$0xf] }
   0xe   :  { %368 = vmatpush.bf16.msra.mxu0 %v640_v12  ;;  %v632_v38 = vld [vmem:[%s858_s0 + $0xc] sm:$0xf]  ;;  %v477_v39 = vld [vmem:[%s858_s0 + $0x1c] sm:$0xf0]  ;;  %v468_v41 = vor.u32 %v633_v33, %v467_v32  ;;  %v472_v42 = vor.u32 %v631_v34, %v469_v35  ;;  %v476_v43 = vor.u32 %v634_v37, %v475_v36  ;;  %v670_v45 = vld [vmem:[%s856_s1 + $0x110] sm:$0xff] }
   0xf   :  { %386 = vmatpush.bf16.msra.mxu1 %v648_v13  ;;  %v480_v44 = vor.u32 %v632_v38, %v477_v39  ;;  %v669_v46 = vld [vmem:[%s856_s1 + $0x108] sm:$0xff]  ;;  %v22_v48 = vld [vmem:[%s858_s0 + $0x30] sm:$0xff]  ;;  %v668_v49 = vld [vmem:[%s856_s1 + $0x100] sm:$0xff] }
  0x10   :  { %404 = vmatpush.bf16.msra.mxu2 %v656_v14  ;;  %v21_v47 = vld [vmem:[%s858_s0 + $0x28] sm:$0xff]  ;;  %v121_v52 = vunpack.c.l.b16 %v22_v48  ;;  %v122_v53 = vunpack.c.h.b16 %v22_v48  ;;  %v23_v58 = vld [vmem:[%s858_s0 + $0x38] sm:$0xf]  ;;  %v483_v60 = vld [vmem:[%s858_s0 + $0x10] sm:$0xf] }
  0x11   :  { %422 = vmatpush.bf16.msra.mxu3 %v664_v15  ;;  %v119_v50 = vunpack.c.l.b16 %v21_v47  ;;  %v120_v51 = vunpack.c.h.b16 %v21_v47  ;;  %v123_v59 = vunpack.c.l.b16 %v23_v58  ;;  %v635_v61 = vld [vmem:[%s858_s0 + $0x20] sm:$0xf0]  ;;  %v676_v10 = vld [vmem:[%s857_s2] ss:$0 sm:$0xff] }
  0x12   :  { %369 = vmatpush.bf16.msra.mxu0 %v639_v16  ;;  %v131_v56 = vpack.c.b16 %v121_v52, %v121_v52  ;;  %v132_v57 = vpack.c.b16 %v122_v53, %v122_v53  ;;  %v484_v62 = vor.u32 %v635_v61, %v483_v60 }
  0x13   :  { %387 = vmatpush.bf16.msra.mxu1 %v647_v17  ;;  %v129_v54 = vpack.c.b16 %v119_v50, %v119_v50  ;;  %v130_v55 = vpack.c.b16 %v120_v51, %v120_v51  ;;  %v133_v63 = vpack.c.b16 %v123_v59, %v123_v59 }
  0x14   :  { %405 = vmatpush.bf16.msra.mxu2 %v655_v18 }
  0x15   :  { %423 = vmatpush.bf16.msra.mxu3 %v663_v19 }
  0x16   :  { %370 = vmatpush.bf16.msra.mxu0 %v638_v20 }
  0x17   :  { %388 = vmatpush.bf16.msra.mxu1 %v646_v21 }
  0x18   :  { %406 = vmatpush.bf16.msra.mxu2 %v654_v22 }
  0x19   :  { %424 = vmatpush.bf16.msra.mxu3 %v662_v23 }
  0x1a   :  { %371 = vmatpush.bf16.msra.mxu0 %v637_v24 }
  0x1b   :  { %389 = vmatpush.bf16.msra.mxu1 %v645_v25 }
  0x1c   :  { %407 = vmatpush.bf16.msra.mxu2 %v653_v26 }
  0x1d   :  { %425 = vmatpush.bf16.msra.mxu3 %v661_v27 }
  0x1e   :  { %372 = vmatpush.bf16.msra.mxu0 %v636_v28 }
  0x1f   :  { %390 = vmatpush.bf16.msra.mxu1 %v644_v29 }
  0x20   :  { %408 = vmatpush.bf16.msra.mxu2 %v652_v30 }
  0x21   :  { %426 = vmatpush.bf16.msra.mxu3 %v660_v31  ;;  %373 = vmatmul.bf16.vlgmr.msra.gmra.mxu0 %v468_v41 }
  0x22   :  { %441 = vmatpush.bf16.msrb.mxu0 %v671_v40  ;;  %391 = vmatmul.bf16.vlgmr.msra.gmra.mxu1 %v472_v42 }
  0x23   :  { %672 = vmatpush.bf16.msrb.mxu1 %v671_v40  ;;  %409 = vmatmul.bf16.vlgmr.msra.gmra.mxu2 %v476_v43 }
  0x24   :  { %427 = vmatmul.bf16.vlgmr.msra.gmra.mxu3 %v480_v44 }
  0x26   :  { %442 = vmatpush.bf16.msrb.mxu0 %v670_v45 }
  0x27   :  { %673 = vmatpush.bf16.msrb.mxu1 %v670_v45 }
  0x2a   :  { %443 = vmatpush.bf16.msrb.mxu0 %v669_v46 }
  0x2b   :  { %674 = vmatpush.bf16.msrb.mxu1 %v669_v46 }
  0x2e   :  { %444 = vmatpush.bf16.msrb.mxu0 %v668_v49 }
  0x2f   :  { %675 = vmatpush.bf16.msrb.mxu1 %v668_v49 }
  0x31   :  { %378 = vmatmul.bf16.gmra.mxu0 %v129_v54 }
  0x32   :  { %396 = vmatmul.bf16.gmra.mxu1 %v130_v55 }
  0x33   :  { %414 = vmatmul.bf16.gmra.mxu2 %v131_v56 }
  0x34   :  { %432 = vmatmul.bf16.gmra.mxu3 %v132_v57 }
  0x41   :  { %629 = vmatmul.msk.bf16.vlgmr.msrb.gmra.mxu0 %vm358_vm0, %v484_v62 }
  0x42   :  { %630 = vmatmul.msk.bf16.vlgmr.msrb.gmra.mxu1 %vm358_vm0, %v133_v63 }
  0x9e   :  { %v374_v0 = vpop.f32.mrf.mxu0 }
  0x9f   :  { %v392_v1 = vpop.f32.mrf.mxu1  ;;  %v375_v11 = vadd.f32 %v676_v10, %v374_v0 }
  0xa1   :  { %v393_v17 = vadd.f32 %v392_v1, %v375_v11 }
  0xa6   :  { %v410_v2 = vpop.f32.mrf.mxu2  ;;  %v376_v4 = vpop.f32.mrf.mxu0 }
  0xa7   :  { %v428_v3 = vpop.f32.mrf.mxu3  ;;  %v394_v5 = vpop.f32.mrf.mxu1  ;;  %v411_v19 = vadd.f32 %v410_v2, %v393_v17  ;;  %v377_v21 = vadd.f32 %v676_v10, %v376_v4 }
  0xa9   :  { %v429_v22 = vadd.f32 %v428_v3, %v411_v19  ;;  %v395_v28 = vadd.f32 %v394_v5, %v377_v21 }
  0xae   :  { %v412_v6 = vpop.f32.mrf.mxu2  ;;  %v379_v8 = vpop.f32.mrf.mxu0 }
  0xaf   :  { %v430_v7 = vpop.f32.mrf.mxu3  ;;  %v397_v9 = vpop.f32.mrf.mxu1  ;;  %v380_v12 = vadd.f32 %v676_v10, %v379_v8  ;;  %v413_v31 = vadd.f32 %v412_v6, %v395_v28 }
  0xb1   :  { %v398_v18 = vadd.f32 %v397_v9, %v380_v12  ;;  %v431_v34 = vadd.f32 %v430_v7, %v413_v31 }
  0xb6   :  { %v415_v13 = vpop.f32.mrf.mxu2  ;;  %v381_v15 = vpop.f32.mrf.mxu0 }
  0xb7   :  { %v433_v14 = vpop.f32.mrf.mxu3  ;;  %v399_v16 = vpop.f32.mrf.mxu1  ;;  %v416_v20 = vadd.f32 %v415_v13, %v398_v18 }
  0xb9   :  { %v434_v23 = vadd.f32 %v433_v14, %v416_v20 }
  0xbe   :  { %v417_v24 = vpop.f32.mrf.mxu2  ;;  %v446_v26 = vpop.f32.mrf.mxu0 }
  0xbf   :  { %v435_v25 = vpop.f32.mrf.mxu3  ;;  %v451_v27 = vpop.f32.mrf.mxu1  ;;  %v447_v29 = vadd.f32 %v446_v26, %v429_v22 }
  0xc0   :  { %v452_v30 = vadd.f32 %v451_v27, %v434_v23 }
  0xc1   :  { %v455_v32 = vmax.f32 %v447_v29, 0.0 }
  0xc2   :  { %v457_v33 = vmax.f32 %v452_v30, 0.0 }
  0xc3   :  { %458 = vst [vmem:[%s859_s3] sm:$0xff] %v455_v32 }
  0xc4   :  { %460 = vst [vmem:[%s859_s3 + $0x10] sm:$0xff] %v457_v33 }
  0xc6   :  { %v448_v35 = vpop.f32.mrf.mxu0 }
  0xc7   :  { %v453_v36 = vpop.f32.mrf.mxu1  ;;  %v449_v37 = vadd.f32 %v448_v35, %v431_v34 }
  0xc9   :  { %v456_v38 = vmax.f32 %v449_v37, 0.0 }
  0xcb   :  { %459 = vst [vmem:[%s859_s3 + $0x8] sm:$0xff] %v456_v38 }

// kernel: incept_init_block.23
= control target key start
LH: loop header
LB: loop body
LE: loop exit
PB: predicated region body
PF: predicated region fallthrough
CT: control target
= control target key end

     0   :  { %vm522_vm0 = vcmask 785408   ;;  %s1229_s1 = inlined_call_operand.vmem [shape: bf16[864,128], index: 1, kind: input, shape index: {}]   ;;  %s1230_s2 = inlined_call_operand.vmem [shape: f32[1,128], index: 2, kind: input, shape index: {}]   ;;  %s1231_s0 = inlined_call_operand.vmem [shape: bf16[24,864], index: 0, kind: input, shape index: {}]   ;;  %s1232_s3 = inlined_call_operand.vmem [shape: f32[24,128], index: 3, kind: output, shape index: {}]  }
   0x1   :  { %v925_v0 = vld [vmem:[%s1229_s1 + $0x38] sm:$0xff]  ;;  %v924_v4 = vld [vmem:[%s1229_s1 + $0x30] sm:$0xff]  ;;  %v923_v8 = vld [vmem:[%s1229_s1 + $0x28] sm:$0xff] }
   0x2   :  { %v933_v1 = vld [vmem:[%s1229_s1 + $0x78] sm:$0xff]  ;;  %529 = vmatpush.bf16.msra.mxu0 %v925_v0  ;;  %v932_v5 = vld [vmem:[%s1229_s1 + $0x70] sm:$0xff]  ;;  %v931_v9 = vld [vmem:[%s1229_s1 + $0x68] sm:$0xff] }
   0x3   :  { %v941_v2 = vld [vmem:[%s1229_s1 + $0xb8] sm:$0xff]  ;;  %547 = vmatpush.bf16.msra.mxu1 %v933_v1  ;;  %v940_v6 = vld [vmem:[%s1229_s1 + $0xb0] sm:$0xff]  ;;  %v939_v10 = vld [vmem:[%s1229_s1 + $0xa8] sm:$0xff] }
   0x4   :  { %v949_v3 = vld [vmem:[%s1229_s1 + $0xf8] sm:$0xff]  ;;  %565 = vmatpush.bf16.msra.mxu2 %v941_v2  ;;  %v948_v7 = vld [vmem:[%s1229_s1 + $0xf0] sm:$0xff]  ;;  %v947_v11 = vld [vmem:[%s1229_s1 + $0xe8] sm:$0xff] }
   0x5   :  { %583 = vmatpush.bf16.msra.mxu3 %v949_v3  ;;  %v922_v12 = vld [vmem:[%s1229_s1 + $0x20] sm:$0xff]  ;;  %v921_v16 = vld [vmem:[%s1229_s1 + $0x18] sm:$0xff]  ;;  %v920_v20 = vld [vmem:[%s1229_s1 + $0x10] sm:$0xff] }
   0x6   :  { %530 = vmatpush.bf16.msra.mxu0 %v924_v4  ;;  %v930_v13 = vld [vmem:[%s1229_s1 + $0x60] sm:$0xff]  ;;  %v929_v17 = vld [vmem:[%s1229_s1 + $0x58] sm:$0xff]  ;;  %v928_v21 = vld [vmem:[%s1229_s1 + $0x50] sm:$0xff] }
   0x7   :  { %548 = vmatpush.bf16.msra.mxu1 %v932_v5  ;;  %v938_v14 = vld [vmem:[%s1229_s1 + $0xa0] sm:$0xff]  ;;  %v937_v18 = vld [vmem:[%s1229_s1 + $0x98] sm:$0xff]  ;;  %v936_v22 = vld [vmem:[%s1229_s1 + $0x90] sm:$0xff] }
   0x8   :  { %566 = vmatpush.bf16.msra.mxu2 %v940_v6  ;;  %v946_v15 = vld [vmem:[%s1229_s1 + $0xe0] sm:$0xff]  ;;  %v945_v19 = vld [vmem:[%s1229_s1 + $0xd8] sm:$0xff]  ;;  %v944_v23 = vld [vmem:[%s1229_s1 + $0xd0] sm:$0xff] }
   0x9   :  { %584 = vmatpush.bf16.msra.mxu3 %v948_v7  ;;  %v919_v24 = vld [vmem:[%s1229_s1 + $0x8] sm:$0xff]  ;;  %v918_v28 = vld [vmem:[%s1229_s1] sm:$0xff]  ;;  %v914_v33 = vld [vmem:[%s1231_s0 + $0x18] sm:$0xf0] }
   0xa   :  { %531 = vmatpush.bf16.msra.mxu0 %v923_v8  ;;  %v927_v25 = vld [vmem:[%s1229_s1 + $0x48] sm:$0xff]  ;;  %v926_v29 = vld [vmem:[%s1229_s1 + $0x40] sm:$0xff]  ;;  %v957_v41 = vld [vmem:[%s1229_s1 + $0x138] sm:$0xff] }
   0xb   :  { %549 = vmatpush.bf16.msra.mxu1 %v931_v9  ;;  %v935_v26 = vld [vmem:[%s1229_s1 + $0x88] sm:$0xff]  ;;  %v934_v30 = vld [vmem:[%s1229_s1 + $0x80] sm:$0xff]  ;;  %v965_v46 = vld [vmem:[%s1229_s1 + $0x178] sm:$0xff] }
   0xc   :  { %567 = vmatpush.bf16.msra.mxu2 %v939_v10  ;;  %v943_v27 = vld [vmem:[%s1229_s1 + $0xc8] sm:$0xff]  ;;  %v942_v31 = vld [vmem:[%s1229_s1 + $0xc0] sm:$0xff]  ;;  %v956_v47 = vld [vmem:[%s1229_s1 + $0x130] sm:$0xff] }
   0xd   :  { %585 = vmatpush.bf16.msra.mxu3 %v947_v11  ;;  %v667_v32 = vld [vmem:[%s1231_s0] sm:$0xf]  ;;  %v911_v34 = vld [vmem:[%s1231_s0 + $0x4] sm:$0xf]  ;;  %v675_v36 = vld [vmem:[%s1231_s0 + $0x8] sm:$0xf] }
   0xe   :  { %532 = vmatpush.bf16.msra.mxu0 %v922_v12  ;;  %v669_v35 = vld [vmem:[%s1231_s0 + $0x1c] sm:$0xf0]  ;;  %v915_v37 = vld [vmem:[%s1231_s0 + $0x20] sm:$0xf0]  ;;  %v912_v38 = vld [vmem:[%s1231_s0 + $0xc] sm:$0xf]  ;;  %v668_v42 = vor.u32 %v914_v33, %v667_v32 }
   0xf   :  { %550 = vmatpush.bf16.msra.mxu1 %v930_v13  ;;  %v677_v39 = vld [vmem:[%s1231_s0 + $0x24] sm:$0xf0]  ;;  %v672_v43 = vor.u32 %v911_v34, %v669_v35  ;;  %v676_v44 = vor.u32 %v915_v37, %v675_v36  ;;  %v970_v48 = vld [vmem:[%s1229_s1 + $0x1a0] sm:$0xff]  ;;  %v964_v49 = vld [vmem:[%s1229_s1 + $0x170] sm:$0xff] }
  0x10   :  { %568 = vmatpush.bf16.msra.mxu2 %v938_v14  ;;  %v971_v40 = vld [vmem:[%s1229_s1 + $0x1a8] sm:$0xff]  ;;  %v680_v45 = vor.u32 %v912_v38, %v677_v39  ;;  %v969_v51 = vld [vmem:[%s1229_s1 + $0x198] sm:$0xff]  ;;  %v24_v54 = vld [vmem:[%s1231_s0 + $0x40] sm:$0xff] }
  0x11   :  { %586 = vmatpush.bf16.msra.mxu3 %v946_v15  ;;  %v955_v50 = vld [vmem:[%s1229_s1 + $0x128] sm:$0xff]  ;;  %v23_v52 = vld [vmem:[%s1231_s0 + $0x38] sm:$0xff]  ;;  %v954_v55 = vld [vmem:[%s1229_s1 + $0x120] sm:$0xff]  ;;  %v167_v59 = vunpack.c.l.b16 %v24_v54  ;;  %v168_v60 = vunpack.c.h.b16 %v24_v54 }
  0x12   :  { %533 = vmatpush.bf16.msra.mxu0 %v921_v16  ;;  %v963_v53 = vld [vmem:[%s1229_s1 + $0x168] sm:$0xff]  ;;  %v968_v56 = vld [vmem:[%s1229_s1 + $0x190] sm:$0xff]  ;;  %v165_v57 = vunpack.c.l.b16 %v23_v52  ;;  %v166_v58 = vunpack.c.h.b16 %v23_v52  ;;  %v962_v61 = vld [vmem:[%s1229_s1 + $0x160] sm:$0xff] }
  0x13   :  { %551 = vmatpush.bf16.msra.mxu1 %v929_v17  ;;  %v953_v62 = vld [vmem:[%s1229_s1 + $0x118] sm:$0xff]  ;;  %v967_v63 = vld [vmem:[%s1229_s1 + $0x188] sm:$0xff]  ;;  %v181_v2 = vpack.c.b16 %v167_v59, %v167_v59  ;;  %v182_v3 = vpack.c.b16 %v168_v60, %v168_v60  ;;  %v952_v5 = vld [vmem:[%s1229_s1 + $0x110] sm:$0xff] }
  0x14   :  { %569 = vmatpush.bf16.msra.mxu2 %v937_v18  ;;  %v179_v0 = vpack.c.b16 %v165_v57, %v165_v57  ;;  %v180_v1 = vpack.c.b16 %v166_v58, %v166_v58  ;;  %v961_v4 = vld [vmem:[%s1229_s1 + $0x158] sm:$0xff]  ;;  %v966_v6 = vld [vmem:[%s1229_s1 + $0x180] sm:$0xff]  ;;  %v960_v7 = vld [vmem:[%s1229_s1 + $0x150] sm:$0xff] }
  0x15   :  { %587 = vmatpush.bf16.msra.mxu3 %v945_v19  ;;  %v951_v8 = vld [vmem:[%s1229_s1 + $0x108] sm:$0xff]  ;;  %v950_v11 = vld [vmem:[%s1229_s1 + $0x100] sm:$0xff]  ;;  %v683_v12 = vld [vmem:[%s1231_s0 + $0x10] sm:$0xf] }
  0x16   :  { %534 = vmatpush.bf16.msra.mxu0 %v920_v20  ;;  %v959_v9 = vld [vmem:[%s1229_s1 + $0x148] sm:$0xff]  ;;  %v958_v15 = vld [vmem:[%s1229_s1 + $0x140] sm:$0xff]  ;;  %v913_v16 = vld [vmem:[%s1231_s0 + $0x14] sm:$0xf] }
  0x17   :  { %552 = vmatpush.bf16.msra.mxu1 %v928_v21  ;;  %v25_v10 = vld [vmem:[%s1231_s0 + $0x48] sm:$0xff]  ;;  %v685_v17 = vld [vmem:[%s1231_s0 + $0x2c] sm:$0xf0]  ;;  %v691_v18 = vld [vmem:[%s1231_s0 + $0x18] sm:$0xf] }
  0x18   :  { %570 = vmatpush.bf16.msra.mxu2 %v936_v22  ;;  %v916_v13 = vld [vmem:[%s1231_s0 + $0x28] sm:$0xf0]  ;;  %v169_v14 = vunpack.c.l.b16 %v25_v10  ;;  %v917_v19 = vld [vmem:[%s1231_s0 + $0x30] sm:$0xf0]  ;;  %v688_v22 = vor.u32 %v913_v16, %v685_v17  ;;  %v980_v39 = vld [vmem:[%s1230_s2] ss:$0 sm:$0xff] }
  0x19   :  { %588 = vmatpush.bf16.msra.mxu3 %v944_v23  ;;  %v684_v20 = vor.u32 %v916_v13, %v683_v12  ;;  %v692_v23 = vor.u32 %v917_v19, %v691_v18 }
  0x1a   :  { %535 = vmatpush.bf16.msra.mxu0 %v919_v24  ;;  %v183_v21 = vpack.c.b16 %v169_v14, %v169_v14  ;;  %v26_v24 = vld [vmem:[%s1231_s0 + $0x50] sm:$0xf] }
  0x1b   :  { %553 = vmatpush.bf16.msra.mxu1 %v927_v25  ;;  %v170_v25 = vunpack.c.h.b16 %v25_v10 }
  0x1c   :  { %571 = vmatpush.bf16.msra.mxu2 %v935_v26  ;;  %v171_v26 = vunpack.c.l.b16 %v26_v24 }
  0x1d   :  { %589 = vmatpush.bf16.msra.mxu3 %v943_v27  ;;  %v184_v27 = vpack.c.b16 %v170_v25, %v170_v25 }
  0x1e   :  { %536 = vmatpush.bf16.msra.mxu0 %v918_v28  ;;  %v185_v28 = vpack.c.b16 %v171_v26, %v171_v26 }
  0x1f   :  { %554 = vmatpush.bf16.msra.mxu1 %v926_v29 }
  0x20   :  { %572 = vmatpush.bf16.msra.mxu2 %v934_v30 }
  0x21   :  { %590 = vmatpush.bf16.msra.mxu3 %v942_v31  ;;  %537 = vmatmul.bf16.vlgmr.msra.gmra.mxu0 %v668_v42 }
  0x22   :  { %601 = vmatpush.bf16.msrb.mxu0 %v957_v41  ;;  %555 = vmatmul.bf16.vlgmr.msra.gmra.mxu1 %v672_v43 }
  0x23   :  { %573 = vmatmul.bf16.vlgmr.msra.gmra.mxu2 %v676_v44  ;;  %619 = vmatpush.bf16.msrb.mxu1 %v965_v46 }
  0x24   :  { %639 = vmatpush.bf16.msrb.mxu2 %v971_v40  ;;  %591 = vmatmul.bf16.vlgmr.msra.gmra.mxu3 %v680_v45 }
  0x25   :  { %972 = vmatpush.bf16.msrb.mxu3 %v957_v41 }
  0x26   :  { %602 = vmatpush.bf16.msrb.mxu0 %v956_v47 }
  0x27   :  { %620 = vmatpush.bf16.msrb.mxu1 %v964_v49 }
  0x28   :  { %640 = vmatpush.bf16.msrb.mxu2 %v970_v48 }
  0x29   :  { %973 = vmatpush.bf16.msrb.mxu3 %v956_v47 }
  0x2a   :  { %603 = vmatpush.bf16.msrb.mxu0 %v955_v50 }
  0x2b   :  { %621 = vmatpush.bf16.msrb.mxu1 %v963_v53 }
  0x2c   :  { %641 = vmatpush.bf16.msrb.mxu2 %v969_v51 }
  0x2d   :  { %974 = vmatpush.bf16.msrb.mxu3 %v955_v50 }
  0x2e   :  { %604 = vmatpush.bf16.msrb.mxu0 %v954_v55 }
  0x2f   :  { %622 = vmatpush.bf16.msrb.mxu1 %v962_v61 }
  0x30   :  { %642 = vmatpush.bf16.msrb.mxu2 %v968_v56 }
  0x31   :  { %975 = vmatpush.bf16.msrb.mxu3 %v954_v55  ;;  %542 = vmatmul.bf16.gmra.mxu0 %v179_v0 }
  0x32   :  { %605 = vmatpush.bf16.msrb.mxu0 %v953_v62  ;;  %560 = vmatmul.bf16.gmra.mxu1 %v180_v1 }
  0x33   :  { %578 = vmatmul.bf16.gmra.mxu2 %v181_v2  ;;  %623 = vmatpush.bf16.msrb.mxu1 %v961_v4 }
  0x34   :  { %643 = vmatpush.bf16.msrb.mxu2 %v967_v63  ;;  %596 = vmatmul.bf16.gmra.mxu3 %v182_v3 }
  0x35   :  { %976 = vmatpush.bf16.msrb.mxu3 %v953_v62 }
  0x36   :  { %606 = vmatpush.bf16.msrb.mxu0 %v952_v5 }
  0x37   :  { %624 = vmatpush.bf16.msrb.mxu1 %v960_v7 }
  0x38   :  { %644 = vmatpush.bf16.msrb.mxu2 %v966_v6 }
  0x39   :  { %977 = vmatpush.bf16.msrb.mxu3 %v952_v5 }
  0x3a   :  { %607 = vmatpush.bf16.msrb.mxu0 %v951_v8 }
  0x3b   :  { %625 = vmatpush.bf16.msrb.mxu1 %v959_v9 }
  0x3d   :  { %978 = vmatpush.bf16.msrb.mxu3 %v951_v8 }
  0x3e   :  { %608 = vmatpush.bf16.msrb.mxu0 %v950_v11 }
  0x3f   :  { %626 = vmatpush.bf16.msrb.mxu1 %v958_v15 }
  0x41   :  { %979 = vmatpush.bf16.msrb.mxu3 %v950_v11  ;;  %609 = vmatmul.bf16.vlgmr.msrb.gmra.mxu0 %v684_v20 }
  0x42   :  { %627 = vmatmul.bf16.vlgmr.msrb.gmra.mxu1 %v688_v22 }
  0x43   :  { %909 = vmatmul.msk.bf16.vlgmr.msrb.gmra.mxu2 %vm522_vm0, %v692_v23 }
  0x44   :  { %614 = vmatmul.bf16.vlgmr.msrb.gmra.mxu3 %v183_v21 }
  0x52   :  { %632 = vmatmul.bf16.gmra.mxu1 %v184_v27 }
  0x53   :  { %910 = vmatmul.msk.bf16.gmra.mxu2 %vm522_vm0, %v185_v28 }
  0x9e   :  { %v538_v29 = vpop.f32.mrf.mxu0 }
  0x9f   :  { %v556_v30 = vpop.f32.mrf.mxu1  ;;  %v539_v40 = vadd.f32 %v980_v39, %v538_v29 }
  0xa1   :  { %v557_v45 = vadd.f32 %v556_v30, %v539_v40 }
  0xa6   :  { %v574_v31 = vpop.f32.mrf.mxu2  ;;  %v540_v33 = vpop.f32.mrf.mxu0 }
  0xa7   :  { %v592_v32 = vpop.f32.mrf.mxu3  ;;  %v558_v34 = vpop.f32.mrf.mxu1  ;;  %v575_v46 = vadd.f32 %v574_v31, %v557_v45  ;;  %v541_v47 = vadd.f32 %v980_v39, %v540_v33 }
  0xa9   :  { %v593_v51 = vadd.f32 %v592_v32, %v575_v46  ;;  %v559_v53 = vadd.f32 %v558_v34, %v541_v47 }
  0xae   :  { %v576_v35 = vpop.f32.mrf.mxu2  ;;  %v543_v37 = vpop.f32.mrf.mxu0 }
  0xaf   :  { %v594_v36 = vpop.f32.mrf.mxu3  ;;  %v561_v38 = vpop.f32.mrf.mxu1  ;;  %v577_v55 = vadd.f32 %v576_v35, %v559_v53  ;;  %v544_v56 = vadd.f32 %v980_v39, %v543_v37 }
  0xb1   :  { %v595_v61 = vadd.f32 %v594_v36, %v577_v55  ;;  %v562_v0 = vadd.f32 %v561_v38, %v544_v56 }
  0xb6   :  { %v579_v41 = vpop.f32.mrf.mxu2  ;;  %v545_v43 = vpop.f32.mrf.mxu0 }
  0xb7   :  { %v597_v42 = vpop.f32.mrf.mxu3  ;;  %v563_v44 = vpop.f32.mrf.mxu1  ;;  %v580_v3 = vadd.f32 %v579_v41, %v562_v0 }
  0xb9   :  { %v598_v9 = vadd.f32 %v597_v42, %v580_v3 }
  0xbe   :  { %v581_v48 = vpop.f32.mrf.mxu2  ;;  %v610_v50 = vpop.f32.mrf.mxu0 }
  0xbf   :  { %v599_v49 = vpop.f32.mrf.mxu3  ;;  %v628_v52 = vpop.f32.mrf.mxu1  ;;  %v611_v54 = vadd.f32 %v610_v50, %v593_v51 }
  0xc1   :  { %v629_v57 = vadd.f32 %v628_v52, %v611_v54 }
  0xc6   :  { %v646_v59 = vpop.f32.mrf.mxu2  ;;  %v612_v60 = vpop.f32.mrf.mxu0 }
  0xc7   :  { %v615_v58 = vpop.f32.mrf.mxu3  ;;  %v647_v62 = vadd.f32 %v646_v59, %v629_v57  ;;  %v630_v63 = vpop.f32.mrf.mxu1  ;;  %v613_v2 = vadd.f32 %v612_v60, %v595_v61 }
  0xc8   :  { %v616_v11 = vadd.f32 %v615_v58, %v598_v9 }
  0xc9   :  { %v655_v1 = vmax.f32 %v647_v62, 0.0  ;;  %v631_v4 = vadd.f32 %v630_v63, %v613_v2 }
  0xcb   :  { %658 = vst [vmem:[%s1232_s3] sm:$0xff] %v655_v1 }
  0xce   :  { %v648_v6 = vpop.f32.mrf.mxu2 }
  0xcf   :  { %v617_v5 = vpop.f32.mrf.mxu3  ;;  %v649_v7 = vadd.f32 %v648_v6, %v631_v4  ;;  %v633_v8 = vpop.f32.mrf.mxu1 }
  0xd0   :  { %v634_v12 = vadd.f32 %v633_v8, %v616_v11 }
  0xd1   :  { %v656_v10 = vmax.f32 %v649_v7, 0.0 }
  0xd3   :  { %659 = vst [vmem:[%s1232_s3 + $0x8] sm:$0xff] %v656_v10 }
  0xd6   :  { %v651_v13 = vpop.f32.mrf.mxu2 }
  0xd7   :  { %v652_v14 = vadd.f32 %v651_v13, %v634_v12  ;;  %v635_v15 = vpop.f32.mrf.mxu1 }
  0xd9   :  { %v657_v16 = vmax.f32 %v652_v14, 0.0 }
  0xdb   :  { %660 = vst [vmem:[%s1232_s3 + $0x10] sm:$0xff] %v657_v16 }
  0xde   :  { %v653_v17 = vpop.f32.mrf.mxu2 }

// kernel: incept_init_block.25
= control target key start
LH: loop header
LB: loop body
LE: loop exit
PB: predicated region body
PF: predicated region fallthrough
CT: control target
= control target key end

     0   :  { %vm133_vm0 = vcmask 523264   ;;  %s352_s1 = inlined_call_operand.vmem [shape: bf16[192,128], index: 1, kind: input, shape index: {}]   ;;  %s353_s0 = inlined_call_operand.vmem [shape: bf16[24,192], index: 0, kind: input, shape index: {}]   ;;  %s354_s2 = inlined_call_operand.vmem [shape: f32[1,128], index: 2, kind: input, shape index: {}]   ;;  %s355_s3 = inlined_call_operand.vmem [shape: f32[24,128], index: 3, kind: output, shape index: {}]  }
   0x1   :  { %v253_v0 = vld [vmem:[%s352_s1 + $0x38] sm:$0xff]  ;;  %v252_v2 = vld [vmem:[%s352_s1 + $0x30] sm:$0xff]  ;;  %v251_v4 = vld [vmem:[%s352_s1 + $0x28] sm:$0xff] }
   0x2   :  { %v257_v1 = vld [vmem:[%s352_s1 + $0x58] sm:$0xff]  ;;  %140 = vmatpush.bf16.msra.mxu0 %v253_v0  ;;  %258 = vmatpush.bf16.msra.mxu2 %v253_v0  ;;  %v256_v3 = vld [vmem:[%s352_s1 + $0x50] sm:$0xff]  ;;  %v255_v5 = vld [vmem:[%s352_s1 + $0x48] sm:$0xff] }
   0x3   :  { %162 = vmatpush.bf16.msra.mxu1 %v257_v1  ;;  %v250_v6 = vld [vmem:[%s352_s1 + $0x20] sm:$0xff]  ;;  %v190_v9 = vld [vmem:[%s353_s0 + $0x8] sm:$0xf0]  ;;  %v249_v11 = vld [vmem:[%s352_s1 + $0x18] sm:$0xff] }
   0x4   :  { %v254_v7 = vld [vmem:[%s352_s1 + $0x40] sm:$0xff]  ;;  %v248_v12 = vld [vmem:[%s352_s1 + $0x10] sm:$0xff]  ;;  %v247_v13 = vld [vmem:[%s352_s1 + $0x8] sm:$0xff] }
   0x5   :  { %v244_v8 = vld [vmem:[%s353_s0 + $0x4] sm:$0xf]  ;;  %v17_v14 = vld [vmem:[%s353_s0 + $0x10] sm:$0xff]  ;;  %v188_v16 = vld [vmem:[%s353_s0] sm:$0xf] }
   0x6   :  { %141 = vmatpush.bf16.msra.mxu0 %v252_v2  ;;  %259 = vmatpush.bf16.msra.mxu2 %v252_v2  ;;  %v193_v10 = vor.u32 %v244_v8, %v190_v9  ;;  %v246_v15 = vld [vmem:[%s352_s1] sm:$0xff]  ;;  %v245_v17 = vld [vmem:[%s353_s0 + $0x4] sm:$0xf0]  ;;  %v53_v18 = vunpack.c.l.b16 %v17_v14  ;;  %v54_v19 = vunpack.c.h.b16 %v17_v14 }
   0x7   :  { %163 = vmatpush.bf16.msra.mxu1 %v256_v3  ;;  %v189_v20 = vor.u32 %v245_v17, %v188_v16  ;;  %v266_v25 = vld [vmem:[%s354_s2] ss:$0 sm:$0xff] }
   0x8   :  { %v57_v21 = vpack.c.b16 %v53_v18, %v53_v18  ;;  %v58_v22 = vpack.c.b16 %v54_v19, %v54_v19 }
   0xa   :  { %142 = vmatpush.bf16.msra.mxu0 %v251_v4  ;;  %260 = vmatpush.bf16.msra.mxu2 %v251_v4 }
   0xb   :  { %164 = vmatpush.bf16.msra.mxu1 %v255_v5 }
   0xe   :  { %143 = vmatpush.bf16.msra.mxu0 %v250_v6  ;;  %261 = vmatpush.bf16.msra.mxu2 %v250_v6 }
   0xf   :  { %165 = vmatpush.bf16.msra.mxu1 %v254_v7 }
  0x12   :  { %242 = vmatmul.msk.bf16.vlgmr.msra.gmra.mxu1 %vm133_vm0, %v193_v10  ;;  %144 = vmatpush.bf16.msra.mxu0 %v249_v11 }
  0x13   :  { %262 = vmatpush.bf16.msra.mxu2 %v249_v11 }
  0x16   :  { %145 = vmatpush.bf16.msra.mxu0 %v248_v12 }
  0x17   :  { %263 = vmatpush.bf16.msra.mxu2 %v248_v12 }
  0x1a   :  { %146 = vmatpush.bf16.msra.mxu0 %v247_v13 }
  0x1b   :  { %264 = vmatpush.bf16.msra.mxu2 %v247_v13 }
  0x1e   :  { %147 = vmatpush.bf16.msra.mxu0 %v246_v15 }
  0x1f   :  { %265 = vmatpush.bf16.msra.mxu2 %v246_v15 }
  0x21   :  { %148 = vmatmul.bf16.vlgmr.msra.gmra.mxu0 %v189_v20 }
  0x22   :  { %153 = vmatmul.bf16.vlgmr.msra.gmra.mxu2 %v57_v21  ;;  %243 = vmatmul.msk.bf16.gmra.mxu1 %vm133_vm0, %v58_v22 }
  0x8f   :  { %v167_v23 = vpop.f32.mrf.mxu1 }
  0x97   :  { %v169_v24 = vpop.f32.mrf.mxu1 }
  0x9e   :  { %v149_v26 = vpop.f32.mrf.mxu0 }
  0x9f   :  { %v150_v27 = vadd.f32 %v266_v25, %v149_v26  ;;  %v172_v28 = vpop.f32.mrf.mxu1 }
  0xa1   :  { %v168_v29 = vadd.f32 %v167_v23, %v150_v27 }
  0xa3   :  { %v176_v30 = vmax.f32 %v168_v29, 0.0 }
  0xa5   :  { %179 = vst [vmem:[%s355_s3] sm:$0xff] %v176_v30  ;;  %v154_v31 = vpop.f32.mrf.mxu2 }
  0xa6   :  { %v155_v32 = vadd.f32 %v266_v25, %v154_v31  ;;  %v151_v33 = vpop.f32.mrf.mxu0 }
  0xa7   :  { %v152_v34 = vadd.f32 %v266_v25, %v151_v33  ;;  %v174_v35 = vpop.f32.mrf.mxu1 }
  0xa8   :  { %v173_v36 = vadd.f32 %v172_v28, %v155_v32 }
  0xa9   :  { %v170_v37 = vadd.f32 %v169_v24, %v152_v34 }
  0xaa   :  { %v178_v38 = vmax.f32 %v173_v36, 0.0 }
  0xab   :  { %v177_v39 = vmax.f32 %v170_v37, 0.0 }
  0xac   :  { %181 = vst [vmem:[%s355_s3 + $0x10] sm:$0xff] %v178_v38 }
  0xad   :  { %180 = vst [vmem:[%s355_s3 + $0x8] sm:$0xff] %v177_v39  ;;  %v156_v40 = vpop.f32.mrf.mxu2 }

// kernel: incept_init_block.24
= control target key start
LH: loop header
LB: loop body
LE: loop exit
PB: predicated region body
PF: predicated region fallthrough
CT: control target
= control target key end

     0   :  { %s415_s6 = smov 0   ;;  %s477_s0 = inlined_call_operand.vmem [shape: f32[2,5,5,192], index: 0, kind: input, shape index: {}]   ;;  %s478_s1 = inlined_call_operand.vmem [shape: f32[2,3,3,192], index: 1, kind: output, shape index: {}]  }
   0x1 LB: > { %s372_s7 = sadd.s32 4294967295, %s403_s6   ;;  %p376_p0 = scmp.ge.s32.totalorder %s403_s6, 1  ;;  %s403_s6 = sphi %s415_s6, %s11_s6  }
   0x2   : > { %p87_p1 = scmp.lt.s32.totalorder %s403_s6, 3 }
   0x4   : > { %p88_p2 = pnand %p376_p0, %p87_p1 }
   0x5   : > { %p107_p3 = scmp.lt.s32.totalorder (!%p88_p2), %s372_s7, 1 }
   0x6   : > { %91 = sbr.rel (%p88_p2) target bundleno = 175 (0xaf), region = 24 }
   0xb   : > { %v231_v0 = vlaneseq  ;;  %s482_s7 = smov (!%p107_p3, %s372_s7), 1  ;;  %vm311_vm8 = vcmask 1042432   ;;  %vm312_vm9 = vcmask 522244   ;;  %vm304_vm10 = vcmask 1043456  }
   0xc   : > { %s383_s8 = smul.u32 80, %s482_s7  ;;  %vm458_vm11 = vmor %vm312_vm9, %vm311_vm8 }
   0xd   : > { %v232_v1 = vshrl.u32 %v231_v0, 7  ;;  %v234_v2 = vand.u32 127, %v231_v0  ;;  %s384_s12 = smul.u32 24, %s482_s7 }
   0xe   : > { %s433_s11 = scalar_lea.vmem %s477_s0, %s383_s8 }
   0xf   : > { %v243_v3 = vadd.s32 1, %v234_v2  ;;  %v380_v4 = vadd.s32 4294967295, %v234_v2  ;;  %393 = vset.pattern.permute.xlu0 %v232_v1  ;;  %v235_v5 = vadd.s32 1, %v232_v1  ;;  %v379_v6 = vadd.s32 4294967295, %v232_v1  ;;  %394 = vset.pattern.permute.xlu1 %v232_v1  ;;  %v118_v30 = vld [vmem:[%s433_s11 + $0x8] sm:$0x1f]  ;;  %s116_s15 = scalar_lea.vmem %s478_s1, %s384_s12 }
  0x10   : > { %v121_v31 = vld [vmem:[%s433_s11 + $0x20] sm:$0x1f]  ;;  %v122_v32 = vld [vmem:[%s433_s11 + $0x28] sm:$0x1f]  ;;  %v140_v34 = vrot.slane %v118_v30, 1  ;;  %v158_v39 = vrot.slane %v118_v30, 2 }
  0x11   : > { %vm244_vm0 = vcmp.lt.s32.totalorder %v243_v3, 2  ;;  %vm247_vm1 = vcmp.gt.s32.totalorder %v380_v4, 0  ;;  %vm236_vm2 = vcmp.lt.s32.totalorder %v235_v5, 2  ;;  %vm239_vm3 = vcmp.gt.s32.totalorder %v379_v6, 0  ;;  %v117_v33 = vld [vmem:[%s433_s11] sm:$0x1f] }
  0x12   : > { %v245_v7 = vsel %vm244_vm0, %v243_v3, 2  ;;  %v248_v8 = vsel %vm247_vm1, %v380_v4, 0  ;;  %v237_v9 = vsel %vm236_vm2, %v235_v5, 2  ;;  %v240_v10 = vsel %vm239_vm3, %v379_v6, 0  ;;  %v120_v44 = vld [vmem:[%s433_s11 + $0x18] sm:$0x1f] }
  0x13   : > { %v249_v11 = vsub.s32 %v245_v7, %v248_v8  ;;  %v241_v12 = vsub.s32 %v237_v9, %v240_v10  ;;  %v143_v35 = vrot.slane %v121_v31, 1  ;;  %v144_v36 = vrot.slane %v122_v32, 1  ;;  %v119_v48 = vld [vmem:[%s433_s11 + $0x10] sm:$0x1f]  ;;  %v445_v53 = vld [vmem:[%s433_s11 + $0x38] sm:$0x1f] }
  0x14   : > { %v139_v37 = vrot.slane %v117_v33, 1  ;;  %v152_v38 = vadd.f32 %v140_v34, %v118_v30  ;;  %v161_v42 = vrot.slane %v121_v31, 2  ;;  %v162_v43 = vrot.slane %v122_v32, 2  ;;  %v442_v52 = vld [vmem:[%s433_s11 + $0x30] sm:$0x1f] }
  0x15   : > { %v250_v13 = vadd.s32 1, %v249_v11  ;;  %v242_v14 = vadd.s32 1, %v241_v12  ;;  %v155_v40 = vadd.f32 %v143_v35, %v121_v31  ;;  %v156_v41 = vadd.f32 %v144_v36, %v122_v32 }
  0x16   : > { %v151_v45 = vadd.f32 %v139_v37, %v117_v33  ;;  %v157_v46 = vrot.slane %v117_v33, 2  ;;  %v170_v47 = vadd.f32 %v158_v39, %v152_v38  ;;  %v142_v51 = vrot.slane %v120_v44, 1 }
  0x17   : > { %v251_v15 = vmul.u32 %v250_v13, %v242_v14  ;;  %v173_v49 = vadd.f32 %v161_v42, %v155_v40  ;;  %v174_v50 = vadd.f32 %v162_v43, %v156_v41  ;;  %v141_v55 = vrot.slane %v119_v48, 1  ;;  %v125_v14 = vld [vmem:[%s433_s11 + $0x40] sm:$0x1f] }
  0x18   : > { %v169_v54 = vadd.f32 %v157_v46, %v151_v45  ;;  %v154_v56 = vadd.f32 %v142_v51, %v120_v44  ;;  %v176_v57 = vadd.f32 %v170_v47, %v120_v44  ;;  %v183_v60 = vrot.slane %v442_v52, 1 }
  0x19   : > { %v252_v16 = vcvt.s32.f32 %v251_v15  ;;  %v179_v58 = vadd.f32 %v173_v49, %v442_v52  ;;  %v180_v59 = vadd.f32 %v174_v50, %v445_v53  ;;  %v184_v61 = vrot.slane %v445_v53, 1  ;;  %v126_v15 = vld [vmem:[%s433_s11 + $0x48] sm:$0x1f] }
  0x1a   : > { %v160_v62 = vrot.slane %v120_v44, 2  ;;  %v153_v63 = vadd.f32 %v141_v55, %v119_v48  ;;  %v175_v0 = vadd.f32 %v169_v54, %v119_v48  ;;  %v159_v1 = vrot.slane %v119_v48, 2 }
  0x1b   : > { %395 = vrcp.f32 %v252_v16  ;;  %v264_v19 = vand.u32 2147483648, %v252_v16  ;;  %vm258_vm4 = vweird.f32 %v252_v16  ;;  %v262_v21 = vand.u32 2147483647, %v252_v16 }
  0x1c   : > { %v172_v2 = vadd.f32 %v160_v62, %v154_v56  ;;  %v188_v3 = vadd.f32 %v176_v57, %v142_v51  ;;  %v191_v4 = vadd.f32 %v183_v60, %v179_v58  ;;  %v192_v5 = vadd.f32 %v184_v61, %v180_v59 }
  0x1d   : > { %v265_v23 = vor.u32 1.1754944e-38, %v264_v19  ;;  %vm263_vm7 = vcmp.eq.f32.partialorder %v262_v21, 8.507059e+37  ;;  %v193_v6 = vrot.slane %v442_v52, 2  ;;  %v194_v7 = vrot.slane %v445_v53, 2 }
  0x1e   : > { %v171_v8 = vadd.f32 %v159_v1, %v153_v63  ;;  %v187_v9 = vadd.f32 %v175_v0, %v141_v55  ;;  %v198_v10 = vadd.f32 %v188_v3, %v160_v62  ;;  %v178_v11 = vadd.f32 %v172_v2, %v122_v32 }
  0x1f   : > { %v201_v12 = vadd.f32 %v193_v6, %v191_v4  ;;  %v202_v13 = vadd.f32 %v194_v7, %v192_v5  ;;  %v221_v30 = vrot.slane %v125_v14, 2  ;;  %v222_v33 = vrot.slane %v126_v15, 2 }
  0x20   : > { %v190_v19 = vadd.f32 %v178_v11, %v144_v36 }
  0x21   : > { %v396_v17 = vpop.eup %395  ;;  %v208_v21 = vadd.f32 %v202_v13, %v126_v15 }
  0x22   : > { %v254_v18 = vmul.f32 %v396_v17, %v252_v16  ;;  %vm259_vm5 = vweird.f32 %v396_v17  ;;  %v197_v16 = vadd.f32 %v187_v9, %v159_v1 }
  0x23   : > { %vm260_vm6 = vmor %vm258_vm4, %vm259_vm5 }
  0x24   : > { %v255_v20 = vsub.f32 1.0, %v254_v18  ;;  %v204_v18 = vadd.f32 %v198_v10, %v122_v32 }
  0x26   : > { %v256_v22 = vmul.f32 %v396_v17, %v255_v20  ;;  %v207_v20 = vadd.f32 %v201_v12, %v125_v14 }
  0x28   : > { %v257_v24 = vadd.f32 %v396_v17, %v256_v22  ;;  %v211_v22 = vrot.slane %v125_v14, 1 }
  0x2a   : > { %v261_v25 = vsel %vm260_vm6, %v396_v17, %v257_v24  ;;  %v177_v17 = vadd.f32 %v171_v8, %v121_v31  ;;  %v203_v24 = vadd.f32 %v197_v16, %v121_v31 }
  0x2b   : > { %v266_v26 = vsel %vm263_vm7, %v265_v23, %v261_v25  ;;  %v212_v23 = vrot.slane %v126_v15, 1 }
  0x2c   : > { %v268_v27 = vperm.slane %v266_v26, 0  ;;  %v282_v28 = vperm.slane %v266_v26, 2  ;;  %v275_v29 = vperm.slane %v266_v26, 1  ;;  %v189_v25 = vadd.f32 %v177_v17, %v143_v35 }
  0x2d   : > { %v216_v26 = vadd.f32 %v204_v18, %v144_v36  ;;  %v215_v34 = vadd.f32 %v203_v24, %v143_v35 }
  0x2e   : > { %273 = vperm.xlu0 %393, %v268_v27   ;;  %287 = vperm.xlu1 %394, %v282_v28   ;;  %v200_v27 = vadd.f32 %v190_v19, %v162_v43  ;;  %v219_v28 = vadd.f32 %v211_v22, %v207_v20  ;;  %v199_v37 = vadd.f32 %v189_v25, %v161_v42 }
  0x2f   : > { %v226_v38 = vadd.f32 %v216_v26, %v162_v43  ;;  %v225_v41 = vadd.f32 %v215_v34, %v161_v42 }
  0x30   : > { %v229_v39 = vadd.f32 %v221_v30, %v219_v28  ;;  %v206_v32 = vadd.f32 %v200_v27, %v445_v53  ;;  %v205_v44 = vadd.f32 %v199_v37, %v442_v52 }
  0x32   : > { %v218_v48 = vadd.f32 %v206_v32, %v184_v61  ;;  %v217_v50 = vadd.f32 %v205_v44, %v183_v60 }
  0x34   : > { %v228_v53 = vadd.f32 %v218_v48, %v194_v7  ;;  %v227_v54 = vadd.f32 %v217_v50, %v193_v6 }
  0x36   : > { %280 = vperm.xlu0 %393, %v275_v29   ;;  %v220_v29 = vadd.f32 %v212_v23, %v208_v21 }
  0x38   : > { %v230_v40 = vadd.f32 %v222_v33, %v220_v29 }
  0xa0   : > { %v274_v31 = vpop.permute.xlu0 %273  ;;  %v288_v36 = vpop.permute.xlu1 %287 }
  0xa1   : > { %v290_v45 = vmul.f32 %v274_v31, %v226_v38  ;;  %v293_v46 = vmul.f32 %v288_v36, %v229_v39  ;;  %v294_v47 = vmul.f32 %v288_v36, %v230_v40  ;;  %v289_v42 = vmul.f32 %v274_v31, %v225_v41 }
  0xa3   : > { %v301_v43 = vrot.slane %v290_v45, 4  ;;  %v303_v49 = vrot.slane %v294_v47, 4 }
  0xa5   : > { %v305_v51 = vsel %vm304_vm10, %v289_v42, %v301_v43  ;;  %v307_v52 = vsel %vm304_vm10, %v293_v46, %v303_v49 }
  0xa6   : > { %314 = vst.msk [vmem:[%s116_s15] sm:$0x77] %vm458_vm11, %v305_v51 }
  0xa7   : > { %316 = vst.msk [vmem:[%s116_s15 + $0x10] sm:$0x77] %vm458_vm11, %v307_v52 }
  0xa8   : > { %v281_v55 = vpop.permute.xlu0 %280 }
  0xa9   : > { %v292_v56 = vmul.f32 %v281_v55, %v228_v53  ;;  %v291_v57 = vmul.f32 %v281_v55, %v227_v54 }
  0xab   : > { %v302_v58 = vrot.slane %v292_v56, 4 }
  0xad   : > { %v306_v59 = vsel %vm304_vm10, %v291_v57, %v302_v58 }
  0xae   : > { %315 = vst.msk [vmem:[%s116_s15 + $0x8] sm:$0x77] %vm458_vm11, %v306_v59 }
  0xaf PF: > { %s11_s6 = sadd.s32 1, %s403_s6  }
  0xb0   : > { %p8_p4 = scmp.ge.s32.totalorder %s11_s6, 4  }
  0xb2   :  { %10 = sbr.rel (!%p8_p4) target bundleno = 1 (0x1), region = 54 }

// kernel: incept_init_block.21
= control target key start
LH: loop header
LB: loop body
LE: loop exit
PB: predicated region body
PF: predicated region fallthrough
CT: control target
= control target key end

     0   :  { %vm717_vm0 = vcmask 392192   ;;  %s1685_s1 = inlined_call_operand.vmem [shape: bf16[1200,128], index: 1, kind: input, shape index: {}]   ;;  %s1686_s2 = inlined_call_operand.vmem [shape: f32[1,128], index: 2, kind: input, shape index: {}]   ;;  %s1687_s0 = inlined_call_operand.vmem [shape: bf16[24,1200], index: 0, kind: input, shape index: {}]   ;;  %s1688_s3 = inlined_call_operand.vmem [shape: f32[24,128], index: 3, kind: output, shape index: {}]  }
   0x1   :  { %v1273_v0 = vld [vmem:[%s1685_s1 + $0x38] sm:$0xff]  ;;  %v1272_v4 = vld [vmem:[%s1685_s1 + $0x30] sm:$0xff]  ;;  %v1271_v8 = vld [vmem:[%s1685_s1 + $0x28] sm:$0xff] }
   0x2   :  { %v1281_v1 = vld [vmem:[%s1685_s1 + $0x78] sm:$0xff]  ;;  %724 = vmatpush.bf16.msra.mxu0 %v1273_v0  ;;  %v1280_v5 = vld [vmem:[%s1685_s1 + $0x70] sm:$0xff]  ;;  %v1279_v9 = vld [vmem:[%s1685_s1 + $0x68] sm:$0xff] }
   0x3   :  { %v1289_v2 = vld [vmem:[%s1685_s1 + $0xb8] sm:$0xff]  ;;  %742 = vmatpush.bf16.msra.mxu1 %v1281_v1  ;;  %v1288_v6 = vld [vmem:[%s1685_s1 + $0xb0] sm:$0xff]  ;;  %v1287_v10 = vld [vmem:[%s1685_s1 + $0xa8] sm:$0xff] }
   0x4   :  { %v1297_v3 = vld [vmem:[%s1685_s1 + $0xf8] sm:$0xff]  ;;  %760 = vmatpush.bf16.msra.mxu2 %v1289_v2  ;;  %v1296_v7 = vld [vmem:[%s1685_s1 + $0xf0] sm:$0xff]  ;;  %v1295_v11 = vld [vmem:[%s1685_s1 + $0xe8] sm:$0xff] }
   0x5   :  { %778 = vmatpush.bf16.msra.mxu3 %v1297_v3  ;;  %v1270_v12 = vld [vmem:[%s1685_s1 + $0x20] sm:$0xff]  ;;  %v1269_v16 = vld [vmem:[%s1685_s1 + $0x18] sm:$0xff]  ;;  %v1268_v20 = vld [vmem:[%s1685_s1 + $0x10] sm:$0xff] }
   0x6   :  { %725 = vmatpush.bf16.msra.mxu0 %v1272_v4  ;;  %v1278_v13 = vld [vmem:[%s1685_s1 + $0x60] sm:$0xff]  ;;  %v1277_v17 = vld [vmem:[%s1685_s1 + $0x58] sm:$0xff]  ;;  %v1276_v21 = vld [vmem:[%s1685_s1 + $0x50] sm:$0xff] }
   0x7   :  { %743 = vmatpush.bf16.msra.mxu1 %v1280_v5  ;;  %v1286_v14 = vld [vmem:[%s1685_s1 + $0xa0] sm:$0xff]  ;;  %v1285_v18 = vld [vmem:[%s1685_s1 + $0x98] sm:$0xff]  ;;  %v1284_v22 = vld [vmem:[%s1685_s1 + $0x90] sm:$0xff] }
   0x8   :  { %761 = vmatpush.bf16.msra.mxu2 %v1288_v6  ;;  %v1294_v15 = vld [vmem:[%s1685_s1 + $0xe0] sm:$0xff]  ;;  %v1293_v19 = vld [vmem:[%s1685_s1 + $0xd8] sm:$0xff]  ;;  %v1292_v23 = vld [vmem:[%s1685_s1 + $0xd0] sm:$0xff] }
   0x9   :  { %779 = vmatpush.bf16.msra.mxu3 %v1296_v7  ;;  %v1267_v24 = vld [vmem:[%s1685_s1 + $0x8] sm:$0xff]  ;;  %v1266_v28 = vld [vmem:[%s1685_s1] sm:$0xff]  ;;  %v1262_v37 = vld [vmem:[%s1687_s0 + $0x2c] sm:$0xf0] }
   0xa   :  { %726 = vmatpush.bf16.msra.mxu0 %v1271_v8  ;;  %v1275_v25 = vld [vmem:[%s1685_s1 + $0x48] sm:$0xff]  ;;  %v1274_v29 = vld [vmem:[%s1685_s1 + $0x40] sm:$0xff]  ;;  %v926_v39 = vld [vmem:[%s1687_s0 + $0x30] sm:$0xf0] }
   0xb   :  { %744 = vmatpush.bf16.msra.mxu1 %v1279_v9  ;;  %v1283_v26 = vld [vmem:[%s1685_s1 + $0x88] sm:$0xff]  ;;  %v1282_v30 = vld [vmem:[%s1685_s1 + $0x80] sm:$0xff]  ;;  %v1305_v40 = vld [vmem:[%s1685_s1 + $0x138] sm:$0xff] }
   0xc   :  { %762 = vmatpush.bf16.msra.mxu2 %v1287_v10  ;;  %v1291_v27 = vld [vmem:[%s1685_s1 + $0xc8] sm:$0xff]  ;;  %v1290_v31 = vld [vmem:[%s1685_s1 + $0xc0] sm:$0xff]  ;;  %v1313_v41 = vld [vmem:[%s1685_s1 + $0x178] sm:$0xff] }
   0xd   :  { %780 = vmatpush.bf16.msra.mxu3 %v1295_v11  ;;  %v916_v32 = vld [vmem:[%s1687_s0] sm:$0xf]  ;;  %v1261_v33 = vld [vmem:[%s1687_s0 + $0x24] sm:$0xf0]  ;;  %v1256_v34 = vld [vmem:[%s1687_s0 + $0x4] sm:$0xf] }
   0xe   :  { %727 = vmatpush.bf16.msra.mxu0 %v1270_v12  ;;  %v918_v35 = vld [vmem:[%s1687_s0 + $0x28] sm:$0xf0]  ;;  %v924_v36 = vld [vmem:[%s1687_s0 + $0x8] sm:$0xf]  ;;  %v917_v42 = vor.u32 %v1261_v33, %v916_v32  ;;  %v1321_v46 = vld [vmem:[%s1685_s1 + $0x1b8] sm:$0xff] }
   0xf   :  { %745 = vmatpush.bf16.msra.mxu1 %v1278_v13  ;;  %v1257_v38 = vld [vmem:[%s1687_s0 + $0xc] sm:$0xf]  ;;  %v921_v43 = vor.u32 %v1256_v34, %v918_v35  ;;  %v925_v44 = vor.u32 %v1262_v37, %v924_v36  ;;  %v1329_v47 = vld [vmem:[%s1685_s1 + $0x1f8] sm:$0xff]  ;;  %v1304_v48 = vld [vmem:[%s1685_s1 + $0x130] sm:$0xff] }
  0x10   :  { %763 = vmatpush.bf16.msra.mxu2 %v1286_v14  ;;  %v929_v45 = vor.u32 %v1257_v38, %v926_v39  ;;  %v1312_v49 = vld [vmem:[%s1685_s1 + $0x170] sm:$0xff]  ;;  %v1303_v52 = vld [vmem:[%s1685_s1 + $0x128] sm:$0xff]  ;;  %v26_v57 = vld [vmem:[%s1687_s0 + $0x58] sm:$0xff] }
  0x11   :  { %781 = vmatpush.bf16.msra.mxu3 %v1294_v15  ;;  %v1320_v50 = vld [vmem:[%s1685_s1 + $0x1b0] sm:$0xff]  ;;  %v1311_v53 = vld [vmem:[%s1685_s1 + $0x168] sm:$0xff]  ;;  %v1302_v58 = vld [vmem:[%s1685_s1 + $0x120] sm:$0xff]  ;;  %v221_v62 = vunpack.c.l.b16 %v26_v57  ;;  %v222_v63 = vunpack.c.h.b16 %v26_v57 }
  0x12   :  { %728 = vmatpush.bf16.msra.mxu0 %v1269_v16  ;;  %v1328_v51 = vld [vmem:[%s1685_s1 + $0x1f0] sm:$0xff]  ;;  %v1319_v55 = vld [vmem:[%s1685_s1 + $0x1a8] sm:$0xff]  ;;  %v1310_v59 = vld [vmem:[%s1685_s1 + $0x160] sm:$0xff] }
  0x13   :  { %746 = vmatpush.bf16.msra.mxu1 %v1277_v17  ;;  %v25_v54 = vld [vmem:[%s1687_s0 + $0x50] sm:$0xff]  ;;  %v1327_v56 = vld [vmem:[%s1685_s1 + $0x1e8] sm:$0xff]  ;;  %v1318_v0 = vld [vmem:[%s1685_s1 + $0x1a0] sm:$0xff]  ;;  %v241_v6 = vpack.c.b16 %v221_v62, %v221_v62  ;;  %v242_v7 = vpack.c.b16 %v222_v63, %v222_v63 }
  0x14   :  { %764 = vmatpush.bf16.msra.mxu2 %v1285_v18  ;;  %v219_v60 = vunpack.c.l.b16 %v25_v54  ;;  %v220_v61 = vunpack.c.h.b16 %v25_v54  ;;  %v1326_v1 = vld [vmem:[%s1685_s1 + $0x1e0] sm:$0xff]  ;;  %v1301_v2 = vld [vmem:[%s1685_s1 + $0x118] sm:$0xff]  ;;  %v1300_v10 = vld [vmem:[%s1685_s1 + $0x110] sm:$0xff] }
  0x15   :  { %782 = vmatpush.bf16.msra.mxu3 %v1293_v19  ;;  %v1309_v3 = vld [vmem:[%s1685_s1 + $0x158] sm:$0xff]  ;;  %v1308_v11 = vld [vmem:[%s1685_s1 + $0x150] sm:$0xff]  ;;  %v1299_v14 = vld [vmem:[%s1685_s1 + $0x108] sm:$0xff] }
  0x16   :  { %729 = vmatpush.bf16.msra.mxu0 %v1268_v20  ;;  %v239_v4 = vpack.c.b16 %v219_v60, %v219_v60  ;;  %v240_v5 = vpack.c.b16 %v220_v61, %v220_v61  ;;  %v1317_v8 = vld [vmem:[%s1685_s1 + $0x198] sm:$0xff]  ;;  %v1316_v12 = vld [vmem:[%s1685_s1 + $0x190] sm:$0xff]  ;;  %v1307_v15 = vld [vmem:[%s1685_s1 + $0x148] sm:$0xff] }
  0x17   :  { %747 = vmatpush.bf16.msra.mxu1 %v1276_v21  ;;  %v1325_v9 = vld [vmem:[%s1685_s1 + $0x1d8] sm:$0xff]  ;;  %v1324_v13 = vld [vmem:[%s1685_s1 + $0x1d0] sm:$0xff]  ;;  %v1315_v16 = vld [vmem:[%s1685_s1 + $0x188] sm:$0xff] }
  0x18   :  { %765 = vmatpush.bf16.msra.mxu2 %v1284_v22  ;;  %v1323_v17 = vld [vmem:[%s1685_s1 + $0x1c8] sm:$0xff]  ;;  %v1298_v18 = vld [vmem:[%s1685_s1 + $0x100] sm:$0xff]  ;;  %v932_v20 = vld [vmem:[%s1687_s0 + $0x10] sm:$0xf] }
  0x19   :  { %783 = vmatpush.bf16.msra.mxu3 %v1292_v23  ;;  %v1306_v19 = vld [vmem:[%s1685_s1 + $0x140] sm:$0xff]  ;;  %v1263_v23 = vld [vmem:[%s1687_s0 + $0x34] sm:$0xf0]  ;;  %v1336_v36 = vld [vmem:[%s1685_s1 + $0x230] sm:$0xff] }
  0x1a   :  { %730 = vmatpush.bf16.msra.mxu0 %v1267_v24  ;;  %v1314_v21 = vld [vmem:[%s1685_s1 + $0x180] sm:$0xff]  ;;  %v1337_v24 = vld [vmem:[%s1685_s1 + $0x238] sm:$0xff]  ;;  %v933_v32 = vor.u32 %v1263_v23, %v932_v20  ;;  %v1339_v37 = vld [vmem:[%s1685_s1 + $0x248] sm:$0xff] }
  0x1b   :  { %748 = vmatpush.bf16.msra.mxu1 %v1275_v25  ;;  %v1322_v22 = vld [vmem:[%s1685_s1 + $0x1c0] sm:$0xff]  ;;  %v1340_v25 = vld [vmem:[%s1685_s1 + $0x250] sm:$0xff]  ;;  %v1335_v38 = vld [vmem:[%s1685_s1 + $0x228] sm:$0xff] }
  0x1c   :  { %766 = vmatpush.bf16.msra.mxu2 %v1283_v26  ;;  %v1258_v26 = vld [vmem:[%s1687_s0 + $0x14] sm:$0xf]  ;;  %v1338_v39 = vld [vmem:[%s1685_s1 + $0x240] sm:$0xff]  ;;  %v1265_v57 = vld [vmem:[%s1687_s0 + $0x44] sm:$0xf0] }
  0x1d   :  { %784 = vmatpush.bf16.msra.mxu3 %v1291_v27  ;;  %v934_v27 = vld [vmem:[%s1687_s0 + $0x38] sm:$0xf0]  ;;  %v1330_v54 = vld [vmem:[%s1685_s1 + $0x200] sm:$0xff]  ;;  %v950_v61 = vld [vmem:[%s1687_s0 + $0x48] sm:$0xf0] }
  0x1e   :  { %731 = vmatpush.bf16.msra.mxu0 %v1266_v28  ;;  %v940_v28 = vld [vmem:[%s1687_s0 + $0x18] sm:$0xf]  ;;  %v937_v33 = vor.u32 %v1258_v26, %v934_v27  ;;  %v1260_v60 = vld [vmem:[%s1687_s0 + $0x24] sm:$0xf]  ;;  %v1352_v20 = vld [vmem:[%s1686_s2] ss:$0 sm:$0xff] }
  0x1f   :  { %749 = vmatpush.bf16.msra.mxu1 %v1274_v29  ;;  %v1264_v29 = vld [vmem:[%s1687_s0 + $0x3c] sm:$0xf0]  ;;  %v953_v63 = vor.u32 %v1260_v60, %v950_v61 }
  0x20   :  { %767 = vmatpush.bf16.msra.mxu2 %v1282_v30  ;;  %v1259_v30 = vld [vmem:[%s1687_s0 + $0x1c] sm:$0xf]  ;;  %v941_v34 = vor.u32 %v1264_v29, %v940_v28 }
  0x21   :  { %785 = vmatpush.bf16.msra.mxu3 %v1290_v31  ;;  %732 = vmatmul.bf16.vlgmr.msra.gmra.mxu0 %v917_v42  ;;  %v942_v31 = vld [vmem:[%s1687_s0 + $0x40] sm:$0xf0]  ;;  %v28_v42 = vld [vmem:[%s1687_s0 + $0x68] sm:$0xff] }
  0x22   :  { %796 = vmatpush.bf16.msrb.mxu0 %v1305_v40  ;;  %750 = vmatmul.bf16.vlgmr.msra.gmra.mxu1 %v921_v43  ;;  %v945_v35 = vor.u32 %v1259_v30, %v942_v31  ;;  %v27_v40 = vld [vmem:[%s1687_s0 + $0x60] sm:$0xff] }
  0x23   :  { %814 = vmatpush.bf16.msrb.mxu1 %v1313_v41  ;;  %768 = vmatmul.bf16.vlgmr.msra.gmra.mxu2 %v925_v44  ;;  %v1334_v41 = vld [vmem:[%s1685_s1 + $0x220] sm:$0xff]  ;;  %v223_v43 = vunpack.c.l.b16 %v27_v40  ;;  %v224_v44 = vunpack.c.h.b16 %v27_v40 }
  0x24   :  { %786 = vmatmul.bf16.vlgmr.msra.gmra.mxu3 %v929_v45  ;;  %832 = vmatpush.bf16.msrb.mxu2 %v1321_v46  ;;  %v225_v45 = vunpack.c.l.b16 %v28_v42  ;;  %v226_v46 = vunpack.c.h.b16 %v28_v42 }
  0x25   :  { %850 = vmatpush.bf16.msrb.mxu3 %v1329_v47  ;;  %v1333_v47 = vld [vmem:[%s1685_s1 + $0x218] sm:$0xff] }
  0x26   :  { %797 = vmatpush.bf16.msrb.mxu0 %v1304_v48  ;;  %v243_v48 = vpack.c.b16 %v223_v43, %v223_v43 }
  0x27   :  { %815 = vmatpush.bf16.msrb.mxu1 %v1312_v49  ;;  %v244_v49 = vpack.c.b16 %v224_v44, %v224_v44 }
  0x28   :  { %833 = vmatpush.bf16.msrb.mxu2 %v1320_v50  ;;  %v245_v50 = vpack.c.b16 %v225_v45, %v225_v45 }
  0x29   :  { %851 = vmatpush.bf16.msrb.mxu3 %v1328_v51  ;;  %v246_v51 = vpack.c.b16 %v226_v46, %v226_v46 }
  0x2a   :  { %798 = vmatpush.bf16.msrb.mxu0 %v1303_v52  ;;  %v1332_v52 = vld [vmem:[%s1685_s1 + $0x210] sm:$0xff] }
  0x2b   :  { %816 = vmatpush.bf16.msrb.mxu1 %v1311_v53  ;;  %v1331_v53 = vld [vmem:[%s1685_s1 + $0x208] sm:$0xff] }
  0x2c   :  { %834 = vmatpush.bf16.msrb.mxu2 %v1319_v55  ;;  %v29_v55 = vld [vmem:[%s1687_s0 + $0x70] sm:$0xff] }
  0x2d   :  { %852 = vmatpush.bf16.msrb.mxu3 %v1327_v56  ;;  %v948_v56 = vld [vmem:[%s1687_s0 + $0x20] sm:$0xf] }
  0x2e   :  { %799 = vmatpush.bf16.msrb.mxu0 %v1302_v58  ;;  %v227_v58 = vunpack.c.l.b16 %v29_v55  ;;  %v949_v62 = vor.u32 %v1265_v57, %v948_v56 }
  0x2f   :  { %817 = vmatpush.bf16.msrb.mxu1 %v1310_v59  ;;  %v228_v59 = vunpack.c.h.b16 %v29_v55 }
  0x30   :  { %835 = vmatpush.bf16.msrb.mxu2 %v1318_v0  ;;  %v247_v0 = vpack.c.b16 %v227_v58, %v227_v58 }
  0x31   :  { %853 = vmatpush.bf16.msrb.mxu3 %v1326_v1  ;;  %737 = vmatmul.bf16.gmra.mxu0 %v239_v4  ;;  %v248_v1 = vpack.c.b16 %v228_v59, %v228_v59 }
  0x32   :  { %800 = vmatpush.bf16.msrb.mxu0 %v1301_v2  ;;  %755 = vmatmul.bf16.gmra.mxu1 %v240_v5 }
  0x33   :  { %818 = vmatpush.bf16.msrb.mxu1 %v1309_v3  ;;  %773 = vmatmul.bf16.gmra.mxu2 %v241_v6 }
  0x34   :  { %791 = vmatmul.bf16.gmra.mxu3 %v242_v7  ;;  %836 = vmatpush.bf16.msrb.mxu2 %v1317_v8 }
  0x35   :  { %854 = vmatpush.bf16.msrb.mxu3 %v1325_v9 }
  0x36   :  { %801 = vmatpush.bf16.msrb.mxu0 %v1300_v10 }
  0x37   :  { %819 = vmatpush.bf16.msrb.mxu1 %v1308_v11 }
  0x38   :  { %837 = vmatpush.bf16.msrb.mxu2 %v1316_v12 }
  0x39   :  { %855 = vmatpush.bf16.msrb.mxu3 %v1324_v13 }
  0x3a   :  { %802 = vmatpush.bf16.msrb.mxu0 %v1299_v14 }
  0x3b   :  { %820 = vmatpush.bf16.msrb.mxu1 %v1307_v15 }
  0x3c   :  { %838 = vmatpush.bf16.msrb.mxu2 %v1315_v16 }
  0x3d   :  { %856 = vmatpush.bf16.msrb.mxu3 %v1323_v17 }
  0x3e   :  { %803 = vmatpush.bf16.msrb.mxu0 %v1298_v18 }
  0x3f   :  { %821 = vmatpush.bf16.msrb.mxu1 %v1306_v19 }
  0x40   :  { %839 = vmatpush.bf16.msrb.mxu2 %v1314_v21 }
  0x41   :  { %857 = vmatpush.bf16.msrb.mxu3 %v1322_v22  ;;  %804 = vmatmul.bf16.vlgmr.msrb.gmra.mxu0 %v933_v32 }
  0x42   :  { %868 = vmatpush.bf16.msra.mxu0 %v1337_v24  ;;  %822 = vmatmul.bf16.vlgmr.msrb.gmra.mxu1 %v937_v33 }
  0x43   :  { %891 = vmatpush.bf16.msra.mxu1 %v1340_v25  ;;  %840 = vmatmul.bf16.vlgmr.msrb.gmra.mxu2 %v941_v34 }
  0x44   :  { %1341 = vmatpush.bf16.msra.mxu2 %v1337_v24  ;;  %858 = vmatmul.bf16.vlgmr.msrb.gmra.mxu3 %v945_v35 }
  0x45   :  { %1349 = vmatpush.bf16.msra.mxu3 %v1340_v25 }
  0x46   :  { %869 = vmatpush.bf16.msra.mxu0 %v1336_v36 }
  0x47   :  { %892 = vmatpush.bf16.msra.mxu1 %v1339_v37 }
  0x48   :  { %1342 = vmatpush.bf16.msra.mxu2 %v1336_v36 }
  0x49   :  { %1350 = vmatpush.bf16.msra.mxu3 %v1339_v37 }
  0x4a   :  { %870 = vmatpush.bf16.msra.mxu0 %v1335_v38 }
  0x4b   :  { %893 = vmatpush.bf16.msra.mxu1 %v1338_v39 }
  0x4c   :  { %1343 = vmatpush.bf16.msra.mxu2 %v1335_v38 }
  0x4d   :  { %1351 = vmatpush.bf16.msra.mxu3 %v1338_v39 }
  0x4e   :  { %871 = vmatpush.bf16.msra.mxu0 %v1334_v41 }
  0x50   :  { %1344 = vmatpush.bf16.msra.mxu2 %v1334_v41 }
  0x51   :  { %809 = vmatmul.bf16.gmra.mxu0 %v243_v48 }
  0x52   :  { %872 = vmatpush.bf16.msra.mxu0 %v1333_v47  ;;  %827 = vmatmul.bf16.gmra.mxu1 %v244_v49 }
  0x53   :  { %845 = vmatmul.bf16.gmra.mxu2 %v245_v50 }
  0x54   :  { %1345 = vmatpush.bf16.msra.mxu2 %v1333_v47  ;;  %863 = vmatmul.bf16.gmra.mxu3 %v246_v51 }
  0x56   :  { %873 = vmatpush.bf16.msra.mxu0 %v1332_v52 }
  0x58   :  { %1346 = vmatpush.bf16.msra.mxu2 %v1332_v52 }
  0x5a   :  { %874 = vmatpush.bf16.msra.mxu0 %v1331_v53 }
  0x5c   :  { %1347 = vmatpush.bf16.msra.mxu2 %v1331_v53 }
  0x5e   :  { %875 = vmatpush.bf16.msra.mxu0 %v1330_v54 }
  0x60   :  { %1348 = vmatpush.bf16.msra.mxu2 %v1330_v54 }
  0x61   :  { %876 = vmatmul.bf16.vlgmr.msra.gmra.mxu0 %v949_v62 }
  0x62   :  { %1254 = vmatmul.msk.bf16.vlgmr.msra.gmra.mxu1 %vm717_vm0, %v953_v63 }
  0x63   :  { %881 = vmatmul.bf16.vlgmr.msra.gmra.mxu2 %v247_v0 }
  0x64   :  { %1255 = vmatmul.msk.bf16.vlgmr.msra.gmra.mxu3 %vm717_vm0, %v248_v1 }
  0x9e   :  { %v733_v2 = vpop.f32.mrf.mxu0 }
  0x9f   :  { %v751_v3 = vpop.f32.mrf.mxu1  ;;  %v734_v25 = vadd.f32 %v1352_v20, %v733_v2 }
  0xa1   :  { %v752_v26 = vadd.f32 %v751_v3, %v734_v25 }
  0xa6   :  { %v769_v4 = vpop.f32.mrf.mxu2  ;;  %v735_v6 = vpop.f32.mrf.mxu0 }
  0xa7   :  { %v787_v5 = vpop.f32.mrf.mxu3  ;;  %v753_v7 = vpop.f32.mrf.mxu1  ;;  %v770_v27 = vadd.f32 %v769_v4, %v752_v26  ;;  %v736_v33 = vadd.f32 %v1352_v20, %v735_v6 }
  0xa9   :  { %v788_v34 = vadd.f32 %v787_v5, %v770_v27  ;;  %v754_v36 = vadd.f32 %v753_v7, %v736_v33 }
  0xae   :  { %v771_v8 = vpop.f32.mrf.mxu2  ;;  %v738_v10 = vpop.f32.mrf.mxu0 }
  0xaf   :  { %v789_v9 = vpop.f32.mrf.mxu3  ;;  %v756_v11 = vpop.f32.mrf.mxu1  ;;  %v739_v30 = vadd.f32 %v1352_v20, %v738_v10  ;;  %v772_v39 = vadd.f32 %v771_v8, %v754_v36 }
  0xb1   :  { %v757_v35 = vadd.f32 %v756_v11, %v739_v30  ;;  %v790_v46 = vadd.f32 %v789_v9, %v772_v39 }
  0xb6   :  { %v774_v12 = vpop.f32.mrf.mxu2  ;;  %v740_v14 = vpop.f32.mrf.mxu0 }
  0xb7   :  { %v792_v13 = vpop.f32.mrf.mxu3  ;;  %v758_v15 = vpop.f32.mrf.mxu1  ;;  %v775_v38 = vadd.f32 %v774_v12, %v757_v35 }
  0xb9   :  { %v793_v45 = vadd.f32 %v792_v13, %v775_v38 }
  0xbe   :  { %v776_v16 = vpop.f32.mrf.mxu2  ;;  %v805_v18 = vpop.f32.mrf.mxu0 }
  0xbf   :  { %v794_v17 = vpop.f32.mrf.mxu3  ;;  %v823_v19 = vpop.f32.mrf.mxu1  ;;  %v806_v37 = vadd.f32 %v805_v18, %v788_v34 }
  0xc1   :  { %v824_v44 = vadd.f32 %v823_v19, %v806_v37 }
  0xc6   :  { %v841_v21 = vpop.f32.mrf.mxu2  ;;  %v807_v23 = vpop.f32.mrf.mxu0 }
  0xc7   :  { %v859_v22 = vpop.f32.mrf.mxu3  ;;  %v825_v24 = vpop.f32.mrf.mxu1  ;;  %v842_v47 = vadd.f32 %v841_v21, %v824_v44  ;;  %v808_v49 = vadd.f32 %v807_v23, %v790_v46 }
  0xc9   :  { %v860_v50 = vadd.f32 %v859_v22, %v842_v47  ;;  %v826_v56 = vadd.f32 %v825_v24, %v808_v49 }
  0xce   :  { %v843_v28 = vpop.f32.mrf.mxu2  ;;  %v810_v31 = vpop.f32.mrf.mxu0 }
  0xcf   :  { %v861_v29 = vpop.f32.mrf.mxu3  ;;  %v828_v32 = vpop.f32.mrf.mxu1  ;;  %v811_v48 = vadd.f32 %v810_v31, %v793_v45  ;;  %v844_v59 = vadd.f32 %v843_v28, %v826_v56 }
  0xd1   :  { %v829_v53 = vadd.f32 %v828_v32, %v811_v48  ;;  %v862_v63 = vadd.f32 %v861_v29, %v844_v59 }
  0xd6   :  { %v846_v40 = vpop.f32.mrf.mxu2  ;;  %v812_v42 = vpop.f32.mrf.mxu0 }
  0xd7   :  { %v864_v41 = vpop.f32.mrf.mxu3  ;;  %v830_v43 = vpop.f32.mrf.mxu1  ;;  %v847_v58 = vadd.f32 %v846_v40, %v829_v53 }
  0xd9   :  { %v865_v62 = vadd.f32 %v864_v41, %v847_v58 }
  0xde   :  { %v848_v51 = vpop.f32.mrf.mxu2  ;;  %v877_v54 = vpop.f32.mrf.mxu0 }
  0xdf   :  { %v866_v52 = vpop.f32.mrf.mxu3  ;;  %v895_v55 = vpop.f32.mrf.mxu1  ;;  %v878_v57 = vadd.f32 %v877_v54, %v860_v50 }
  0xe1   :  { %v896_v60 = vadd.f32 %v895_v55, %v878_v57 }
  0xe3   :  { %v904_v61 = vmax.f32 %v896_v60, 0.0 }
  0xe5   :  { %907 = vst [vmem:[%s1688_s3] sm:$0xff] %v904_v61 }
  0xe6   :  { %v882_v0 = vpop.f32.mrf.mxu2  ;;  %v879_v3 = vpop.f32.mrf.mxu0 }
  0xe7   :  { %v900_v1 = vpop.f32.mrf.mxu3  ;;  %v883_v2 = vadd.f32 %v882_v0, %v865_v62  ;;  %v880_v4 = vadd.f32 %v879_v3, %v862_v63  ;;  %v897_v6 = vpop.f32.mrf.mxu1 }
  0xe9   :  { %v901_v5 = vadd.f32 %v900_v1, %v883_v2  ;;  %v898_v7 = vadd.f32 %v897_v6, %v880_v4 }
  0xeb   :  { %v906_v8 = vmax.f32 %v901_v5, 0.0  ;;  %v905_v9 = vmax.f32 %v898_v7, 0.0 }
  0xed   :  { %909 = vst [vmem:[%s1688_s3 + $0x10] sm:$0xff] %v906_v8 }
  0xee   :  { %908 = vst [vmem:[%s1688_s3 + $0x8] sm:$0xff] %v905_v9  ;;  %v884_v10 = vpop.f32.mrf.mxu2 }
  0xef   :  { %v902_v11 = vpop.f32.mrf.mxu3 }

</bundles_post_ra>
